<compile_context>
chip_gen: v5e
topology: v5e:2x2
jax: 0.10.0
libtpu: 0.0.40
codegen_flags: <defaults>
</compile_context>

<pallas_src>
import jax
import jax.numpy as jnp
from jax import lax
from jax.experimental import pallas as pl
from jax.experimental.pallas import tpu as pltpu


def bottleneck_kernel(x_ref, w1_ref, s1_ref, b1_ref,
                      w2_ref, s2_ref, b2_ref,
                      w3_ref, s3_ref, b3_ref,
                      o_ref, mid_ref, col_ref):
    """One grid step = IB images.

    x_ref  : (IB, H*W, Cin)      bf16  unpadded input, channels minor (NHWC flat)
    w1_ref : (Cin, Cw)           bf16  conv1 (1x1) weights
    w2_ref : (9*Cw, Cw)          bf16  conv2 (3x3) weights, rows = (kh, kw, cin)
    w3_ref : (Cw, Cexp)          bf16  conv3 (1x1) weights
    s*/b*  : (1, C)              f32   folded BN scale / bias
    o_ref  : (IB, H*W, Cexp)     bf16  output, NHWC-flat (no in-kernel transpose)
    mid_ref: (IB, H+2, W+2, Cw)  bf16  VMEM scratch: padded conv1 output
    col_ref: (IB, H, W, 9*Cw)    bf16  VMEM scratch: im2col staging
    """
    IB, Hp2, Wp2, Cw = mid_ref.shape
    H, W = Hp2 - 2, Wp2 - 2
    HW = H * W
    M = IB * HW
    Cin = x_ref.shape[2]

    x = x_ref[...].reshape(M, Cin)                  # (M, Cin) bf16

    # ---- conv1 (1x1) + bn1 + relu : single MXU matmul, f32 accumulate ----
    acc1 = jnp.dot(x, w1_ref[...], preferred_element_type=jnp.float32)
    out1 = jnp.maximum(acc1 * s1_ref[...] + b1_ref[...], 0.0)     # (M, Cw) f32
    out1 = out1.astype(jnp.bfloat16).reshape(IB, H, W, Cw)        # cast once

    # ---- stage conv1 output into padded bf16 scratch ----
    # Halo: two full-width row stores; side columns folded into the interior
    # row store (no sublane-strided masked column stores).
    zrow = jnp.zeros((IB, 1, Wp2, Cw), jnp.bfloat16)
    mid_ref[:, 0:1, :, :] = zrow
    mid_ref[:, H + 1:H + 2, :, :] = zrow
    zcol = jnp.zeros((IB, H, 1, Cw), jnp.bfloat16)
    mid_ref[:, 1:H + 1, :, :] = jnp.concatenate([zcol, out1, zcol], axis=2)

    # ---- im2col: 9 window slices taken DIRECTLY from the ref, stored into a
    #      lane-dense bf16 scratch (no concatenate, no full-scratch load) ----
    for dh in range(3):
        for dw in range(3):
            k = dh * 3 + dw
            col_ref[:, :, :, k * Cw:(k + 1) * Cw] = \
                mid_ref[:, dh:dh + H, dw:dw + W, :]

    # ---- conv2 (3x3, pad=1) as ONE matmul with K = 9*Cw ----
    cols = col_ref[...].reshape(M, 9 * Cw)                        # bf16
    acc2 = jnp.dot(cols, w2_ref[...], preferred_element_type=jnp.float32)
    out2 = jnp.maximum(acc2 * s2_ref[...] + b2_ref[...], 0.0)
    out2 = out2.astype(jnp.bfloat16)                              # (M, Cw)

    # ---- conv3 (1x1) + bn3 + residual add + relu ----
    acc3 = jnp.dot(out2, w3_ref[...], preferred_element_type=jnp.float32)
    out3 = acc3 * s3_ref[...] + b3_ref[...] + x.astype(jnp.float32)
    out3 = jnp.maximum(out3, 0.0)                                 # (M, Cexp) f32

    # ---- transpose-free, lane-dense bf16 store ----
    o_ref[...] = out3.astype(o_ref.dtype).reshape(o_ref.shape)


def bottleneck_forward(x_nchw, w1_oihw, bn1, w2_oihw, bn2, w3_oihw, bn3,
                       eps=1e-5):
    """x_nchw: (N, Cin, H, W) float32. Returns (N, Cin, H, W) float32.

    Kernel I/O is bf16 (inference precision policy); all accumulation and BN
    math is f32. The final NHWC->NCHW + f32 cast happens in the wrapper.
    """
    N, Cin, H, W = x_nchw.shape
    Cw = w1_oihw.shape[0]            # width
    Cexp = w3_oihw.shape[0]          # planes * expansion
    assert Cin == Cexp, "identity shortcut requires inplanes == planes*expansion"
    HW = H * W

    # Fuse images per grid step so matmul M = IB*HW >= ~512 (bounded working set).
    IB = 1
    for d in range(1, N + 1):
        if N % d == 0 and d * HW <= 4096:
            IB = d
            if d * HW >= 512:
                break
    G = N // IB

    # Input: NCHW -> (N, H*W, Cin), bf16 for the MXU / half the DMA bytes.
    x_flat = jnp.transpose(x_nchw, (0, 2, 3, 1)).reshape(N, HW, Cin)
    x_flat = x_flat.astype(jnp.bfloat16)

    # Weights -> matmul layouts, bf16.
    w1m = jnp.transpose(w1_oihw[:, :, 0, 0], (1, 0)).astype(jnp.bfloat16)          # (Cin, Cw)
    w2m = jnp.transpose(w2_oihw, (2, 3, 1, 0)).reshape(9 * Cw, Cw).astype(jnp.bfloat16)  # (9Cw, Cw)
    w3m = jnp.transpose(w3_oihw[:, :, 0, 0], (1, 0)).astype(jnp.bfloat16)          # (Cw, Cexp)

    # Fold inference-mode BatchNorm into per-channel scale / bias (f32).
    def fold(bn):
        gamma, beta, mean, var = bn
        scale = gamma / jnp.sqrt(var + eps)
        bias = beta - mean * scale
        return (scale.reshape(1, -1).astype(jnp.float32),
                bias.reshape(1, -1).astype(jnp.float32))

    s1, b1 = fold(bn1)
    s2, b2 = fold(bn2)
    s3, b3 = fold(bn3)

    # Explicit VMEM budget (bytes): double-buffered I/O + weights + scratches
    # + f32 intermediate margin, clamped with headroom under physical VMEM.
    est = 2 * 2 * IB * HW * Cin                        # x blocks (bf16, 2 bufs)
    est += 2 * 2 * IB * HW * Cexp                      # out blocks
    est += 2 * 2 * (Cin * Cw + 9 * Cw * Cw + Cw * Cexp)  # weights
    est += 2 * 4 * 2 * (Cw + Cw + Cexp)                # BN scale/bias (f32)
    est += 2 * IB * (H + 2) * (W + 2) * Cw             # padded mid scratch (bf16)
    est += 2 * IB * HW * 9 * Cw                        # im2col scratch (bf16)
    est += 4 * IB * HW * (3 * Cw + 2 * Cexp)           # f32 live intermediates
    try:
        phys = pltpu.get_tpu_info().vmem_capacity_bytes
    except Exception:
        phys = 64 * 1024 * 1024                        # conservative (v7x)
    vmem_limit = int(min(max(2 * est, 32 * 1024 * 1024), 0.75 * phys))

    full2 = lambda shape: pl.BlockSpec(shape, lambda n: (0, 0))

    out_flat = pl.pallas_call(
        bottleneck_kernel,
        out_shape=jax.ShapeDtypeStruct((N, HW, Cexp), jnp.bfloat16),
        grid_spec=pltpu.PrefetchScalarGridSpec(
            num_scalar_prefetch=0,
            grid=(G,),
            in_specs=[
                pl.BlockSpec((IB, HW, Cin), lambda n: (n, 0, 0)),    # x
                full2((Cin, Cw)),                                    # w1
                full2((1, Cw)), full2((1, Cw)),                      # s1, b1
                full2((9 * Cw, Cw)),                                 # w2
                full2((1, Cw)), full2((1, Cw)),                      # s2, b2
                full2((Cw, Cexp)),                                   # w3
                full2((1, Cexp)), full2((1, Cexp)),                  # s3, b3
            ],
            out_specs=pl.BlockSpec((IB, HW, Cexp), lambda n: (n, 0, 0)),
            scratch_shapes=[
                pltpu.VMEM((IB, H + 2, W + 2, Cw), jnp.bfloat16),    # padded mid
                pltpu.VMEM((IB, H, W, 9 * Cw), jnp.bfloat16),        # im2col
            ],
        ),
        compiler_params=pltpu.CompilerParams(
            dimension_semantics=("parallel",),
            vmem_limit_bytes=vmem_limit),
    )(x_flat, w1m, s1, b1, w2m, s2, b2, w3m, s3, b3)

    # (N, HW, Cexp) bf16 -> NCHW f32 (production: keep NHWC bf16 for chaining).
    out = out_flat.reshape(N, H, W, Cexp).transpose(0, 3, 1, 2)
    return out.astype(jnp.float32)


def reference_forward(x, w1, bn1, w2, bn2, w3, bn3, eps=1e-5):
    """Pure-JAX (lax.conv) f32 reference for correctness checking."""
    def bn_apply(y, bn):
        gamma, beta, mean, var = bn
        scale = (gamma / jnp.sqrt(var + eps)).reshape(1, -1, 1, 1)
        bias = (beta - mean * gamma / jnp.sqrt(var + eps)).reshape(1, -1, 1, 1)
        return y * scale + bias

    def conv(xx, ww, pad):
        return lax.conv_general_dilated(
            xx, ww, window_strides=(1, 1), padding=((pad, pad), (pad, pad)),
            dimension_numbers=("NCHW", "OIHW", "NCHW"))

    out = jax.nn.relu(bn_apply(conv(x, w1, 0), bn1))
    out = jax.nn.relu(bn_apply(conv(out, w2, 1), bn2))
    out = bn_apply(conv(out, w3, 0), bn3)
    return jax.nn.relu(out + x)


if __name__ == "__main__":
    key = jax.random.PRNGKey(0)
    ks = jax.random.split(key, 8)

    N, H, W = 2, 16, 16
    planes = 4
    inplanes = planes * 4        # identity shortcut: inplanes == planes*expansion
    width = planes               # base_width=64, groups=1 -> width = planes

    x = jax.random.normal(ks[0], (N, inplanes, H, W), jnp.float32)
    w1 = 0.1 * jax.random.normal(ks[1], (width, inplanes, 1, 1), jnp.float32)
    w2 = 0.1 * jax.random.normal(ks[2], (width, width, 3, 3), jnp.float32)
    w3 = 0.1 * jax.random.normal(ks[3], (inplanes, width, 1, 1), jnp.float32)

    def mk_bn(k, c):
        k1, k2, k3, k4 = jax.random.split(k, 4)
        return (1.0 + 0.1 * jax.random.normal(k1, (c,), jnp.float32),     # gamma
                0.1 * jax.random.normal(k2, (c,), jnp.float32),           # beta
                0.1 * jax.random.normal(k3, (c,), jnp.float32),           # running_mean
                jnp.abs(jax.random.normal(k4, (c,), jnp.float32)) + 0.5)  # running_var

    bn1 = mk_bn(ks[4], width)
    bn2 = mk_bn(ks[5], width)
    bn3 = mk_bn(ks[6], inplanes)

    out = bottleneck_forward(x, w1, bn1, w2, bn2, w3, bn3)
    out = jax.block_until_ready(out)

    ref = jax.block_until_ready(reference_forward(x, w1, bn1, w2, bn2, w3, bn3))
    assert out.shape == (N, inplanes, H, W)
    err = float(jnp.max(jnp.abs(out - ref)))
    assert err < 1e-1, f"mismatch vs JAX reference: max abs err = {err}"

    print("KERNEL_OK")
</pallas_src>

<mosaic_0001>
module attributes {stable_mosaic.version = 11 : i64} {
  func.func @bottleneck_kernel(%arg0: i32, %arg1: memref<2x256x16xbf16, #tpu.memory_space<vmem>>, %arg2: memref<16x4xbf16, #tpu.memory_space<vmem>>, %arg3: memref<1x4xf32, #tpu.memory_space<vmem>>, %arg4: memref<1x4xf32, #tpu.memory_space<vmem>>, %arg5: memref<36x4xbf16, #tpu.memory_space<vmem>>, %arg6: memref<1x4xf32, #tpu.memory_space<vmem>>, %arg7: memref<1x4xf32, #tpu.memory_space<vmem>>, %arg8: memref<4x16xbf16, #tpu.memory_space<vmem>>, %arg9: memref<1x16xf32, #tpu.memory_space<vmem>>, %arg10: memref<1x16xf32, #tpu.memory_space<vmem>>, %arg11: memref<2x256x16xbf16, #tpu.memory_space<vmem>>, %arg12: memref<2x18x18x4xbf16, #tpu.memory_space<vmem>>, %arg13: memref<2x16x16x36xbf16, #tpu.memory_space<vmem>>) attributes {dimension_semantics = [#tpu.dimension_semantics<parallel>], iteration_bounds = array<i64: 1>, scalar_prefetch = 0 : i64, scratch_operands = 2 : i64, tpu.core_type = #tpu.core_type<tc>, window_params = [{transform_indices = @transform_0, window_bounds = array<i64: 2, 256, 16>}, {pipeline_mode = #tpu.pipeline_mode<synchronous>, transform_indices = @transform_1, window_bounds = array<i64: 16, 4>}, {pipeline_mode = #tpu.pipeline_mode<synchronous>, transform_indices = @transform_2, window_bounds = array<i64: 1, 4>}, {pipeline_mode = #tpu.pipeline_mode<synchronous>, transform_indices = @transform_3, window_bounds = array<i64: 1, 4>}, {pipeline_mode = #tpu.pipeline_mode<synchronous>, transform_indices = @transform_4, window_bounds = array<i64: 36, 4>}, {pipeline_mode = #tpu.pipeline_mode<synchronous>, transform_indices = @transform_5, window_bounds = array<i64: 1, 4>}, {pipeline_mode = #tpu.pipeline_mode<synchronous>, transform_indices = @transform_6, window_bounds = array<i64: 1, 4>}, {pipeline_mode = #tpu.pipeline_mode<synchronous>, transform_indices = @transform_7, window_bounds = array<i64: 4, 16>}, {pipeline_mode = #tpu.pipeline_mode<synchronous>, transform_indices = @transform_8, window_bounds = array<i64: 1, 16>}, {pipeline_mode = #tpu.pipeline_mode<synchronous>, transform_indices = @transform_9, window_bounds = array<i64: 1, 16>}, {transform_indices = @transform_10, window_bounds = array<i64: 2, 256, 16>}]} {
    %c0 = arith.constant 0 : index
    %c0_0 = arith.constant 0 : index
    %c0_1 = arith.constant 0 : index
    %0 = vector.load %arg1[%c0, %c0_0, %c0_1] : memref<2x256x16xbf16, #tpu.memory_space<vmem>>, vector<2x256x16xbf16>
    %1 = vector.shape_cast %0 : vector<2x256x16xbf16> to vector<512x16xbf16>
    %c0_2 = arith.constant 0 : index
    %c0_3 = arith.constant 0 : index
    %2 = vector.load %arg2[%c0_2, %c0_3] : memref<16x4xbf16, #tpu.memory_space<vmem>>, vector<16x4xbf16>
    %cst = arith.constant dense<0.000000e+00> : vector<512x4xf32>
    %3 = tpu.matmul %1, %2, %cst {dimension_numbers = #tpu.dot_dimension_numbers<[1], [0], [0], [1], [0, 0, 1, 1], [], []>} : vector<512x16xbf16>, vector<16x4xbf16>, vector<512x4xf32> -> vector<512x4xf32>
    %c0_4 = arith.constant 0 : index
    %c0_5 = arith.constant 0 : index
    %4 = vector.load %arg3[%c0_4, %c0_5] : memref<1x4xf32, #tpu.memory_space<vmem>>, vector<1x4xf32>
    %5 = vector.broadcast %4 : vector<1x4xf32> to vector<512x4xf32>
    %6 = arith.mulf %3, %5 : vector<512x4xf32>
    %c0_6 = arith.constant 0 : index
    %c0_7 = arith.constant 0 : index
    %7 = vector.load %arg4[%c0_6, %c0_7] : memref<1x4xf32, #tpu.memory_space<vmem>>, vector<1x4xf32>
    %8 = vector.broadcast %7 : vector<1x4xf32> to vector<512x4xf32>
    %9 = arith.addf %6, %8 : vector<512x4xf32>
    %cst_8 = arith.constant 0.000000e+00 : f32
    %10 = vector.broadcast %cst_8 : f32 to vector<512x4xf32>
    %11 = arith.maximumf %9, %10 : vector<512x4xf32>
    %12 = arith.truncf %11 : vector<512x4xf32> to vector<512x4xbf16>
    %13 = vector.shape_cast %12 : vector<512x4xbf16> to vector<2x16x16x4xbf16>
    %cst_9 = arith.constant 0.000000e+00 : bf16
    %14 = vector.broadcast %cst_9 : bf16 to vector<2x1x18x4xbf16>
    %c0_10 = arith.constant 0 : index
    %c0_11 = arith.constant 0 : index
    %c0_12 = arith.constant 0 : index
    %c0_13 = arith.constant 0 : index
    %15 = vector.load %arg12[%c0_10, %c0_11, %c0_12, %c0_13] : memref<2x18x18x4xbf16, #tpu.memory_space<vmem>>, vector<2x1x18x4xbf16>
    tpu.vector_store %arg12[%c0_10, %c0_11, %c0_12, %c0_13], %14 {strides = array<i32>} : memref<2x18x18x4xbf16, #tpu.memory_space<vmem>>, vector<2x1x18x4xbf16>,
    %c0_14 = arith.constant 0 : index
    %c17 = arith.constant 17 : index
    %c0_15 = arith.constant 0 : index
    %c0_16 = arith.constant 0 : index
    %16 = vector.load %arg12[%c0_14, %c17, %c0_15, %c0_16] : memref<2x18x18x4xbf16, #tpu.memory_space<vmem>>, vector<2x1x18x4xbf16>
    tpu.vector_store %arg12[%c0_14, %c17, %c0_15, %c0_16], %14 {strides = array<i32>} : memref<2x18x18x4xbf16, #tpu.memory_space<vmem>>, vector<2x1x18x4xbf16>,
    %cst_17 = arith.constant 0.000000e+00 : bf16
    %17 = vector.broadcast %cst_17 : bf16 to vector<2x16x1x4xbf16>
    %18 = tpu.concatenate %17, %13, %17 in 2 : vector<2x16x1x4xbf16>, vector<2x16x16x4xbf16>, vector<2x16x1x4xbf16> -> vector<2x16x18x4xbf16>
    %c0_18 = arith.constant 0 : index
    %c1 = arith.constant 1 : index
    %c0_19 = arith.constant 0 : index
    %c0_20 = arith.constant 0 : index
    %19 = vector.load %arg12[%c0_18, %c1, %c0_19, %c0_20] : memref<2x18x18x4xbf16, #tpu.memory_space<vmem>>, vector<2x16x18x4xbf16>
    tpu.vector_store %arg12[%c0_18, %c1, %c0_19, %c0_20], %18 {strides = array<i32>} : memref<2x18x18x4xbf16, #tpu.memory_space<vmem>>, vector<2x16x18x4xbf16>,
    %c0_21 = arith.constant 0 : index
    %c0_22 = arith.constant 0 : index
    %c0_23 = arith.constant 0 : index
    %c0_24 = arith.constant 0 : index
    %20 = vector.load %arg12[%c0_21, %c0_22, %c0_23, %c0_24] : memref<2x18x18x4xbf16, #tpu.memory_space<vmem>>, vector<2x16x16x4xbf16>
    %c0_25 = arith.constant 0 : index
    %c0_26 = arith.constant 0 : index
    %c0_27 = arith.constant 0 : index
    %c0_28 = arith.constant 0 : index
    %21 = vector.load %arg13[%c0_25, %c0_26, %c0_27, %c0_28] : memref<2x16x16x36xbf16, #tpu.memory_space<vmem>>, vector<2x16x16x4xbf16>
    tpu.vector_store %arg13[%c0_25, %c0_26, %c0_27, %c0_28], %20 {strides = array<i32>} : memref<2x16x16x36xbf16, #tpu.memory_space<vmem>>, vector<2x16x16x4xbf16>,
    %c0_29 = arith.constant 0 : index
    %c0_30 = arith.constant 0 : index
    %c1_31 = arith.constant 1 : index
    %c0_32 = arith.constant 0 : index
    %22 = vector.load %arg12[%c0_29, %c0_30, %c1_31, %c0_32] : memref<2x18x18x4xbf16, #tpu.memory_space<vmem>>, vector<2x16x16x4xbf16>
    %c0_33 = arith.constant 0 : index
    %c0_34 = arith.constant 0 : index
    %c0_35 = arith.constant 0 : index
    %c4 = arith.constant 4 : index
    %23 = vector.load %arg13[%c0_33, %c0_34, %c0_35, %c4] : memref<2x16x16x36xbf16, #tpu.memory_space<vmem>>, vector<2x16x16x4xbf16>
    tpu.vector_store %arg13[%c0_33, %c0_34, %c0_35, %c4], %22 {strides = array<i32>} : memref<2x16x16x36xbf16, #tpu.memory_space<vmem>>, vector<2x16x16x4xbf16>,
    %c0_36 = arith.constant 0 : index
    %c0_37 = arith.constant 0 : index
    %c2 = arith.constant 2 : index
    %c0_38 = arith.constant 0 : index
    %24 = vector.load %arg12[%c0_36, %c0_37, %c2, %c0_38] : memref<2x18x18x4xbf16, #tpu.memory_space<vmem>>, vector<2x16x16x4xbf16>
    %c0_39 = arith.constant 0 : index
    %c0_40 = arith.constant 0 : index
    %c0_41 = arith.constant 0 : index
    %c8 = arith.constant 8 : index
    %25 = vector.load %arg13[%c0_39, %c0_40, %c0_41, %c8] : memref<2x16x16x36xbf16, #tpu.memory_space<vmem>>, vector<2x16x16x4xbf16>
    tpu.vector_store %arg13[%c0_39, %c0_40, %c0_41, %c8], %24 {strides = array<i32>} : memref<2x16x16x36xbf16, #tpu.memory_space<vmem>>, vector<2x16x16x4xbf16>,
    %c0_42 = arith.constant 0 : index
    %c1_43 = arith.constant 1 : index
    %c0_44 = arith.constant 0 : index
    %c0_45 = arith.constant 0 : index
    %26 = vector.load %arg12[%c0_42, %c1_43, %c0_44, %c0_45] : memref<2x18x18x4xbf16, #tpu.memory_space<vmem>>, vector<2x16x16x4xbf16>
    %c0_46 = arith.constant 0 : index
    %c0_47 = arith.constant 0 : index
    %c0_48 = arith.constant 0 : index
    %c12 = arith.constant 12 : index
    %27 = vector.load %arg13[%c0_46, %c0_47, %c0_48, %c12] : memref<2x16x16x36xbf16, #tpu.memory_space<vmem>>, vector<2x16x16x4xbf16>
    tpu.vector_store %arg13[%c0_46, %c0_47, %c0_48, %c12], %26 {strides = array<i32>} : memref<2x16x16x36xbf16, #tpu.memory_space<vmem>>, vector<2x16x16x4xbf16>,
    %c0_49 = arith.constant 0 : index
    %c1_50 = arith.constant 1 : index
    %c1_51 = arith.constant 1 : index
    %c0_52 = arith.constant 0 : index
    %28 = vector.load %arg12[%c0_49, %c1_50, %c1_51, %c0_52] : memref<2x18x18x4xbf16, #tpu.memory_space<vmem>>, vector<2x16x16x4xbf16>
    %c0_53 = arith.constant 0 : index
    %c0_54 = arith.constant 0 : index
    %c0_55 = arith.constant 0 : index
    %c16 = arith.constant 16 : index
    %29 = vector.load %arg13[%c0_53, %c0_54, %c0_55, %c16] : memref<2x16x16x36xbf16, #tpu.memory_space<vmem>>, vector<2x16x16x4xbf16>
    tpu.vector_store %arg13[%c0_53, %c0_54, %c0_55, %c16], %28 {strides = array<i32>} : memref<2x16x16x36xbf16, #tpu.memory_space<vmem>>, vector<2x16x16x4xbf16>,
    %c0_56 = arith.constant 0 : index
    %c1_57 = arith.constant 1 : index
    %c2_58 = arith.constant 2 : index
    %c0_59 = arith.constant 0 : index
    %30 = vector.load %arg12[%c0_56, %c1_57, %c2_58, %c0_59] : memref<2x18x18x4xbf16, #tpu.memory_space<vmem>>, vector<2x16x16x4xbf16>
    %c0_60 = arith.constant 0 : index
    %c0_61 = arith.constant 0 : index
    %c0_62 = arith.constant 0 : index
    %c20 = arith.constant 20 : index
    %31 = vector.load %arg13[%c0_60, %c0_61, %c0_62, %c20] : memref<2x16x16x36xbf16, #tpu.memory_space<vmem>>, vector<2x16x16x4xbf16>
    tpu.vector_store %arg13[%c0_60, %c0_61, %c0_62, %c20], %30 {strides = array<i32>} : memref<2x16x16x36xbf16, #tpu.memory_space<vmem>>, vector<2x16x16x4xbf16>,
    %c0_63 = arith.constant 0 : index
    %c2_64 = arith.constant 2 : index
    %c0_65 = arith.constant 0 : index
    %c0_66 = arith.constant 0 : index
    %32 = vector.load %arg12[%c0_63, %c2_64, %c0_65, %c0_66] : memref<2x18x18x4xbf16, #tpu.memory_space<vmem>>, vector<2x16x16x4xbf16>
    %c0_67 = arith.constant 0 : index
    %c0_68 = arith.constant 0 : index
    %c0_69 = arith.constant 0 : index
    %c24 = arith.constant 24 : index
    %33 = vector.load %arg13[%c0_67, %c0_68, %c0_69, %c24] : memref<2x16x16x36xbf16, #tpu.memory_space<vmem>>, vector<2x16x16x4xbf16>
    tpu.vector_store %arg13[%c0_67, %c0_68, %c0_69, %c24], %32 {strides = array<i32>} : memref<2x16x16x36xbf16, #tpu.memory_space<vmem>>, vector<2x16x16x4xbf16>,
    %c0_70 = arith.constant 0 : index
    %c2_71 = arith.constant 2 : index
    %c1_72 = arith.constant 1 : index
    %c0_73 = arith.constant 0 : index
    %34 = vector.load %arg12[%c0_70, %c2_71, %c1_72, %c0_73] : memref<2x18x18x4xbf16, #tpu.memory_space<vmem>>, vector<2x16x16x4xbf16>
    %c0_74 = arith.constant 0 : index
    %c0_75 = arith.constant 0 : index
    %c0_76 = arith.constant 0 : index
    %c28 = arith.constant 28 : index
    %35 = vector.load %arg13[%c0_74, %c0_75, %c0_76, %c28] : memref<2x16x16x36xbf16, #tpu.memory_space<vmem>>, vector<2x16x16x4xbf16>
    tpu.vector_store %arg13[%c0_74, %c0_75, %c0_76, %c28], %34 {strides = array<i32>} : memref<2x16x16x36xbf16, #tpu.memory_space<vmem>>, vector<2x16x16x4xbf16>,
    %c0_77 = arith.constant 0 : index
    %c2_78 = arith.constant 2 : index
    %c2_79 = arith.constant 2 : index
    %c0_80 = arith.constant 0 : index
    %36 = vector.load %arg12[%c0_77, %c2_78, %c2_79, %c0_80] : memref<2x18x18x4xbf16, #tpu.memory_space<vmem>>, vector<2x16x16x4xbf16>
    %c0_81 = arith.constant 0 : index
    %c0_82 = arith.constant 0 : index
    %c0_83 = arith.constant 0 : index
    %c32 = arith.constant 32 : index
    %37 = vector.load %arg13[%c0_81, %c0_82, %c0_83, %c32] : memref<2x16x16x36xbf16, #tpu.memory_space<vmem>>, vector<2x16x16x4xbf16>
    tpu.vector_store %arg13[%c0_81, %c0_82, %c0_83, %c32], %36 {strides = array<i32>} : memref<2x16x16x36xbf16, #tpu.memory_space<vmem>>, vector<2x16x16x4xbf16>,
    %c0_84 = arith.constant 0 : index
    %c0_85 = arith.constant 0 : index
    %c0_86 = arith.constant 0 : index
    %c0_87 = arith.constant 0 : index
    %38 = vector.load %arg13[%c0_84, %c0_85, %c0_86, %c0_87] : memref<2x16x16x36xbf16, #tpu.memory_space<vmem>>, vector<2x16x16x36xbf16>
    %39 = vector.shape_cast %38 : vector<2x16x16x36xbf16> to vector<512x36xbf16>
    %c0_88 = arith.constant 0 : index
    %c0_89 = arith.constant 0 : index
    %40 = vector.load %arg5[%c0_88, %c0_89] : memref<36x4xbf16, #tpu.memory_space<vmem>>, vector<36x4xbf16>
    %cst_90 = arith.constant dense<0.000000e+00> : vector<512x4xf32>
    %41 = tpu.matmul %39, %40, %cst_90 {dimension_numbers = #tpu.dot_dimension_numbers<[1], [0], [0], [1], [0, 0, 1, 1], [], []>} : vector<512x36xbf16>, vector<36x4xbf16>, vector<512x4xf32> -> vector<512x4xf32>
    %c0_91 = arith.constant 0 : index
    %c0_92 = arith.constant 0 : index
    %42 = vector.load %arg6[%c0_91, %c0_92] : memref<1x4xf32, #tpu.memory_space<vmem>>, vector<1x4xf32>
    %43 = vector.broadcast %42 : vector<1x4xf32> to vector<512x4xf32>
    %44 = arith.mulf %41, %43 : vector<512x4xf32>
    %c0_93 = arith.constant 0 : index
    %c0_94 = arith.constant 0 : index
    %45 = vector.load %arg7[%c0_93, %c0_94] : memref<1x4xf32, #tpu.memory_space<vmem>>, vector<1x4xf32>
    %46 = vector.broadcast %45 : vector<1x4xf32> to vector<512x4xf32>
    %47 = arith.addf %44, %46 : vector<512x4xf32>
    %cst_95 = arith.constant 0.000000e+00 : f32
    %48 = vector.broadcast %cst_95 : f32 to vector<512x4xf32>
    %49 = arith.maximumf %47, %48 : vector<512x4xf32>
    %50 = arith.truncf %49 : vector<512x4xf32> to vector<512x4xbf16>
    %c0_96 = arith.constant 0 : index
    %c0_97 = arith.constant 0 : index
    %51 = vector.load %arg8[%c0_96, %c0_97] : memref<4x16xbf16, #tpu.memory_space<vmem>>, vector<4x16xbf16>
    %cst_98 = arith.constant dense<0.000000e+00> : vector<512x16xf32>
    %52 = tpu.matmul %50, %51, %cst_98 {dimension_numbers = #tpu.dot_dimension_numbers<[1], [0], [0], [1], [0, 0, 1, 1], [], []>} : vector<512x4xbf16>, vector<4x16xbf16>, vector<512x16xf32> -> vector<512x16xf32>
    %c0_99 = arith.constant 0 : index
    %c0_100 = arith.constant 0 : index
    %53 = vector.load %arg9[%c0_99, %c0_100] : memref<1x16xf32, #tpu.memory_space<vmem>>, vector<1x16xf32>
    %54 = vector.broadcast %53 : vector<1x16xf32> to vector<512x16xf32>
    %55 = arith.mulf %52, %54 : vector<512x16xf32>
    %c0_101 = arith.constant 0 : index
    %c0_102 = arith.constant 0 : index
    %56 = vector.load %arg10[%c0_101, %c0_102] : memref<1x16xf32, #tpu.memory_space<vmem>>, vector<1x16xf32>
    %57 = vector.broadcast %56 : vector<1x16xf32> to vector<512x16xf32>
    %58 = arith.addf %55, %57 : vector<512x16xf32>
    %59 = arith.extf %1 : vector<512x16xbf16> to vector<512x16xf32>
    %60 = arith.addf %58, %59 : vector<512x16xf32>
    %cst_103 = arith.constant 0.000000e+00 : f32
    %61 = vector.broadcast %cst_103 : f32 to vector<512x16xf32>
    %62 = arith.maximumf %60, %61 : vector<512x16xf32>
    %63 = arith.truncf %62 : vector<512x16xf32> to vector<512x16xbf16>
    %64 = vector.shape_cast %63 : vector<512x16xbf16> to vector<2x256x16xbf16>
    %c0_104 = arith.constant 0 : index
    %c0_105 = arith.constant 0 : index
    %c0_106 = arith.constant 0 : index
    %65 = vector.load %arg11[%c0_104, %c0_105, %c0_106] : memref<2x256x16xbf16, #tpu.memory_space<vmem>>, vector<2x256x16xbf16>
    tpu.vector_store %arg11[%c0_104, %c0_105, %c0_106], %64 {strides = array<i32>} : memref<2x256x16xbf16, #tpu.memory_space<vmem>>, vector<2x256x16xbf16>,
    return
  }
  func.func @transform_0(%arg0: i32) -> (i32, i32, i32) {
    %c0_i32 = arith.constant 0 : i32
    %c0_i32_0 = arith.constant 0 : i32
    %c0_i32_1 = arith.constant 0 : i32
    return %arg0, %c0_i32, %c0_i32_0 : i32, i32, i32
  }
  func.func @transform_1(%arg0: i32) -> (i32, i32) {
    %c0_i32 = arith.constant 0 : i32
    %c0_i32_0 = arith.constant 0 : i32
    %c0_i32_1 = arith.constant 0 : i32
    return %c0_i32, %c0_i32_0 : i32, i32
  }
  func.func @transform_2(%arg0: i32) -> (i32, i32) {
    %c0_i32 = arith.constant 0 : i32
    %c0_i32_0 = arith.constant 0 : i32
    %c0_i32_1 = arith.constant 0 : i32
    return %c0_i32, %c0_i32_0 : i32, i32
  }
  func.func @transform_3(%arg0: i32) -> (i32, i32) {
    %c0_i32 = arith.constant 0 : i32
    %c0_i32_0 = arith.constant 0 : i32
    %c0_i32_1 = arith.constant 0 : i32
    return %c0_i32, %c0_i32_0 : i32, i32
  }
  func.func @transform_4(%arg0: i32) -> (i32, i32) {
    %c0_i32 = arith.constant 0 : i32
    %c0_i32_0 = arith.constant 0 : i32
    %c0_i32_1 = arith.constant 0 : i32
    return %c0_i32, %c0_i32_0 : i32, i32
  }
  func.func @transform_5(%arg0: i32) -> (i32, i32) {
    %c0_i32 = arith.constant 0 : i32
    %c0_i32_0 = arith.constant 0 : i32
    %c0_i32_1 = arith.constant 0 : i32
    return %c0_i32, %c0_i32_0 : i32, i32
  }
  func.func @transform_6(%arg0: i32) -> (i32, i32) {
    %c0_i32 = arith.constant 0 : i32
    %c0_i32_0 = arith.constant 0 : i32
    %c0_i32_1 = arith.constant 0 : i32
    return %c0_i32, %c0_i32_0 : i32, i32
  }
  func.func @transform_7(%arg0: i32) -> (i32, i32) {
    %c0_i32 = arith.constant 0 : i32
    %c0_i32_0 = arith.constant 0 : i32
    %c0_i32_1 = arith.constant 0 : i32
    return %c0_i32, %c0_i32_0 : i32, i32
  }
  func.func @transform_8(%arg0: i32) -> (i32, i32) {
    %c0_i32 = arith.constant 0 : i32
    %c0_i32_0 = arith.constant 0 : i32
    %c0_i32_1 = arith.constant 0 : i32
    return %c0_i32, %c0_i32_0 : i32, i32
  }
  func.func @transform_9(%arg0: i32) -> (i32, i32) {
    %c0_i32 = arith.constant 0 : i32
    %c0_i32_0 = arith.constant 0 : i32
    %c0_i32_1 = arith.constant 0 : i32
    return %c0_i32, %c0_i32_0 : i32, i32
  }
  func.func @transform_10(%arg0: i32) -> (i32, i32, i32) {
    %c0_i32 = arith.constant 0 : i32
    %c0_i32_0 = arith.constant 0 : i32
    %c0_i32_1 = arith.constant 0 : i32
    return %arg0, %c0_i32, %c0_i32_0 : i32, i32, i32
  }
}

</mosaic_0001>

<bundles_post_ra>
// kernel: tpu_custom_call.1
= control target key start
LH: loop header
LB: loop body
LE: loop exit
PB: predicated region body
PF: predicated region fallthrough
CT: control target
= control target key end

     0   :  { %vm268_vm0 = vcmask 130048   ;;  %vm798_vm1 = vcmask 27648   ;;  %v10106_v9 = vmov 0   ;;  %vm801_vm2 = vcmask 24576   ;;  %s10107_s30 = smov 4   ;;  %s10108_s13 = smov 8   ;;  %s14424_s1 = inlined_call_operand.vmem [shape: bf16[16,4], index: 1, kind: input, shape index: {}]   ;;  %s14425_s0 = inlined_call_operand.vmem [shape: bf16[2,256,16], index: 0, kind: input, shape index: {}]   ;;  %s14426_s2 = inlined_call_operand.vmem [shape: f32[1,4], index: 2, kind: input, shape index: {}]   ;;  %s14427_s3 = inlined_call_operand.vmem [shape: f32[1,4], index: 3, kind: input, shape index: {}]   ;;  %s14428_s4 = inlined_call_operand.vmem [shape: bf16[36,4], index: 4, kind: input, shape index: {}]   ;;  %s14429_s5 = inlined_call_operand.vmem [shape: f32[1,4], index: 5, kind: input, shape index: {}]   ;;  %s14430_s6 = inlined_call_operand.vmem [shape: f32[1,4], index: 6, kind: input, shape index: {}]   ;;  %s14431_s7 = inlined_call_operand.vmem [shape: bf16[4,16], index: 7, kind: input, shape index: {}]   ;;  %s14432_s8 = inlined_call_operand.vmem [shape: f32[1,16], index: 8, kind: input, shape index: {}]   ;;  %s14433_s9 = inlined_call_operand.vmem [shape: f32[1,16], index: 9, kind: input, shape index: {}]   ;;  %s14434_s10 = inlined_call_operand.vmem [shape: bf16[2,256,16], index: 10, kind: output, shape index: {}]  }
   0x1   :  { %v10033_v0 = vld [vmem:[%s14424_s1] sm:$0xff]  ;;  %v10026_v2 = vld [vmem:[%s14425_s0 + $0xc8] sm:$0xff]  ;;  %v10027_v4 = vld [vmem:[%s14425_s0 + $0xd0] sm:$0xff]  ;;  %799 = vst.msk [vmem:[#allocation2] sm:$0xf] %vm798_vm1, %v10106_v9  ;;  %vm3221_vm6 = vcmask 1042432  }
   0x2   :  { %v10001_v1 = vld [vmem:[%s14425_s0] sm:$0xff]  ;;  %372 = vmatpush.bf16.msra.mxu0 %v10033_v0  ;;  %10068 = vmatpush.bf16.msra.mxu3 %v10033_v0  ;;  %v10002_v3 = vld [vmem:[%s14425_s0 + $0x8] sm:$0xff]  ;;  %v10003_v5 = vld [vmem:[%s14425_s0 + $0x10] sm:$0xff]  ;;  %800 = vst.msk [vmem:[#allocation2 + $0x4] sm:$0xf] %vm798_vm1, %v10106_v9  ;;  %vm3222_vm7 = vcmask 1046532  }
   0x3   :  { %v10028_v6 = vld [vmem:[%s14425_s0 + $0xd8] sm:$0xff]  ;;  %v10029_v8 = vld [vmem:[%s14425_s0 + $0xe0] sm:$0xff]  ;;  %803 = vst.msk [vmem:[#allocation2 + $0xd8] sm:$0xf] %vm798_vm1, %v10106_v9  ;;  %vm2001_vm3 = vsmask.f32 3328  ;;  %vm10227_vm8 = vmor %vm3221_vm6, %vm3222_vm7 }
   0x4   :  { %v10004_v7 = vld [vmem:[%s14425_s0 + $0x18] sm:$0xff]  ;;  %804 = vst.msk [vmem:[#allocation2 + $0xdc] sm:$0xf] %vm798_vm1, %v10106_v9  ;;  %vm2002_vm4 = vsmask.f32 7440  ;;  %v10005_v29 = vld [vmem:[%s14425_s0 + $0x20] sm:$0xff] }
   0x5   :  { %9673 = vmatmul.msk.bf16.vlgmr.msra.gmra.mxu0 %vm268_vm0, %v10001_v1  ;;  %9698 = vmatmul.msk.bf16.vlgmr.msra.gmra.mxu3 %vm268_vm0, %v10026_v2  ;;  %807 = vst.msk [vmem:[#allocation2 + $0xcc] sm:$0xf] %vm798_vm1, %v10106_v9  ;;  %vm10215_vm5 = vmor %vm2001_vm3, %vm2002_vm4  ;;  %v10030_v42 = vld [vmem:[%s14425_s0 + $0xe8] sm:$0xff]  ;;  %v10251_v59 = vld [vmem:[%s14426_s2] ss:$0 sm:$0xff]  ;;  %vm1261_vm9 = vcmask 1040384  }
   0x6   :  { %808 = vst.msk [vmem:[#allocation2 + $0xd0] sm:$0xf] %vm798_vm1, %v10106_v9  ;;  %v10256_v2 = vld [vmem:[%s14427_s3] ss:$0 sm:$0xff]  ;;  %vm1262_vm10 = vsmask.f32 256 }
   0x7   :  { %810 = vst.msk [vmem:[#allocation2 + $0x1a4] sm:$0xf] %vm798_vm1, %v10106_v9  ;;  %vm10284_vm11 = vmand %vm1261_vm9, %vm1262_vm10  ;;  %s10109_s23 = smov 12   ;;  %s10110_s24 = smov 16   ;;  %vm2964_vm12 = vcmask 60448   ;;  %vm3640_vm13 = vcmask 93248  }
   0x8   :  { %v1905_v10 = vld [vmem:[#allocation2] sm:$0xf]  ;;  %811 = vst.msk [vmem:[#allocation2 + $0x1a8] sm:$0xf] %vm798_vm1, %v10106_v9  ;;  %vm4025_vm14 = vcmask 126048   ;;  %vm5146_vm15 = vcmask 158848  }
   0x9   :  { %v2005_v11 = vshrl.u32 %v1905_v10, 16  ;;  %v2008_v12 = vshll.u32 %v1905_v10, 16  ;;  %v1906_v15 = vld [vmem:[#allocation2 + $0x4] sm:$0xf]  ;;  %802 = vst.msk [vmem:[#allocation2 + $0x8] sm:$0x1] %vm801_vm2, %v10106_v9 }
   0xa   :  { %v2014_v17 = vshll.u32 %v1906_v15, 16  ;;  %805 = vst.msk [vmem:[#allocation2 + $0xe0] sm:$0x1] %vm801_vm2, %v10106_v9  ;;  %v2018_v22 = vshrl.u32 %v1906_v15, 16  ;;  %v3029_v25 = vld [vmem:[#allocation2] sm:$0xe] }
   0xb   :  { %v2007_v13 = vrot.slane %v2005_v11, 4  ;;  %v2010_v14 = vrot.slane %v2008_v12, 5  ;;  %809 = vst.msk [vmem:[#allocation2 + $0xd4] sm:$0x1] %vm801_vm2, %v10106_v9  ;;  %v3030_v26 = vld [vmem:[#allocation2 + $0x4] sm:$0xf] }
   0xc   :  { %v2016_v19 = vrot.slane %v2014_v17, 5  ;;  %812 = vst.msk [vmem:[#allocation2 + $0x1ac] sm:$0x1] %vm801_vm2, %v10106_v9  ;;  %v2020_v23 = vrot.slane %v2018_v22, 4  ;;  %v9705_v30 = vrot.slane %v3029_v25, 9  ;;  %v3226_v31 = vrot.slane %v3030_v26, 5 }
   0xd   :  { %v2011_v16 = vor.u32 %v2010_v14, %v2007_v13  ;;  %v1954_v36 = vld [vmem:[#allocation2 + $0xdc] sm:$0xf]  ;;  %v1953_v51 = vld [vmem:[#allocation2 + $0xd8] sm:$0xf]  ;;  %vm7326_vm3 = vcmask 257248   ;;  %vm7999_vm4 = vcmask 290048  }
   0xe   :  { %v2021_v27 = vor.u32 %v2020_v23, %v2016_v19  ;;  %v3227_v35 = vsel %vm10227_vm8, %v9705_v30, %v3226_v31  ;;  %v2398_v38 = vshll.u32 %v1954_v36, 16  ;;  %v2402_v39 = vshrl.u32 %v1954_v36, 16  ;;  %v3077_v60 = vld [vmem:[#allocation2 + $0xd8] sm:$0xe]  ;;  %v3078_v61 = vld [vmem:[#allocation2 + $0xdc] sm:$0xf] }
   0xf   :  { %v2012_v18 = vrot.slane %v2011_v16, 4  ;;  %3448 = vrot.lane.b32.xlu1 %v3227_v35, %s10108_s13  ;;  %v3228_v47 = vrot.slane %v3226_v31, 4  ;;  %v2389_v54 = vshrl.u32 %v1953_v51, 16  ;;  %v2392_v55 = vshll.u32 %v1953_v51, 16  ;;  %v10006_v35 = vld [vmem:[%s14425_s0 + $0x28] sm:$0xff] }
  0x10   :  { %v1907_v24 = vld [vmem:[#allocation2 + $0x8] sm:$0x1]  ;;  %v2022_v33 = vrot.slane %v2021_v27, 4  ;;  %v2400_v40 = vrot.slane %v2398_v38, 5  ;;  %v2404_v41 = vrot.slane %v2402_v39, 4  ;;  %v9721_v63 = vrot.slane %v3077_v60, 9 }
  0x11   :  { %v2017_v21 = vsel %vm10215_vm5, %v2012_v18, %v2016_v19  ;;  %v2024_v28 = vshll.u32 %v1907_v24, 16  ;;  %v1955_v43 = vld [vmem:[#allocation2 + $0xe0] sm:$0x1]  ;;  %v3031_v46 = vld [vmem:[#allocation2 + $0x8] sm:$0x1]  ;;  %v2391_v56 = vrot.slane %v2389_v54, 4 }
  0x12   :  { %2772 = vrot.lane.b32.xlu0 %v2017_v21, %s10107_s30  ;;  %v2405_v44 = vor.u32 %v2404_v41, %v2400_v40  ;;  %v2408_v45 = vshll.u32 %v1955_v43, 16  ;;  %v3229_v48 = vrot.slane %v3031_v46, 5  ;;  %v2394_v57 = vrot.slane %v2392_v55, 5  ;;  %v10031_v39 = vld [vmem:[%s14425_s0 + $0xf0] sm:$0xff] }
  0x13   :  { %v2026_v34 = vrot.slane %v2024_v28, 5  ;;  %v3338_v0 = vrot.slane %v3078_v61, 5  ;;  %vm8308_vm6 = vcmask 293888   ;;  %vm8811_vm7 = vcmask 31744  }
  0x14   :  { %v2406_v49 = vrot.slane %v2405_v44, 4  ;;  %v2410_v50 = vrot.slane %v2408_v45, 5  ;;  %v3230_v52 = vsel %vm10227_vm8, %v3228_v47, %v3229_v48  ;;  %v2395_v58 = vor.u32 %v2394_v57, %v2391_v56 }
  0x15   :  { %9674 = vmatmul.msk.bf16.gmra.mxu0 %vm268_vm0, %v10002_v3  ;;  %9699 = vmatmul.msk.bf16.gmra.mxu3 %vm268_vm0, %v10027_v4  ;;  %v2027_v37 = vsel %vm10215_vm5, %v2022_v33, %v2026_v34  ;;  %v3339_v4 = vsel %vm10227_vm8, %v9721_v63, %v3338_v0  ;;  %vm9472_vm9 = vcmask 125952  }
  0x16   :  { %v2411_v53 = vsel %vm10215_vm5, %v2406_v49, %v2410_v50  ;;  %3450 = vrot.lane.b32.xlu2 %v3230_v52, %s10108_s13  ;;  %v2396_v62 = vrot.slane %v2395_v58, 4 }
  0x18   :  { %v2401_v3 = vsel %vm10215_vm5, %v2396_v62, %v2400_v40 }
  0x1a   :  { %2774 = vrot.lane.b32.xlu0 %v2027_v37, %s10107_s30 }
  0x1e   :  { %2836 = vrot.lane.b32.xlu2 %v2401_v3, %s10107_s30 }
  0x22   :  { %2838 = vrot.lane.b32.xlu0 %v2411_v53, %s10107_s30 }
  0x25   :  { %9675 = vmatmul.msk.bf16.gmra.mxu0 %vm268_vm0, %v10003_v5  ;;  %9700 = vmatmul.msk.bf16.gmra.mxu3 %vm268_vm0, %v10028_v6  ;;  %v3079_v6 = vld [vmem:[#allocation2 + $0xe0] sm:$0x1] }
  0x2a   :  { %3512 = vrot.lane.b32.xlu0 %v3339_v4, %s10108_s13 }
  0x35   :  { %9676 = vmatmul.msk.bf16.gmra.mxu0 %vm268_vm0, %v10004_v7  ;;  %9701 = vmatmul.msk.bf16.gmra.mxu3 %vm268_vm0, %v10029_v8  ;;  %v3340_v7 = vrot.slane %v3338_v0, 4  ;;  %v3341_v8 = vrot.slane %v3079_v6, 5 }
  0x37   :  { %v3342_v10 = vsel %vm10227_vm8, %v3340_v7, %v3341_v8 }
  0x38   :  { %3514 = vrot.lane.b32.xlu1 %v3342_v10, %s10108_s13 }
  0x45   :  { %9677 = vmatmul.msk.bf16.gmra.mxu0 %vm268_vm0, %v10005_v29  ;;  %9702 = vmatmul.msk.bf16.gmra.mxu3 %vm268_vm0, %v10030_v42 }
  0x55   :  { %9678 = vmatmul.msk.bf16.gmra.mxu0 %vm268_vm0, %v10006_v35  ;;  %9703 = vmatmul.msk.bf16.gmra.mxu3 %vm268_vm0, %v10031_v39 }
  0x82   :  { %v374_v1 = vpop.f32.mrf.mxu0 }
  0x83   :  { %v538_v5 = vmul.f32 %v10251_v59, %v374_v1 }
  0x85   :  { %v606_v9 = vadd.f32 %v10256_v2, %v538_v5 }
  0x87   :  { %v670_v13 = vmax.f32 %v606_v9, 0.0 }
  0x88   :  { %v499_v11 = vpop.f32.mrf.mxu3 }
  0x89   :  { %v588_v12 = vmul.f32 %v10251_v59, %v499_v11  ;;  %v734_v18 = vpack.c.bf16 %v670_v13, %v670_v13 }
  0x8a   :  { %v376_v14 = vpop.f32.mrf.mxu0 }
  0x8b   :  { %v656_v15 = vadd.f32 %v10256_v2, %v588_v12  ;;  %v539_v16 = vmul.f32 %v10251_v59, %v376_v14  ;;  %v877_v25 = vunpack.c.l.b16 %v734_v18 }
  0x8d   :  { %v607_v17 = vadd.f32 %v10256_v2, %v539_v16  ;;  %v720_v19 = vmax.f32 %v656_v15, 0.0 }
  0x8f   :  { %v671_v21 = vmax.f32 %v607_v17, 0.0  ;;  %v784_v27 = vpack.c.bf16 %v720_v19, %v720_v19 }
  0x90   :  { %v501_v22 = vpop.f32.mrf.mxu3 }
  0x91   :  { %v735_v23 = vpack.c.bf16 %v671_v21, %v671_v21  ;;  %v589_v24 = vmul.f32 %v10251_v59, %v501_v22  ;;  %v927_v36 = vunpack.c.l.b16 %v784_v27 }
  0x92   :  { %v379_v26 = vpop.f32.mrf.mxu0 }
  0x93   :  { %v878_v28 = vunpack.c.l.b16 %v735_v23  ;;  %v657_v29 = vadd.f32 %v10256_v2, %v589_v24  ;;  %v540_v30 = vmul.f32 %v10251_v59, %v379_v26 }
  0x95   :  { %v941_v31 = vpack.c.b16 %v878_v28, %v877_v25  ;;  %v721_v33 = vmax.f32 %v657_v29, 0.0  ;;  %v608_v34 = vadd.f32 %v10256_v2, %v540_v30 }
  0x97   :  { %v974_v37 = vshrl.u32 %v941_v31, 16  ;;  %v785_v38 = vpack.c.bf16 %v721_v33, %v721_v33  ;;  %v977_v40 = vshll.u32 %v941_v31, 16  ;;  %v672_v45 = vmax.f32 %v608_v34, 0.0 }
  0x98   :  { %v504_v42 = vpop.f32.mrf.mxu3 }
  0x99   :  { %v976_v43 = vrot.slane %v974_v37, 7  ;;  %v928_v44 = vunpack.c.l.b16 %v785_v38  ;;  %v590_v46 = vmul.f32 %v10251_v59, %v504_v42  ;;  %v736_v56 = vpack.c.bf16 %v672_v45, %v672_v45 }
  0x9a   :  { %v381_v47 = vpop.f32.mrf.mxu0 }
  0x9b   :  { %v979_v48 = vor.u32 %v977_v40, %v976_v43  ;;  %v1296_v49 = vsel %vm10284_vm11, %v976_v43, 0  ;;  %v966_v50 = vpack.c.b16 %v928_v44, %v927_v36  ;;  %v541_v52 = vmul.f32 %v10251_v59, %v381_v47 }
  0x9c   :  { %v1394_v51 = vunpack.c.l.b16 %v1296_v49  ;;  %v658_v53 = vadd.f32 %v10256_v2, %v590_v46  ;;  %v879_v10 = vunpack.c.l.b16 %v736_v56 }
  0x9d   :  { %v1264_v54 = vsel %vm10284_vm11, 0, %v979_v48  ;;  %v1149_v55 = vshrl.u32 %v966_v50, 16  ;;  %v609_v61 = vadd.f32 %v10256_v2, %v541_v52  ;;  %v1152_v63 = vshll.u32 %v966_v50, 16 }
  0x9e   :  { %v1392_v57 = vunpack.c.l.b16 %v1264_v54  ;;  %v1393_v58 = vunpack.c.h.b16 %v1264_v54  ;;  %v1490_v60 = vpack.c.b16 %v1394_v51, %v1394_v51  ;;  %v722_v0 = vmax.f32 %v658_v53, 0.0 }
  0x9f   :  { %v1151_v62 = vrot.slane %v1149_v55, 7  ;;  %v673_v4 = vmax.f32 %v609_v61, 0.0 }
  0xa0   :  { %v1488_v1 = vpack.c.b16 %v1392_v57, %v1392_v57  ;;  %v1489_v3 = vpack.c.b16 %v1393_v58, %v1393_v58  ;;  %1683 = vst.msk [vmem:[#allocation2 + $0x14] sm:$0x1] %vm801_vm2, %v1490_v60  ;;  %v506_v5 = vpop.f32.mrf.mxu3  ;;  %v786_v13 = vpack.c.bf16 %v722_v0, %v722_v0 }
  0xa1   :  { %v1154_v6 = vor.u32 %v1152_v63, %v1151_v62  ;;  %v1321_v7 = vsel %vm10284_vm11, %v1151_v62, 0  ;;  %v591_v8 = vmul.f32 %v10251_v59, %v506_v5  ;;  %v737_v11 = vpack.c.bf16 %v673_v4, %v673_v4 }
  0xa2   :  { %1681 = vst.msk [vmem:[#allocation2 + $0xc] sm:$0xf] %vm798_vm1, %v1488_v1  ;;  %v1469_v9 = vunpack.c.l.b16 %v1321_v7  ;;  %v929_v24 = vunpack.c.l.b16 %v786_v13  ;;  %v384_v36 = vpop.f32.mrf.mxu0 }
  0xa3   :  { %1682 = vst.msk [vmem:[#allocation2 + $0x10] sm:$0xf] %vm798_vm1, %v1489_v3  ;;  %v1289_v12 = vsel %vm10284_vm11, 0, %v1154_v6  ;;  %v659_v14 = vadd.f32 %v10256_v2, %v591_v8  ;;  %v880_v18 = vunpack.c.l.b16 %v737_v11  ;;  %v542_v42 = vmul.f32 %v10251_v59, %v384_v36 }
  0xa4   :  { %v1467_v15 = vunpack.c.l.b16 %v1289_v12  ;;  %v1468_v16 = vunpack.c.h.b16 %v1289_v12  ;;  %v1565_v17 = vpack.c.b16 %v1469_v9, %v1469_v9 }
  0xa5   :  { %v723_v19 = vmax.f32 %v659_v14, 0.0  ;;  %v942_v23 = vpack.c.b16 %v880_v18, %v879_v10  ;;  %v10327_v7 = vadd.f32 %v10256_v2, %v542_v42 }
  0xa6   :  { %v1563_v21 = vpack.c.b16 %v1467_v15, %v1467_v15  ;;  %v1564_v22 = vpack.c.b16 %v1468_v16, %v1468_v16  ;;  %1758 = vst.msk [vmem:[#allocation2 + $0x158] sm:$0x1] %vm801_vm2, %v1565_v17 }
  0xa7   :  { %v787_v25 = vpack.c.bf16 %v723_v19, %v723_v19  ;;  %v981_v26 = vshrl.u32 %v942_v23, 16  ;;  %v984_v27 = vshll.u32 %v942_v23, 16  ;;  %v3034_v28 = vld [vmem:[#allocation2 + $0x14] sm:$0x1] }
  0xa8   :  { %1756 = vst.msk [vmem:[#allocation2 + $0x150] sm:$0xf] %vm798_vm1, %v1563_v21  ;;  %v3236_v38 = vrot.slane %v3034_v28, 5  ;;  %v509_v8 = vpop.f32.mrf.mxu3 }
  0xa9   :  { %1757 = vst.msk [vmem:[#allocation2 + $0x154] sm:$0xf] %vm798_vm1, %v1564_v22  ;;  %v3705_v29 = vld [vmem:[#allocation2 + $0xc] sm:$0xf]  ;;  %v930_v30 = vunpack.c.l.b16 %v787_v25  ;;  %v983_v33 = vrot.slane %v981_v26, 7  ;;  %v592_v17 = vmul.f32 %v10251_v59, %v509_v8 }
  0xaa   :  { %v3032_v31 = vld [vmem:[#allocation2 + $0xc] sm:$0xe]  ;;  %v3706_v34 = vld [vmem:[#allocation2 + $0x10] sm:$0xf]  ;;  %3833 = vrot.lane.b32.xlu2 %v3705_v29, %s10109_s23 }
  0xab   :  { %v3033_v35 = vld [vmem:[#allocation2 + $0x10] sm:$0xf]  ;;  %3835 = vrot.lane.b32.xlu0 %v3706_v34, %s10109_s23  ;;  %v967_v39 = vpack.c.b16 %v930_v30, %v929_v24  ;;  %v4090_v40 = vld [vmem:[#allocation2 + $0xc] sm:$0xf]  ;;  %v986_v43 = vor.u32 %v984_v27, %v983_v33  ;;  %v1297_v44 = vsel %vm10284_vm11, %v983_v33, 0  ;;  %v9706_v50 = vrot.slane %v3032_v31, 9 }
  0xac   :  { %v3233_v37 = vrot.slane %v3033_v35, 5  ;;  %v4187_v45 = vshrl.u32 %v4090_v40, 16  ;;  %v4190_v46 = vshll.u32 %v4090_v40, 16  ;;  %v1397_v47 = vunpack.c.l.b16 %v1297_v44  ;;  %v10318_v61 = vld [vmem:[#allocation2 + $0x10] sm:$0xf] }
  0xad   :  { %v1156_v49 = vshrl.u32 %v967_v39, 16  ;;  %v1265_v51 = vsel %vm10284_vm11, 0, %v986_v43  ;;  %v1159_v52 = vshll.u32 %v967_v39, 16  ;;  %v1908_v0 = vld [vmem:[#allocation2 + $0xc] sm:$0xf]  ;;  %v4196_v21 = vshll.u32 %v10318_v61, 16 }
  0xae   :  { %v3235_v48 = vrot.slane %v3233_v37, 4  ;;  %v4189_v53 = vrot.slane %v4187_v45, 4  ;;  %v4192_v54 = vrot.slane %v4190_v46, 5  ;;  %v1395_v55 = vunpack.c.l.b16 %v1265_v51  ;;  %v1909_v6 = vld [vmem:[#allocation2 + $0x10] sm:$0xf]  ;;  %v386_v45 = vpop.f32.mrf.mxu0 }
  0xaf   :  { %v1396_v56 = vunpack.c.h.b16 %v1265_v51  ;;  %v1493_v57 = vpack.c.b16 %v1397_v47, %v1397_v47  ;;  %v3107_v60 = vld [vmem:[#allocation2 + $0x150] sm:$0xe]  ;;  %v1158_v62 = vrot.slane %v1156_v49, 7  ;;  %v3234_v5 = vsel %vm10227_vm8, %v9706_v50, %v3233_v37  ;;  %v1779_v28 = vld [vmem:[#allocation2 + $0xc] sm:$0xf] }
  0xb0   :  { %v3237_v58 = vsel %vm10227_vm8, %v3235_v48, %v3236_v38  ;;  %v10321_v63 = vld [vmem:[#allocation2 + $0x154] sm:$0xf]  ;;  %v1491_v1 = vpack.c.b16 %v1395_v55, %v1395_v55  ;;  %v9731_v11 = vrot.slane %v3107_v60, 9  ;;  %v4193_v12 = vor.u32 %v4192_v54, %v4189_v53  ;;  %1843 = vst.msk [vmem:[#allocation3 + $0x8] sm:$0xf] %vm798_vm1, %v1779_v28 }
  0xb1   :  { %3454 = vrot.lane.b32.xlu1 %v3237_v58, %s10108_s13  ;;  %v1492_v3 = vpack.c.b16 %v1396_v56, %v1396_v56  ;;  %1686 = vst.msk [vmem:[#allocation2 + $0x20] sm:$0x1] %vm801_vm2, %v1493_v57  ;;  %v3756_v4 = vld [vmem:[#allocation2 + $0x154] sm:$0xf]  ;;  %v1161_v9 = vor.u32 %v1159_v52, %v1158_v62  ;;  %v1322_v10 = vsel %vm10284_vm11, %v1158_v62, 0  ;;  %v3408_v15 = vrot.slane %v10321_v63, 5  ;;  %v511_v57 = vpop.f32.mrf.mxu3 }
  0xb2   :  { %3935 = vrot.lane.b32.xlu2 %v3756_v4, %s10109_s23  ;;  %v1984_v13 = vld [vmem:[#allocation2 + $0x154] sm:$0xf]  ;;  %1684 = vst.msk [vmem:[#allocation2 + $0x18] sm:$0xf] %vm798_vm1, %v1491_v1  ;;  %v1472_v14 = vunpack.c.l.b16 %v1322_v10  ;;  %v2029_v16 = vshrl.u32 %v1908_v0, 16  ;;  %v2032_v22 = vshll.u32 %v1908_v0, 16  ;;  %v660_v44 = vadd.f32 %v10256_v2, %v592_v17 }
  0xb3   :  { %3452 = vrot.lane.b32.xlu0 %v3234_v5, %s10108_s13  ;;  %v1830_v18 = vld [vmem:[#allocation2 + $0x154] sm:$0xf]  ;;  %1685 = vst.msk [vmem:[#allocation2 + $0x1c] sm:$0xf] %vm798_vm1, %v1492_v3  ;;  %v1290_v19 = vsel %vm10284_vm11, 0, %v1161_v9  ;;  %v2038_v23 = vshll.u32 %v1909_v6, 16  ;;  %v3409_v46 = vsel %vm10227_vm8, %v9731_v11, %v3408_v15  ;;  %v543_v56 = vmul.f32 %v10251_v59, %v386_v45 }
  0xb4   :  { %v1470_v24 = vunpack.c.l.b16 %v1290_v19  ;;  %v1471_v25 = vunpack.c.h.b16 %v1290_v19  ;;  %v1568_v26 = vpack.c.b16 %v1472_v14, %v1472_v14  ;;  %v2042_v27 = vshrl.u32 %v1909_v6, 16  ;;  %1894 = vst.msk [vmem:[#allocation3 + $0xd4] sm:$0xf] %vm798_vm1, %v1830_v18  ;;  %v3755_v36 = vld [vmem:[#allocation2 + $0x150] sm:$0xf] }
  0xb5   :  { %v4194_v29 = vrot.slane %v4193_v12, 4  ;;  %v2031_v30 = vrot.slane %v2029_v16, 4  ;;  %v2034_v31 = vrot.slane %v2032_v22, 5  ;;  %v2638_v33 = vshll.u32 %v1984_v13, 16  ;;  %v1985_v42 = vld [vmem:[#allocation2 + $0x158] sm:$0x1] }
  0xb6   :  { %v1566_v34 = vpack.c.b16 %v1470_v24, %v1470_v24  ;;  %v1567_v35 = vpack.c.b16 %v1471_v25, %v1471_v25  ;;  %1761 = vst.msk [vmem:[#allocation2 + $0x164] sm:$0x1] %vm801_vm2, %v1568_v26  ;;  %v2642_v37 = vshrl.u32 %v1984_v13, 16  ;;  %v674_v38 = vmax.f32 %v10327_v7, 0.0  ;;  %v1910_v55 = vld [vmem:[#allocation2 + $0x14] sm:$0x1] }
  0xb7   :  { %v10345_v39 = vrot.slane %v4196_v21, 5  ;;  %v2035_v40 = vor.u32 %v2034_v31, %v2031_v30  ;;  %v10347_v43 = vrot.slane %v2638_v33, 5  ;;  %v2040_v47 = vrot.slane %v2038_v23, 5  ;;  %v10007_v58 = vld [vmem:[%s14425_s0 + $0x30] sm:$0xff]  ;;  %v3109_v0 = vld [vmem:[#allocation2 + $0x158] sm:$0x1] }
  0xb8   :  { %1759 = vst.msk [vmem:[#allocation2 + $0x15c] sm:$0xf] %vm798_vm1, %v1566_v34  ;;  %v2644_v48 = vrot.slane %v2642_v37, 4  ;;  %v2044_v49 = vrot.slane %v2042_v27, 4  ;;  %v4200_v51 = vshrl.u32 %v10318_v61, 16  ;;  %v2648_v54 = vshll.u32 %v1985_v42, 16  ;;  %9679 = vmatmul.msk.bf16.gmra.mxu0 %vm268_vm0, %v10007_v58 }
  0xb9   :  { %3933 = vrot.lane.b32.xlu1 %v3755_v36, %s10109_s23  ;;  %1760 = vst.msk [vmem:[#allocation2 + $0x160] sm:$0xf] %vm798_vm1, %v1567_v35  ;;  %v4199_v50 = vsel %vm10215_vm5, %v4194_v29, %v10345_v39  ;;  %v2036_v52 = vrot.slane %v2035_v40, 4  ;;  %v724_v60 = vmax.f32 %v660_v44, 0.0  ;;  %v1780_v62 = vld [vmem:[#allocation2 + $0x10] sm:$0xf]  ;;  %v738_v61 = vpack.c.bf16 %v674_v38, %v674_v38 }
  0xba   :  { %3552 = vrot.lane.b32.xlu2 %v3409_v46, %s10108_s13  ;;  %v2645_v53 = vor.u32 %v2644_v48, %v10347_v43  ;;  %v2045_v1 = vor.u32 %v2044_v49, %v2040_v47  ;;  %v10365_v3 = vld [vmem:[#allocation2 + $0x1c] sm:$0xf]  ;;  %v611_v4 = vadd.f32 %v10256_v2, %v543_v56  ;;  %v3410_v5 = vrot.slane %v3408_v15, 4  ;;  %v4092_v7 = vld [vmem:[#allocation2 + $0x14] sm:$0x1] }
  0xbb   :  { %4954 = vrot.lane.b32.xlu0 %v4199_v50, %s10110_s24  ;;  %v2048_v6 = vshll.u32 %v1910_v55, 16  ;;  %v4202_v8 = vrot.slane %v4200_v51, 4  ;;  %v593_v9 = vmul.f32 %v10251_v59, %v511_v57  ;;  %v2041_v10 = vsel %vm10215_vm5, %v2036_v52, %v2040_v47  ;;  %1844 = vst.msk [vmem:[#allocation3 + $0xc] sm:$0xf] %vm798_vm1, %v1780_v62  ;;  %v1829_v13 = vld [vmem:[#allocation2 + $0x150] sm:$0xf] }
  0xbc   :  { %v2646_v63 = vrot.slane %v2645_v53, 4  ;;  %v2650_v11 = vrot.slane %v2648_v54, 5  ;;  %v675_v12 = vmax.f32 %v611_v4, 0.0  ;;  %v3411_v14 = vrot.slane %v3109_v0, 5  ;;  %v3037_v22 = vld [vmem:[#allocation2 + $0x20] sm:$0x1] }
  0xbd   :  { %v788_v16 = vpack.c.bf16 %v724_v60, %v724_v60  ;;  %v3240_v17 = vrot.slane %v10365_v3, 5  ;;  %v661_v15 = vadd.f32 %v10256_v2, %v593_v9  ;;  %v881_v19 = vunpack.c.l.b16 %v738_v61  ;;  %v1983_v28 = vld [vmem:[#allocation2 + $0x150] sm:$0xf]  ;;  %1893 = vst.msk [vmem:[#allocation3 + $0xd0] sm:$0xf] %vm798_vm1, %v1829_v13  ;;  %v10032_v33 = vld [vmem:[%s14425_s0 + $0xf8] sm:$0xff] }
  0xbe   :  { %v2651_v18 = vsel %vm10215_vm5, %v2646_v63, %v2650_v11  ;;  %v2046_v21 = vrot.slane %v2045_v1, 4  ;;  %v739_v23 = vpack.c.bf16 %v675_v12, %v675_v12  ;;  %v3412_v24 = vsel %vm10227_vm8, %v3410_v5, %v3411_v14  ;;  %v3035_v31 = vld [vmem:[#allocation2 + $0x18] sm:$0xe]  ;;  %v4094_v38 = vld [vmem:[#allocation2 + $0x1c] sm:$0xf]  ;;  %9704 = vmatmul.msk.bf16.gmra.mxu3 %vm268_vm0, %v10032_v33  ;;  %v389_v11 = vpop.f32.mrf.mxu0 }
  0xbf   :  { %v4203_v25 = vor.u32 %v4202_v8, %v10345_v39  ;;  %v4206_v26 = vshll.u32 %v4092_v7, 16  ;;  %v725_v27 = vmax.f32 %v661_v15, 0.0  ;;  %v2050_v29 = vrot.slane %v2048_v6, 5  ;;  %v1911_v39 = vld [vmem:[#allocation2 + $0x18] sm:$0xf] }
  0xc0   :  { %v882_v30 = vunpack.c.l.b16 %v739_v23  ;;  %v931_v34 = vunpack.c.l.b16 %v788_v16  ;;  %v3242_v35 = vrot.slane %v3240_v17, 4  ;;  %v3243_v36 = vrot.slane %v3037_v22, 5  ;;  %v3708_v42 = vld [vmem:[#allocation2 + $0x1c] sm:$0xf]  ;;  %v1781_v47 = vld [vmem:[#allocation2 + $0x18] sm:$0xf] }
  0xc1   :  { %2776 = vrot.lane.b32.xlu1 %v2041_v10, %s10107_s30  ;;  %v789_v37 = vpack.c.bf16 %v725_v27, %v725_v27  ;;  %v2051_v40 = vsel %vm10215_vm5, %v2046_v21, %v2050_v29  ;;  %v2629_v45 = vshrl.u32 %v1983_v28, 16  ;;  %v2632_v46 = vshll.u32 %v1983_v28, 16  ;;  %v1782_v48 = vld [vmem:[#allocation2 + $0x1c] sm:$0xf]  ;;  %1845 = vst.msk [vmem:[#allocation3 + $0x10] sm:$0xf] %vm798_vm1, %v1781_v47 }
  0xc2   :  { %2878 = vrot.lane.b32.xlu2 %v2651_v18, %s10107_s30  ;;  %v943_v44 = vpack.c.b16 %v882_v30, %v881_v19  ;;  %v4204_v49 = vrot.slane %v4203_v25, 4  ;;  %v4208_v50 = vrot.slane %v4206_v26, 5  ;;  %v9707_v52 = vrot.slane %v3035_v31, 9  ;;  %1846 = vst.msk [vmem:[#allocation3 + $0x14] sm:$0xf] %vm798_vm1, %v1782_v48 }
  0xc3   :  { %3554 = vrot.lane.b32.xlu0 %v3412_v24, %s10108_s13  ;;  %v932_v51 = vunpack.c.l.b16 %v789_v37  ;;  %v2053_v55 = vshrl.u32 %v1911_v39, 16  ;;  %v2056_v56 = vshll.u32 %v1911_v39, 16  ;;  %v3244_v57 = vsel %vm10227_vm8, %v3242_v35, %v3243_v36  ;;  %v1912_v6 = vld [vmem:[#allocation2 + $0x1c] sm:$0xf]  ;;  %v4095_v26 = vld [vmem:[#allocation2 + $0x20] sm:$0x1] }
  0xc4   :  { %v988_v53 = vshrl.u32 %v943_v44, 16  ;;  %v991_v54 = vshll.u32 %v943_v44, 16  ;;  %v4220_v60 = vshll.u32 %v4094_v38, 16  ;;  %v4224_v62 = vshrl.u32 %v4094_v38, 16  ;;  %v1986_v15 = vld [vmem:[#allocation2 + $0x15c] sm:$0xf] }
  0xc5   :  { %v968_v58 = vpack.c.b16 %v932_v51, %v931_v34  ;;  %v2631_v0 = vrot.slane %v2629_v45, 4  ;;  %v2634_v61 = vrot.slane %v2632_v46, 5  ;;  %v4209_v1 = vsel %vm10215_vm5, %v4204_v49, %v4208_v50  ;;  %v3757_v36 = vld [vmem:[#allocation2 + $0x15c] sm:$0xf] }
  0xc6   :  { %v990_v63 = vrot.slane %v988_v53, 7  ;;  %v3241_v5 = vsel %vm10227_vm8, %v9707_v52, %v3240_v17  ;;  %v2055_v9 = vrot.slane %v2053_v55, 4  ;;  %v2058_v10 = vrot.slane %v2056_v56, 5  ;;  %v391_v50 = vpop.f32.mrf.mxu0  ;;  %v10008_v51 = vld [vmem:[%s14425_s0 + $0x38] sm:$0xff]  ;;  %v1913_v56 = vld [vmem:[#allocation2 + $0x20] sm:$0x1] }
  0xc7   :  { %v1163_v3 = vshrl.u32 %v968_v58, 16  ;;  %v1166_v4 = vshll.u32 %v968_v58, 16  ;;  %v10403_v14 = vrot.slane %v4220_v60, 5  ;;  %v4226_v16 = vrot.slane %v4224_v62, 4  ;;  %v1831_v55 = vld [vmem:[#allocation2 + $0x15c] sm:$0xf]  ;;  %v10425_v60 = vpop.permute.xlu2 %3450 }
  0xc8   :  { %v993_v7 = vor.u32 %v991_v54, %v990_v63  ;;  %v1298_v8 = vsel %vm10284_vm11, %v990_v63, 0  ;;  %v2635_v17 = vor.u32 %v2634_v61, %v2631_v0  ;;  %v2062_v19 = vshll.u32 %v1912_v6, 16  ;;  %9680 = vmatmul.msk.bf16.gmra.mxu0 %vm268_vm0, %v10008_v51  ;;  %v1832_v61 = vld [vmem:[#allocation2 + $0x160] sm:$0xf]  ;;  %1895 = vst.msk [vmem:[#allocation3 + $0xd8] sm:$0xf] %vm798_vm1, %v1831_v55 }
  0xc9   :  { %2778 = vrot.lane.b32.xlu1 %v2051_v40, %s10107_s30  ;;  %v1400_v12 = vunpack.c.l.b16 %v1298_v8  ;;  %v1165_v13 = vrot.slane %v1163_v3, 7  ;;  %v2066_v21 = vshrl.u32 %v1912_v6, 16  ;;  %v2059_v28 = vor.u32 %v2058_v10, %v2055_v9  ;;  %v514_v10 = vpop.f32.mrf.mxu3  ;;  %1896 = vst.msk [vmem:[#allocation3 + $0xdc] sm:$0xf] %vm798_vm1, %v1832_v61  ;;  %v10009_v51 = vld [vmem:[%s14425_s0 + $0x40] sm:$0xff] }
  0xca   :  { %3839 = vrot.lane.b32.xlu2 %v3708_v42, %s10109_s23  ;;  %v1266_v18 = vsel %vm10284_vm11, 0, %v993_v7  ;;  %v2653_v29 = vshrl.u32 %v1986_v15, 16  ;;  %v2656_v30 = vshll.u32 %v1986_v15, 16  ;;  %v4230_v39 = vshll.u32 %v4095_v26, 16  ;;  %v2773_v26 = vpop.permute.xlu0 %2772  ;;  %v3758_v61 = vld [vmem:[#allocation2 + $0x160] sm:$0xf] }
  0xcb   :  { %3458 = vrot.lane.b32.xlu0 %v3244_v57, %s10108_s13  ;;  %v1398_v22 = vunpack.c.l.b16 %v1266_v18  ;;  %v1399_v23 = vunpack.c.h.b16 %v1266_v18  ;;  %v1496_v24 = vpack.c.b16 %v1400_v12, %v1400_v12  ;;  %v1168_v25 = vor.u32 %v1166_v4, %v1165_v13  ;;  %v4093_v57 = vld [vmem:[#allocation2 + $0x18] sm:$0xf]  ;;  %v10435_v4 = vld [vmem:[#allocation2 + $0x160] sm:$0xf] }
  0xcc   :  { %v1323_v27 = vsel %vm10284_vm11, %v1165_v13, 0  ;;  %v2636_v42 = vrot.slane %v2635_v17, 4  ;;  %v4227_v44 = vor.u32 %v4226_v16, %v10403_v14  ;;  %v2064_v45 = vrot.slane %v2062_v19, 5 }
  0xcd   :  { %v1494_v31 = vpack.c.b16 %v1398_v22, %v1398_v22  ;;  %v1495_v33 = vpack.c.b16 %v1399_v23, %v1399_v23  ;;  %1689 = vst.msk [vmem:[#allocation2 + $0x2c] sm:$0x1] %vm801_vm2, %v1496_v24  ;;  %v1291_v34 = vsel %vm10284_vm11, 0, %v1168_v25  ;;  %v1475_v35 = vunpack.c.l.b16 %v1323_v27 }
  0xce   :  { %v1473_v37 = vunpack.c.l.b16 %v1291_v34  ;;  %v1474_v38 = vunpack.c.h.b16 %v1291_v34  ;;  %v2060_v48 = vrot.slane %v2059_v28, 4  ;;  %v2655_v49 = vrot.slane %v2653_v29, 4  ;;  %v3707_v34 = vld [vmem:[#allocation2 + $0x18] sm:$0xf] }
  0xcf   :  { %1687 = vst.msk [vmem:[#allocation2 + $0x24] sm:$0xf] %vm798_vm1, %v1494_v31  ;;  %v1571_v40 = vpack.c.b16 %v1475_v35, %v1475_v35  ;;  %v2658_v52 = vrot.slane %v2656_v30, 5  ;;  %v2068_v53 = vrot.slane %v2066_v21, 4  ;;  %v544_v54 = vmul.f32 %v10251_v59, %v389_v11  ;;  %v1809_v21 = vld [vmem:[#allocation2 + $0xd8] sm:$0xf]  ;;  %v2837_v31 = vpop.permute.xlu2 %2836 }
  0xd0   :  { %1688 = vst.msk [vmem:[#allocation2 + $0x28] sm:$0xf] %vm798_vm1, %v1495_v33  ;;  %v1569_v46 = vpack.c.b16 %v1473_v37, %v1473_v37  ;;  %v1570_v47 = vpack.c.b16 %v1474_v38, %v1474_v38  ;;  %v545_v58 = vmul.f32 %v10251_v59, %v391_v50  ;;  %v4228_v62 = vrot.slane %v4227_v44, 4  ;;  %v1777_v33 = vld [vmem:[#allocation2] sm:$0xf] }
  0xd1   :  { %4956 = vrot.lane.b32.xlu1 %v4209_v1, %s10110_s24  ;;  %1764 = vst.msk [vmem:[#allocation2 + $0x170] sm:$0x1] %vm801_vm2, %v1571_v40  ;;  %v4232_v63 = vrot.slane %v4230_v39, 5  ;;  %v612_v0 = vadd.f32 %v10256_v2, %v544_v54  ;;  %v2641_v1 = vsel %vm10215_vm5, %v2636_v42, %v10347_v43  ;;  %v2065_v3 = vsel %vm10215_vm5, %v2060_v48, %v2064_v45  ;;  %v516_v39 = vpop.f32.mrf.mxu3  ;;  %v1778_v50 = vld [vmem:[#allocation2 + $0x4] sm:$0xf] }
  0xd2   :  { %3456 = vrot.lane.b32.xlu2 %v3241_v5, %s10108_s13  ;;  %1762 = vst.msk [vmem:[#allocation2 + $0x168] sm:$0xf] %vm798_vm1, %v1569_v46  ;;  %v613_v5 = vadd.f32 %v10256_v2, %v545_v58  ;;  %v2659_v6 = vor.u32 %v2658_v52, %v2655_v49  ;;  %v2069_v7 = vor.u32 %v2068_v53, %v2064_v45  ;;  %v2072_v8 = vshll.u32 %v1913_v56, 16  ;;  %v10463_v46 = vld [vmem:[#allocation2 + $0x160] sm:$0xf]  ;;  %v3449_v53 = vpop.permute.xlu1 %3448  ;;  %v2775_v58 = vpop.permute.xlu0 %2774 }
  0xd3   :  { %3937 = vrot.lane.b32.xlu0 %v3757_v36, %s10109_s23  ;;  %1763 = vst.msk [vmem:[#allocation2 + $0x16c] sm:$0xf] %vm798_vm1, %v1570_v47  ;;  %v676_v9 = vmax.f32 %v612_v0, 0.0  ;;  %v4211_v11 = vshrl.u32 %v4093_v57, 16  ;;  %v4214_v12 = vshll.u32 %v4093_v57, 16  ;;  %v594_v43 = vmul.f32 %v10251_v59, %v514_v10 }
  0xd4   :  { %v677_v13 = vmax.f32 %v613_v5, 0.0  ;;  %v4233_v16 = vsel %vm10215_vm5, %v4228_v62, %v4232_v63  ;;  %v2662_v15 = vshll.u32 %v10435_v4, 16  ;;  %v2660_v22 = vrot.slane %v2659_v6, 4  ;;  %1873 = vst.msk [vmem:[#allocation3 + $0x80] sm:$0xf] %vm798_vm1, %v1809_v21 }
  0xd5   :  { %v740_v18 = vpack.c.bf16 %v676_v9, %v676_v9  ;;  %v662_v19 = vadd.f32 %v10256_v2, %v594_v43  ;;  %v2070_v23 = vrot.slane %v2069_v7, 4  ;;  %v2074_v24 = vrot.slane %v2072_v8, 5  ;;  %2997 = vst.msk [vmem:[#allocation3 + $0x80] sm:$0xf] %vm2964_vm12, %v2837_v31  ;;  %v3110_v8 = vld [vmem:[#allocation2 + $0x15c] sm:$0xe] }
  0xd6   :  { %v741_v17 = vpack.c.bf16 %v677_v13, %v677_v13  ;;  %v4213_v27 = vrot.slane %v4211_v11, 4  ;;  %v4216_v28 = vrot.slane %v4214_v12, 5  ;;  %v10449_v30 = vrot.slane %v2662_v15, 5  ;;  %1841 = vst.msk [vmem:[#allocation3] sm:$0xf] %vm798_vm1, %v1777_v33  ;;  %v394_v33 = vpop.f32.mrf.mxu0 }
  0xd7   :  { %v883_v25 = vunpack.c.l.b16 %v740_v18  ;;  %v726_v36 = vmax.f32 %v662_v19, 0.0  ;;  %v2075_v38 = vsel %vm10215_vm5, %v2070_v23, %v2074_v24  ;;  %2965 = vst.msk [vmem:[#allocation3] sm:$0xf] %vm2964_vm12, %v2773_v26  ;;  %v595_v45 = vmul.f32 %v10251_v59, %v516_v39  ;;  %v1914_v52 = vld [vmem:[#allocation2 + $0x24] sm:$0xf] }
  0xd8   :  { %v884_v29 = vunpack.c.l.b16 %v741_v17  ;;  %v2665_v37 = vsel %vm10215_vm5, %v2660_v22, %v10449_v30  ;;  %v4217_v40 = vor.u32 %v4216_v28, %v4213_v27  ;;  %1842 = vst.msk [vmem:[#allocation3 + $0x4] sm:$0xf] %vm798_vm1, %v1778_v50  ;;  %9681 = vmatmul.msk.bf16.gmra.mxu0 %vm268_vm0, %v10009_v51  ;;  %v2666_v62 = vshrl.u32 %v10435_v4, 16  ;;  %v3709_v7 = vld [vmem:[#allocation2 + $0x24] sm:$0xf] }
  0xd9   :  { %2876 = vrot.lane.b32.xlu1 %v2641_v1, %s10107_s30  ;;  %v790_v48 = vpack.c.bf16 %v726_v36, %v726_v36  ;;  %v663_v49 = vadd.f32 %v10256_v2, %v595_v45  ;;  %3641 = vst.msk [vmem:[#allocation3] sm:$0xf] %vm3640_vm13, %v3449_v53  ;;  %v3415_v63 = vrot.slane %v10463_v46, 5  ;;  %v2077_v5 = vshrl.u32 %v1914_v52, 16  ;;  %v3112_v13 = vld [vmem:[#allocation2 + $0x164] sm:$0x1] }
  0xda   :  { %2780 = vrot.lane.b32.xlu2 %v2065_v3, %s10107_s30  ;;  %v944_v35 = vpack.c.b16 %v884_v29, %v883_v25  ;;  %v4218_v54 = vrot.slane %v4217_v40, 4  ;;  %2966 = vst.msk [vmem:[#allocation3 + $0x4] sm:$0xf] %vm2964_vm12, %v2775_v58  ;;  %v2080_v11 = vshll.u32 %v1914_v52, 16  ;;  %v1988_v18 = vld [vmem:[#allocation2 + $0x164] sm:$0x1]  ;;  %v2839_v27 = vpop.permute.xlu0 %2838 }
  0xdb   :  { %4960 = vrot.lane.b32.xlu0 %v4233_v16, %s10110_s24  ;;  %v727_v57 = vmax.f32 %v663_v49, 0.0  ;;  %v933_v3 = vunpack.c.l.b16 %v790_v48  ;;  %3642 = vst.msk [vmem:[#allocation3 + $0x4] sm:$0xf] %vm3640_vm13, %v10425_v60  ;;  %v9732_v60 = vrot.slane %v3110_v8, 9  ;;  %v2668_v17 = vrot.slane %v2666_v62, 4 }
  0xdc   :  { %v995_v42 = vshrl.u32 %v944_v35, 16  ;;  %v998_v44 = vshll.u32 %v944_v35, 16  ;;  %v4223_v12 = vsel %vm10215_vm5, %v4218_v54, %v10403_v14  ;;  %v1810_v21 = vld [vmem:[#allocation2 + $0xdc] sm:$0xf]  ;;  %v3417_v22 = vrot.slane %v3415_v63, 4 }
  0xdd   :  { %v791_v6 = vpack.c.bf16 %v727_v57, %v727_v57  ;;  %v3418_v23 = vrot.slane %v3112_v13, 5  ;;  %v2079_v14 = vrot.slane %v2077_v5, 4  ;;  %v2082_v24 = vrot.slane %v2080_v11, 5  ;;  %v1783_v28 = vld [vmem:[#allocation2 + $0x24] sm:$0xf] }
  0xde   :  { %v997_v47 = vrot.slane %v995_v42, 7  ;;  %v2672_v29 = vshll.u32 %v1988_v18, 16  ;;  %v10490_v31 = vld [vmem:[#allocation2 + $0x28] sm:$0xf]  ;;  %1874 = vst.msk [vmem:[#allocation3 + $0x84] sm:$0xf] %vm798_vm1, %v1810_v21  ;;  %v2669_v35 = vor.u32 %v2668_v17, %v10449_v30  ;;  %v519_v21 = vpop.f32.mrf.mxu3 }
  0xdf   :  { %v934_v43 = vunpack.c.l.b16 %v791_v6  ;;  %v10496_v36 = vld [vmem:[#allocation2 + $0x28] sm:$0xf]  ;;  %2998 = vst.msk [vmem:[#allocation3 + $0x84] sm:$0xf] %vm2964_vm12, %v2839_v27  ;;  %v3419_v39 = vsel %vm10227_vm8, %v3417_v22, %v3418_v23  ;;  %v3760_v40 = vld [vmem:[#allocation2 + $0x16c] sm:$0xf] }
  0xe0   :  { %v1000_v55 = vor.u32 %v998_v44, %v997_v47  ;;  %v1299_v56 = vsel %vm10284_vm11, %v997_v47, 0  ;;  %v3040_v42 = vld [vmem:[#allocation2 + $0x2c] sm:$0x1]  ;;  %v2083_v44 = vor.u32 %v2082_v24, %v2079_v14  ;;  %1847 = vst.msk [vmem:[#allocation3 + $0x18] sm:$0xf] %vm798_vm1, %v1783_v28  ;;  %v3247_v45 = vrot.slane %v10490_v31, 5 }
  0xe1   :  { %3837 = vrot.lane.b32.xlu1 %v3707_v34, %s10109_s23  ;;  %v1403_v0 = vunpack.c.l.b16 %v1299_v56  ;;  %v969_v19 = vpack.c.b16 %v934_v43, %v933_v3  ;;  %v3416_v34 = vsel %vm10227_vm8, %v9732_v60, %v3415_v63  ;;  %v1833_v48 = vld [vmem:[#allocation2 + $0x168] sm:$0xf]  ;;  %v1834_v50 = vld [vmem:[#allocation2 + $0x16c] sm:$0xf]  ;;  %v2670_v51 = vrot.slane %v2669_v35, 4 }
  0xe2   :  { %2782 = vrot.lane.b32.xlu2 %v2075_v38, %s10107_s30  ;;  %v1267_v1 = vsel %vm10284_vm11, 0, %v1000_v55  ;;  %v546_v38 = vmul.f32 %v10251_v59, %v394_v33  ;;  %v2086_v59 = vshll.u32 %v10496_v36, 16  ;;  %1897 = vst.msk [vmem:[#allocation3 + $0xe0] sm:$0xf] %vm798_vm1, %v1833_v48  ;;  %v2674_v52 = vrot.slane %v2672_v29, 5  ;;  %v3513_v6 = vpop.permute.xlu0 %3512 }
  0xe3   :  { %2880 = vrot.lane.b32.xlu0 %v2665_v37, %s10107_s30  ;;  %v1401_v4 = vunpack.c.l.b16 %v1267_v1  ;;  %v1402_v9 = vunpack.c.h.b16 %v1267_v1  ;;  %v1499_v10 = vpack.c.b16 %v1403_v0, %v1403_v0  ;;  %v1170_v25 = vshrl.u32 %v969_v19, 16  ;;  %1898 = vst.msk [vmem:[#allocation3 + $0xe4] sm:$0xf] %vm798_vm1, %v1834_v50  ;;  %v1784_v62 = vld [vmem:[#allocation2 + $0x28] sm:$0xf] }
  0xe4   :  { %v1173_v26 = vshll.u32 %v969_v19, 16  ;;  %v614_v47 = vadd.f32 %v10256_v2, %v546_v38  ;;  %v3250_v53 = vrot.slane %v3040_v42, 5  ;;  %v10010_v2 = vld [vmem:[%s14425_s0 + $0x48] sm:$0xff]  ;;  %v2084_v55 = vrot.slane %v2083_v44, 4  ;;  %1848 = vst.msk [vmem:[#allocation3 + $0x1c] sm:$0xf] %vm798_vm1, %v1784_v62  ;;  %v3515_v19 = vpop.permute.xlu1 %3514 }
  0xe5   :  { %v1497_v16 = vpack.c.b16 %v1401_v4, %v1401_v4  ;;  %v1498_v15 = vpack.c.b16 %v1402_v9, %v1402_v9  ;;  %1692 = vst.msk [vmem:[#allocation2 + $0x38] sm:$0x1] %vm801_vm2, %v1499_v10  ;;  %v1172_v37 = vrot.slane %v1170_v25, 7  ;;  %v3249_v63 = vrot.slane %v3247_v45, 4  ;;  %v4097_v0 = vld [vmem:[#allocation2 + $0x28] sm:$0xf] }
  0xe6   :  { %v10522_v1 = vrot.slane %v2086_v59, 5  ;;  %v2675_v8 = vsel %vm10215_vm5, %v2670_v51, %v2674_v52  ;;  %v1990_v4 = vld [vmem:[#allocation2 + $0x16c] sm:$0xf]  ;;  %3673 = vst.msk [vmem:[#allocation3 + $0x80] sm:$0xf] %vm3640_vm13, %v3513_v6  ;;  %v4248_v13 = vshrl.u32 %v4097_v0, 16 }
  0xe7   :  { %1690 = vst.msk [vmem:[#allocation2 + $0x30] sm:$0xf] %vm798_vm1, %v1497_v16  ;;  %v1175_v30 = vor.u32 %v1173_v26, %v1172_v37  ;;  %v1324_v46 = vsel %vm10284_vm11, %v1172_v37, 0  ;;  %v10531_v9 = vld [vmem:[%s14426_s2] ss:$0 sm:$0xff]  ;;  %v3251_v43 = vsel %vm10227_vm8, %v3249_v63, %v3250_v53  ;;  %v2686_v18 = vshll.u32 %v1990_v4, 16 }
  0xe8   :  { %1691 = vst.msk [vmem:[#allocation2 + $0x34] sm:$0xf] %vm798_vm1, %v1498_v15  ;;  %v1478_v49 = vunpack.c.l.b16 %v1324_v46  ;;  %9682 = vmatmul.msk.bf16.gmra.mxu0 %vm268_vm0, %v10010_v2  ;;  %v2089_v11 = vsel %vm10215_vm5, %v2084_v55, %v10522_v1  ;;  %v10545_v15 = vld [vmem:[%s14427_s3] ss:$0 sm:$0xff]  ;;  %v2690_v17 = vshrl.u32 %v1990_v4, 16  ;;  %v596_v14 = vmul.f32 %v10531_v9, %v519_v21 }
  0xe9   :  { %3939 = vrot.lane.b32.xlu1 %v3758_v61, %s10109_s23  ;;  %v1292_v54 = vsel %vm10284_vm11, 0, %v1175_v30  ;;  %v678_v61 = vmax.f32 %v614_v47, 0.0  ;;  %v3113_v22 = vld [vmem:[#allocation2 + $0x168] sm:$0xe]  ;;  %3674 = vst.msk [vmem:[#allocation3 + $0x84] sm:$0xf] %vm3640_vm13, %v3515_v19 }
  0xea   :  { %4958 = vrot.lane.b32.xlu2 %v4223_v12, %s10110_s24  ;;  %v1476_v56 = vunpack.c.l.b16 %v1292_v54  ;;  %v1477_v57 = vunpack.c.h.b16 %v1292_v54  ;;  %v1574_v58 = vpack.c.b16 %v1478_v49, %v1478_v49  ;;  %v4244_v12 = vshll.u32 %v4097_v0, 16  ;;  %v3038_v24 = vld [vmem:[#allocation2 + $0x24] sm:$0xe]  ;;  %v10554_v27 = vld [vmem:[#allocation2 + $0x16c] sm:$0xf] }
  0xeb   :  { %3841 = vrot.lane.b32.xlu0 %v3709_v7, %s10109_s23  ;;  %v396_v7 = vpop.f32.mrf.mxu0  ;;  %v742_v16 = vpack.c.bf16 %v678_v61, %v678_v61  ;;  %v4250_v26 = vrot.slane %v4248_v13, 4  ;;  %v4098_v28 = vld [vmem:[#allocation2 + $0x2c] sm:$0x1]  ;;  %v1989_v33 = vld [vmem:[#allocation2 + $0x168] sm:$0xf]  ;;  %v664_v35 = vadd.f32 %v10545_v15, %v596_v14  ;;  %v2090_v37 = vshrl.u32 %v10496_v36, 16 }
  0xec   :  { %v1572_v3 = vpack.c.b16 %v1476_v56, %v1476_v56  ;;  %v1573_v5 = vpack.c.b16 %v1477_v57, %v1477_v57  ;;  %1767 = vst.msk [vmem:[#allocation2 + $0x17c] sm:$0x1] %vm801_vm2, %v1574_v58  ;;  %v547_v10 = vmul.f32 %v10531_v9, %v396_v7  ;;  %v10552_v25 = vrot.slane %v4244_v12, 5  ;;  %v3710_v42 = vld [vmem:[#allocation2 + $0x28] sm:$0xf]  ;;  %v521_v57 = vpop.f32.mrf.mxu3 }
  0xed   :  { %v885_v29 = vunpack.c.l.b16 %v742_v16  ;;  %v9733_v38 = vrot.slane %v3113_v22, 9  ;;  %v9708_v44 = vrot.slane %v3038_v24, 9  ;;  %v1991_v30 = vld [vmem:[#allocation2 + $0x170] sm:$0x1]  ;;  %v3759_v47 = vld [vmem:[#allocation2 + $0x168] sm:$0xf]  ;;  %v597_v61 = vmul.f32 %v10531_v9, %v521_v57 }
  0xee   :  { %1765 = vst.msk [vmem:[#allocation2 + $0x174] sm:$0xf] %vm798_vm1, %v1572_v3  ;;  %v615_v60 = vadd.f32 %v10545_v15, %v547_v10  ;;  %v3422_v48 = vrot.slane %v10554_v27, 5  ;;  %v4251_v59 = vor.u32 %v4250_v26, %v10552_v25  ;;  %v4254_v49 = vshll.u32 %v4098_v28, 16  ;;  %v1916_v51 = vld [vmem:[#allocation2 + $0x2c] sm:$0x1] }
  0xef   :  { %1766 = vst.msk [vmem:[#allocation2 + $0x178] sm:$0xf] %vm798_vm1, %v1573_v5  ;;  %v2677_v50 = vshrl.u32 %v1989_v33, 16  ;;  %v2680_v36 = vshll.u32 %v1989_v33, 16  ;;  %v728_v53 = vmax.f32 %v664_v35, 0.0  ;;  %v2696_v55 = vshll.u32 %v1991_v30, 16 }
  0xf0   :  { %v679_v23 = vmax.f32 %v615_v60, 0.0  ;;  %v3423_v54 = vsel %vm10227_vm8, %v9733_v38, %v3422_v48  ;;  %v2092_v56 = vrot.slane %v2090_v37, 4  ;;  %v3248_v58 = vsel %vm10227_vm8, %v9708_v44, %v3247_v45  ;;  %v4096_v0 = vld [vmem:[#allocation2 + $0x24] sm:$0xf]  ;;  %v10011_v3 = vld [vmem:[%s14425_s0 + $0x50] sm:$0xff] }
  0xf1   :  { %3556 = vrot.lane.b32.xlu1 %v3416_v34, %s10108_s13  ;;  %v4252_v6 = vrot.slane %v4251_v59, 4  ;;  %v4256_v7 = vrot.slane %v4254_v49, 5  ;;  %v2679_v4 = vrot.slane %v2677_v50, 4  ;;  %v2682_v31 = vrot.slane %v2680_v36, 5  ;;  %v1785_v59 = vld [vmem:[#allocation2 + $0x30] sm:$0xf] }
  0xf2   :  { %3558 = vrot.lane.b32.xlu2 %v3419_v39, %s10108_s13  ;;  %v743_v34 = vpack.c.bf16 %v679_v23, %v679_v23  ;;  %v10558_v39 = vrot.slane %v2686_v18, 5  ;;  %v665_v45 = vadd.f32 %v10545_v15, %v597_v61  ;;  %v2698_v13 = vrot.slane %v2696_v55, 5  ;;  %v1918_v49 = vld [vmem:[#allocation2 + $0x34] sm:$0xf]  ;;  %1849 = vst.msk [vmem:[#allocation3 + $0x20] sm:$0xf] %vm798_vm1, %v1785_v59 }
  0xf3   :  { %3943 = vrot.lane.b32.xlu0 %v3760_v40, %s10109_s23  ;;  %v2692_v40 = vrot.slane %v2690_v17, 4  ;;  %v4235_v16 = vshrl.u32 %v4096_v0, 16  ;;  %v4238_v17 = vshll.u32 %v4096_v0, 16  ;;  %v4257_v21 = vsel %vm10215_vm5, %v4252_v6, %v4256_v7  ;;  %v1786_v50 = vld [vmem:[#allocation2 + $0x34] sm:$0xf]  ;;  %v399_v7 = vpop.f32.mrf.mxu0 }
  0xf4   :  { %v886_v46 = vunpack.c.l.b16 %v743_v34  ;;  %v729_v19 = vmax.f32 %v665_v45, 0.0  ;;  %v2683_v14 = vor.u32 %v2682_v31, %v2679_v4  ;;  %1850 = vst.msk [vmem:[#allocation3 + $0x24] sm:$0xf] %vm798_vm1, %v1786_v50  ;;  %v524_v59 = vpop.f32.mrf.mxu3 }
  0xf5   :  { %v2693_v2 = vor.u32 %v2692_v40, %v10558_v39  ;;  %v4237_v37 = vrot.slane %v4235_v16, 4  ;;  %v4240_v38 = vrot.slane %v4238_v17, 5  ;;  %v1917_v16 = vld [vmem:[#allocation2 + $0x30] sm:$0xf]  ;;  %v598_v50 = vmul.f32 %v10531_v9, %v524_v59 }
  0xf6   :  { %v945_v52 = vpack.c.b16 %v886_v46, %v885_v29  ;;  %v2684_v46 = vrot.slane %v2683_v14, 4  ;;  %v3711_v17 = vld [vmem:[#allocation2 + $0x30] sm:$0xf] }
  0xf7   :  { %v2694_v12 = vrot.slane %v2693_v2, 4  ;;  %v4241_v36 = vor.u32 %v4240_v38, %v4237_v37  ;;  %v3041_v2 = vld [vmem:[#allocation2 + $0x30] sm:$0xe]  ;;  %v1835_v38 = vld [vmem:[#allocation2 + $0x174] sm:$0xf] }
  0xf8   :  { %v1002_v62 = vshrl.u32 %v945_v52, 16  ;;  %v1005_v63 = vshll.u32 %v945_v52, 16  ;;  %9683 = vmatmul.msk.bf16.gmra.mxu0 %vm268_vm0, %v10011_v3  ;;  %v2689_v55 = vsel %vm10215_vm5, %v2684_v46, %v10558_v39  ;;  %1899 = vst.msk [vmem:[#allocation3 + $0xe8] sm:$0xf] %vm798_vm1, %v1835_v38  ;;  %v3116_v38 = vld [vmem:[#allocation2 + $0x174] sm:$0xe] }
  0xf9   :  { %2882 = vrot.lane.b32.xlu1 %v2675_v8, %s10107_s30  ;;  %v2096_v8 = vshll.u32 %v1916_v51, 16  ;;  %v2699_v28 = vsel %vm10215_vm5, %v2694_v12, %v2698_v13  ;;  %v1919_v13 = vld [vmem:[#allocation2 + $0x38] sm:$0x1] }
  0xfa   :  { %3462 = vrot.lane.b32.xlu2 %v3251_v43, %s10108_s13  ;;  %v1004_v10 = vrot.slane %v1002_v62, 7  ;;  %v2093_v43 = vor.u32 %v2092_v56, %v10522_v1  ;;  %v793_v1 = vpack.c.bf16 %v729_v19, %v729_v19  ;;  %v10605_v56 = vld [vmem:[#allocation2 + $0x34] sm:$0xf]  ;;  %v2114_v62 = vshrl.u32 %v1918_v49, 16 }
  0xfb   :  { %2784 = vrot.lane.b32.xlu0 %v2089_v11, %s10107_s30  ;;  %v792_v11 = vpack.c.bf16 %v728_v53, %v728_v53  ;;  %v2098_v22 = vrot.slane %v2096_v8, 5  ;;  %v3254_v39 = vrot.slane %v10605_v56, 5  ;;  %v10012_v8 = vld [vmem:[%s14425_s0 + $0x58] sm:$0xff]  ;;  %v2120_v14 = vshll.u32 %v1919_v13, 16 }
  0xfc   :  { %v1007_v60 = vor.u32 %v1005_v63, %v1004_v10  ;;  %v1300_v18 = vsel %vm10284_vm11, %v1004_v10, 0  ;;  %v2094_v35 = vrot.slane %v2093_v43, 4  ;;  %v936_v40 = vunpack.c.l.b16 %v793_v1 }
  0xfd   :  { %v1406_v23 = vunpack.c.l.b16 %v1300_v18  ;;  %v935_v26 = vunpack.c.l.b16 %v792_v11  ;;  %v4242_v63 = vrot.slane %v4241_v36, 4  ;;  %v548_v10 = vmul.f32 %v10531_v9, %v399_v7  ;;  %v4099_v18 = vld [vmem:[#allocation2 + $0x30] sm:$0xf] }
  0xfe   :  { %v1268_v24 = vsel %vm10284_vm11, 0, %v1007_v60  ;;  %v2099_v51 = vsel %vm10215_vm5, %v2094_v35, %v2098_v22  ;;  %v2116_v43 = vrot.slane %v2114_v62, 4 }
  0xff   :  { %v1404_v29 = vunpack.c.l.b16 %v1268_v24  ;;  %v1405_v33 = vunpack.c.h.b16 %v1268_v24  ;;  %v1502_v34 = vpack.c.b16 %v1406_v23, %v1406_v23  ;;  %v4247_v60 = vsel %vm10215_vm5, %v4242_v63, %v10552_v25  ;;  %v1836_v25 = vld [vmem:[#allocation2 + $0x178] sm:$0xf] }
 0x100   :  { %v2101_v24 = vshrl.u32 %v1917_v16, 16  ;;  %v616_v1 = vadd.f32 %v10545_v15, %v548_v10  ;;  %1900 = vst.msk [vmem:[#allocation3 + $0xec] sm:$0xf] %vm798_vm1, %v1836_v25 }
 0x101   :  { %3843 = vrot.lane.b32.xlu1 %v3710_v42, %s10109_s23  ;;  %v1500_v44 = vpack.c.b16 %v1404_v29, %v1404_v29  ;;  %v1501_v30 = vpack.c.b16 %v1405_v33, %v1405_v33  ;;  %1695 = vst.msk [vmem:[#allocation2 + $0x44] sm:$0x1] %vm801_vm2, %v1502_v34  ;;  %v4259_v29 = vshrl.u32 %v4099_v18, 16  ;;  %v4262_v33 = vshll.u32 %v4099_v18, 16  ;;  %v526_v18 = vpop.f32.mrf.mxu3 }
 0x102   :  { %3941 = vrot.lane.b32.xlu2 %v3759_v47, %s10109_s23  ;;  %v970_v47 = vpack.c.b16 %v936_v40, %v935_v26  ;;  %v2104_v26 = vshll.u32 %v1917_v16, 16  ;;  %v3424_v34 = vrot.slane %v3422_v48, 4 }
 0x103   :  { %3560 = vrot.lane.b32.xlu0 %v3423_v54, %s10108_s13  ;;  %1693 = vst.msk [vmem:[#allocation2 + $0x3c] sm:$0xf] %vm798_vm1, %v1500_v44  ;;  %v3712_v54 = vld [vmem:[#allocation2 + $0x34] sm:$0xf]  ;;  %v2122_v44 = vrot.slane %v2120_v14, 5  ;;  %v4261_v27 = vrot.slane %v4259_v29, 4 }
 0x104   :  { %v3834_v5 = vpop.permute.xlu2 %3833  ;;  %1694 = vst.msk [vmem:[#allocation2 + $0x40] sm:$0xf] %vm798_vm1, %v1501_v30  ;;  %v1177_v52 = vshrl.u32 %v970_v47, 16  ;;  %v1180_v53 = vshll.u32 %v970_v47, 16  ;;  %v2103_v30 = vrot.slane %v2101_v24, 4  ;;  %v2106_v46 = vrot.slane %v2104_v26, 5 }
 0x105   :  { %4026 = vst.msk [vmem:[#allocation3] sm:$0xf] %vm4025_vm14, %v3834_v5  ;;  %v9709_v5 = vrot.slane %v3041_v2, 9  ;;  %v680_v47 = vmax.f32 %v616_v1, 0.0  ;;  %v4264_v48 = vrot.slane %v4262_v33, 5  ;;  %v666_v2 = vadd.f32 %v10545_v15, %v598_v50 }
 0x106   :  { %v1179_v57 = vrot.slane %v1177_v52, 7  ;;  %v3762_v52 = vld [vmem:[#allocation2 + $0x178] sm:$0xf]  ;;  %v3118_v29 = vld [vmem:[#allocation2 + $0x17c] sm:$0x1] }
 0x107   :  { %v3255_v19 = vsel %vm10227_vm8, %v9709_v5, %v3254_v39  ;;  %v3256_v5 = vrot.slane %v3254_v39, 4  ;;  %v3117_v39 = vld [vmem:[#allocation2 + $0x178] sm:$0xf] }
 0x108   :  { %v1182_v0 = vor.u32 %v1180_v53, %v1179_v57  ;;  %v1325_v61 = vsel %vm10284_vm11, %v1179_v57, 0  ;;  %9684 = vmatmul.msk.bf16.gmra.mxu0 %vm268_vm0, %v10012_v8  ;;  %v2107_v57 = vor.u32 %v2106_v46, %v2103_v30  ;;  %v3429_v33 = vrot.slane %v3117_v39, 5 }
 0x109   :  { %3460 = vrot.lane.b32.xlu1 %v3248_v58, %s10108_s13  ;;  %v2110_v58 = vshll.u32 %v1918_v49, 16  ;;  %v1481_v6 = vunpack.c.l.b16 %v1325_v61  ;;  %v4265_v61 = vor.u32 %v4264_v48, %v4261_v27  ;;  %v3432_v48 = vrot.slane %v3118_v29, 5 }
 0x10a   :  { %4964 = vrot.lane.b32.xlu2 %v4257_v21, %s10110_s24  ;;  %v1293_v4 = vsel %vm10284_vm11, 0, %v1182_v0  ;;  %v3115_v21 = vld [vmem:[#allocation2 + $0x170] sm:$0x1] }
 0x10b   :  { %2886 = vrot.lane.b32.xlu0 %v2699_v28, %s10107_s30  ;;  %v10620_v31 = vrot.slane %v2110_v58, 5  ;;  %v1479_v11 = vunpack.c.l.b16 %v1293_v4  ;;  %v1480_v45 = vunpack.c.h.b16 %v1293_v4  ;;  %v1577_v12 = vpack.c.b16 %v1481_v6, %v1481_v6 }
 0x10c   :  { %v10593_v42 = vpop.permute.xlu2 %3935  ;;  %v3425_v35 = vrot.slane %v3115_v21, 5  ;;  %v744_v58 = vpack.c.bf16 %v680_v47, %v680_v47  ;;  %v4266_v56 = vrot.slane %v4265_v61, 4  ;;  %v4101_v21 = vld [vmem:[#allocation2 + $0x38] sm:$0x1] }
 0x10d   :  { %v1575_v22 = vpack.c.b16 %v1479_v11, %v1479_v11  ;;  %v1576_v23 = vpack.c.b16 %v1480_v45, %v1480_v45  ;;  %1770 = vst.msk [vmem:[#allocation2 + $0x188] sm:$0x1] %vm801_vm2, %v1577_v12  ;;  %v2117_v28 = vor.u32 %v2116_v43, %v10620_v31  ;;  %v730_v11 = vmax.f32 %v666_v2, 0.0  ;;  %v1993_v45 = vld [vmem:[#allocation2 + $0x178] sm:$0xf]  ;;  %v10013_v12 = vld [vmem:[%s14425_s0 + $0x60] sm:$0xff] }
 0x10e   :  { %v3426_v36 = vsel %vm10227_vm8, %v3424_v34, %v3425_v35  ;;  %v2108_v43 = vrot.slane %v2107_v57, 4  ;;  %v887_v16 = vunpack.c.l.b16 %v744_v58 }
 0x10f   :  { %1768 = vst.msk [vmem:[#allocation2 + $0x180] sm:$0xf] %vm798_vm1, %v1575_v22  ;;  %v2118_v49 = vrot.slane %v2117_v28, 4  ;;  %v2710_v22 = vshll.u32 %v1993_v45, 16  ;;  %v794_v1 = vpack.c.bf16 %v730_v11, %v730_v11 }
 0x110   :  { %1769 = vst.msk [vmem:[#allocation2 + $0x184] sm:$0xf] %vm798_vm1, %v1576_v23  ;;  %v2714_v23 = vshrl.u32 %v1993_v45, 16  ;;  %v2113_v28 = vsel %vm10215_vm5, %v2108_v43, %v10620_v31 }
 0x111   :  { %2786 = vrot.lane.b32.xlu1 %v2099_v51, %s10107_s30  ;;  %v401_v51 = vpop.f32.mrf.mxu0  ;;  %v2123_v0 = vsel %vm10215_vm5, %v2118_v49, %v2122_v44  ;;  %v1994_v44 = vld [vmem:[#allocation2 + $0x17c] sm:$0x1]  ;;  %v10682_v46 = vrot.slane %v2710_v22, 5  ;;  %v1992_v49 = vld [vmem:[#allocation2 + $0x174] sm:$0xf] }
 0x112   :  { %2884 = vrot.lane.b32.xlu2 %v2689_v55, %s10107_s30  ;;  %v549_v53 = vmul.f32 %v10531_v9, %v401_v51  ;;  %v4100_v55 = vld [vmem:[#allocation2 + $0x34] sm:$0xf]  ;;  %v2716_v31 = vrot.slane %v2714_v23, 4  ;;  %v937_v51 = vunpack.c.l.b16 %v794_v1  ;;  %v2720_v2 = vshll.u32 %v1994_v44, 16 }
 0x113   :  { %3847 = vrot.lane.b32.xlu0 %v3712_v54, %s10109_s23  ;;  %v3043_v54 = vld [vmem:[#allocation2 + $0x38] sm:$0x1]  ;;  %v4268_v4 = vshll.u32 %v4100_v55, 16  ;;  %v4272_v10 = vshrl.u32 %v4100_v55, 16  ;;  %v10684_v55 = vld [vmem:[#allocation2 + $0x40] sm:$0xf] }
 0x114   :  { %v10612_v3 = vpop.permute.xlu2 %3552  ;;  %v617_v62 = vadd.f32 %v10545_v15, %v549_v53  ;;  %v3257_v6 = vrot.slane %v3043_v54, 5  ;;  %v3431_v53 = vrot.slane %v3429_v33, 4  ;;  %v9734_v54 = vrot.slane %v3116_v38, 9 }
 0x115   :  { %v4270_v24 = vrot.slane %v4268_v4, 5  ;;  %v4274_v26 = vrot.slane %v4272_v10, 4  ;;  %v2701_v58 = vshrl.u32 %v1992_v49, 16  ;;  %v2717_v61 = vor.u32 %v2716_v31, %v10682_v46 }
 0x116   :  { %v681_v7 = vmax.f32 %v617_v62, 0.0  ;;  %v3261_v11 = vrot.slane %v10684_v55, 5  ;;  %v3430_v43 = vsel %vm10227_vm8, %v9734_v54, %v3429_v33 }
 0x117   :  { %v4275_v50 = vor.u32 %v4274_v26, %v4270_v24  ;;  %v2718_v22 = vrot.slane %v2717_v61, 4  ;;  %v2703_v23 = vrot.slane %v2701_v58, 4 }
 0x118   :  { %9685 = vmatmul.msk.bf16.gmra.mxu0 %vm268_vm0, %v10013_v12  ;;  %v3433_v12 = vsel %vm10227_vm8, %v3431_v53, %v3432_v48  ;;  %v3263_v1 = vrot.slane %v3261_v11, 4 }
 0x119   :  { %4962 = vrot.lane.b32.xlu1 %v4247_v60, %s10110_s24  ;;  %v745_v60 = vpack.c.bf16 %v681_v7, %v681_v7  ;;  %v2704_v7 = vshll.u32 %v1992_v49, 16  ;;  %v4276_v4 = vrot.slane %v4275_v50, 4  ;;  %v4104_v50 = vld [vmem:[#allocation2 + $0x44] sm:$0x1] }
 0x11a   :  { %3845 = vrot.lane.b32.xlu2 %v3711_v17, %s10109_s23  ;;  %v599_v17 = vmul.f32 %v10531_v9, %v526_v18 }
 0x11b   :  { %3464 = vrot.lane.b32.xlu0 %v3255_v19, %s10108_s13  ;;  %v3258_v19 = vsel %vm10227_vm8, %v3256_v5, %v3257_v6  ;;  %v888_v14 = vunpack.c.l.b16 %v745_v60  ;;  %v3046_v60 = vld [vmem:[#allocation2 + $0x44] sm:$0x1] }
 0x11c   :  { %v2879_v37 = vpop.permute.xlu2 %2878  ;;  %v667_v25 = vadd.f32 %v10545_v15, %v599_v17 }
 0x11d   :  { %v3836_v40 = vpop.permute.xlu0 %3835  ;;  %3018 = vst.msk [vmem:[#allocation3 + $0xd4] sm:$0xf] %vm2964_vm12, %v2879_v37  ;;  %v946_v34 = vpack.c.b16 %v888_v14, %v887_v16  ;;  %v4271_v37 = vsel %vm10215_vm5, %v4266_v56, %v4270_v24  ;;  %v2722_v16 = vrot.slane %v2720_v2, 5  ;;  %v2706_v14 = vrot.slane %v2704_v7, 5 }
 0x11e   :  { %4027 = vst.msk [vmem:[#allocation3 + $0x4] sm:$0xf] %vm4025_vm14, %v3836_v40  ;;  %v4278_v40 = vshll.u32 %v4101_v21, 16  ;;  %v731_v30 = vmax.f32 %v667_v25, 0.0  ;;  %v3264_v25 = vrot.slane %v3046_v60, 5 }
 0x11f   :  { %v1009_v47 = vshrl.u32 %v946_v34, 16  ;;  %v1012_v59 = vshll.u32 %v946_v34, 16  ;;  %v3044_v60 = vld [vmem:[#allocation2 + $0x3c] sm:$0xe] }
 0x120   :  { %v4280_v10 = vrot.slane %v4278_v40, 5  ;;  %v4103_v40 = vld [vmem:[#allocation2 + $0x40] sm:$0xf] }
 0x121   :  { %3562 = vrot.lane.b32.xlu1 %v3426_v36, %s10108_s13  ;;  %v795_v36 = vpack.c.bf16 %v731_v30, %v731_v30  ;;  %v1011_v57 = vrot.slane %v1009_v47, 7  ;;  %v2707_v30 = vor.u32 %v2706_v14, %v2703_v23  ;;  %v2723_v47 = vsel %vm10215_vm5, %v2718_v22, %v2722_v16  ;;  %v1837_v23 = vld [vmem:[#allocation2 + $0x180] sm:$0xf] }
 0x122   :  { %3947 = vrot.lane.b32.xlu2 %v3762_v52, %s10109_s23  ;;  %v4281_v44 = vsel %vm10215_vm5, %v4276_v4, %v4280_v10  ;;  %v1921_v10 = vld [vmem:[#allocation2 + $0x40] sm:$0xf]  ;;  %v9710_v14 = vrot.slane %v3044_v60, 9  ;;  %1901 = vst.msk [vmem:[#allocation3 + $0xf0] sm:$0xf] %vm798_vm1, %v1837_v23 }
 0x123   :  { %v10652_v63 = vpop.permute.xlu1 %3454  ;;  %2790 = vrot.lane.b32.xlu0 %v2123_v0, %s10107_s30  ;;  %v938_v62 = vunpack.c.l.b16 %v795_v36  ;;  %v3761_v0 = vld [vmem:[#allocation2 + $0x174] sm:$0xf]  ;;  %v1014_v5 = vor.u32 %v1012_v59, %v1011_v57  ;;  %v1301_v6 = vsel %vm10284_vm11, %v1011_v57, 0  ;;  %v3265_v59 = vsel %vm10227_vm8, %v3263_v1, %v3264_v25  ;;  %v1922_v25 = vld [vmem:[#allocation2 + $0x44] sm:$0x1] }
 0x124   :  { %v10660_v8 = vpop.permute.xlu2 %3839  ;;  %v4296_v36 = vshrl.u32 %v4103_v40, 16  ;;  %v2708_v54 = vrot.slane %v2707_v30, 4 }
 0x125   :  { %v10665_v13 = vpop.permute.xlu0 %3452  ;;  %v971_v45 = vpack.c.b16 %v938_v62, %v937_v51  ;;  %v1269_v18 = vsel %vm10284_vm11, 0, %v1014_v5  ;;  %v4292_v51 = vshll.u32 %v4103_v40, 16  ;;  %v4302_v62 = vshll.u32 %v4104_v50, 16 }
 0x126   :  { %v1407_v39 = vunpack.c.l.b16 %v1269_v18  ;;  %v1408_v17 = vunpack.c.h.b16 %v1269_v18  ;;  %v3262_v50 = vsel %vm10227_vm8, %v9710_v14, %v3261_v11 }
 0x127   :  { %v1184_v21 = vshrl.u32 %v971_v45, 16  ;;  %v1187_v24 = vshll.u32 %v971_v45, 16  ;;  %v10733_v5 = vrot.slane %v4292_v51, 5  ;;  %v3714_v45 = vld [vmem:[#allocation2 + $0x40] sm:$0xf]  ;;  %v4304_v16 = vrot.slane %v4302_v62, 5 }
 0x128   :  { %v1504_v34 = vpack.c.b16 %v1408_v17, %v1408_v17  ;;  %v1920_v17 = vld [vmem:[#allocation2 + $0x3c] sm:$0xf] }
 0x129   :  { %3466 = vrot.lane.b32.xlu1 %v3258_v19, %s10108_s13  ;;  %v1409_v19 = vunpack.c.l.b16 %v1301_v6  ;;  %v1186_v29 = vrot.slane %v1184_v21, 7  ;;  %v4298_v6 = vrot.slane %v4296_v36, 4 }
 0x12a   :  { %2788 = vrot.lane.b32.xlu2 %v2113_v28, %s10107_s30  ;;  %v1503_v28 = vpack.c.b16 %v1407_v39, %v1407_v39  ;;  %1697 = vst.msk [vmem:[#allocation2 + $0x4c] sm:$0xf] %vm798_vm1, %v1504_v34  ;;  %v2138_v39 = vshrl.u32 %v1921_v10, 16 }
 0x12b   :  { %v10676_v35 = vpop.permute.xlu1 %3933  ;;  %4966 = vrot.lane.b32.xlu0 %v4271_v37, %s10110_s24  ;;  %v1505_v37 = vpack.c.b16 %v1409_v19, %v1409_v19  ;;  %v1189_v38 = vor.u32 %v1187_v24, %v1186_v29  ;;  %v1326_v31 = vsel %vm10284_vm11, %v1186_v29, 0  ;;  %v4299_v18 = vor.u32 %v4298_v6, %v10733_v5  ;;  %v1788_v19 = vld [vmem:[#allocation2 + $0x40] sm:$0xf] }
 0x12c   :  { %v3457_v27 = vpop.permute.xlu2 %3456  ;;  %1696 = vst.msk [vmem:[#allocation2 + $0x48] sm:$0xf] %vm798_vm1, %v1503_v28  ;;  %v1484_v53 = vunpack.c.l.b16 %v1326_v31  ;;  %v4102_v28 = vld [vmem:[#allocation2 + $0x3c] sm:$0xf]  ;;  %v2140_v40 = vrot.slane %v2138_v39, 4 }
 0x12d   :  { %v4955_v52 = vpop.permute.xlu0 %4954  ;;  %v1294_v49 = vsel %vm10284_vm11, 0, %v1189_v38  ;;  %1698 = vst.msk [vmem:[#allocation2 + $0x50] sm:$0x1] %vm801_vm2, %v1505_v37  ;;  %v4300_v37 = vrot.slane %v4299_v18, 4  ;;  %v4283_v51 = vshrl.u32 %v4102_v28, 16  ;;  %v4286_v36 = vshll.u32 %v4102_v28, 16 }
 0x12e   :  { %5147 = vst.msk [vmem:[#allocation3] sm:$0xf] %vm5146_vm15, %v4955_v52  ;;  %v1483_v48 = vunpack.c.h.b16 %v1294_v49  ;;  %v1580_v4 = vpack.c.b16 %v1484_v53, %v1484_v53  ;;  %v10769_v53 = vld [vmem:[#allocation2 + $0x184] sm:$0xf] }
 0x12f   :  { %1852 = vst.msk [vmem:[#allocation3 + $0x2c] sm:$0xf] %vm798_vm1, %v1788_v19  ;;  %v4305_v55 = vsel %vm10215_vm5, %v4300_v37, %v4304_v16  ;;  %v3764_v39 = vld [vmem:[#allocation2 + $0x184] sm:$0xf] }
 0x130   :  { %v1579_v61 = vpack.c.b16 %v1483_v48, %v1483_v48  ;;  %1773 = vst.msk [vmem:[#allocation2 + $0x194] sm:$0x1] %vm801_vm2, %v1580_v4 }
 0x131   :  { %3945 = vrot.lane.b32.xlu1 %v3761_v0, %s10109_s23 }
 0x132   :  { %3564 = vrot.lane.b32.xlu2 %v3430_v43, %s10108_s13  ;;  %1772 = vst.msk [vmem:[#allocation2 + $0x190] sm:$0xf] %vm798_vm1, %v1579_v61 }
 0x133   :  { %v2777_v56 = vpop.permute.xlu1 %2776  ;;  %3566 = vrot.lane.b32.xlu0 %v3433_v12, %s10108_s13  ;;  %v3763_v12 = vld [vmem:[#allocation2 + $0x180] sm:$0xf] }
 0x134   :  { %2967 = vst.msk [vmem:[#allocation3 + $0x8] sm:$0xf] %vm2964_vm12, %v2777_v56  ;;  %v2781_v26 = vpop.permute.xlu2 %2780  ;;  %v2134_v56 = vshll.u32 %v1921_v10, 16  ;;  %v2734_v10 = vshll.u32 %v10769_v53, 16 }
 0x135   :  { %3643 = vst.msk [vmem:[#allocation3 + $0x8] sm:$0xf] %vm3640_vm13, %v10665_v13  ;;  %v3555_v33 = vpop.permute.xlu0 %3554  ;;  %v10014_v13 = vld [vmem:[%s14425_s0 + $0x68] sm:$0xff]  ;;  %v404_v2 = vpop.f32.mrf.mxu0 }
 0x136   :  { %2969 = vst.msk [vmem:[#allocation3 + $0x10] sm:$0xf] %vm2964_vm12, %v2781_v26  ;;  %9686 = vmatmul.msk.bf16.gmra.mxu0 %vm268_vm0, %v10014_v13  ;;  %v550_v7 = vmul.f32 %v10531_v9, %v404_v2  ;;  %v1787_v26 = vld [vmem:[#allocation2 + $0x3c] sm:$0xf]  ;;  %v10753_v38 = vrot.slane %v2134_v56, 5  ;;  %v2144_v2 = vshll.u32 %v1922_v25, 16 }
 0x137   :  { %3694 = vst.msk [vmem:[#allocation3 + $0xd4] sm:$0xf] %vm3640_vm13, %v3555_v33  ;;  %v1838_v33 = vld [vmem:[#allocation2 + $0x184] sm:$0xf] }
 0x138   :  { %3645 = vst.msk [vmem:[#allocation3 + $0x10] sm:$0xf] %vm3640_vm13, %v3457_v27  ;;  %v1482_v27 = vunpack.c.l.b16 %v1294_v49  ;;  %v618_v43 = vadd.f32 %v10545_v15, %v550_v7  ;;  %v3713_v49 = vld [vmem:[#allocation2 + $0x3c] sm:$0xf]  ;;  %v2146_v16 = vrot.slane %v2144_v2, 5 }
 0x139   :  { %4968 = vrot.lane.b32.xlu1 %v4281_v44, %s10110_s24  ;;  %v10015_v44 = vld [vmem:[%s14425_s0 + $0x70] sm:$0xff]  ;;  %1851 = vst.msk [vmem:[#allocation3 + $0x28] sm:$0xf] %vm798_vm1, %v1787_v26  ;;  %v3715_v2 = vld [vmem:[#allocation2 + $0x48] sm:$0xf] }
 0x13a   :  { %2890 = vrot.lane.b32.xlu2 %v2723_v47, %s10107_s30  ;;  %v1578_v58 = vpack.c.b16 %v1482_v27, %v1482_v27  ;;  %v682_v24 = vmax.f32 %v618_v43, 0.0  ;;  %v2125_v47 = vshrl.u32 %v1920_v17, 16  ;;  %1902 = vst.msk [vmem:[#allocation3 + $0xf4] sm:$0xf] %vm798_vm1, %v1838_v33 }
 0x13b   :  { %v2779_v52 = vpop.permute.xlu1 %2778  ;;  %3470 = vrot.lane.b32.xlu0 %v3265_v59, %s10108_s13  ;;  %v2128_v59 = vshll.u32 %v1920_v17, 16  ;;  %v10787_v17 = vrot.slane %v2734_v10, 5  ;;  %v3121_v10 = vld [vmem:[#allocation2 + $0x188] sm:$0x1] }
 0x13c   :  { %2968 = vst.msk [vmem:[#allocation3 + $0xc] sm:$0xf] %vm2964_vm12, %v2779_v52  ;;  %v2783_v57 = vpop.permute.xlu2 %2782  ;;  %v746_v27 = vpack.c.bf16 %v682_v24, %v682_v24 }
 0x13d   :  { %3644 = vst.msk [vmem:[#allocation3 + $0xc] sm:$0xf] %vm3640_vm13, %v10652_v63  ;;  %v3459_v0 = vpop.permute.xlu0 %3458  ;;  %v2713_v63 = vsel %vm10215_vm5, %v2708_v54, %v10682_v46  ;;  %v406_v29 = vpop.f32.mrf.mxu0  ;;  %v2141_v54 = vor.u32 %v2140_v40, %v10753_v38  ;;  %v2130_v61 = vrot.slane %v2128_v59, 5  ;;  %v1923_v40 = vld [vmem:[#allocation2 + $0x48] sm:$0xf] }
 0x13e   :  { %4029 = vst.msk [vmem:[#allocation3 + $0xc] sm:$0xf] %vm4025_vm14, %v10660_v8  ;;  %v1995_v8 = vld [vmem:[#allocation2 + $0x180] sm:$0xf]  ;;  %v551_v13 = vmul.f32 %v10531_v9, %v406_v29  ;;  %v889_v6 = vunpack.c.l.b16 %v746_v27  ;;  %v3120_v27 = vld [vmem:[#allocation2 + $0x184] sm:$0xf] }
 0x13f   :  { %2970 = vst.msk [vmem:[#allocation3 + $0x14] sm:$0xf] %vm2964_vm12, %v2783_v57  ;;  %v2725_v21 = vshrl.u32 %v1995_v8, 16  ;;  %v2728_v22 = vshll.u32 %v1995_v8, 16  ;;  %v2142_v43 = vrot.slane %v2141_v54, 4 }
 0x140   :  { %3646 = vst.msk [vmem:[#allocation3 + $0x14] sm:$0xf] %vm3640_vm13, %v3459_v0  ;;  %v619_v48 = vadd.f32 %v10545_v15, %v551_v13  ;;  %v2127_v0 = vrot.slane %v2125_v47, 4 }
 0x141   :  { %2888 = vrot.lane.b32.xlu1 %v2713_v63, %s10107_s30  ;;  %1771 = vst.msk [vmem:[#allocation2 + $0x18c] sm:$0xf] %vm798_vm1, %v1578_v58  ;;  %v2727_v30 = vrot.slane %v2725_v21, 4  ;;  %v2730_v31 = vrot.slane %v2728_v22, 5  ;;  %v529_v52 = vpop.f32.mrf.mxu3  ;;  %v4285_v63 = vrot.slane %v4283_v51, 4  ;;  %v2147_v22 = vsel %vm10215_vm5, %v2142_v43, %v2146_v16 }
 0x142   :  { %3851 = vrot.lane.b32.xlu2 %v3714_v45, %s10109_s23  ;;  %v683_v57 = vmax.f32 %v619_v48, 0.0  ;;  %v600_v58 = vmul.f32 %v10531_v9, %v529_v52  ;;  %v4288_v45 = vrot.slane %v4286_v36, 5  ;;  %v2131_v56 = vor.u32 %v2130_v61, %v2127_v0  ;;  %v3119_v51 = vld [vmem:[#allocation2 + $0x180] sm:$0xe] }
 0x143   :  { %v4957_v46 = vpop.permute.xlu1 %4956  ;;  %3949 = vrot.lane.b32.xlu0 %v3763_v12, %s10109_s23  ;;  %v2731_v11 = vor.u32 %v2730_v31, %v2727_v30  ;;  %v2149_v52 = vshrl.u32 %v1923_v40, 16 }
 0x144   :  { %5148 = vst.msk [vmem:[#allocation3 + $0x4] sm:$0xf] %vm5146_vm15, %v4957_v46  ;;  %v10750_v1 = vpop.permute.xlu2 %4958  ;;  %v747_v7 = vpack.c.bf16 %v683_v57, %v683_v57  ;;  %v668_v12 = vadd.f32 %v10545_v15, %v600_v58  ;;  %v4289_v19 = vor.u32 %v4288_v45, %v4285_v63  ;;  %v2132_v25 = vrot.slane %v2131_v56, 4 }
 0x145   :  { %v3938_v34 = vpop.permute.xlu0 %3937  ;;  %v2732_v18 = vrot.slane %v2731_v11, 4  ;;  %v409_v13 = vpop.f32.mrf.mxu0  ;;  %v3436_v11 = vrot.slane %v3120_v27, 5 }
 0x146   :  { %9687 = vmatmul.msk.bf16.gmra.mxu0 %vm268_vm0, %v10015_v44  ;;  %v890_v60 = vunpack.c.l.b16 %v747_v7  ;;  %v732_v46 = vmax.f32 %v668_v12, 0.0  ;;  %v552_v59 = vmul.f32 %v10531_v9, %v409_v13  ;;  %v9735_v7 = vrot.slane %v3119_v51, 9 }
 0x147   :  { %v2737_v26 = vsel %vm10215_vm5, %v2732_v18, %v10787_v17 }
 0x148   :  { %v796_v37 = vpack.c.bf16 %v732_v46, %v732_v46  ;;  %v3439_v46 = vrot.slane %v3121_v10, 5  ;;  %v1839_v27 = vld [vmem:[#allocation2 + $0x18c] sm:$0xf] }
 0x149   :  { %3849 = vrot.lane.b32.xlu1 %v3713_v49, %s10109_s23  ;;  %v531_v21 = vpop.f32.mrf.mxu3  ;;  %v2738_v49 = vshrl.u32 %v10769_v53, 16  ;;  %v620_v53 = vadd.f32 %v10545_v15, %v552_v59  ;;  %1903 = vst.msk [vmem:[#allocation3 + $0xf8] sm:$0xf] %vm798_vm1, %v1839_v27 }
 0x14a   :  { %3468 = vrot.lane.b32.xlu2 %v3262_v50, %s10108_s13  ;;  %v601_v29 = vmul.f32 %v10531_v9, %v531_v21  ;;  %v10016_v50 = vld [vmem:[%s14425_s0 + $0x78] sm:$0xff]  ;;  %v939_v0 = vunpack.c.l.b16 %v796_v37 }
 0x14b   :  { %v2877_v62 = vpop.permute.xlu1 %2876  ;;  %4972 = vrot.lane.b32.xlu0 %v4305_v55, %s10110_s24  ;;  %v2740_v12 = vrot.slane %v2738_v49, 4 }
 0x14c   :  { %3017 = vst.msk [vmem:[#allocation3 + $0xd0] sm:$0xf] %vm2964_vm12, %v2877_v62  ;;  %v10780_v4 = vpop.permute.xlu2 %3558  ;;  %v669_v47 = vadd.f32 %v10545_v15, %v601_v29  ;;  %v2152_v62 = vshll.u32 %v1923_v40, 16 }
 0x14d   :  { %3693 = vst.msk [vmem:[#allocation3 + $0xd0] sm:$0xf] %vm3640_vm13, %v10612_v3  ;;  %v4961_v8 = vpop.permute.xlu0 %4960  ;;  %v947_v3 = vpack.c.b16 %v890_v60, %v889_v6  ;;  %v2151_v60 = vrot.slane %v2149_v52, 4  ;;  %v411_v56 = vpop.f32.mrf.mxu0  ;;  %v1840_v52 = vld [vmem:[#allocation2 + $0x190] sm:$0xf] }
 0x14e   :  { %4078 = vst.msk [vmem:[#allocation3 + $0xd0] sm:$0xf] %vm4025_vm14, %v3938_v34  ;;  %v4290_v34 = vrot.slane %v4289_v19, 4  ;;  %v733_v54 = vmax.f32 %v669_v47, 0.0  ;;  %v2154_v18 = vrot.slane %v2152_v62, 5  ;;  %v3438_v19 = vrot.slane %v3436_v11, 4 }
 0x14f   :  { %5150 = vst.msk [vmem:[#allocation3 + $0xc] sm:$0xf] %vm5146_vm15, %v4961_v8  ;;  %v1016_v23 = vshrl.u32 %v947_v3, 16  ;;  %v1019_v14 = vshll.u32 %v947_v3, 16  ;;  %v1997_v8 = vld [vmem:[#allocation2 + $0x188] sm:$0x1] }
 0x150   :  { %v4295_v55 = vsel %vm10215_vm5, %v4290_v34, %v10733_v5  ;;  %v797_v61 = vpack.c.bf16 %v733_v54, %v733_v54  ;;  %v684_v5 = vmax.f32 %v620_v53, 0.0  ;;  %v2155_v13 = vor.u32 %v2154_v18, %v2151_v60  ;;  %1904 = vst.msk [vmem:[#allocation3 + $0xfc] sm:$0xf] %vm798_vm1, %v1840_v52  ;;  %v10877_v60 = vld [vmem:[%s14427_s3] ss:$0 sm:$0xff] }
 0x151   :  { %3951 = vrot.lane.b32.xlu1 %v3764_v39, %s10109_s23  ;;  %v1018_v28 = vrot.slane %v1016_v23, 7  ;;  %v1789_v39 = vld [vmem:[#allocation2 + $0x48] sm:$0xf]  ;;  %v1790_v23 = vld [vmem:[#allocation2 + $0x4c] sm:$0xf] }
 0x152   :  { %2794 = vrot.lane.b32.xlu2 %v2147_v22, %s10107_s30  ;;  %v940_v43 = vunpack.c.l.b16 %v797_v61  ;;  %v553_v22 = vmul.f32 %v10531_v9, %v411_v56  ;;  %v748_v37 = vpack.c.bf16 %v684_v5, %v684_v5  ;;  %1853 = vst.msk [vmem:[#allocation3 + $0x30] sm:$0xf] %vm798_vm1, %v1789_v39  ;;  %v3766_v9 = vld [vmem:[#allocation2 + $0x190] sm:$0xf]  ;;  %v10860_v61 = vld [vmem:[%s14426_s2] ss:$0 sm:$0xff] }
 0x153   :  { %v3838_v24 = vpop.permute.xlu1 %3837  ;;  %2892 = vrot.lane.b32.xlu0 %v2737_v26, %s10107_s30  ;;  %v1021_v30 = vor.u32 %v1019_v14, %v1018_v28  ;;  %v1302_v31 = vsel %vm10284_vm11, %v1018_v28, 0  ;;  %v3437_v14 = vsel %vm10227_vm8, %v9735_v7, %v3436_v11  ;;  %v2744_v26 = vshll.u32 %v1997_v8, 16  ;;  %v10835_v28 = vld [vmem:[#allocation2 + $0x4c] sm:$0xf]  ;;  %1854 = vst.msk [vmem:[#allocation3 + $0x34] sm:$0xf] %vm798_vm1, %v1790_v23 }
 0x154   :  { %4028 = vst.msk [vmem:[#allocation3 + $0x8] sm:$0xf] %vm4025_vm14, %v3838_v24  ;;  %v10800_v33 = vpop.permute.xlu2 %3462  ;;  %v1412_v48 = vunpack.c.l.b16 %v1302_v31  ;;  %v972_v21 = vpack.c.b16 %v940_v43, %v939_v0  ;;  %v2741_v24 = vor.u32 %v2740_v12, %v10787_v17  ;;  %v621_v40 = vadd.f32 %v10545_v15, %v553_v22  ;;  %v10872_v8 = vld [vmem:[#allocation2 + $0x18c] sm:$0xe] }
 0x155   :  { %5149 = vst.msk [vmem:[#allocation3 + $0x8] sm:$0xf] %vm5146_vm15, %v10750_v1  ;;  %v2881_v44 = vpop.permute.xlu0 %2880  ;;  %v2137_v1 = vsel %vm10215_vm5, %v2132_v25, %v10753_v38  ;;  %v1270_v36 = vsel %vm10284_vm11, 0, %v1021_v30  ;;  %v10833_v25 = vld [vmem:[#allocation2 + $0x4c] sm:$0xf]  ;;  %v3440_v17 = vsel %vm10227_vm8, %v3438_v19, %v3439_v46  ;;  %v2746_v49 = vrot.slane %v2744_v26, 5 }
 0x156   :  { %3019 = vst.msk [vmem:[#allocation3 + $0xd8] sm:$0xf] %vm2964_vm12, %v2881_v44  ;;  %v1410_v57 = vunpack.c.l.b16 %v1270_v36  ;;  %v1411_v58 = vunpack.c.h.b16 %v1270_v36  ;;  %v1508_v38 = vpack.c.b16 %v1412_v48, %v1412_v48  ;;  %9688 = vmatmul.msk.bf16.gmra.mxu0 %vm268_vm0, %v10016_v50  ;;  %v1191_v29 = vshrl.u32 %v972_v21, 16  ;;  %v3049_v44 = vld [vmem:[#allocation2 + $0x50] sm:$0x1] }
 0x157   :  { %v1194_v34 = vshll.u32 %v972_v21, 16  ;;  %v3268_v30 = vrot.slane %v10833_v25, 5  ;;  %v685_v47 = vmax.f32 %v621_v40, 0.0  ;;  %v2742_v15 = vrot.slane %v2741_v24, 4  ;;  %v10885_v19 = vld [vmem:[#allocation2 + $0x190] sm:$0xf] }
 0x158   :  { %v1506_v63 = vpack.c.b16 %v1410_v57, %v1410_v57  ;;  %v1507_v45 = vpack.c.b16 %v1411_v58, %v1411_v58  ;;  %1701 = vst.msk [vmem:[#allocation2 + $0x5c] sm:$0x1] %vm801_vm2, %v1508_v38  ;;  %v1193_v31 = vrot.slane %v1191_v29, 7  ;;  %v891_v51 = vunpack.c.l.b16 %v748_v37  ;;  %v4106_v58 = vld [vmem:[#allocation2 + $0x4c] sm:$0xf]  ;;  %v414_v38 = vpop.f32.mrf.mxu0 }
 0x159   :  { %2792 = vrot.lane.b32.xlu1 %v2137_v1, %s10107_s30  ;;  %v2158_v1 = vshll.u32 %v10835_v28, 16  ;;  %v749_v36 = vpack.c.bf16 %v685_v47, %v685_v47  ;;  %v3271_v53 = vrot.slane %v3049_v44, 5  ;;  %v2747_v12 = vsel %vm10215_vm5, %v2742_v15, %v2746_v49  ;;  %v3047_v26 = vld [vmem:[#allocation2 + $0x48] sm:$0xe]  ;;  %v4107_v44 = vld [vmem:[#allocation2 + $0x50] sm:$0x1] }
 0x15a   :  { %4970 = vrot.lane.b32.xlu2 %v4295_v55, %s10110_s24  ;;  %1699 = vst.msk [vmem:[#allocation2 + $0x54] sm:$0xf] %vm798_vm1, %v1506_v63  ;;  %v1196_v48 = vor.u32 %v1194_v34, %v1193_v31  ;;  %v1327_v50 = vsel %vm10284_vm11, %v1193_v31, 0  ;;  %v3270_v55 = vrot.slane %v3268_v30, 4  ;;  %v4316_v5 = vshll.u32 %v4106_v58, 16 }
 0x15b   :  { %v3940_v6 = vpop.permute.xlu1 %3939  ;;  %3853 = vrot.lane.b32.xlu0 %v3715_v2, %s10109_s23  ;;  %1700 = vst.msk [vmem:[#allocation2 + $0x58] sm:$0xf] %vm798_vm1, %v1507_v45  ;;  %v2156_v2 = vrot.slane %v2155_v13, 4  ;;  %v1487_v57 = vunpack.c.l.b16 %v1327_v50  ;;  %v892_v0 = vunpack.c.l.b16 %v749_v36  ;;  %v10864_v7 = vrot.slane %v2158_v1, 5  ;;  %v10017_v45 = vld [vmem:[%s14425_s0 + $0x80] sm:$0xff] }
 0x15c   :  { %4079 = vst.msk [vmem:[#allocation3 + $0xd4] sm:$0xf] %vm4025_vm14, %v3940_v6  ;;  %v3942_v16 = vpop.permute.xlu2 %3941  ;;  %v1295_v11 = vsel %vm10284_vm11, 0, %v1196_v48  ;;  %v554_v6 = vmul.f32 %v10860_v61, %v414_v38  ;;  %v4320_v46 = vshrl.u32 %v4106_v58, 16  ;;  %v3272_v21 = vsel %vm10227_vm8, %v3270_v55, %v3271_v53  ;;  %v3716_v49 = vld [vmem:[#allocation2 + $0x4c] sm:$0xf] }
 0x15d   :  { %v3842_v3 = vpop.permute.xlu0 %3841  ;;  %v1485_v10 = vunpack.c.l.b16 %v1295_v11  ;;  %v1583_v63 = vpack.c.b16 %v1487_v57, %v1487_v57  ;;  %v948_v43 = vpack.c.b16 %v892_v0, %v891_v51  ;;  %v2161_v56 = vsel %vm10215_vm5, %v2156_v2, %v10864_v7  ;;  %v1998_v52 = vld [vmem:[#allocation2 + $0x18c] sm:$0xf]  ;;  %v2000_v57 = vld [vmem:[#allocation2 + $0x194] sm:$0x1] }
 0x15e   :  { %4030 = vst.msk [vmem:[#allocation3 + $0x10] sm:$0xf] %vm4025_vm14, %v3842_v3  ;;  %v622_v18 = vadd.f32 %v10877_v60, %v554_v6  ;;  %v1486_v39 = vunpack.c.h.b16 %v1295_v11  ;;  %v2162_v22 = vshrl.u32 %v10835_v28, 16  ;;  %v9736_v37 = vrot.slane %v10872_v8, 9  ;;  %v3765_v6 = vld [vmem:[#allocation2 + $0x18c] sm:$0xf] }
 0x15f   :  { %v1581_v3 = vpack.c.b16 %v1485_v10, %v1485_v10  ;;  %1776 = vst.msk [vmem:[#allocation2 + $0x1a0] sm:$0x1] %vm801_vm2, %v1583_v63  ;;  %v1023_v23 = vshrl.u32 %v948_v43, 16  ;;  %v3443_v40 = vrot.slane %v10885_v19, 5  ;;  %v10899_v31 = vrot.slane %v4316_v5, 5 }
 0x160   :  { %v686_v28 = vmax.f32 %v622_v18, 0.0  ;;  %v4322_v47 = vrot.slane %v4320_v46, 4  ;;  %v9711_v1 = vrot.slane %v3047_v26, 9  ;;  %v4326_v2 = vshll.u32 %v4107_v44, 16 }
 0x161   :  { %3568 = vrot.lane.b32.xlu1 %v3437_v14, %s10108_s13  ;;  %v1026_v14 = vshll.u32 %v948_v43, 16  ;;  %1774 = vst.msk [vmem:[#allocation2 + $0x198] sm:$0xf] %vm798_vm1, %v1581_v3  ;;  %v3444_v10 = vsel %vm10227_vm8, %v9736_v37, %v3443_v40  ;;  %v2749_v63 = vshrl.u32 %v1998_v52, 16  ;;  %v2164_v18 = vrot.slane %v2162_v22, 4 }
 0x162   :  { %3570 = vrot.lane.b32.xlu2 %v3440_v17, %s10108_s13  ;;  %v1582_v17 = vpack.c.b16 %v1486_v39, %v1486_v39  ;;  %v750_v58 = vpack.c.bf16 %v686_v28, %v686_v28  ;;  %v4323_v0 = vor.u32 %v4322_v47, %v10899_v31  ;;  %v1925_v39 = vld [vmem:[#allocation2 + $0x50] sm:$0x1]  ;;  %v4105_v22 = vld [vmem:[#allocation2 + $0x48] sm:$0xf] }
 0x163   :  { %v3557_v59 = vpop.permute.xlu1 %3556  ;;  %3955 = vrot.lane.b32.xlu0 %v3766_v9, %s10109_s23  ;;  %v1025_v9 = vrot.slane %v1023_v23, 7  ;;  %v3269_v23 = vsel %vm10227_vm8, %v9711_v1, %v3268_v30  ;;  %v2165_v25 = vor.u32 %v2164_v18, %v10864_v7  ;;  %v10018_v30 = vld [vmem:[%s14425_s0 + $0x88] sm:$0xff]  ;;  %v4307_v44 = vshrl.u32 %v4105_v22, 16 }
 0x164   :  { %3695 = vst.msk [vmem:[#allocation3 + $0xd8] sm:$0xf] %vm3640_vm13, %v3557_v59  ;;  %v10851_v54 = vpop.permute.xlu2 %4964  ;;  %v416_v59 = vpop.f32.mrf.mxu0  ;;  %v893_v3 = vunpack.c.l.b16 %v750_v58  ;;  %v4310_v47 = vshll.u32 %v4105_v22, 16 }
 0x165   :  { %4080 = vst.msk [vmem:[#allocation3 + $0xd8] sm:$0xf] %vm4025_vm14, %v3942_v16  ;;  %v3944_v62 = vpop.permute.xlu0 %3943  ;;  %v1999_v16 = vld [vmem:[#allocation2 + $0x190] sm:$0xf]  ;;  %v1028_v27 = vor.u32 %v1026_v14, %v1025_v9  ;;  %v1303_v48 = vsel %vm10284_vm11, %v1025_v9, 0  ;;  %v555_v50 = vmul.f32 %v10860_v61, %v416_v59  ;;  %v4324_v14 = vrot.slane %v4323_v0, 4 }
 0x166   :  { %9689 = vmatmul.msk.bf16.gmra.mxu0 %vm268_vm0, %v10017_v45  ;;  %v2758_v29 = vshll.u32 %v1999_v16, 16  ;;  %v2762_v34 = vshrl.u32 %v1999_v16, 16  ;;  %1775 = vst.msk [vmem:[#allocation2 + $0x19c] sm:$0xf] %vm798_vm1, %v1582_v17  ;;  %v2752_v45 = vshll.u32 %v1998_v52, 16  ;;  %v2768_v16 = vshll.u32 %v2000_v57, 16 }
 0x167   :  { %v1271_v53 = vsel %vm10284_vm11, 0, %v1028_v27  ;;  %v623_v38 = vadd.f32 %v10877_v60, %v555_v50  ;;  %v2168_v17 = vshll.u32 %v1925_v39, 16  ;;  %v4309_v52 = vrot.slane %v4307_v44, 4 }
 0x168   :  { %v10906_v51 = vrot.slane %v2758_v29, 5  ;;  %v2764_v36 = vrot.slane %v2762_v34, 4  ;;  %v1414_v55 = vunpack.c.h.b16 %v1271_v53  ;;  %v2751_v34 = vrot.slane %v2749_v63, 4  ;;  %v1927_v63 = vld [vmem:[#allocation2 + $0x58] sm:$0xf] }
 0x169   :  { %2894 = vrot.lane.b32.xlu1 %v2747_v12, %s10107_s30  ;;  %v687_v12 = vmax.f32 %v623_v38, 0.0  ;;  %v2754_v37 = vrot.slane %v2752_v45, 5  ;;  %v2186_v22 = vshrl.u32 %v1927_v63, 16 }
 0x16a   :  { %3474 = vrot.lane.b32.xlu2 %v3272_v21, %s10108_s13  ;;  %v2765_v5 = vor.u32 %v2764_v36, %v10906_v51  ;;  %v2170_v36 = vrot.slane %v2168_v17, 5 }
 0x16b   :  { %v2883_v24 = vpop.permute.xlu1 %2882  ;;  %2796 = vrot.lane.b32.xlu0 %v2161_v56, %s10107_s30  ;;  %v1510_v56 = vpack.c.b16 %v1414_v55, %v1414_v55  ;;  %v751_v46 = vpack.c.bf16 %v687_v12, %v687_v12  ;;  %v2755_v7 = vor.u32 %v2754_v37, %v2751_v34 }
 0x16c   :  { %3020 = vst.msk [vmem:[#allocation3 + $0xdc] sm:$0xf] %vm2964_vm12, %v2883_v24  ;;  %v2885_v13 = vpop.permute.xlu2 %2884  ;;  %v4328_v24 = vrot.slane %v4326_v2, 5  ;;  %v419_v26 = vpop.f32.mrf.mxu0 }
 0x16d   :  { %3696 = vst.msk [vmem:[#allocation3 + $0xdc] sm:$0xf] %vm3640_vm13, %v10780_v4  ;;  %v2785_v15 = vpop.permute.xlu0 %2784  ;;  %v1415_v4 = vunpack.c.l.b16 %v1303_v48  ;;  %v894_v9 = vunpack.c.l.b16 %v751_v46  ;;  %v556_v28 = vmul.f32 %v10860_v61, %v419_v26  ;;  %v2756_v55 = vrot.slane %v2755_v7, 4  ;;  %v10019_v7 = vld [vmem:[%s14425_s0 + $0x90] sm:$0xff] }
 0x16e   :  { %4081 = vst.msk [vmem:[#allocation3 + $0xdc] sm:$0xf] %vm4025_vm14, %v3944_v62  ;;  %v1413_v62 = vunpack.c.l.b16 %v1271_v53  ;;  %v4312_v53 = vrot.slane %v4310_v47, 5  ;;  %v2188_v47 = vrot.slane %v2186_v22, 4 }
 0x16f   :  { %3021 = vst.msk [vmem:[#allocation3 + $0xe0] sm:$0xf] %vm2964_vm12, %v2885_v13  ;;  %v1511_v11 = vpack.c.b16 %v1415_v4, %v1415_v4  ;;  %v2770_v13 = vrot.slane %v2768_v16, 5  ;;  %v949_v59 = vpack.c.b16 %v894_v9, %v893_v3  ;;  %v2166_v4 = vrot.slane %v2165_v25, 4  ;;  %v3718_v16 = vld [vmem:[#allocation2 + $0x58] sm:$0xf] }
 0x170   :  { %2971 = vst.msk [vmem:[#allocation3 + $0x18] sm:$0xf] %vm2964_vm12, %v2785_v15  ;;  %v1509_v43 = vpack.c.b16 %v1413_v62, %v1413_v62  ;;  %v624_v15 = vadd.f32 %v10877_v60, %v556_v28  ;;  %v3050_v3 = vld [vmem:[#allocation2 + $0x54] sm:$0xe] }
 0x171   :  { %3855 = vrot.lane.b32.xlu1 %v3716_v49, %s10109_s23  ;;  %1704 = vst.msk [vmem:[#allocation2 + $0x68] sm:$0x1] %vm801_vm2, %v1511_v11  ;;  %v4329_v49 = vsel %vm10215_vm5, %v4324_v14, %v4328_v24  ;;  %v1030_v1 = vshrl.u32 %v949_v59, 16  ;;  %v1033_v27 = vshll.u32 %v949_v59, 16  ;;  %v2171_v12 = vsel %vm10215_vm5, %v2166_v4, %v2170_v36  ;;  %v10965_v14 = vld [vmem:[#allocation2 + $0x58] sm:$0xf] }
 0x172   :  { %3953 = vrot.lane.b32.xlu2 %v3765_v6, %s10109_s23  ;;  %1702 = vst.msk [vmem:[#allocation2 + $0x60] sm:$0xf] %vm798_vm1, %v1509_v43  ;;  %v688_v57 = vmax.f32 %v624_v15, 0.0  ;;  %v1791_v6 = vld [vmem:[#allocation2 + $0x54] sm:$0xf]  ;;  %v2182_v24 = vshll.u32 %v1927_v63, 16 }
 0x173   :  { %v3844_v8 = vpop.permute.xlu1 %3843  ;;  %3572 = vrot.lane.b32.xlu0 %v3444_v10, %s10108_s13  ;;  %1703 = vst.msk [vmem:[#allocation2 + $0x64] sm:$0xf] %vm798_vm1, %v1510_v56  ;;  %v1032_v2 = vrot.slane %v1030_v1, 7  ;;  %v9712_v9 = vrot.slane %v3050_v3, 9  ;;  %v1926_v59 = vld [vmem:[#allocation2 + $0x54] sm:$0xf] }
 0x174   :  { %4031 = vst.msk [vmem:[#allocation3 + $0x14] sm:$0xf] %vm4025_vm14, %v3844_v8  ;;  %v3846_v21 = vpop.permute.xlu2 %3845  ;;  %v421_v38 = vpop.f32.mrf.mxu0  ;;  %v4313_v8 = vor.u32 %v4312_v53, %v4309_v52  ;;  %v10976_v44 = vrot.slane %v2182_v24, 5  ;;  %v3124_v4 = vld [vmem:[#allocation2 + $0x194] sm:$0x1]  ;;  %v2173_v52 = vshrl.u32 %v1926_v59, 16 }
 0x175   :  { %5152 = vst.msk [vmem:[#allocation3 + $0x14] sm:$0xf] %vm5146_vm15, %v10851_v54  ;;  %v3561_v29 = vpop.permute.xlu0 %3560  ;;  %v2766_v54 = vrot.slane %v2765_v5, 4  ;;  %v1035_v11 = vor.u32 %v1033_v27, %v1032_v2  ;;  %v1304_v0 = vsel %vm10284_vm11, %v1032_v2, 0  ;;  %v557_v45 = vmul.f32 %v10860_v61, %v421_v38  ;;  %v4108_v27 = vld [vmem:[#allocation2 + $0x54] sm:$0xf] }
 0x176   :  { %3697 = vst.msk [vmem:[#allocation3 + $0xe0] sm:$0xf] %vm3640_vm13, %v3561_v29  ;;  %9690 = vmatmul.msk.bf16.gmra.mxu0 %vm268_vm0, %v10018_v30  ;;  %v1418_v10 = vunpack.c.l.b16 %v1304_v0  ;;  %v752_v5 = vpack.c.bf16 %v688_v57, %v688_v57  ;;  %v4314_v34 = vrot.slane %v4313_v8, 4  ;;  %v2176_v53 = vshll.u32 %v1926_v59, 16 }
 0x177   :  { %v2771_v50 = vsel %vm10215_vm5, %v2766_v54, %v2770_v13  ;;  %v1272_v43 = vsel %vm10284_vm11, 0, %v1035_v11  ;;  %1855 = vst.msk [vmem:[#allocation3 + $0x38] sm:$0xf] %vm798_vm1, %v1791_v6  ;;  %v625_v46 = vadd.f32 %v10877_v60, %v557_v45  ;;  %v3275_v54 = vrot.slane %v10965_v14, 5 }
 0x178   :  { %v1416_v18 = vunpack.c.l.b16 %v1272_v43  ;;  %v1417_v56 = vunpack.c.h.b16 %v1272_v43  ;;  %v1514_v39 = vpack.c.b16 %v1418_v10, %v1418_v10  ;;  %v895_v13 = vunpack.c.l.b16 %v752_v5 }
 0x179   :  { %3472 = vrot.lane.b32.xlu1 %v3269_v23, %s10108_s13  ;;  %v2761_v23 = vsel %vm10215_vm5, %v2756_v55, %v10906_v51  ;;  %v689_v29 = vmax.f32 %v625_v46, 0.0  ;;  %v4319_v1 = vsel %vm10215_vm5, %v4314_v34, %v10899_v31  ;;  %v3717_v31 = vld [vmem:[#allocation2 + $0x54] sm:$0xf]  ;;  %v2189_v2 = vor.u32 %v2188_v47, %v10976_v44 }
 0x17a   :  { %4976 = vrot.lane.b32.xlu2 %v4329_v49, %s10110_s24  ;;  %1707 = vst.msk [vmem:[#allocation2 + $0x74] sm:$0x1] %vm801_vm2, %v1514_v39  ;;  %v1512_v37 = vpack.c.b16 %v1416_v18, %v1416_v18  ;;  %v1513_v28 = vpack.c.b16 %v1417_v56, %v1417_v56  ;;  %v1928_v49 = vld [vmem:[#allocation2 + $0x5c] sm:$0x1]  ;;  %v4331_v11 = vshrl.u32 %v4108_v27, 16  ;;  %v4334_v0 = vshll.u32 %v4108_v27, 16 }
 0x17b   :  { %v3461_v48 = vpop.permute.xlu1 %3460  ;;  %2898 = vrot.lane.b32.xlu0 %v2771_v50, %s10107_s30  ;;  %v753_v25 = vpack.c.bf16 %v689_v29, %v689_v29  ;;  %v3276_v50 = vsel %vm10227_vm8, %v9712_v9, %v3275_v54  ;;  %v2192_v57 = vshll.u32 %v1928_v49, 16  ;;  %v3445_v6 = vrot.slane %v3443_v40, 4 }
 0x17c   :  { %3647 = vst.msk [vmem:[#allocation3 + $0x18] sm:$0xf] %vm3640_vm13, %v3461_v48  ;;  %v10949_v58 = vpop.permute.xlu2 %3947  ;;  %v424_v17 = vpop.f32.mrf.mxu0  ;;  %v3446_v10 = vrot.slane %v3124_v4, 5  ;;  %v2175_v8 = vrot.slane %v2173_v52, 4  ;;  %v2178_v43 = vrot.slane %v2176_v53, 5  ;;  %v2190_v18 = vrot.slane %v2189_v2, 4 }
 0x17d   :  { %4032 = vst.msk [vmem:[#allocation3 + $0x18] sm:$0xf] %vm4025_vm14, %v3846_v21  ;;  %v2887_v62 = vpop.permute.xlu0 %2886  ;;  %v1792_v21 = vld [vmem:[#allocation2 + $0x58] sm:$0xf]  ;;  %v558_v15 = vmul.f32 %v10860_v61, %v424_v17  ;;  %v2194_v56 = vrot.slane %v2192_v57, 5  ;;  %v4333_v40 = vrot.slane %v4331_v11, 4 }
 0x17e   :  { %3022 = vst.msk [vmem:[#allocation3 + $0xe4] sm:$0xf] %vm2964_vm12, %v2887_v62  ;;  %v4336_v46 = vrot.slane %v4334_v0, 5  ;;  %v2179_v34 = vor.u32 %v2178_v43, %v2175_v8  ;;  %v4110_v52 = vld [vmem:[#allocation2 + $0x5c] sm:$0x1] }
 0x17f   :  { %1856 = vst.msk [vmem:[#allocation3 + $0x3c] sm:$0xf] %vm798_vm1, %v1792_v21  ;;  %v626_v48 = vadd.f32 %v10877_v60, %v558_v15  ;;  %v3447_v21 = vsel %vm10227_vm8, %v3445_v6, %v3446_v10  ;;  %v2195_v17 = vsel %vm10215_vm5, %v2190_v18, %v2194_v56  ;;  %v3055_v57 = vld [vmem:[#allocation2 + $0x68] sm:$0x1]  ;;  %v4350_v6 = vshll.u32 %v4110_v52, 16 }
 0x180   :  { %1705 = vst.msk [vmem:[#allocation2 + $0x6c] sm:$0xf] %vm798_vm1, %v1512_v37  ;;  %v4337_v47 = vor.u32 %v4336_v46, %v4333_v40  ;;  %v1930_v56 = vld [vmem:[#allocation2 + $0x64] sm:$0xf] }
 0x181   :  { %2798 = vrot.lane.b32.xlu1 %v2171_v12, %s10107_s30  ;;  %1706 = vst.msk [vmem:[#allocation2 + $0x70] sm:$0xf] %vm798_vm1, %v1513_v28  ;;  %v690_v63 = vmax.f32 %v626_v48, 0.0  ;;  %v4109_v28 = vld [vmem:[#allocation2 + $0x58] sm:$0xf] }
 0x182   :  { %2896 = vrot.lane.b32.xlu2 %v2761_v23, %s10107_s30  ;;  %v3768_v23 = vld [vmem:[#allocation2 + $0x19c] sm:$0xf]  ;;  %v4340_v27 = vshll.u32 %v4109_v28, 16  ;;  %v4344_v48 = vshrl.u32 %v4109_v28, 16  ;;  %v4338_v2 = vrot.slane %v4337_v47, 4 }
 0x183   :  { %v2787_v26 = vpop.permute.xlu1 %2786  ;;  %3859 = vrot.lane.b32.xlu0 %v3718_v16, %s10109_s23  ;;  %v754_v24 = vpack.c.bf16 %v690_v63, %v690_v63 }
 0x184   :  { %2972 = vst.msk [vmem:[#allocation3 + $0x1c] sm:$0xf] %vm2964_vm12, %v2787_v26  ;;  %v2789_v51 = vpop.permute.xlu2 %2788  ;;  %v426_v5 = vpop.f32.mrf.mxu0  ;;  %v3052_v26 = vld [vmem:[#allocation2 + $0x5c] sm:$0x1]  ;;  %v4342_v11 = vrot.slane %v4340_v27, 5  ;;  %v4346_v0 = vrot.slane %v4344_v48, 4 }
 0x185   :  { %3648 = vst.msk [vmem:[#allocation3 + $0x1c] sm:$0xf] %vm3640_vm13, %v10800_v33  ;;  %v3848_v30 = vpop.permute.xlu0 %3847  ;;  %v896_v33 = vunpack.c.l.b16 %v753_v25  ;;  %v559_v39 = vmul.f32 %v10860_v61, %v426_v5  ;;  %v3278_v59 = vrot.slane %v3052_v26, 5  ;;  %v897_v49 = vunpack.c.l.b16 %v754_v24  ;;  %v4112_v48 = vld [vmem:[#allocation2 + $0x64] sm:$0xf] }
 0x186   :  { %2973 = vst.msk [vmem:[#allocation3 + $0x20] sm:$0xf] %vm2964_vm12, %v2789_v51  ;;  %9691 = vmatmul.msk.bf16.gmra.mxu0 %vm268_vm0, %v10019_v7  ;;  %v4343_v5 = vsel %vm10215_vm5, %v4338_v2, %v4342_v11  ;;  %v1929_v2 = vld [vmem:[#allocation2 + $0x60] sm:$0xf] }
 0x187   :  { %4033 = vst.msk [vmem:[#allocation3 + $0x1c] sm:$0xf] %vm4025_vm14, %v3848_v30  ;;  %v950_v36 = vpack.c.b16 %v896_v33, %v895_v13  ;;  %v627_v22 = vadd.f32 %v10877_v60, %v559_v39  ;;  %v3277_v30 = vrot.slane %v3275_v54, 4 }
 0x189   :  { %4974 = vrot.lane.b32.xlu1 %v4319_v1, %s10110_s24  ;;  %v1037_v62 = vshrl.u32 %v950_v36, 16  ;;  %v1040_v55 = vshll.u32 %v950_v36, 16  ;;  %v691_v13 = vmax.f32 %v627_v22, 0.0  ;;  %v2180_v36 = vrot.slane %v2179_v34, 4 }
 0x18a   :  { %3857 = vrot.lane.b32.xlu2 %v3717_v31, %s10109_s23  ;;  %v2206_v34 = vshll.u32 %v1930_v56, 16 }
 0x18b   :  { %v4963_v38 = vpop.permute.xlu1 %4962  ;;  %3476 = vrot.lane.b32.xlu0 %v3276_v50, %s10108_s13  ;;  %v1039_v12 = vrot.slane %v1037_v62, 7  ;;  %v755_v33 = vpack.c.bf16 %v691_v13, %v691_v13  ;;  %v11022_v50 = vld [vmem:[#allocation2 + $0x64] sm:$0xf]  ;;  %v2185_v10 = vsel %vm10215_vm5, %v2180_v36, %v10976_v44 }
 0x18c   :  { %5151 = vst.msk [vmem:[#allocation3 + $0x10] sm:$0xf] %vm5146_vm15, %v4963_v38  ;;  %v11001_v45 = vpop.permute.xlu2 %3564  ;;  %v429_v14 = vpop.f32.mrf.mxu0  ;;  %v3282_v38 = vrot.slane %v11022_v50, 5  ;;  %v11065_v36 = vrot.slane %v2206_v34, 5  ;;  %v1795_v34 = vld [vmem:[#allocation2 + $0x6c] sm:$0xf] }
 0x18d   :  { %v3465_v16 = vpop.permute.xlu0 %3464  ;;  %v1042_v3 = vor.u32 %v1040_v55, %v1039_v12  ;;  %v1305_v19 = vsel %vm10284_vm11, %v1039_v12, 0  ;;  %v898_v53 = vunpack.c.l.b16 %v755_v33  ;;  %v560_v31 = vmul.f32 %v10860_v61, %v429_v14  ;;  %v10020_v55 = vld [vmem:[%s14425_s0 + $0x98] sm:$0xff]  ;;  %1859 = vst.msk [vmem:[#allocation3 + $0x48] sm:$0xf] %vm798_vm1, %v1795_v34 }
 0x18e   :  { %3649 = vst.msk [vmem:[#allocation3 + $0x20] sm:$0xf] %vm3640_vm13, %v3465_v16  ;;  %v1421_v51 = vunpack.c.l.b16 %v1305_v19  ;;  %v3285_v16 = vrot.slane %v3055_v57, 5  ;;  %v3284_v44 = vrot.slane %v3282_v38, 4  ;;  %v1932_v19 = vld [vmem:[#allocation2 + $0x6c] sm:$0xf] }
 0x18f   :  { %v1273_v29 = vsel %vm10284_vm11, 0, %v1042_v3  ;;  %v951_v62 = vpack.c.b16 %v898_v53, %v897_v49  ;;  %v628_v8 = vadd.f32 %v10877_v60, %v560_v31  ;;  %v4347_v3 = vor.u32 %v4346_v0, %v4342_v11  ;;  %v1794_v49 = vld [vmem:[#allocation2 + $0x64] sm:$0xf]  ;;  %v11067_v53 = vld [vmem:[#allocation2 + $0x70] sm:$0xf] }
 0x190   :  { %v1419_v37 = vunpack.c.l.b16 %v1273_v29  ;;  %v1420_v9 = vunpack.c.h.b16 %v1273_v29  ;;  %v1517_v4 = vpack.c.b16 %v1421_v51, %v1421_v51  ;;  %v3053_v29 = vld [vmem:[#allocation2 + $0x60] sm:$0xe]  ;;  %v3720_v51 = vld [vmem:[#allocation2 + $0x64] sm:$0xf]  ;;  %v3286_v28 = vsel %vm10227_vm8, %v3284_v44, %v3285_v16  ;;  %1858 = vst.msk [vmem:[#allocation3 + $0x44] sm:$0xf] %vm798_vm1, %v1794_v49 }
 0x191   :  { %3574 = vrot.lane.b32.xlu1 %v3447_v21, %s10108_s13  ;;  %v1044_v63 = vshrl.u32 %v951_v62, 16  ;;  %v1047_v12 = vshll.u32 %v951_v62, 16  ;;  %v11050_v21 = vrot.slane %v4350_v6, 5  ;;  %v692_v22 = vmax.f32 %v628_v8, 0.0  ;;  %v1793_v0 = vld [vmem:[#allocation2 + $0x60] sm:$0xf] }
 0x192   :  { %3959 = vrot.lane.b32.xlu2 %v3768_v23, %s10109_s23  ;;  %v1515_v15 = vpack.c.b16 %v1419_v37, %v1419_v37  ;;  %v1516_v1 = vpack.c.b16 %v1420_v9, %v1420_v9  ;;  %1710 = vst.msk [vmem:[#allocation2 + $0x80] sm:$0x1] %vm801_vm2, %v1517_v4  ;;  %v2210_v37 = vshrl.u32 %v1930_v56, 16  ;;  %v3767_v9 = vld [vmem:[#allocation2 + $0x198] sm:$0xf]  ;;  %v4348_v33 = vrot.slane %v4347_v3, 4 }
 0x193   :  { %v3563_v25 = vpop.permute.xlu1 %3562  ;;  %2802 = vrot.lane.b32.xlu0 %v2195_v17, %s10107_s30  ;;  %v1046_v18 = vrot.slane %v1044_v63, 7  ;;  %v4368_v8 = vshrl.u32 %v4112_v48, 16  ;;  %v1931_v16 = vld [vmem:[#allocation2 + $0x68] sm:$0x1]  ;;  %v2197_v44 = vshrl.u32 %v1929_v2, 16 }
 0x194   :  { %3698 = vst.msk [vmem:[#allocation3 + $0xe4] sm:$0xf] %vm3640_vm13, %v3563_v25  ;;  %v2891_v7 = vpop.permute.xlu2 %2890  ;;  %v431_v40 = vpop.f32.mrf.mxu0  ;;  %v2221_v25 = vshrl.u32 %v1932_v19, 16  ;;  %v2212_v52 = vrot.slane %v2210_v37, 4 }
 0x195   :  { %4083 = vst.msk [vmem:[#allocation3 + $0xe4] sm:$0xf] %vm4025_vm14, %v10949_v58  ;;  %v2791_v54 = vpop.permute.xlu0 %2790  ;;  %v3279_v58 = vsel %vm10227_vm8, %v3277_v30, %v3278_v59  ;;  %v1049_v23 = vor.u32 %v1047_v12, %v1046_v18  ;;  %v1306_v24 = vsel %vm10284_vm11, %v1046_v18, 0  ;;  %v561_v17 = vmul.f32 %v10860_v61, %v431_v40  ;;  %v4111_v12 = vld [vmem:[#allocation2 + $0x60] sm:$0xf] }
 0x196   :  { %3024 = vst.msk [vmem:[#allocation3 + $0xec] sm:$0xf] %vm2964_vm12, %v2891_v7  ;;  %9692 = vmatmul.msk.bf16.gmra.mxu0 %vm268_vm0, %v10020_v55  ;;  %v1424_v26 = vunpack.c.l.b16 %v1306_v24  ;;  %v9713_v7 = vrot.slane %v3053_v29, 9  ;;  %v2223_v31 = vrot.slane %v2221_v25, 4  ;;  %v4364_v55 = vshll.u32 %v4112_v48, 16  ;;  %v10021_v40 = vld [vmem:[%s14425_s0 + $0xa0] sm:$0xff] }
 0x197   :  { %2974 = vst.msk [vmem:[#allocation3 + $0x24] sm:$0xf] %vm2964_vm12, %v2791_v54  ;;  %v1274_v13 = vsel %vm10284_vm11, 0, %v1049_v23  ;;  %v629_v27 = vadd.f32 %v10877_v60, %v561_v17  ;;  %v2200_v18 = vshll.u32 %v1929_v2, 16  ;;  %v4355_v23 = vshrl.u32 %v4111_v12, 16 }
 0x198   :  { %1708 = vst.msk [vmem:[#allocation2 + $0x78] sm:$0xf] %vm798_vm1, %v1515_v15  ;;  %v1422_v30 = vunpack.c.l.b16 %v1274_v13  ;;  %v1423_v47 = vunpack.c.h.b16 %v1274_v13  ;;  %v1520_v59 = vpack.c.b16 %v1424_v26, %v1424_v26  ;;  %v2224_v15 = vshll.u32 %v1932_v19, 16 }
 0x199   :  { %3478 = vrot.lane.b32.xlu1 %v3279_v58, %s10108_s13  ;;  %1709 = vst.msk [vmem:[#allocation2 + $0x7c] sm:$0xf] %vm798_vm1, %v1516_v1  ;;  %v756_v1 = vpack.c.bf16 %v692_v22, %v692_v22  ;;  %v693_v58 = vmax.f32 %v629_v27, 0.0  ;;  %v3283_v56 = vsel %vm10227_vm8, %v9713_v7, %v3282_v38  ;;  %v4358_v50 = vshll.u32 %v4111_v12, 16 }
 0x19a   :  { %2800 = vrot.lane.b32.xlu2 %v2185_v10, %s10107_s30  ;;  %v1518_v54 = vpack.c.b16 %v1422_v30, %v1422_v30  ;;  %v1519_v4 = vpack.c.b16 %v1423_v47, %v1423_v47  ;;  %1713 = vst.msk [vmem:[#allocation2 + $0x8c] sm:$0x1] %vm801_vm2, %v1520_v59  ;;  %v2226_v62 = vrot.slane %v2224_v15, 5  ;;  %v11091_v24 = vrot.slane %v4364_v55, 5 }
 0x19b   :  { %v3467_v43 = vpop.permute.xlu1 %3466  ;;  %4978 = vrot.lane.b32.xlu0 %v4343_v5, %s10110_s24  ;;  %v899_v10 = vunpack.c.l.b16 %v756_v1  ;;  %v757_v63 = vpack.c.bf16 %v693_v58, %v693_v58  ;;  %v4353_v5 = vsel %vm10215_vm5, %v4348_v33, %v11050_v21  ;;  %1857 = vst.msk [vmem:[#allocation3 + $0x40] sm:$0xf] %vm798_vm1, %v1793_v0  ;;  %v2213_v38 = vor.u32 %v2212_v52, %v11065_v36 }
 0x19c   :  { %3650 = vst.msk [vmem:[#allocation3 + $0x24] sm:$0xf] %vm3640_vm13, %v3467_v43  ;;  %v3852_v39 = vpop.permute.xlu2 %3851  ;;  %v434_v11 = vpop.f32.mrf.mxu0  ;;  %v2227_v21 = vor.u32 %v2226_v62, %v2223_v31  ;;  %v2216_v22 = vshll.u32 %v1931_v16, 16  ;;  %v11095_v29 = vrot.slane %v4368_v8, 4  ;;  %v4357_v59 = vrot.slane %v4355_v23, 4 }
 0x19d   :  { %v4967_v46 = vpop.permute.xlu0 %4966  ;;  %4035 = vst.msk [vmem:[#allocation3 + $0x24] sm:$0xf] %vm4025_vm14, %v3852_v39  ;;  %v562_v43 = vmul.f32 %v10860_v61, %v434_v11  ;;  %v2230_v39 = vshll.u32 %v11067_v53, 16  ;;  %v900_v3 = vunpack.c.l.b16 %v757_v63  ;;  %v4360_v15 = vrot.slane %v4358_v50, 5  ;;  %v1796_v62 = vld [vmem:[#allocation2 + $0x70] sm:$0xf] }
 0x19e   :  { %5153 = vst.msk [vmem:[#allocation3 + $0x18] sm:$0xf] %vm5146_vm15, %v4967_v46  ;;  %v3721_v46 = vld [vmem:[#allocation2 + $0x6c] sm:$0xf]  ;;  %v2228_v47 = vrot.slane %v2227_v21, 4  ;;  %v4371_v33 = vor.u32 %v11095_v29, %v11091_v24  ;;  %v2214_v1 = vrot.slane %v2213_v38, 4 }
 0x19f   :  { %1711 = vst.msk [vmem:[#allocation2 + $0x84] sm:$0xf] %vm798_vm1, %v1518_v54  ;;  %v630_v19 = vadd.f32 %v10877_v60, %v562_v43  ;;  %v952_v26 = vpack.c.b16 %v900_v3, %v899_v10  ;;  %v2218_v27 = vrot.slane %v2216_v22, 5  ;;  %v4361_v0 = vor.u32 %v4360_v15, %v4357_v59  ;;  %v3059_v23 = vld [vmem:[#allocation2 + $0x78] sm:$0xe] }
 0x1a0   :  { %1712 = vst.msk [vmem:[#allocation2 + $0x88] sm:$0xf] %vm798_vm1, %v1519_v4  ;;  %v3719_v4 = vld [vmem:[#allocation2 + $0x60] sm:$0xf]  ;;  %v11128_v50 = vld [vmem:[#allocation2 + $0x7c] sm:$0xf] }
 0x1a1   :  { %3957 = vrot.lane.b32.xlu1 %v3767_v9, %s10109_s23  ;;  %v2199_v9 = vrot.slane %v2197_v44, 4  ;;  %v1051_v13 = vshrl.u32 %v952_v26, 16  ;;  %v1054_v25 = vshll.u32 %v952_v26, 16  ;;  %v694_v17 = vmax.f32 %v630_v19, 0.0  ;;  %1860 = vst.msk [vmem:[#allocation3 + $0x4c] sm:$0xf] %vm798_vm1, %v1796_v62 }
 0x1a2   :  { %3863 = vrot.lane.b32.xlu2 %v3720_v51, %s10109_s23  ;;  %v2202_v51 = vrot.slane %v2200_v18, 5  ;;  %v9715_v59 = vrot.slane %v3059_v23, 9  ;;  %v1797_v62 = vld [vmem:[#allocation2 + $0x78] sm:$0xf] }
 0x1a3   :  { %v3946_v14 = vpop.permute.xlu1 %3945  ;;  %3482 = vrot.lane.b32.xlu0 %v3286_v28, %s10108_s13  ;;  %v11101_v28 = vrot.slane %v2230_v39, 5  ;;  %v1053_v48 = vrot.slane %v1051_v13, 7  ;;  %v758_v2 = vpack.c.bf16 %v694_v17, %v694_v17  ;;  %v2234_v13 = vshrl.u32 %v11067_v53, 16  ;;  %v3724_v17 = vld [vmem:[#allocation2 + $0x7c] sm:$0xf] }
 0x1a4   :  { %4082 = vst.msk [vmem:[#allocation3 + $0xe0] sm:$0xf] %vm4025_vm14, %v3946_v14  ;;  %v11071_v57 = vpop.permute.xlu2 %3468  ;;  %v436_v49 = vpop.f32.mrf.mxu0  ;;  %v2203_v54 = vor.u32 %v2202_v51, %v2199_v9 }
 0x1a5   :  { %v3567_v6 = vpop.permute.xlu0 %3566  ;;  %v563_v14 = vmul.f32 %v10860_v61, %v436_v49  ;;  %v1056_v52 = vor.u32 %v1054_v25, %v1053_v48  ;;  %v1307_v31 = vsel %vm10284_vm11, %v1053_v48, 0  ;;  %v2233_v55 = vsel %vm10215_vm5, %v2228_v47, %v11101_v28  ;;  %1861 = vst.msk [vmem:[#allocation3 + $0x50] sm:$0xf] %vm798_vm1, %v1797_v62  ;;  %v10023_v62 = vld [vmem:[%s14425_s0 + $0xb0] sm:$0xff] }
 0x1a6   :  { %3700 = vst.msk [vmem:[#allocation3 + $0xec] sm:$0xf] %vm3640_vm13, %v3567_v6  ;;  %9693 = vmatmul.msk.bf16.gmra.mxu0 %vm268_vm0, %v10021_v40  ;;  %v1427_v11 = vunpack.c.l.b16 %v1307_v31  ;;  %v2219_v6 = vsel %vm10215_vm5, %v2214_v1, %v2218_v27  ;;  %v2204_v16 = vrot.slane %v2203_v54, 4  ;;  %v901_v44 = vunpack.c.l.b16 %v758_v2  ;;  %v3058_v1 = vld [vmem:[#allocation2 + $0x74] sm:$0x1] }
 0x1a7   :  { %v631_v58 = vadd.f32 %v10877_v60, %v563_v14  ;;  %v1275_v10 = vsel %vm10284_vm11, 0, %v1056_v52  ;;  %v4362_v40 = vrot.slane %v4361_v0, 4  ;;  %v4118_v14 = vld [vmem:[#allocation2 + $0x7c] sm:$0xf] }
 0x1a8   :  { %v1425_v8 = vunpack.c.l.b16 %v1275_v10  ;;  %v1426_v43 = vunpack.c.h.b16 %v1275_v10  ;;  %v2209_v9 = vsel %vm10215_vm5, %v2204_v16, %v11065_v36  ;;  %v3296_v36 = vrot.slane %v11128_v50, 5 }
 0x1a9   :  { %4980 = vrot.lane.b32.xlu1 %v4353_v5, %s10110_s24  ;;  %v695_v63 = vmax.f32 %v631_v58, 0.0  ;;  %v1523_v5 = vpack.c.b16 %v1427_v11, %v1427_v11  ;;  %v4367_v25 = vsel %vm10215_vm5, %v4362_v40, %v11091_v24  ;;  %v4412_v58 = vshll.u32 %v4118_v14, 16 }
 0x1aa   :  { %3480 = vrot.lane.b32.xlu2 %v3283_v56, %s10108_s13  ;;  %v1936_v56 = vld [vmem:[#allocation2 + $0x7c] sm:$0xf]  ;;  %v1521_v3 = vpack.c.b16 %v1425_v8, %v1425_v8  ;;  %v1522_v19 = vpack.c.b16 %v1426_v43, %v1426_v43  ;;  %v3292_v11 = vrot.slane %v3058_v1, 5  ;;  %v3297_v0 = vsel %vm10227_vm8, %v9715_v59, %v3296_v36 }
 0x1ab   :  { %v4969_v37 = vpop.permute.xlu1 %4968  ;;  %3865 = vrot.lane.b32.xlu0 %v3721_v46, %s10109_s23  ;;  %v759_v18 = vpack.c.bf16 %v695_v63, %v695_v63  ;;  %v11125_v46 = vld [vmem:[#allocation2 + $0x70] sm:$0xf]  ;;  %1716 = vst.msk [vmem:[#allocation2 + $0x98] sm:$0x1] %vm801_vm2, %v1523_v5  ;;  %v2254_v26 = vshll.u32 %v1936_v56, 16  ;;  %v2258_v34 = vshrl.u32 %v1936_v56, 16 }
 0x1ac   :  { %5154 = vst.msk [vmem:[#allocation3 + $0x1c] sm:$0xf] %vm5146_vm15, %v4969_v37  ;;  %v2795_v30 = vpop.permute.xlu2 %2794  ;;  %v10022_v37 = vld [vmem:[%s14425_s0 + $0xa8] sm:$0xff]  ;;  %v1935_v5 = vld [vmem:[#allocation2 + $0x78] sm:$0xf] }
 0x1ad   :  { %v3471_v7 = vpop.permute.xlu0 %3470  ;;  %2976 = vst.msk [vmem:[#allocation3 + $0x2c] sm:$0xf] %vm2964_vm12, %v2795_v30  ;;  %v902_v38 = vunpack.c.l.b16 %v759_v18  ;;  %v3289_v30 = vrot.slane %v11125_v46, 5  ;;  %v11150_v27 = vrot.slane %v2254_v26, 5  ;;  %v2260_v48 = vrot.slane %v2258_v34, 4 }
 0x1ae   :  { %3652 = vst.msk [vmem:[#allocation3 + $0x2c] sm:$0xf] %vm3640_vm13, %v3471_v7  ;;  %v2245_v26 = vshrl.u32 %v1935_v5, 16  ;;  %v2248_v34 = vshll.u32 %v1935_v5, 16 }
 0x1af   :  { %1714 = vst.msk [vmem:[#allocation2 + $0x90] sm:$0xf] %vm798_vm1, %v1521_v3  ;;  %v953_v51 = vpack.c.b16 %v902_v38, %v901_v44  ;;  %v3291_v2 = vrot.slane %v3289_v30, 4  ;;  %v2261_v8 = vor.u32 %v2260_v48, %v11150_v27  ;;  %v3722_v44 = vld [vmem:[#allocation2 + $0x70] sm:$0xf]  ;;  %v4416_v3 = vshrl.u32 %v4118_v14, 16 }
 0x1b0   :  { %1715 = vst.msk [vmem:[#allocation2 + $0x94] sm:$0xf] %vm798_vm1, %v1522_v19  ;;  %v3056_v19 = vld [vmem:[#allocation2 + $0x6c] sm:$0xe] }
 0x1b1   :  { %3861 = vrot.lane.b32.xlu1 %v3719_v4, %s10109_s23  ;;  %v1058_v15 = vshrl.u32 %v953_v51, 16  ;;  %v1061_v49 = vshll.u32 %v953_v51, 16  ;;  %v1937_v4 = vld [vmem:[#allocation2 + $0x80] sm:$0x1] }
 0x1b2   :  { %2806 = vrot.lane.b32.xlu2 %v2219_v6, %s10107_s30  ;;  %v2264_v43 = vshll.u32 %v1937_v4, 16  ;;  %v2250_v4 = vrot.slane %v2248_v34, 5 }
 0x1b3   :  { %v2889_v12 = vpop.permute.xlu1 %2888  ;;  %2808 = vrot.lane.b32.xlu0 %v2233_v55, %s10107_s30  ;;  %v439_v22 = vpop.f32.mrf.mxu0  ;;  %v1060_v54 = vrot.slane %v1058_v15, 7  ;;  %v2262_v15 = vrot.slane %v2261_v8, 4 }
 0x1b4   :  { %3023 = vst.msk [vmem:[#allocation3 + $0xe8] sm:$0xf] %vm2964_vm12, %v2889_v12  ;;  %v4971_v39 = vpop.permute.xlu2 %4970 }
 0x1b5   :  { %3699 = vst.msk [vmem:[#allocation3 + $0xe8] sm:$0xf] %vm3640_vm13, %v11001_v45  ;;  %v3950_v21 = vpop.permute.xlu0 %3949  ;;  %v564_v45 = vmul.f32 %v10860_v61, %v439_v22  ;;  %v1063_v6 = vor.u32 %v1061_v49, %v1060_v54  ;;  %v1308_v10 = vsel %vm10284_vm11, %v1060_v54, 0  ;;  %v1798_v22 = vld [vmem:[#allocation2 + $0x7c] sm:$0xf]  ;;  %v2247_v54 = vrot.slane %v2245_v26, 4 }
 0x1b6   :  { %4084 = vst.msk [vmem:[#allocation3 + $0xe8] sm:$0xf] %vm4025_vm14, %v3950_v21  ;;  %9694 = vmatmul.msk.bf16.gmra.mxu0 %vm268_vm0, %v10022_v37  ;;  %v1430_v12 = vunpack.c.l.b16 %v1308_v10  ;;  %v1934_v49 = vld [vmem:[#allocation2 + $0x74] sm:$0x1]  ;;  %v1800_v26 = vld [vmem:[#allocation2 + $0x88] sm:$0xf] }
 0x1b7   :  { %v632_v47 = vadd.f32 %v10877_v60, %v564_v45  ;;  %v1276_v18 = vsel %vm10284_vm11, 0, %v1063_v6  ;;  %1862 = vst.msk [vmem:[#allocation3 + $0x54] sm:$0xf] %vm798_vm1, %v1798_v22  ;;  %v2251_v8 = vor.u32 %v2250_v4, %v2247_v54  ;;  %v3061_v22 = vld [vmem:[#allocation2 + $0x80] sm:$0x1] }
 0x1b8   :  { %v1428_v40 = vunpack.c.l.b16 %v1276_v18  ;;  %v1429_v21 = vunpack.c.h.b16 %v1276_v18  ;;  %v1526_v23 = vpack.c.b16 %v1430_v12, %v1430_v12  ;;  %v3723_v12 = vld [vmem:[#allocation2 + $0x78] sm:$0xf]  ;;  %1864 = vst.msk [vmem:[#allocation3 + $0x5c] sm:$0xf] %vm798_vm1, %v1800_v26 }
 0x1b9   :  { %2804 = vrot.lane.b32.xlu1 %v2209_v9, %s10107_s30  ;;  %v696_v52 = vmax.f32 %v632_v47, 0.0  ;;  %v2236_v47 = vrot.slane %v2234_v13, 4 }
 0x1ba   :  { %4982 = vrot.lane.b32.xlu2 %v4367_v25, %s10110_s24  ;;  %v1524_v37 = vpack.c.b16 %v1428_v40, %v1428_v40  ;;  %v1525_v9 = vpack.c.b16 %v1429_v21, %v1429_v21  ;;  %1719 = vst.msk [vmem:[#allocation2 + $0xa4] sm:$0x1] %vm801_vm2, %v1526_v23  ;;  %v11180_v25 = vrot.slane %v4416_v3, 4 }
 0x1bb   :  { %v3850_v7 = vpop.permute.xlu1 %3849  ;;  %3871 = vrot.lane.b32.xlu0 %v3724_v17, %s10109_s23  ;;  %v441_v63 = vpop.f32.mrf.mxu0  ;;  %v760_v56 = vpack.c.bf16 %v696_v52, %v696_v52  ;;  %v2266_v17 = vrot.slane %v2264_v43, 5  ;;  %v11192_v52 = vld [vmem:[#allocation2 + $0x88] sm:$0xf]  ;;  %v3064_v43 = vld [vmem:[#allocation2 + $0x8c] sm:$0x1] }
 0x1bc   :  { %4034 = vst.msk [vmem:[#allocation3 + $0x20] sm:$0xf] %vm4025_vm14, %v3850_v7  ;;  %v11155_v31 = vpop.permute.xlu2 %3570  ;;  %v565_v16 = vmul.f32 %v10860_v61, %v441_v63  ;;  %v3293_v61 = vsel %vm10227_vm8, %v3291_v2, %v3292_v11  ;;  %v11198_v2 = vld [vmem:[%s14426_s2] ss:$0 sm:$0xff]  ;;  %v2237_v11 = vor.u32 %v2236_v47, %v11101_v28  ;;  %v3303_v10 = vrot.slane %v11192_v52, 5 }
 0x1bd   :  { %5155 = vst.msk [vmem:[#allocation3 + $0x20] sm:$0xf] %vm5146_vm15, %v4971_v39  ;;  %v4973_v55 = vpop.permute.xlu0 %4972  ;;  %v11171_v39 = vrot.slane %v4412_v58, 5  ;;  %v903_v7 = vunpack.c.l.b16 %v760_v56  ;;  %v2267_v6 = vsel %vm10215_vm5, %v2262_v15, %v2266_v17  ;;  %v11218_v28 = vld [vmem:[%s14427_s3] ss:$0 sm:$0xff]  ;;  %v3306_v40 = vrot.slane %v3064_v43, 5 }
 0x1be   :  { %5156 = vst.msk [vmem:[#allocation3 + $0x24] sm:$0xf] %vm5146_vm15, %v4973_v55  ;;  %v633_v38 = vadd.f32 %v10877_v60, %v565_v16  ;;  %v9714_v60 = vrot.slane %v3056_v19, 9  ;;  %v1941_v56 = vld [vmem:[#allocation2 + $0x90] sm:$0xf]  ;;  %v3305_v19 = vrot.slane %v3303_v10, 4 }
 0x1bf   :  { %1717 = vst.msk [vmem:[#allocation2 + $0x9c] sm:$0xf] %vm798_vm1, %v1524_v37  ;;  %v4419_v48 = vor.u32 %v11180_v25, %v11171_v39  ;;  %v1799_v47 = vld [vmem:[#allocation2 + $0x84] sm:$0xf] }
 0x1c0   :  { %v697_v51 = vmax.f32 %v633_v38, 0.0  ;;  %1718 = vst.msk [vmem:[#allocation2 + $0xa0] sm:$0xf] %vm798_vm1, %v1525_v9  ;;  %v3290_v55 = vsel %vm10227_vm8, %v9714_v60, %v3289_v30  ;;  %v2252_v38 = vrot.slane %v2251_v8, 4  ;;  %v2293_v9 = vshrl.u32 %v1941_v56, 16 }
 0x1c1   :  { %3867 = vrot.lane.b32.xlu1 %v3722_v44, %s10109_s23  ;;  %v2238_v44 = vrot.slane %v2237_v11, 4  ;;  %v2296_v60 = vshll.u32 %v1941_v56, 16  ;;  %v3307_v15 = vsel %vm10227_vm8, %v3305_v19, %v3306_v40  ;;  %1863 = vst.msk [vmem:[#allocation3 + $0x58] sm:$0xf] %vm798_vm1, %v1799_v47  ;;  %v10024_v56 = vld [vmem:[%s14425_s0 + $0xb8] sm:$0xff] }
 0x1c2   :  { %3486 = vrot.lane.b32.xlu2 %v3293_v61, %s10108_s13  ;;  %v761_v1 = vpack.c.bf16 %v697_v51, %v697_v51  ;;  %v2295_v50 = vrot.slane %v2293_v9, 4  ;;  %v3070_v29 = vld [vmem:[#allocation2 + $0xa4] sm:$0x1] }
 0x1c3   :  { %v3952_v45 = vpop.permute.xlu1 %3951  ;;  %3488 = vrot.lane.b32.xlu0 %v3297_v0, %s10108_s13  ;;  %v444_v53 = vpop.f32.mrf.mxu0  ;;  %v2240_v0 = vshll.u32 %v1934_v49, 16  ;;  %v3298_v49 = vrot.slane %v3296_v36, 4 }
 0x1c4   :  { %4085 = vst.msk [vmem:[#allocation3 + $0xec] sm:$0xf] %vm4025_vm14, %v3952_v45  ;;  %v11186_v59 = vpop.permute.xlu2 %3474  ;;  %v904_v13 = vunpack.c.l.b16 %v761_v1  ;;  %v566_v58 = vmul.f32 %v11198_v2, %v444_v53  ;;  %v2257_v1 = vsel %vm10215_vm5, %v2252_v38, %v11150_v27  ;;  %v2298_v27 = vrot.slane %v2296_v60, 5 }
 0x1c5   :  { %v2893_v14 = vpop.permute.xlu0 %2892  ;;  %v2242_v18 = vrot.slane %v2240_v0, 5  ;;  %v1938_v0 = vld [vmem:[#allocation2 + $0x84] sm:$0xf] }
 0x1c6   :  { %3025 = vst.msk [vmem:[#allocation3 + $0xf0] sm:$0xf] %vm2964_vm12, %v2893_v14  ;;  %v954_v63 = vpack.c.b16 %v904_v13, %v903_v7  ;;  %9695 = vmatmul.msk.bf16.gmra.mxu0 %vm268_vm0, %v10023_v62  ;;  %v634_v16 = vadd.f32 %v11218_v28, %v566_v58  ;;  %v3299_v14 = vrot.slane %v3061_v22, 5  ;;  %v11246_v58 = vld [vmem:[#allocation2 + $0x94] sm:$0xf]  ;;  %v2272_v19 = vshll.u32 %v1938_v0, 16 }
 0x1c8   :  { %v1065_v30 = vshrl.u32 %v954_v63, 16  ;;  %v1068_v5 = vshll.u32 %v954_v63, 16  ;;  %v698_v37 = vmax.f32 %v634_v16, 0.0  ;;  %v1939_v63 = vld [vmem:[#allocation2 + $0x88] sm:$0xf]  ;;  %v3300_v43 = vsel %vm10227_vm8, %v3298_v49, %v3299_v14 }
 0x1c9   :  { %3484 = vrot.lane.b32.xlu1 %v3290_v55, %s10108_s13  ;;  %v2269_v16 = vshrl.u32 %v1938_v0, 16  ;;  %v2278_v40 = vshll.u32 %v1939_v63, 16 }
 0x1ca   :  { %3869 = vrot.lane.b32.xlu2 %v3723_v12, %s10109_s23  ;;  %v1067_v21 = vrot.slane %v1065_v30, 7  ;;  %v762_v13 = vpack.c.bf16 %v698_v37, %v698_v37 }
 0x1cb   :  { %v2793_v46 = vpop.permute.xlu1 %2792  ;;  %2814 = vrot.lane.b32.xlu0 %v2267_v6, %s10107_s30  ;;  %v446_v61 = vpop.f32.mrf.mxu0  ;;  %v2271_v37 = vrot.slane %v2269_v16, 4  ;;  %v11272_v60 = vrot.slane %v2278_v40, 5  ;;  %v11297_v16 = vld [vmem:[#allocation2 + $0x94] sm:$0xf] }
 0x1cc   :  { %2975 = vst.msk [vmem:[#allocation3 + $0x28] sm:$0xf] %vm2964_vm12, %v2793_v46  ;;  %v3954_v3 = vpop.permute.xlu2 %3953  ;;  %v1070_v34 = vor.u32 %v1068_v5, %v1067_v21  ;;  %v1309_v45 = vsel %vm10284_vm11, %v1067_v21, 0  ;;  %v567_v17 = vmul.f32 %v11198_v2, %v446_v61  ;;  %v2302_v46 = vshll.u32 %v11246_v58, 16  ;;  %v3726_v61 = vld [vmem:[#allocation2 + $0x88] sm:$0xf] }
 0x1cd   :  { %3651 = vst.msk [vmem:[#allocation3 + $0x28] sm:$0xf] %vm3640_vm13, %v11071_v57  ;;  %v3854_v23 = vpop.permute.xlu0 %3853  ;;  %v2243_v57 = vsel %vm10215_vm5, %v2238_v44, %v2242_v18  ;;  %v1433_v51 = vunpack.c.l.b16 %v1309_v45  ;;  %v905_v5 = vunpack.c.l.b16 %v762_v13  ;;  %v2282_v21 = vshrl.u32 %v1939_v63, 16 }
 0x1ce   :  { %4036 = vst.msk [vmem:[#allocation3 + $0x28] sm:$0xf] %vm4025_vm14, %v3854_v23  ;;  %v1277_v7 = vsel %vm10284_vm11, 0, %v1070_v34  ;;  %v635_v36 = vadd.f32 %v11218_v28, %v567_v17  ;;  %v3727_v23 = vld [vmem:[#allocation2 + $0x90] sm:$0xf]  ;;  %v11268_v45 = vrot.slane %v2302_v46, 5 }
 0x1cf   :  { %v1431_v54 = vunpack.c.l.b16 %v1277_v7  ;;  %v1432_v4 = vunpack.c.h.b16 %v1277_v7  ;;  %v1529_v11 = vpack.c.b16 %v1433_v51, %v1433_v51  ;;  %v3062_v34 = vld [vmem:[#allocation2 + $0x84] sm:$0xe]  ;;  %v2274_v51 = vrot.slane %v2272_v19, 5 }
 0x1d0   :  { %v699_v12 = vmax.f32 %v635_v36, 0.0  ;;  %v2284_v17 = vrot.slane %v2282_v21, 4  ;;  %v9716_v14 = vrot.slane %v3062_v34, 9  ;;  %v3725_v36 = vld [vmem:[#allocation2 + $0x84] sm:$0xf] }
 0x1d1   :  { %2810 = vrot.lane.b32.xlu1 %v2243_v57, %s10107_s30  ;;  %v1527_v62 = vpack.c.b16 %v1431_v54, %v1431_v54  ;;  %v1528_v55 = vpack.c.b16 %v1432_v4, %v1432_v4  ;;  %1722 = vst.msk [vmem:[#allocation2 + $0xb0] sm:$0x1] %vm801_vm2, %v1529_v11  ;;  %v1940_v54 = vld [vmem:[#allocation2 + $0x8c] sm:$0x1]  ;;  %v3067_v34 = vld [vmem:[#allocation2 + $0x98] sm:$0x1] }
 0x1d2   :  { %2812 = vrot.lane.b32.xlu2 %v2257_v1, %s10107_s30  ;;  %v763_v44 = vpack.c.bf16 %v699_v12, %v699_v12  ;;  %v1802_v12 = vld [vmem:[#allocation2 + $0x94] sm:$0xf]  ;;  %v2288_v46 = vshll.u32 %v1940_v54, 16 }
 0x1d3   :  { %v3569_v53 = vpop.permute.xlu1 %3568  ;;  %3494 = vrot.lane.b32.xlu0 %v3307_v15, %s10108_s13  ;;  %1720 = vst.msk [vmem:[#allocation2 + $0xa8] sm:$0xf] %vm798_vm1, %v1527_v62  ;;  %v449_v30 = vpop.f32.mrf.mxu0  ;;  %v2275_v62 = vor.u32 %v2274_v51, %v2271_v37  ;;  %v3310_v37 = vrot.slane %v11297_v16, 5  ;;  %v3729_v16 = vld [vmem:[#allocation2 + $0x9c] sm:$0xf] }
 0x1d4   :  { %3701 = vst.msk [vmem:[#allocation3 + $0xf0] sm:$0xf] %vm3640_vm13, %v3569_v53  ;;  %v11252_v6 = vpop.permute.xlu2 %4976  ;;  %v568_v18 = vmul.f32 %v11198_v2, %v449_v30  ;;  %v906_v38 = vunpack.c.l.b16 %v763_v44 }
 0x1d5   :  { %4086 = vst.msk [vmem:[#allocation3 + $0xf0] sm:$0xf] %vm4025_vm14, %v3954_v3  ;;  %v3956_v8 = vpop.permute.xlu0 %3955  ;;  %v2299_v3 = vor.u32 %v2298_v27, %v2295_v50  ;;  %v1801_v50 = vld [vmem:[#allocation2 + $0x90] sm:$0xf]  ;;  %v2276_v52 = vrot.slane %v2275_v62, 4 }
 0x1d6   :  { %1721 = vst.msk [vmem:[#allocation2 + $0xac] sm:$0xf] %vm798_vm1, %v1528_v55  ;;  %v636_v22 = vadd.f32 %v11218_v28, %v568_v18  ;;  %9696 = vmatmul.msk.bf16.gmra.mxu0 %vm268_vm0, %v10024_v56  ;;  %v955_v9 = vpack.c.b16 %v906_v38, %v905_v5  ;;  %v2285_v55 = vor.u32 %v2284_v17, %v11272_v60  ;;  %v10025_v17 = vld [vmem:[%s14425_s0 + $0xc0] sm:$0xff] }
 0x1d7   :  { %v2300_v57 = vrot.slane %v2299_v3, 4  ;;  %1865 = vst.msk [vmem:[#allocation3 + $0x60] sm:$0xf] %vm798_vm1, %v1801_v50 }
 0x1d8   :  { %v1072_v15 = vshrl.u32 %v955_v9, 16  ;;  %v1075_v49 = vshll.u32 %v955_v9, 16  ;;  %v700_v7 = vmax.f32 %v636_v22, 0.0  ;;  %1866 = vst.msk [vmem:[#allocation3 + $0x64] sm:$0xf] %vm798_vm1, %v1802_v12  ;;  %v2286_v19 = vrot.slane %v2285_v55, 4 }
 0x1d9   :  { %3490 = vrot.lane.b32.xlu1 %v3300_v43, %s10108_s13  ;;  %v1946_v55 = vld [vmem:[#allocation2 + $0xa4] sm:$0x1] }
 0x1da   :  { %3875 = vrot.lane.b32.xlu2 %v3726_v61, %s10109_s23  ;;  %v1074_v53 = vrot.slane %v1072_v15, 7  ;;  %v764_v0 = vpack.c.bf16 %v700_v7, %v700_v7  ;;  %v11314_v15 = vld [vmem:[#allocation2 + $0xa0] sm:$0xf]  ;;  %v1805_v24 = vld [vmem:[#allocation2 + $0xa8] sm:$0xf] }
 0x1db   :  { %v2895_v26 = vpop.permute.xlu1 %2894  ;;  %3877 = vrot.lane.b32.xlu0 %v3727_v23, %s10109_s23  ;;  %v451_v4 = vpop.f32.mrf.mxu0  ;;  %v1945_v23 = vld [vmem:[#allocation2 + $0xa0] sm:$0xf]  ;;  %1869 = vst.msk [vmem:[#allocation3 + $0x70] sm:$0xf] %vm798_vm1, %v1805_v24 }
 0x1dc   :  { %3026 = vst.msk [vmem:[#allocation3 + $0xf4] sm:$0xf] %vm2964_vm12, %v2895_v26  ;;  %v2897_v47 = vpop.permute.xlu2 %2896  ;;  %v569_v13 = vmul.f32 %v11198_v2, %v451_v4  ;;  %v1077_v11 = vor.u32 %v1075_v49, %v1074_v53  ;;  %v1310_v27 = vsel %vm10284_vm11, %v1074_v53, 0  ;;  %v907_v40 = vunpack.c.l.b16 %v764_v0  ;;  %v1803_v0 = vld [vmem:[#allocation2 + $0x9c] sm:$0xf] }
 0x1dd   :  { %3702 = vst.msk [vmem:[#allocation3 + $0xf4] sm:$0xf] %vm3640_vm13, %v11155_v31  ;;  %v2797_v1 = vpop.permute.xlu0 %2796  ;;  %v2305_v31 = vsel %vm10215_vm5, %v2300_v57, %v11268_v45  ;;  %v1436_v43 = vunpack.c.l.b16 %v1310_v27  ;;  %v2290_v26 = vrot.slane %v2288_v46, 5  ;;  %v3068_v57 = vld [vmem:[#allocation2 + $0x9c] sm:$0xe]  ;;  %v2326_v49 = vshll.u32 %v1945_v23, 16 }
 0x1de   :  { %4087 = vst.msk [vmem:[#allocation3 + $0xf4] sm:$0xf] %vm4025_vm14, %v3956_v8  ;;  %v637_v63 = vadd.f32 %v11218_v28, %v569_v13  ;;  %v3304_v8 = vsel %vm10227_vm8, %v9716_v14, %v3303_v10  ;;  %v1278_v5 = vsel %vm10284_vm11, 0, %v1077_v11  ;;  %v2330_v7 = vshrl.u32 %v1945_v23, 16 }
 0x1df   :  { %3027 = vst.msk [vmem:[#allocation3 + $0xf8] sm:$0xf] %vm2964_vm12, %v2897_v47  ;;  %v1434_v18 = vunpack.c.l.b16 %v1278_v5  ;;  %v1435_v10 = vunpack.c.h.b16 %v1278_v5  ;;  %v1532_v56 = vpack.c.b16 %v1436_v43, %v1436_v43  ;;  %v2281_v47 = vsel %vm10215_vm5, %v2276_v52, %v11272_v60  ;;  %v1804_v43 = vld [vmem:[#allocation2 + $0xa0] sm:$0xf] }
 0x1e0   :  { %2977 = vst.msk [vmem:[#allocation3 + $0x30] sm:$0xf] %vm2964_vm12, %v2797_v1  ;;  %v701_v44 = vmax.f32 %v637_v63, 0.0  ;;  %v3730_v1 = vld [vmem:[#allocation2 + $0xa0] sm:$0xf]  ;;  %v2291_v4 = vsel %vm10215_vm5, %v2286_v19, %v2290_v26  ;;  %v3312_v60 = vrot.slane %v3310_v37, 4 }
 0x1e1   :  { %3873 = vrot.lane.b32.xlu1 %v3725_v36, %s10109_s23  ;;  %v1530_v22 = vpack.c.b16 %v1434_v18, %v1434_v18  ;;  %v1531_v61 = vpack.c.b16 %v1435_v10, %v1435_v10  ;;  %1725 = vst.msk [vmem:[#allocation2 + $0xbc] sm:$0x1] %vm801_vm2, %v1532_v56  ;;  %v3313_v53 = vrot.slane %v3067_v34, 5  ;;  %v9718_v50 = vrot.slane %v3068_v57, 9  ;;  %v3728_v56 = vld [vmem:[#allocation2 + $0x94] sm:$0xf] }
 0x1e2   :  { %3492 = vrot.lane.b32.xlu2 %v3304_v8, %s10108_s13  ;;  %v765_v21 = vpack.c.bf16 %v701_v44, %v701_v44  ;;  %v3317_v36 = vrot.slane %v11314_v15, 5  ;;  %v11328_v11 = vrot.slane %v2326_v49, 5  ;;  %v2332_v27 = vrot.slane %v2330_v7, 4  ;;  %1867 = vst.msk [vmem:[#allocation3 + $0x68] sm:$0xf] %vm798_vm1, %v1803_v0 }
 0x1e3   :  { %v3856_v30 = vpop.permute.xlu1 %3855  ;;  %2820 = vrot.lane.b32.xlu0 %v2305_v31, %s10107_s30  ;;  %v454_v9 = vpop.f32.mrf.mxu0  ;;  %1723 = vst.msk [vmem:[#allocation2 + $0xb4] sm:$0xf] %vm798_vm1, %v1530_v22  ;;  %v2306_v44 = vshrl.u32 %v11246_v58, 16  ;;  %v3314_v52 = vsel %vm10227_vm8, %v3312_v60, %v3313_v53 }
 0x1e4   :  { %4037 = vst.msk [vmem:[#allocation3 + $0x2c] sm:$0xf] %vm4025_vm14, %v3856_v30  ;;  %v3858_v3 = vpop.permute.xlu2 %3857  ;;  %v908_v51 = vunpack.c.l.b16 %v765_v21  ;;  %v1944_v30 = vld [vmem:[#allocation2 + $0x9c] sm:$0xf]  ;;  %v2333_v19 = vor.u32 %v2332_v27, %v11328_v11  ;;  %v3065_v21 = vld [vmem:[#allocation2 + $0x90] sm:$0xe] }
 0x1e5   :  { %5158 = vst.msk [vmem:[#allocation3 + $0x2c] sm:$0xf] %vm5146_vm15, %v11252_v6  ;;  %v3573_v38 = vpop.permute.xlu0 %3572  ;;  %v570_v6 = vmul.f32 %v11198_v2, %v454_v9  ;;  %v2317_v22 = vshrl.u32 %v1944_v30, 16  ;;  %v2308_v49 = vrot.slane %v2306_v44, 4  ;;  %v4113_v27 = vld [vmem:[#allocation2 + $0x68] sm:$0x1] }
 0x1e6   :  { %3703 = vst.msk [vmem:[#allocation3 + $0xf8] sm:$0xf] %vm3640_vm13, %v3573_v38  ;;  %v956_v14 = vpack.c.b16 %v908_v51, %v907_v40  ;;  %9697 = vmatmul.msk.bf16.gmra.mxu0 %vm268_vm0, %v10025_v17  ;;  %v2336_v40 = vshll.u32 %v1946_v55, 16  ;;  %v9717_v17 = vrot.slane %v3065_v21, 9  ;;  %vm5819_vm0 = vcmask 191648  }
 0x1e7   :  { %1724 = vst.msk [vmem:[#allocation2 + $0xb8] sm:$0xf] %vm798_vm1, %v1531_v61  ;;  %v638_v54 = vadd.f32 %v11218_v28, %v570_v6  ;;  %v2320_v61 = vshll.u32 %v1944_v30, 16  ;;  %v1943_v6 = vld [vmem:[#allocation2 + $0x98] sm:$0x1]  ;;  %v2319_v60 = vrot.slane %v2317_v22, 4 }
 0x1e8   :  { %v1079_v31 = vshrl.u32 %v956_v14, 16  ;;  %v1082_v62 = vshll.u32 %v956_v14, 16  ;;  %1868 = vst.msk [vmem:[#allocation3 + $0x6c] sm:$0xf] %vm798_vm1, %v1804_v43 }
 0x1e9   :  { %2816 = vrot.lane.b32.xlu1 %v2281_v47, %s10107_s30  ;;  %v702_v8 = vmax.f32 %v638_v54, 0.0  ;;  %v2334_v54 = vrot.slane %v2333_v19, 4 }
 0x1ea   :  { %2818 = vrot.lane.b32.xlu2 %v2291_v4, %s10107_s30  ;;  %v1081_v12 = vrot.slane %v1079_v31, 7  ;;  %v2338_v4 = vrot.slane %v2336_v40, 5  ;;  %v2322_v31 = vrot.slane %v2320_v61, 5  ;;  %v11380_v61 = vld [vmem:[#allocation2 + $0xac] sm:$0xf] }
 0x1eb   :  { %v3473_v13 = vpop.permute.xlu1 %3472  ;;  %3883 = vrot.lane.b32.xlu0 %v3730_v1, %s10109_s23  ;;  %v456_v5 = vpop.f32.mrf.mxu0  ;;  %v766_v38 = vpack.c.bf16 %v702_v8, %v702_v8  ;;  %v2312_v8 = vshll.u32 %v1943_v6, 16 }
 0x1ec   :  { %3653 = vst.msk [vmem:[#allocation3 + $0x30] sm:$0xf] %vm3640_vm13, %v3473_v13  ;;  %v11331_v63 = vpop.permute.xlu2 %3959  ;;  %v1084_v18 = vor.u32 %v1082_v62, %v1081_v12  ;;  %v1311_v10 = vsel %vm10284_vm11, %v1081_v12, 0  ;;  %v571_v58 = vmul.f32 %v11198_v2, %v456_v5  ;;  %v2309_v12 = vor.u32 %v2308_v49, %v11268_v45 }
 0x1ed   :  { %4038 = vst.msk [vmem:[#allocation3 + $0x30] sm:$0xf] %vm4025_vm14, %v3858_v3  ;;  %v2899_v46 = vpop.permute.xlu0 %2898  ;;  %v3318_v3 = vsel %vm10227_vm8, %v9718_v50, %v3317_v36  ;;  %v1439_v9 = vunpack.c.l.b16 %v1311_v10  ;;  %v909_v50 = vunpack.c.l.b16 %v766_v38  ;;  %v4374_v5 = vshll.u32 %v4113_v27, 16 }
 0x1ee   :  { %3028 = vst.msk [vmem:[#allocation3 + $0xfc] sm:$0xf] %vm2964_vm12, %v2899_v46  ;;  %v1279_v23 = vsel %vm10284_vm11, 0, %v1084_v18  ;;  %v639_v57 = vadd.f32 %v11218_v28, %v571_v58  ;;  %v2339_v46 = vsel %vm10215_vm5, %v2334_v54, %v2338_v4  ;;  %v2310_v45 = vrot.slane %v2309_v12, 4  ;;  %v1950_v12 = vld [vmem:[#allocation2 + $0xb4] sm:$0xf] }
 0x1ef   :  { %v1437_v26 = vunpack.c.l.b16 %v1279_v23  ;;  %v1438_v34 = vunpack.c.h.b16 %v1279_v23  ;;  %v1535_v13 = vpack.c.b16 %v1439_v9, %v1439_v9  ;;  %v2314_v18 = vrot.slane %v2312_v8, 5 }
 0x1f0   :  { %v703_v7 = vmax.f32 %v639_v57, 0.0  ;;  %v4372_v58 = vrot.slane %v4371_v33, 4  ;;  %v4376_v21 = vrot.slane %v4374_v5, 5 }
 0x1f1   :  { %3879 = vrot.lane.b32.xlu1 %v3728_v56, %s10109_s23  ;;  %v1533_v47 = vpack.c.b16 %v1437_v26, %v1437_v26  ;;  %v1534_v14 = vpack.c.b16 %v1438_v34, %v1438_v34  ;;  %1728 = vst.msk [vmem:[#allocation2 + $0xc8] sm:$0x1] %vm801_vm2, %v1535_v13  ;;  %v1806_v34 = vld [vmem:[#allocation2 + $0xac] sm:$0xf]  ;;  %v2315_v9 = vsel %vm10215_vm5, %v2310_v45, %v2314_v18  ;;  %v2368_v45 = vshll.u32 %v1950_v12, 16 }
 0x1f2   :  { %3498 = vrot.lane.b32.xlu2 %v3314_v52, %s10108_s13  ;;  %v767_v62 = vpack.c.bf16 %v703_v7, %v703_v7  ;;  %1870 = vst.msk [vmem:[#allocation3 + $0x74] sm:$0xf] %vm798_vm1, %v1806_v34 }
 0x1f3   :  { %v2799_v51 = vpop.permute.xlu1 %2798  ;;  %3500 = vrot.lane.b32.xlu0 %v3318_v3, %s10108_s13  ;;  %v459_v55 = vpop.f32.mrf.mxu0  ;;  %1726 = vst.msk [vmem:[#allocation2 + $0xc0] sm:$0xf] %vm798_vm1, %v1533_v47  ;;  %v4377_v47 = vsel %vm10215_vm5, %v4372_v58, %v4376_v21 }
 0x1f4   :  { %2978 = vst.msk [vmem:[#allocation3 + $0x34] sm:$0xf] %vm2964_vm12, %v2799_v51  ;;  %v2801_v1 = vpop.permute.xlu2 %2800  ;;  %v572_v0 = vmul.f32 %v11198_v2, %v459_v55  ;;  %v910_v43 = vunpack.c.l.b16 %v767_v62 }
 0x1f5   :  { %3654 = vst.msk [vmem:[#allocation3 + $0x34] sm:$0xf] %vm3640_vm13, %v11186_v59  ;;  %v3860_v53 = vpop.permute.xlu0 %3859  ;;  %v3311_v59 = vsel %vm10227_vm8, %v9717_v17, %v3310_v37  ;;  %v2323_v37 = vor.u32 %v2322_v31, %v2319_v60  ;;  %v1947_v31 = vld [vmem:[#allocation2 + $0xa8] sm:$0xf] }
 0x1f6   :  { %2979 = vst.msk [vmem:[#allocation3 + $0x38] sm:$0xf] %vm2964_vm12, %v2801_v1  ;;  %v640_v30 = vadd.f32 %v11218_v28, %v572_v0  ;;  %v957_v44 = vpack.c.b16 %v910_v43, %v909_v50  ;;  %v3324_v1 = vrot.slane %v11380_v61, 5  ;;  %v3320_v50 = vrot.slane %v3070_v29, 5 }
 0x1f7   :  { %4039 = vst.msk [vmem:[#allocation3 + $0x34] sm:$0xf] %vm4025_vm14, %v3860_v53  ;;  %v2324_v23 = vrot.slane %v2323_v37, 4  ;;  %v3073_v53 = vld [vmem:[#allocation2 + $0xb0] sm:$0x1] }
 0x1f8   :  { %1727 = vst.msk [vmem:[#allocation2 + $0xc4] sm:$0xf] %vm798_vm1, %v1534_v14  ;;  %v1086_v10 = vshrl.u32 %v957_v44, 16  ;;  %v1089_v56 = vshll.u32 %v957_v44, 16  ;;  %v704_v19 = vmax.f32 %v640_v30, 0.0  ;;  %v3326_v43 = vrot.slane %v3324_v1, 4 }
 0x1f9   :  { %3496 = vrot.lane.b32.xlu1 %v3311_v59, %s10108_s13  ;;  %v2329_v49 = vsel %vm10215_vm5, %v2324_v23, %v11328_v11  ;;  %v3319_v11 = vrot.slane %v3317_v36, 4  ;;  %v3327_v15 = vrot.slane %v3073_v53, 5  ;;  %v3071_v36 = vld [vmem:[#allocation2 + $0xa8] sm:$0xe]  ;;  %v1948_v30 = vld [vmem:[#allocation2 + $0xac] sm:$0xf] }
 0x1fa   :  { %3881 = vrot.lane.b32.xlu2 %v3729_v16, %s10109_s23  ;;  %v1088_v38 = vrot.slane %v1086_v10, 7  ;;  %v768_v6 = vpack.c.bf16 %v704_v19, %v704_v19  ;;  %v2344_v16 = vshll.u32 %v1947_v31, 16  ;;  %v2350_v58 = vshll.u32 %v1948_v30, 16 }
 0x1fb   :  { %v4975_v52 = vpop.permute.xlu1 %4974  ;;  %2826 = vrot.lane.b32.xlu0 %v2339_v46, %s10107_s30  ;;  %v461_v22 = vpop.f32.mrf.mxu0  ;;  %v3321_v44 = vsel %vm10227_vm8, %v3319_v11, %v3320_v50  ;;  %v3328_v19 = vsel %vm10227_vm8, %v3326_v43, %v3327_v15  ;;  %v2354_v21 = vshrl.u32 %v1948_v30, 16 }
 0x1fc   :  { %5157 = vst.msk [vmem:[#allocation3 + $0x28] sm:$0xf] %vm5146_vm15, %v4975_v52  ;;  %v11374_v3 = vpop.permute.xlu2 %3863  ;;  %v573_v26 = vmul.f32 %v11198_v2, %v461_v22  ;;  %v1091_v57 = vor.u32 %v1089_v56, %v1088_v38  ;;  %v1312_v51 = vsel %vm10284_vm11, %v1088_v38, 0  ;;  %v911_v0 = vunpack.c.l.b16 %v768_v6  ;;  %v3732_v56 = vld [vmem:[#allocation2 + $0xac] sm:$0xf] }
 0x1fd   :  { %v3477_v40 = vpop.permute.xlu0 %3476  ;;  %v1442_v33 = vunpack.c.l.b16 %v1312_v51  ;;  %v2365_v52 = vshrl.u32 %v1950_v12, 16  ;;  %v2346_v22 = vrot.slane %v2344_v16, 5  ;;  %v2370_v51 = vrot.slane %v2368_v45, 5  ;;  %v1807_v6 = vld [vmem:[#allocation2 + $0xb4] sm:$0xf] }
 0x1fe   :  { %3655 = vst.msk [vmem:[#allocation3 + $0x38] sm:$0xf] %vm3640_vm13, %v3477_v40  ;;  %v641_v17 = vadd.f32 %v11218_v28, %v573_v26  ;;  %v1280_v7 = vsel %vm10284_vm11, 0, %v1091_v57  ;;  %v9719_v40 = vrot.slane %v3071_v36, 9  ;;  %v4115_v45 = vld [vmem:[#allocation2 + $0x70] sm:$0xf] }
 0x1ff   :  { %v1440_v54 = vunpack.c.l.b16 %v1280_v7  ;;  %v1441_v4 = vunpack.c.h.b16 %v1280_v7  ;;  %v1538_v60 = vpack.c.b16 %v1442_v33, %v1442_v33  ;;  %v2367_v57 = vrot.slane %v2365_v52, 4  ;;  %1871 = vst.msk [vmem:[#allocation3 + $0x78] sm:$0xf] %vm798_vm1, %v1807_v6 }
 0x200   :  { %v705_v13 = vmax.f32 %v641_v17, 0.0  ;;  %v3325_v53 = vsel %vm10227_vm8, %v9719_v40, %v3324_v1 }
 0x201   :  { %2822 = vrot.lane.b32.xlu1 %v2315_v9, %s10107_s30  ;;  %v1536_v55 = vpack.c.b16 %v1440_v54, %v1440_v54  ;;  %v1537_v27 = vpack.c.b16 %v1441_v4, %v1441_v4  ;;  %1731 = vst.msk [vmem:[#allocation2 + $0xec] sm:$0x1] %vm801_vm2, %v1538_v60  ;;  %v1949_v9 = vld [vmem:[#allocation2 + $0xb0] sm:$0x1]  ;;  %v3731_v54 = vld [vmem:[#allocation2 + $0xa8] sm:$0xf] }
 0x202   :  { %2824 = vrot.lane.b32.xlu2 %v2329_v49, %s10107_s30  ;;  %v769_v59 = vpack.c.bf16 %v705_v13, %v705_v13  ;;  %v2356_v49 = vrot.slane %v2354_v21, 4  ;;  %v2360_v50 = vshll.u32 %v1949_v9, 16  ;;  %v4117_v21 = vld [vmem:[#allocation2 + $0x78] sm:$0xf] }
 0x203   :  { %v3575_v14 = vpop.permute.xlu1 %3574  ;;  %4984 = vrot.lane.b32.xlu0 %v4377_v47, %s10110_s24  ;;  %v464_v46 = vpop.f32.mrf.mxu0  ;;  %1729 = vst.msk [vmem:[#allocation2 + $0xe4] sm:$0xf] %vm798_vm1, %v1536_v55  ;;  %v2352_v47 = vrot.slane %v2350_v58, 5  ;;  %v3733_v55 = vld [vmem:[#allocation2 + $0xb4] sm:$0xf] }
 0x204   :  { %3704 = vst.msk [vmem:[#allocation3 + $0xfc] sm:$0xf] %vm3640_vm13, %v3575_v14  ;;  %v11406_v62 = vpop.permute.xlu2 %3480  ;;  %v912_v5 = vunpack.c.l.b16 %v769_v59  ;;  %v574_v37 = vmul.f32 %v11198_v2, %v464_v46  ;;  %v1808_v14 = vld [vmem:[#allocation2 + $0xb8] sm:$0xf] }
 0x205   :  { %4089 = vst.msk [vmem:[#allocation3 + $0xfc] sm:$0xf] %vm4025_vm14, %v11331_v63  ;;  %v2803_v8 = vpop.permute.xlu0 %2802  ;;  %v2341_v63 = vshrl.u32 %v1947_v31, 16  ;;  %v11435_v31 = vld [vmem:[#allocation2 + $0xb8] sm:$0xf]  ;;  %v2357_v43 = vor.u32 %v2356_v49, %v2352_v47 }
 0x206   :  { %2980 = vst.msk [vmem:[#allocation3 + $0x3c] sm:$0xf] %vm2964_vm12, %v2803_v8  ;;  %v958_v18 = vpack.c.b16 %v912_v5, %v911_v0  ;;  %v642_v10 = vadd.f32 %v11218_v28, %v574_v37  ;;  %v2371_v0 = vor.u32 %v2370_v51, %v2367_v57  ;;  %v2374_v36 = vshll.u32 %v11435_v31, 16 }
 0x207   :  { %1730 = vst.msk [vmem:[#allocation2 + $0xe8] sm:$0xf] %vm798_vm1, %v1537_v27  ;;  %v2343_v38 = vrot.slane %v2341_v63, 4  ;;  %v4392_v51 = vshrl.u32 %v4115_v45, 16 }
 0x208   :  { %v1093_v26 = vshrl.u32 %v958_v18, 16  ;;  %v1096_v34 = vshll.u32 %v958_v18, 16  ;;  %v706_v33 = vmax.f32 %v642_v10, 0.0  ;;  %1872 = vst.msk [vmem:[#allocation3 + $0x7c] sm:$0xf] %vm798_vm1, %v1808_v14  ;;  %v2372_v37 = vrot.slane %v2371_v0, 4 }
 0x209   :  { %3502 = vrot.lane.b32.xlu1 %v3321_v44, %s10108_s13  ;;  %v2347_v13 = vor.u32 %v2346_v22, %v2343_v38  ;;  %v2358_v10 = vrot.slane %v2357_v43, 4  ;;  %v11454_v40 = vrot.slane %v2374_v36, 5  ;;  %v4388_v22 = vshll.u32 %v4115_v45, 16  ;;  %v3736_v36 = vld [vmem:[#allocation2 + $0xc4] sm:$0xf] }
 0x20a   :  { %3887 = vrot.lane.b32.xlu2 %v3732_v56, %s10109_s23  ;;  %v1095_v29 = vrot.slane %v1093_v26, 7  ;;  %v770_v59 = vpack.c.bf16 %v706_v33, %v706_v33  ;;  %v2362_v56 = vrot.slane %v2360_v50, 5  ;;  %v4403_v33 = vshrl.u32 %v4117_v21, 16 }
 0x20b   :  { %v3479_v23 = vpop.permute.xlu1 %3478  ;;  %3506 = vrot.lane.b32.xlu0 %v3328_v19, %s10108_s13  ;;  %v466_v7 = vpop.f32.mrf.mxu0  ;;  %v2348_v30 = vrot.slane %v2347_v13, 4  ;;  %v11451_v19 = vld [vmem:[#allocation2 + $0xb8] sm:$0xf]  ;;  %v11471_v14 = vrot.slane %v4388_v22, 5  ;;  %v4394_v13 = vrot.slane %v4392_v51, 4 }
 0x20c   :  { %3656 = vst.msk [vmem:[#allocation3 + $0x3c] sm:$0xf] %vm3640_vm13, %v3479_v23  ;;  %v2807_v24 = vpop.permute.xlu2 %2806  ;;  %v1098_v4 = vor.u32 %v1096_v34, %v1095_v29  ;;  %v1313_v60 = vsel %vm10284_vm11, %v1095_v29, 0  ;;  %v913_v44 = vunpack.c.l.b16 %v770_v59  ;;  %v2377_v34 = vsel %vm10215_vm5, %v2372_v37, %v11454_v40  ;;  %v3076_v29 = vld [vmem:[#allocation2 + $0xbc] sm:$0x1] }
 0x20d   :  { %4041 = vst.msk [vmem:[#allocation3 + $0x3c] sm:$0xf] %vm4025_vm14, %v11374_v3  ;;  %v4979_v17 = vpop.permute.xlu0 %4978  ;;  %v575_v3 = vmul.f32 %v11198_v2, %v466_v7  ;;  %v1445_v11 = vunpack.c.l.b16 %v1313_v60  ;;  %v2353_v38 = vsel %vm10215_vm5, %v2348_v30, %v2352_v47  ;;  %v3331_v9 = vrot.slane %v11451_v19, 5 }
 0x20e   :  { %2982 = vst.msk [vmem:[#allocation3 + $0x44] sm:$0xf] %vm2964_vm12, %v2807_v24  ;;  %v1281_v27 = vsel %vm10284_vm11, 0, %v1098_v4  ;;  %v2363_v24 = vsel %vm10215_vm5, %v2358_v10, %v2362_v56  ;;  %v4406_v7 = vshll.u32 %v4117_v21, 16  ;;  %v3334_v60 = vrot.slane %v3076_v29, 5 }
 0x20f   :  { %5159 = vst.msk [vmem:[#allocation3 + $0x30] sm:$0xf] %vm5146_vm15, %v4979_v17  ;;  %v643_v61 = vadd.f32 %v11218_v28, %v575_v3  ;;  %v1443_v1 = vunpack.c.l.b16 %v1281_v27  ;;  %v1444_v12 = vunpack.c.h.b16 %v1281_v27  ;;  %v1541_v8 = vpack.c.b16 %v1445_v11, %v1445_v11  ;;  %v4114_v56 = vld [vmem:[#allocation2 + $0x6c] sm:$0xf] }
 0x210   :  { %v3333_v4 = vrot.slane %v3331_v9, 4  ;;  %v4405_v50 = vrot.slane %v4403_v33, 4  ;;  %v2378_v27 = vshrl.u32 %v11435_v31, 16 }
 0x211   :  { %3885 = vrot.lane.b32.xlu1 %v3731_v54, %s10109_s23  ;;  %v707_v46 = vmax.f32 %v643_v61, 0.0  ;;  %v1539_v63 = vpack.c.b16 %v1443_v1, %v1443_v1  ;;  %v1540_v16 = vpack.c.b16 %v1444_v12, %v1444_v12  ;;  %1734 = vst.msk [vmem:[#allocation2 + $0xf8] sm:$0x1] %vm801_vm2, %v1541_v8  ;;  %v4408_v61 = vrot.slane %v4406_v7, 5  ;;  %v3734_v12 = vld [vmem:[#allocation2 + $0xb8] sm:$0xf] }
 0x212   :  { %3504 = vrot.lane.b32.xlu2 %v3325_v53, %s10108_s13  ;;  %v4116_v53 = vld [vmem:[#allocation2 + $0x74] sm:$0x1]  ;;  %v2380_v10 = vrot.slane %v2378_v27, 4 }
 0x213   :  { %v3958_v15 = vpop.permute.xlu1 %3957  ;;  %3889 = vrot.lane.b32.xlu0 %v3733_v55, %s10109_s23  ;;  %v771_v52 = vpack.c.bf16 %v707_v46, %v707_v46  ;;  %1732 = vst.msk [vmem:[#allocation2 + $0xf0] sm:$0xf] %vm798_vm1, %v1539_v63  ;;  %v469_v23 = vpop.f32.mrf.mxu0  ;;  %v4398_v8 = vshll.u32 %v4116_v53, 16  ;;  %v3074_v46 = vld [vmem:[#allocation2 + $0xb4] sm:$0xe]  ;;  %v4395_v63 = vor.u32 %v4394_v13, %v11471_v14 }
 0x214   :  { %4088 = vst.msk [vmem:[#allocation3 + $0xf8] sm:$0xf] %vm4025_vm14, %v3958_v15  ;;  %v11447_v5 = vpop.permute.xlu2 %4982  ;;  %v576_v26 = vmul.f32 %v11198_v2, %v469_v23  ;;  %v3335_v15 = vsel %vm10227_vm8, %v3333_v4, %v3334_v60  ;;  %v2381_v7 = vor.u32 %v2380_v10, %v11454_v40  ;;  %v11539_v10 = vld [vmem:[%s14426_s2] ss:$0 sm:$0xff] }
 0x215   :  { %v3483_v18 = vpop.permute.xlu0 %3482  ;;  %v914_v58 = vunpack.c.l.b16 %v771_v52  ;;  %1733 = vst.msk [vmem:[#allocation2 + $0xf4] sm:$0xf] %vm798_vm1, %v1540_v16  ;;  %v4400_v51 = vrot.slane %v4398_v8, 5 }
 0x216   :  { %3658 = vst.msk [vmem:[#allocation3 + $0x44] sm:$0xf] %vm3640_vm13, %v3483_v18  ;;  %v644_v6 = vadd.f32 %v11218_v28, %v576_v26  ;;  %v4409_v18 = vor.u32 %v4408_v61, %v4405_v50 }
 0x217   :  { %v959_v57 = vpack.c.b16 %v914_v58, %v913_v44  ;;  %v9720_v58 = vrot.slane %v3074_v46, 9 }
 0x218   :  { %v708_v55 = vmax.f32 %v644_v6, 0.0  ;;  %v4379_v6 = vshrl.u32 %v4114_v56, 16 }
 0x219   :  { %2828 = vrot.lane.b32.xlu1 %v2353_v38, %s10107_s30  ;;  %v1100_v47 = vshrl.u32 %v959_v57, 16  ;;  %v1103_v49 = vshll.u32 %v959_v57, 16  ;;  %v1952_v38 = vld [vmem:[#allocation2 + $0xbc] sm:$0x1]  ;;  %v4396_v57 = vrot.slane %v4395_v63, 4  ;;  %v3332_v60 = vsel %vm10227_vm8, %v9720_v58, %v3331_v9 }
 0x21a   :  { %2830 = vrot.lane.b32.xlu2 %v2363_v24, %s10107_s30  ;;  %v772_v44 = vpack.c.bf16 %v708_v55, %v708_v55  ;;  %v11497_v24 = vld [vmem:[#allocation2 + $0xe8] sm:$0xf]  ;;  %v4381_v55 = vrot.slane %v4379_v6, 4  ;;  %v1811_v58 = vld [vmem:[#allocation2 + $0xe4] sm:$0xf] }
 0x21b   :  { %v4981_v17 = vpop.permute.xlu1 %4980  ;;  %2832 = vrot.lane.b32.xlu0 %v2377_v34, %s10107_s30  ;;  %v1102_v3 = vrot.slane %v1100_v47, 7  ;;  %v471_v1 = vpop.f32.mrf.mxu0  ;;  %v3345_v53 = vrot.slane %v11497_v24, 5  ;;  %v4401_v40 = vsel %vm10215_vm5, %v4396_v57, %v4400_v51  ;;  %1875 = vst.msk [vmem:[#allocation3 + $0x88] sm:$0xf] %vm798_vm1, %v1811_v58  ;;  %v1956_v6 = vld [vmem:[#allocation2 + $0xe4] sm:$0xf] }
 0x21c   :  { %5160 = vst.msk [vmem:[#allocation3 + $0x34] sm:$0xf] %vm5146_vm15, %v4981_v17  ;;  %v11473_v54 = vpop.permute.xlu2 %3486  ;;  %v577_v43 = vmul.f32 %v11198_v2, %v471_v1  ;;  %v915_v33 = vunpack.c.l.b16 %v772_v44  ;;  %v4382_v17 = vshll.u32 %v4114_v56, 16 }
 0x21d   :  { %v11477_v11 = vpop.permute.xlu0 %3865  ;;  %v1105_v0 = vor.u32 %v1103_v49, %v1102_v3  ;;  %v1314_v59 = vsel %vm10284_vm11, %v1102_v3, 0  ;;  %v4410_v49 = vrot.slane %v4409_v18, 4  ;;  %v3082_v3 = vld [vmem:[#allocation2 + $0xec] sm:$0x1]  ;;  %v3347_v1 = vrot.slane %v3345_v53, 4 }
 0x21e   :  { %v1448_v30 = vunpack.c.l.b16 %v1314_v59  ;;  %v645_v52 = vadd.f32 %v11218_v28, %v577_v43  ;;  %v4384_v19 = vrot.slane %v4382_v17, 5  ;;  %v2382_v59 = vrot.slane %v2381_v7, 4  ;;  %v11554_v17 = vld [vmem:[%s14427_s3] ss:$0 sm:$0xff]  ;;  %s10111_s3 = smov 20  }
 0x21f   :  { %v1282_v31 = vsel %vm10284_vm11, 0, %v1105_v0  ;;  %v4415_v9 = vsel %vm10215_vm5, %v4410_v49, %v11171_v39 }
 0x220   :  { %v1446_v16 = vunpack.c.l.b16 %v1282_v31  ;;  %v1447_v37 = vunpack.c.h.b16 %v1282_v31  ;;  %v709_v22 = vmax.f32 %v645_v52, 0.0  ;;  %v1544_v34 = vpack.c.b16 %v1448_v30, %v1448_v30  ;;  %v1959_v31 = vld [vmem:[#allocation2 + $0xf0] sm:$0xf] }
 0x221   :  { %3891 = vrot.lane.b32.xlu1 %v3734_v12, %s10109_s23  ;;  %v4385_v63 = vor.u32 %v4384_v19, %v4381_v55  ;;  %v2440_v18 = vshll.u32 %v1959_v31, 16  ;;  %v2413_v19 = vshrl.u32 %v1956_v6, 16 }
 0x222   :  { %3510 = vrot.lane.b32.xlu2 %v3335_v15, %s10108_s13  ;;  %v1542_v21 = vpack.c.b16 %v1446_v16, %v1446_v16  ;;  %v1543_v23 = vpack.c.b16 %v1447_v37, %v1447_v37  ;;  %v773_v47 = vpack.c.bf16 %v709_v22, %v709_v22  ;;  %1737 = vst.msk [vmem:[#allocation2 + $0x104] sm:$0x1] %vm801_vm2, %v1544_v34 }
 0x223   :  { %v3862_v45 = vpop.permute.xlu1 %3861  ;;  %3895 = vrot.lane.b32.xlu0 %v3736_v36, %s10109_s23  ;;  %v474_v4 = vpop.f32.mrf.mxu0  ;;  %v4386_v22 = vrot.slane %v4385_v63, 4 }
 0x224   :  { %4040 = vst.msk [vmem:[#allocation3 + $0x38] sm:$0xf] %vm4025_vm14, %v3862_v45  ;;  %v11495_v26 = vpop.permute.xlu2 %3869  ;;  %v916_v13 = vunpack.c.l.b16 %v773_v47  ;;  %v578_v50 = vmul.f32 %v11198_v2, %v474_v4  ;;  %v3348_v2 = vrot.slane %v3082_v3, 5  ;;  %v2437_v45 = vshrl.u32 %v1959_v31, 16  ;;  %v1957_v3 = vld [vmem:[#allocation2 + $0xe8] sm:$0xf] }
 0x225   :  { %5161 = vst.msk [vmem:[#allocation3 + $0x38] sm:$0xf] %vm5146_vm15, %v11447_v5  ;;  %v2809_v29 = vpop.permute.xlu0 %2808  ;;  %v2384_v5 = vshll.u32 %v1952_v38, 16 }
 0x226   :  { %1735 = vst.msk [vmem:[#allocation2 + $0xfc] sm:$0xf] %vm798_vm1, %v1542_v21  ;;  %v960_v27 = vpack.c.b16 %v916_v13, %v915_v33  ;;  %v646_v43 = vadd.f32 %v11218_v28, %v578_v50  ;;  %v3349_v28 = vsel %vm10227_vm8, %v3347_v1, %v3348_v2  ;;  %v3735_v21 = vld [vmem:[#allocation2 + $0xc0] sm:$0xf]  ;;  %v11549_v33 = vld [vmem:[#allocation2 + $0xf4] sm:$0xf] }
 0x227   :  { %2983 = vst.msk [vmem:[#allocation3 + $0x48] sm:$0xf] %vm2964_vm12, %v2809_v29  ;;  %v2386_v61 = vrot.slane %v2384_v5, 5  ;;  %v2439_v4 = vrot.slane %v2437_v45, 4  ;;  %v2446_v55 = vshll.u32 %v11549_v33, 16 }
 0x228   :  { %1736 = vst.msk [vmem:[#allocation2 + $0x100] sm:$0xf] %vm798_vm1, %v1543_v23  ;;  %v1107_v12 = vshrl.u32 %v960_v27, 16  ;;  %v1110_v8 = vshll.u32 %v960_v27, 16  ;;  %v710_v44 = vmax.f32 %v646_v43, 0.0  ;;  %v2416_v27 = vshll.u32 %v1956_v6, 16 }
 0x229   :  { %3508 = vrot.lane.b32.xlu1 %v3332_v60, %s10108_s13  ;;  %v2387_v30 = vsel %vm10215_vm5, %v2382_v59, %v2386_v61  ;;  %v2442_v60 = vrot.slane %v2440_v18, 5  ;;  %v2422_v61 = vshll.u32 %v1957_v3, 16  ;;  %v3738_v43 = vld [vmem:[#allocation2 + $0xe8] sm:$0xf]  ;;  %v1813_v45 = vld [vmem:[#allocation2 + $0xf0] sm:$0xf] }
 0x22a   :  { %4988 = vrot.lane.b32.xlu2 %v4401_v40, %s10110_s24  ;;  %v1109_v46 = vrot.slane %v1107_v12, 7  ;;  %v774_v29 = vpack.c.bf16 %v710_v44, %v710_v44  ;;  %v4391_v40 = vsel %vm10215_vm5, %v4386_v22, %v11471_v14  ;;  %v3080_v12 = vld [vmem:[#allocation2 + $0xe4] sm:$0xe]  ;;  %v2426_v14 = vshrl.u32 %v1957_v3, 16  ;;  %1877 = vst.msk [vmem:[#allocation3 + $0x90] sm:$0xf] %vm798_vm1, %v1813_v45 }
 0x22b   :  { %v2805_v0 = vpop.permute.xlu1 %2804  ;;  %4990 = vrot.lane.b32.xlu0 %v4415_v9, %s10110_s24  ;;  %v476_v16 = vpop.f32.mrf.mxu0  ;;  %v3739_v9 = vld [vmem:[#allocation2 + $0xf0] sm:$0xf]  ;;  %v2418_v63 = vrot.slane %v2416_v27, 5 }
 0x22c   :  { %2981 = vst.msk [vmem:[#allocation3 + $0x40] sm:$0xf] %vm2964_vm12, %v2805_v0  ;;  %v2813_v15 = vpop.permute.xlu2 %2812  ;;  %v1112_v37 = vor.u32 %v1110_v8, %v1109_v46  ;;  %v579_v56 = vmul.f32 %v11539_v10, %v476_v16  ;;  %v917_v59 = vunpack.c.l.b16 %v774_v29  ;;  %v2443_v8 = vor.u32 %v2442_v60, %v2439_v4 }
 0x22d   :  { %3657 = vst.msk [vmem:[#allocation3 + $0x40] sm:$0xf] %vm3640_vm13, %v11406_v62  ;;  %v11526_v36 = vpop.permute.xlu0 %3871  ;;  %v1315_v62 = vsel %vm10284_vm11, %v1109_v46, 0  ;;  %v9722_v16 = vrot.slane %v3080_v12, 9 }
 0x22e   :  { %4042 = vst.msk [vmem:[#allocation3 + $0x40] sm:$0xf] %vm4025_vm14, %v11477_v11  ;;  %v1812_v11 = vld [vmem:[#allocation2 + $0xe8] sm:$0xf]  ;;  %v1451_v52 = vunpack.c.l.b16 %v1315_v62  ;;  %v1283_v23 = vsel %vm10284_vm11, 0, %v1112_v37  ;;  %v647_v47 = vadd.f32 %v11554_v17, %v579_v56  ;;  %v11575_v37 = vrot.slane %v2422_v61, 5 }
 0x22f   :  { %2985 = vst.msk [vmem:[#allocation3 + $0x50] sm:$0xf] %vm2964_vm12, %v2813_v15  ;;  %v1449_v34 = vunpack.c.l.b16 %v1283_v23  ;;  %v1450_v57 = vunpack.c.h.b16 %v1283_v23  ;;  %v3346_v29 = vsel %vm10227_vm8, %v9722_v16, %v3345_v53 }
 0x230   :  { %1876 = vst.msk [vmem:[#allocation3 + $0x8c] sm:$0xf] %vm798_vm1, %v1812_v11  ;;  %v1547_v51 = vpack.c.b16 %v1451_v52, %v1451_v52  ;;  %v711_v50 = vmax.f32 %v647_v47, 0.0  ;;  %v2444_v11 = vrot.slane %v2443_v8, 4  ;;  %v2428_v52 = vrot.slane %v2426_v14, 4 }
 0x231   :  { %2834 = vrot.lane.b32.xlu1 %v2387_v30, %s10107_s30  ;;  %v1545_v7 = vpack.c.b16 %v1449_v34, %v1449_v34  ;;  %v1546_v5 = vpack.c.b16 %v1450_v57, %v1450_v57  ;;  %v2415_v30 = vrot.slane %v2413_v19, 4 }
 0x232   :  { %3893 = vrot.lane.b32.xlu2 %v3735_v21, %s10109_s23  ;;  %1740 = vst.msk [vmem:[#allocation2 + $0x110] sm:$0x1] %vm801_vm2, %v1547_v51  ;;  %v775_v2 = vpack.c.bf16 %v711_v50, %v711_v50  ;;  %v1958_v21 = vld [vmem:[#allocation2 + $0xec] sm:$0x1]  ;;  %v2429_v47 = vor.u32 %v2428_v52, %v11575_v37  ;;  %v11620_v52 = vld [vmem:[#allocation2 + $0x100] sm:$0xf] }
 0x233   :  { %v3868_v38 = vpop.permute.xlu1 %3867  ;;  %3518 = vrot.lane.b32.xlu0 %v3349_v28, %s10108_s13  ;;  %v479_v0 = vpop.f32.mrf.mxu0  ;;  %1738 = vst.msk [vmem:[#allocation2 + $0x108] sm:$0xf] %vm798_vm1, %v1545_v7  ;;  %v11573_v28 = vrot.slane %v2446_v55, 5  ;;  %v2419_v22 = vor.u32 %v2418_v63, %v2415_v30  ;;  %v2432_v7 = vshll.u32 %v1958_v21, 16 }
 0x234   :  { %4043 = vst.msk [vmem:[#allocation3 + $0x44] sm:$0xf] %vm4025_vm14, %v3868_v38  ;;  %v11557_v49 = vpop.permute.xlu2 %3875  ;;  %v580_v1 = vmul.f32 %v11539_v10, %v479_v0  ;;  %v918_v15 = vunpack.c.l.b16 %v775_v2  ;;  %v3737_v38 = vld [vmem:[#allocation2 + $0xe4] sm:$0xf]  ;;  %v1963_v0 = vld [vmem:[#allocation2 + $0x100] sm:$0xf] }
 0x235   :  { %v3489_v13 = vpop.permute.xlu0 %3488  ;;  %1739 = vst.msk [vmem:[#allocation2 + $0x10c] sm:$0xf] %vm798_vm1, %v1546_v5  ;;  %v2449_v6 = vsel %vm10215_vm5, %v2444_v11, %v11573_v28  ;;  %v2420_v53 = vrot.slane %v2419_v22, 4  ;;  %v2434_v61 = vrot.slane %v2432_v7, 5  ;;  %v2470_v30 = vshll.u32 %v1963_v0, 16 }
 0x236   :  { %3661 = vst.msk [vmem:[#allocation3 + $0x50] sm:$0xf] %vm3640_vm13, %v3489_v13  ;;  %v648_v46 = vadd.f32 %v11554_v17, %v580_v1  ;;  %v961_v62 = vpack.c.b16 %v918_v15, %v917_v59  ;;  %v2430_v59 = vrot.slane %v2429_v47, 4  ;;  %v11606_v1 = vld [vmem:[#allocation2 + $0xf4] sm:$0xf]  ;;  %v2474_v63 = vshrl.u32 %v1963_v0, 16 }
 0x237   :  { %v3085_v15 = vld [vmem:[#allocation2 + $0xf8] sm:$0x1] }
 0x238   :  { %v1114_v56 = vshrl.u32 %v961_v62, 16  ;;  %v1117_v58 = vshll.u32 %v961_v62, 16  ;;  %v712_v23 = vmax.f32 %v648_v46, 0.0  ;;  %v3742_v62 = vld [vmem:[#allocation2 + $0x100] sm:$0xf]  ;;  %v2435_v11 = vsel %vm10215_vm5, %v2430_v59, %v2434_v61 }
 0x239   :  { %4986 = vrot.lane.b32.xlu1 %v4391_v40, %s10110_s24 }
 0x23a   :  { %3899 = vrot.lane.b32.xlu2 %v3738_v43, %s10109_s23  ;;  %v1116_v57 = vrot.slane %v1114_v56, 7  ;;  %v776_v60 = vpack.c.bf16 %v712_v23, %v712_v23  ;;  %v1964_v23 = vld [vmem:[#allocation2 + $0x104] sm:$0x1] }
 0x23b   :  { %v3485_v31 = vpop.permute.xlu1 %3484  ;;  %3901 = vrot.lane.b32.xlu0 %v3739_v9, %s10109_s23  ;;  %v481_v34 = vpop.f32.mrf.mxu0 }
 0x23c   :  { %3659 = vst.msk [vmem:[#allocation3 + $0x48] sm:$0xf] %vm3640_vm13, %v3485_v31  ;;  %v11579_v44 = vpop.permute.xlu2 %3492  ;;  %v581_v51 = vmul.f32 %v11539_v10, %v481_v34  ;;  %v1119_v5 = vor.u32 %v1117_v58, %v1116_v57  ;;  %v1316_v4 = vsel %vm10284_vm11, %v1116_v57, 0  ;;  %v919_v2 = vunpack.c.l.b16 %v776_v60 }
 0x23d   :  { %4044 = vst.msk [vmem:[#allocation3 + $0x48] sm:$0xf] %vm4025_vm14, %v11495_v26  ;;  %v2815_v18 = vpop.permute.xlu0 %2814  ;;  %v1814_v26 = vld [vmem:[#allocation2 + $0xf4] sm:$0xf]  ;;  %v1454_v13 = vunpack.c.l.b16 %v1316_v4  ;;  %v3355_v58 = vrot.slane %v3085_v15, 5  ;;  %v11627_v34 = vrot.slane %v2470_v30, 5 }
 0x23e   :  { %2986 = vst.msk [vmem:[#allocation3 + $0x54] sm:$0xf] %vm2964_vm12, %v2815_v18  ;;  %v649_v3 = vadd.f32 %v11554_v17, %v581_v51  ;;  %v1284_v50 = vsel %vm10284_vm11, 0, %v1119_v5  ;;  %v2476_v57 = vrot.slane %v2474_v63, 4  ;;  %v1962_v4 = vld [vmem:[#allocation2 + $0xfc] sm:$0xf] }
 0x23f   :  { %1878 = vst.msk [vmem:[#allocation3 + $0x94] sm:$0xf] %vm798_vm1, %v1814_v26  ;;  %v1452_v19 = vunpack.c.l.b16 %v1284_v50  ;;  %v1453_v27 = vunpack.c.h.b16 %v1284_v50  ;;  %v1550_v43 = vpack.c.b16 %v1454_v13, %v1454_v13  ;;  %v2450_v60 = vshrl.u32 %v11549_v33, 16 }
 0x240   :  { %v713_v40 = vmax.f32 %v649_v3, 0.0  ;;  %v3740_v3 = vld [vmem:[#allocation2 + $0xf4] sm:$0xf]  ;;  %v2461_v0 = vshrl.u32 %v1962_v4, 16 }
 0x241   :  { %3897 = vrot.lane.b32.xlu1 %v3737_v38, %s10109_s23  ;;  %v1548_v8 = vpack.c.b16 %v1452_v19, %v1452_v19  ;;  %v1549_v14 = vpack.c.b16 %v1453_v27, %v1453_v27  ;;  %1743 = vst.msk [vmem:[#allocation2 + $0x11c] sm:$0x1] %vm801_vm2, %v1550_v43  ;;  %v1816_v19 = vld [vmem:[#allocation2 + $0x100] sm:$0xf] }
 0x242   :  { %3516 = vrot.lane.b32.xlu2 %v3346_v29, %s10108_s13  ;;  %v777_v12 = vpack.c.bf16 %v713_v40, %v713_v40  ;;  %v3359_v29 = vrot.slane %v11620_v52, 5  ;;  %v2477_v40 = vor.u32 %v2476_v57, %v11627_v34  ;;  %1880 = vst.msk [vmem:[#allocation3 + $0x9c] sm:$0xf] %vm798_vm1, %v1816_v19 }
 0x243   :  { %v2811_v24 = vpop.permute.xlu1 %2810  ;;  %2844 = vrot.lane.b32.xlu0 %v2449_v6, %s10107_s30  ;;  %v484_v46 = vpop.f32.mrf.mxu0  ;;  %1741 = vst.msk [vmem:[#allocation2 + $0x114] sm:$0xf] %vm798_vm1, %v1548_v8  ;;  %v1815_v6 = vld [vmem:[#allocation2 + $0xfc] sm:$0xf] }
 0x244   :  { %2984 = vst.msk [vmem:[#allocation3 + $0x4c] sm:$0xf] %vm2964_vm12, %v2811_v24  ;;  %v2819_v55 = vpop.permute.xlu2 %2818  ;;  %v920_v31 = vunpack.c.l.b16 %v777_v12  ;;  %v582_v16 = vmul.f32 %v11539_v10, %v484_v46  ;;  %v2480_v24 = vshll.u32 %v1964_v23, 16  ;;  %v2478_v46 = vrot.slane %v2477_v40, 4 }
 0x245   :  { %3660 = vst.msk [vmem:[#allocation3 + $0x4c] sm:$0xf] %vm3640_vm13, %v11473_v54  ;;  %v3495_v9 = vpop.permute.xlu0 %3494  ;;  %v2425_v54 = vsel %vm10215_vm5, %v2420_v53, %v11575_v37  ;;  %v3352_v37 = vrot.slane %v11606_v1, 5  ;;  %v3083_v53 = vld [vmem:[#allocation2 + $0xf0] sm:$0xe] }
 0x246   :  { %4045 = vst.msk [vmem:[#allocation3 + $0x4c] sm:$0xf] %vm4025_vm14, %v11526_v36  ;;  %v3086_v36 = vld [vmem:[#allocation2 + $0xfc] sm:$0xe]  ;;  %v962_v45 = vpack.c.b16 %v920_v31, %v919_v2  ;;  %v650_v18 = vadd.f32 %v11554_v17, %v582_v16  ;;  %v9723_v8 = vrot.slane %v3083_v53, 9  ;;  %v2452_v31 = vrot.slane %v2450_v60, 4 }
 0x247   :  { %2988 = vst.msk [vmem:[#allocation3 + $0x5c] sm:$0xf] %vm2964_vm12, %v2819_v55  ;;  %v9724_v21 = vrot.slane %v3086_v36, 9  ;;  %v3354_v26 = vrot.slane %v3352_v37, 4  ;;  %v2482_v36 = vrot.slane %v2480_v24, 5 }
 0x248   :  { %3664 = vst.msk [vmem:[#allocation3 + $0x5c] sm:$0xf] %vm3640_vm13, %v3495_v9  ;;  %v1121_v38 = vshrl.u32 %v962_v45, 16  ;;  %v1124_v22 = vshll.u32 %v962_v45, 16  ;;  %v714_v5 = vmax.f32 %v650_v18, 0.0  ;;  %v2464_v9 = vshll.u32 %v1962_v4, 16 }
 0x249   :  { %2840 = vrot.lane.b32.xlu1 %v2425_v54, %s10107_s30  ;;  %1742 = vst.msk [vmem:[#allocation2 + $0x118] sm:$0xf] %vm798_vm1, %v1549_v14  ;;  %v3360_v33 = vsel %vm10227_vm8, %v9724_v21, %v3359_v29  ;;  %v3356_v59 = vsel %vm10227_vm8, %v3354_v26, %v3355_v58  ;;  %v2463_v45 = vrot.slane %v2461_v0, 4  ;;  %v11661_v21 = vld [vmem:[#allocation2 + $0x10c] sm:$0xf]  ;;  %v2453_v57 = vor.u32 %v2452_v31, %v11573_v28 }
 0x24a   :  { %2842 = vrot.lane.b32.xlu2 %v2435_v11, %s10107_s30  ;;  %v1123_v7 = vrot.slane %v1121_v38, 7  ;;  %1879 = vst.msk [vmem:[#allocation3 + $0x98] sm:$0xf] %vm798_vm1, %v1815_v6  ;;  %v778_v2 = vpack.c.bf16 %v714_v5, %v714_v5  ;;  %v1961_v11 = vld [vmem:[#allocation2 + $0xf8] sm:$0x1]  ;;  %v2466_v18 = vrot.slane %v2464_v9, 5  ;;  %v3353_v38 = vsel %vm10227_vm8, %v9723_v8, %v3352_v37 }
 0x24b   :  { %v3491_v56 = vpop.permute.xlu1 %3490  ;;  %3907 = vrot.lane.b32.xlu0 %v3742_v62, %s10109_s23  ;;  %v2456_v26 = vshll.u32 %v1961_v11, 16  ;;  %v2483_v5 = vsel %vm10215_vm5, %v2478_v46, %v2482_v36  ;;  %v3366_v4 = vrot.slane %v11661_v21, 5  ;;  %v3741_v37 = vld [vmem:[#allocation2 + $0xfc] sm:$0xf]  ;;  %v3091_v60 = vld [vmem:[#allocation2 + $0x110] sm:$0x1] }
 0x24c   :  { %3662 = vst.msk [vmem:[#allocation3 + $0x54] sm:$0xf] %vm3640_vm13, %v3491_v56  ;;  %v11631_v51 = vpop.permute.xlu2 %3498  ;;  %v1126_v13 = vor.u32 %v1124_v22, %v1123_v7  ;;  %v1317_v50 = vsel %vm10284_vm11, %v1123_v7, 0  ;;  %v921_v58 = vunpack.c.l.b16 %v778_v2  ;;  %v2467_v1 = vor.u32 %v2466_v18, %v2463_v45  ;;  %v1818_v8 = vld [vmem:[#allocation2 + $0x10c] sm:$0xf] }
 0x24d   :  { %4047 = vst.msk [vmem:[#allocation3 + $0x54] sm:$0xf] %vm4025_vm14, %v11557_v49  ;;  %v11636_v47 = vpop.permute.xlu0 %3877  ;;  %v486_v49 = vpop.f32.mrf.mxu0  ;;  %v1457_v27 = vunpack.c.l.b16 %v1317_v50  ;;  %v2458_v53 = vrot.slane %v2456_v26, 5  ;;  %v3368_v19 = vrot.slane %v3366_v4, 4  ;;  %v3361_v11 = vrot.slane %v3359_v29, 4 }
 0x24e   :  { %v583_v55 = vmul.f32 %v11539_v10, %v486_v49  ;;  %v1285_v61 = vsel %vm10284_vm11, 0, %v1126_v13  ;;  %v2454_v49 = vrot.slane %v2453_v57, 4  ;;  %1882 = vst.msk [vmem:[#allocation3 + $0xa4] sm:$0xf] %vm798_vm1, %v1818_v8 }
 0x24f   :  { %v1455_v14 = vunpack.c.l.b16 %v1285_v61  ;;  %v1456_v43 = vunpack.c.h.b16 %v1285_v61  ;;  %v1553_v15 = vpack.c.b16 %v1457_v27, %v1457_v27 }
 0x250   :  { %v651_v12 = vadd.f32 %v11554_v17, %v583_v55  ;;  %v2468_v55 = vrot.slane %v2467_v1, 4 }
 0x251   :  { %3903 = vrot.lane.b32.xlu1 %v3740_v3, %s10109_s23  ;;  %v1551_v16 = vpack.c.b16 %v1455_v14, %v1455_v14  ;;  %v1552_v62 = vpack.c.b16 %v1456_v43, %v1456_v43  ;;  %1746 = vst.msk [vmem:[#allocation2 + $0x128] sm:$0x1] %vm801_vm2, %v1553_v15  ;;  %v3088_v14 = vld [vmem:[#allocation2 + $0x104] sm:$0x1] }
 0x252   :  { %3522 = vrot.lane.b32.xlu2 %v3356_v59, %s10108_s13  ;;  %v715_v30 = vmax.f32 %v651_v12, 0.0  ;;  %v1968_v59 = vld [vmem:[#allocation2 + $0x114] sm:$0xf]  ;;  %v2473_v36 = vsel %vm10215_vm5, %v2468_v55, %v11627_v34  ;;  %v3362_v34 = vrot.slane %v3088_v14, 5 }
 0x253   :  { %v3874_v54 = vpop.permute.xlu1 %3873  ;;  %3524 = vrot.lane.b32.xlu0 %v3360_v33, %s10108_s13  ;;  %1744 = vst.msk [vmem:[#allocation2 + $0x120] sm:$0xf] %vm798_vm1, %v1551_v16  ;;  %v3369_v33 = vrot.slane %v3091_v60, 5  ;;  %v2509_v15 = vshrl.u32 %v1968_v59, 16  ;;  %v2512_v46 = vshll.u32 %v1968_v59, 16 }
 0x254   :  { %4046 = vst.msk [vmem:[#allocation3 + $0x50] sm:$0xf] %vm4025_vm14, %v3874_v54  ;;  %v11658_v63 = vpop.permute.xlu2 %3881  ;;  %v779_v23 = vpack.c.bf16 %v715_v30, %v715_v30 }
 0x255   :  { %v2821_v56 = vpop.permute.xlu0 %2820  ;;  %v489_v22 = vpop.f32.mrf.mxu0  ;;  %1745 = vst.msk [vmem:[#allocation2 + $0x124] sm:$0xf] %vm798_vm1, %v1552_v62  ;;  %v2511_v26 = vrot.slane %v2509_v15, 4 }
 0x256   :  { %2989 = vst.msk [vmem:[#allocation3 + $0x60] sm:$0xf] %vm2964_vm12, %v2821_v56  ;;  %v922_v6 = vunpack.c.l.b16 %v779_v23  ;;  %v584_v7 = vmul.f32 %v11539_v10, %v489_v22 }
 0x258   :  { %v963_v3 = vpack.c.b16 %v922_v6, %v921_v58  ;;  %v652_v24 = vadd.f32 %v11554_v17, %v584_v7  ;;  %v1965_v58 = vld [vmem:[#allocation2 + $0x108] sm:$0xf]  ;;  %v2514_v6 = vrot.slane %v2512_v46, 5  ;;  %v11712_v7 = vld [vmem:[#allocation2 + $0x118] sm:$0xf] }
 0x259   :  { %3520 = vrot.lane.b32.xlu1 %v3353_v38, %s10108_s13 }
 0x25a   :  { %3905 = vrot.lane.b32.xlu2 %v3741_v37, %s10109_s23  ;;  %v1128_v13 = vshrl.u32 %v963_v3, 16  ;;  %v1131_v50 = vshll.u32 %v963_v3, 16  ;;  %v716_v9 = vmax.f32 %v652_v24, 0.0  ;;  %v2485_v37 = vshrl.u32 %v1965_v58, 16  ;;  %v3745_v24 = vld [vmem:[#allocation2 + $0x114] sm:$0xf] }
 0x25b   :  { %v2817_v28 = vpop.permute.xlu1 %2816  ;;  %2850 = vrot.lane.b32.xlu0 %v2483_v5, %s10107_s30  ;;  %v1966_v5 = vld [vmem:[#allocation2 + $0x10c] sm:$0xf]  ;;  %v3363_v3 = vsel %vm10227_vm8, %v3361_v11, %v3362_v34 }
 0x25c   :  { %2987 = vst.msk [vmem:[#allocation3 + $0x58] sm:$0xf] %vm2964_vm12, %v2817_v28  ;;  %v2825_v40 = vpop.permute.xlu2 %2824  ;;  %v1130_v0 = vrot.slane %v1128_v13, 7  ;;  %v780_v30 = vpack.c.bf16 %v716_v9, %v716_v9  ;;  %v2488_v28 = vshll.u32 %v1965_v58, 16  ;;  %v2515_v13 = vor.u32 %v2514_v6, %v2511_v26  ;;  %v3089_v9 = vld [vmem:[#allocation2 + $0x108] sm:$0xe] }
 0x25d   :  { %3663 = vst.msk [vmem:[#allocation3 + $0x58] sm:$0xf] %vm3640_vm13, %v11579_v44  ;;  %v11686_v27 = vpop.permute.xlu0 %3883  ;;  %v491_v61 = vpop.f32.mrf.mxu0  ;;  %v2459_v44 = vsel %vm10215_vm5, %v2454_v49, %v2458_v53  ;;  %v2498_v55 = vshrl.u32 %v1966_v5, 16  ;;  %v2487_v59 = vrot.slane %v2485_v37, 4  ;;  %v9725_v46 = vrot.slane %v3089_v9, 9 }
 0x25e   :  { %4048 = vst.msk [vmem:[#allocation3 + $0x58] sm:$0xf] %vm4025_vm14, %v11636_v47  ;;  %v1133_v2 = vor.u32 %v1131_v50, %v1130_v0  ;;  %v1318_v12 = vsel %vm10284_vm11, %v1130_v0, 0  ;;  %v585_v54 = vmul.f32 %v11539_v10, %v491_v61  ;;  %v3370_v47 = vsel %vm10227_vm8, %v3368_v19, %v3369_v33  ;;  %v3744_v19 = vld [vmem:[#allocation2 + $0x10c] sm:$0xf] }
 0x25f   :  { %2991 = vst.msk [vmem:[#allocation3 + $0x68] sm:$0xf] %vm2964_vm12, %v2825_v40  ;;  %v1460_v43 = vunpack.c.l.b16 %v1318_v12  ;;  %v923_v29 = vunpack.c.l.b16 %v780_v30  ;;  %v2518_v50 = vshll.u32 %v11712_v7, 16  ;;  %v2494_v40 = vshll.u32 %v1966_v5, 16 }
 0x260   :  { %v1286_v31 = vsel %vm10284_vm11, 0, %v1133_v2  ;;  %v653_v16 = vadd.f32 %v11554_v17, %v585_v54  ;;  %v2490_v61 = vrot.slane %v2488_v28, 5  ;;  %v2516_v8 = vrot.slane %v2515_v13, 4 }
 0x261   :  { %2846 = vrot.lane.b32.xlu1 %v2459_v44, %s10107_s30  ;;  %v1458_v45 = vunpack.c.l.b16 %v1286_v31  ;;  %v1459_v18 = vunpack.c.h.b16 %v1286_v31  ;;  %v1556_v56 = vpack.c.b16 %v1460_v43, %v1460_v43  ;;  %v2496_v14 = vrot.slane %v2494_v40, 5  ;;  %v1967_v31 = vld [vmem:[#allocation2 + $0x110] sm:$0x1] }
 0x262   :  { %2848 = vrot.lane.b32.xlu2 %v2473_v36, %s10107_s30  ;;  %v717_v23 = vmax.f32 %v653_v16, 0.0  ;;  %v2500_v43 = vrot.slane %v2498_v55, 4  ;;  %v3743_v16 = vld [vmem:[#allocation2 + $0x108] sm:$0xf]  ;;  %v3367_v58 = vsel %vm10227_vm8, %v9725_v46, %v3366_v4  ;;  %v3095_v55 = vld [vmem:[#allocation2 + $0x120] sm:$0xe] }
 0x263   :  { %v3880_v62 = vpop.permute.xlu1 %3879  ;;  %3530 = vrot.lane.b32.xlu0 %v3370_v47, %s10108_s13  ;;  %v1554_v22 = vpack.c.b16 %v1458_v45, %v1458_v45  ;;  %v1555_v57 = vpack.c.b16 %v1459_v18, %v1459_v18  ;;  %1749 = vst.msk [vmem:[#allocation2 + $0x134] sm:$0x1] %vm801_vm2, %v1556_v56  ;;  %v11730_v47 = vrot.slane %v2518_v50, 5  ;;  %v3094_v50 = vld [vmem:[#allocation2 + $0x11c] sm:$0x1] }
 0x264   :  { %4049 = vst.msk [vmem:[#allocation3 + $0x5c] sm:$0xf] %vm4025_vm14, %v3880_v62  ;;  %v11709_v38 = vpop.permute.xlu2 %3887  ;;  %v781_v1 = vpack.c.bf16 %v717_v23, %v717_v23  ;;  %v2491_v62 = vor.u32 %v2490_v61, %v2487_v59  ;;  %v2501_v56 = vor.u32 %v2500_v43, %v2496_v14  ;;  %v1973_v46 = vld [vmem:[#allocation2 + $0x128] sm:$0x1] }
 0x265   :  { %v3501_v52 = vpop.permute.xlu0 %3500  ;;  %v494_v60 = vpop.f32.mrf.mxu0  ;;  %1747 = vst.msk [vmem:[#allocation2 + $0x12c] sm:$0xf] %vm798_vm1, %v1554_v22  ;;  %v2521_v18 = vsel %vm10215_vm5, %v2516_v8, %v11730_v47  ;;  %v2504_v22 = vshll.u32 %v1967_v31, 16  ;;  %v9727_v8 = vrot.slane %v3095_v55, 9 }
 0x266   :  { %3667 = vst.msk [vmem:[#allocation3 + $0x68] sm:$0xf] %vm3640_vm13, %v3501_v52  ;;  %v924_v49 = vunpack.c.l.b16 %v781_v1  ;;  %v586_v53 = vmul.f32 %v11539_v10, %v494_v60  ;;  %v2502_v37 = vrot.slane %v2501_v56, 4  ;;  %v11753_v60 = vld [vmem:[#allocation2 + $0x118] sm:$0xf] }
 0x267   :  { %1748 = vst.msk [vmem:[#allocation2 + $0x130] sm:$0xf] %vm798_vm1, %v1555_v57  ;;  %v1817_v57 = vld [vmem:[#allocation2 + $0x108] sm:$0xf]  ;;  %v2506_v28 = vrot.slane %v2504_v22, 5  ;;  %v3373_v40 = vrot.slane %v11753_v60, 5 }
 0x268   :  { %v964_v33 = vpack.c.b16 %v924_v49, %v923_v29  ;;  %v654_v12 = vadd.f32 %v11554_v17, %v586_v53  ;;  %1881 = vst.msk [vmem:[#allocation3 + $0xa0] sm:$0xf] %vm798_vm1, %v1817_v57  ;;  %v1972_v49 = vld [vmem:[#allocation2 + $0x124] sm:$0xf] }
 0x269   :  { %3526 = vrot.lane.b32.xlu1 %v3363_v3, %s10108_s13  ;;  %v2546_v9 = vshrl.u32 %v1972_v49, 16  ;;  %v2507_v59 = vsel %vm10215_vm5, %v2502_v37, %v2506_v28 }
 0x26a   :  { %3911 = vrot.lane.b32.xlu2 %v3744_v19, %s10109_s23  ;;  %v1135_v44 = vshrl.u32 %v964_v33, 16  ;;  %v1138_v2 = vshll.u32 %v964_v33, 16  ;;  %v718_v45 = vmax.f32 %v654_v12, 0.0  ;;  %v11764_v33 = vld [vmem:[#allocation2 + $0x124] sm:$0xf]  ;;  %v3375_v12 = vrot.slane %v3373_v40, 4 }
 0x26b   :  { %v3497_v0 = vpop.permute.xlu1 %3496  ;;  %3913 = vrot.lane.b32.xlu0 %v3745_v24, %s10109_s23  ;;  %v2548_v31 = vrot.slane %v2546_v9, 4  ;;  %v3100_v60 = vld [vmem:[#allocation2 + $0x134] sm:$0x1] }
 0x26c   :  { %3665 = vst.msk [vmem:[#allocation3 + $0x60] sm:$0xf] %vm3640_vm13, %v3497_v0  ;;  %v11728_v54 = vpop.permute.xlu2 %3504  ;;  %v1137_v36 = vrot.slane %v1135_v44, 7  ;;  %v782_v21 = vpack.c.bf16 %v718_v45, %v718_v45  ;;  %v2542_v0 = vshll.u32 %v1972_v49, 16  ;;  %v3746_v45 = vld [vmem:[#allocation2 + $0x118] sm:$0xf] }
 0x26d   :  { %4050 = vst.msk [vmem:[#allocation3 + $0x60] sm:$0xf] %vm4025_vm14, %v11658_v63  ;;  %v2827_v15 = vpop.permute.xlu0 %2826  ;;  %v496_v30 = vpop.f32.mrf.mxu0  ;;  %v1970_v49 = vld [vmem:[#allocation2 + $0x11c] sm:$0x1] }
 0x26e   :  { %2992 = vst.msk [vmem:[#allocation3 + $0x6c] sm:$0xf] %vm2964_vm12, %v2827_v15  ;;  %v1140_v11 = vor.u32 %v1138_v2, %v1137_v36  ;;  %v1319_v63 = vsel %vm10284_vm11, %v1137_v36, 0  ;;  %v587_v34 = vmul.f32 %v11539_v10, %v496_v30  ;;  %v2492_v10 = vrot.slane %v2491_v62, 4 }
 0x26f   :  { %v1463_v29 = vunpack.c.l.b16 %v1319_v63  ;;  %v925_v19 = vunpack.c.l.b16 %v782_v21  ;;  %v3376_v2 = vrot.slane %v3094_v50, 5  ;;  %v11780_v36 = vrot.slane %v2542_v0, 5  ;;  %v11801_v50 = vld [vmem:[#allocation2 + $0x130] sm:$0xf] }
 0x270   :  { %v1287_v23 = vsel %vm10284_vm11, 0, %v1140_v11  ;;  %v655_v4 = vadd.f32 %v11554_v17, %v587_v34  ;;  %v3748_v17 = vld [vmem:[#allocation2 + $0x124] sm:$0xf]  ;;  %v1971_v11 = vld [vmem:[#allocation2 + $0x120] sm:$0xf]  ;;  %v2522_v63 = vshrl.u32 %v11712_v7, 16 }
 0x271   :  { %3909 = vrot.lane.b32.xlu1 %v3743_v16, %s10109_s23  ;;  %v1461_v6 = vunpack.c.l.b16 %v1287_v23  ;;  %v1462_v52 = vunpack.c.h.b16 %v1287_v23  ;;  %v1559_v13 = vpack.c.b16 %v1463_v29, %v1463_v29  ;;  %v2549_v23 = vor.u32 %v2548_v31, %v11780_v36 }
 0x272   :  { %3528 = vrot.lane.b32.xlu2 %v3367_v58, %s10108_s13  ;;  %v719_v53 = vmax.f32 %v655_v4, 0.0  ;;  %v3092_v58 = vld [vmem:[#allocation2 + $0x114] sm:$0xe]  ;;  %v2533_v57 = vshrl.u32 %v1971_v11, 16  ;;  %v3387_v9 = vrot.slane %v11801_v50, 5 }
 0x273   :  { %v2823_v26 = vpop.permute.xlu1 %2822  ;;  %2856 = vrot.lane.b32.xlu0 %v2521_v18, %s10107_s30  ;;  %v1557_v1 = vpack.c.b16 %v1461_v6, %v1461_v6  ;;  %v1558_v24 = vpack.c.b16 %v1462_v52, %v1462_v52  ;;  %1752 = vst.msk [vmem:[#allocation2 + $0x140] sm:$0x1] %vm801_vm2, %v1559_v13  ;;  %v2552_v18 = vshll.u32 %v1973_v46, 16  ;;  %v1819_v6 = vld [vmem:[#allocation2 + $0x114] sm:$0xf]  ;;  %v2550_v37 = vrot.slane %v2549_v23, 4 }
 0x274   :  { %2990 = vst.msk [vmem:[#allocation3 + $0x64] sm:$0xf] %vm2964_vm12, %v2823_v26  ;;  %v2831_v5 = vpop.permute.xlu2 %2830  ;;  %v2536_v26 = vshll.u32 %v1971_v11, 16  ;;  %v2535_v13 = vrot.slane %v2533_v57, 4 }
 0x275   :  { %3666 = vst.msk [vmem:[#allocation3 + $0x64] sm:$0xf] %vm3640_vm13, %v11631_v51  ;;  %v4985_v3 = vpop.permute.xlu0 %4984  ;;  %v2497_v51 = vsel %vm10215_vm5, %v2492_v10, %v2496_v14  ;;  %v3380_v14 = vrot.slane %v11764_v33, 5  ;;  %v9726_v10 = vrot.slane %v3092_v58, 9  ;;  %v2554_v21 = vrot.slane %v2552_v18, 5 }
 0x276   :  { %4051 = vst.msk [vmem:[#allocation3 + $0x64] sm:$0xf] %vm4025_vm14, %v11686_v27  ;;  %v783_v27 = vpack.c.bf16 %v719_v53, %v719_v53  ;;  %v1821_v18 = vld [vmem:[#allocation2 + $0x120] sm:$0xf] }
 0x277   :  { %5162 = vst.msk [vmem:[#allocation3 + $0x3c] sm:$0xf] %vm5146_vm15, %v4985_v3  ;;  %v3381_v34 = vsel %vm10227_vm8, %v9727_v8, %v3380_v14  ;;  %v3374_v41 = vsel %vm10227_vm8, %v9726_v10, %v3373_v40  ;;  %v2555_v0 = vsel %vm10215_vm5, %v2550_v37, %v2554_v21  ;;  %v3390_v8 = vrot.slane %v3100_v60, 5  ;;  %v3750_v21 = vld [vmem:[#allocation2 + $0x130] sm:$0xf] }
 0x278   :  { %2994 = vst.msk [vmem:[#allocation3 + $0x74] sm:$0xf] %vm2964_vm12, %v2831_v5  ;;  %v926_v61 = vunpack.c.l.b16 %v783_v27  ;;  %v2524_v5 = vrot.slane %v2522_v63, 4  ;;  %v2528_v27 = vshll.u32 %v1970_v49, 16  ;;  %v3098_v37 = vld [vmem:[#allocation2 + $0x12c] sm:$0xe] }
 0x279   :  { %2852 = vrot.lane.b32.xlu1 %v2497_v51, %s10107_s30  ;;  %1750 = vst.msk [vmem:[#allocation2 + $0x138] sm:$0xf] %vm798_vm1, %v1557_v1 }
 0x27a   :  { %1751 = vst.msk [vmem:[#allocation2 + $0x13c] sm:$0xf] %vm798_vm1, %v1558_v24  ;;  %2854 = vrot.lane.b32.xlu2 %v2507_v59, %s10107_s30  ;;  %v965_v43 = vpack.c.b16 %v926_v61, %v925_v19  ;;  %v2525_v19 = vor.u32 %v2524_v5, %v11730_v47  ;;  %v3747_v59 = vld [vmem:[#allocation2 + $0x120] sm:$0xf]  ;;  %v2530_v40 = vrot.slane %v2528_v27, 5 }
 0x27b   :  { %v3503_v44 = vpop.permute.xlu1 %3502  ;;  %3919 = vrot.lane.b32.xlu0 %v3748_v17, %s10109_s23  ;;  %1883 = vst.msk [vmem:[#allocation3 + $0xa8] sm:$0xf] %vm798_vm1, %v1819_v6  ;;  %v2538_v17 = vrot.slane %v2536_v26, 5  ;;  %v1975_v26 = vld [vmem:[#allocation2 + $0x130] sm:$0xf] }
 0x27c   :  { %3668 = vst.msk [vmem:[#allocation3 + $0x6c] sm:$0xf] %vm3640_vm13, %v3503_v44  ;;  %v11778_v15 = vpop.permute.xlu2 %3510  ;;  %v1142_v16 = vshrl.u32 %v965_v43, 16  ;;  %v1145_v62 = vshll.u32 %v965_v43, 16  ;;  %v2526_v47 = vrot.slane %v2525_v19, 4  ;;  %v2570_v5 = vshrl.u32 %v1975_v26, 16 }
 0x27d   :  { %4053 = vst.msk [vmem:[#allocation3 + $0x6c] sm:$0xf] %vm4025_vm14, %v11709_v38  ;;  %v3507_v30 = vpop.permute.xlu0 %3506  ;;  %v3377_v38 = vsel %vm10227_vm8, %v3375_v12, %v3376_v2  ;;  %v2539_v61 = vor.u32 %v2538_v17, %v2535_v13  ;;  %v3389_v12 = vrot.slane %v3387_v9, 4  ;;  %v1820_v43 = vld [vmem:[#allocation2 + $0x118] sm:$0xf] }
 0x27e   :  { %3670 = vst.msk [vmem:[#allocation3 + $0x74] sm:$0xf] %vm3640_vm13, %v3507_v30  ;;  %v1144_v56 = vrot.slane %v1142_v16, 7  ;;  %v2531_v16 = vsel %vm10215_vm5, %v2526_v47, %v2530_v40  ;;  %v1976_v19 = vld [vmem:[#allocation2 + $0x134] sm:$0x1] }
 0x27f   :  { %v2540_v31 = vrot.slane %v2539_v61, 4  ;;  %1884 = vst.msk [vmem:[#allocation3 + $0xac] sm:$0xf] %vm798_vm1, %v1820_v43  ;;  %v3749_v27 = vld [vmem:[#allocation2 + $0x12c] sm:$0xf] }
 0x280   :  { %v1147_v22 = vor.u32 %v1145_v62, %v1144_v56  ;;  %v1320_v7 = vsel %vm10284_vm11, %v1144_v56, 0  ;;  %v1977_v30 = vld [vmem:[#allocation2 + $0x138] sm:$0xf]  ;;  %v3097_v62 = vld [vmem:[#allocation2 + $0x128] sm:$0x1] }
 0x281   :  { %3915 = vrot.lane.b32.xlu1 %v3746_v45, %s10109_s23  ;;  %v1466_v29 = vunpack.c.l.b16 %v1320_v7  ;;  %v2581_v11 = vshrl.u32 %v1977_v30, 16  ;;  %v2584_v63 = vshll.u32 %v1977_v30, 16  ;;  %v2545_v45 = vsel %vm10215_vm5, %v2540_v31, %v11780_v36  ;;  %1885 = vst.msk [vmem:[#allocation3 + $0xb0] sm:$0xf] %vm798_vm1, %v1821_v18  ;;  %v1974_v7 = vld [vmem:[#allocation2 + $0x12c] sm:$0xf] }
 0x282   :  { %3534 = vrot.lane.b32.xlu2 %v3377_v38, %s10108_s13  ;;  %v1288_v4 = vsel %vm10284_vm11, 0, %v1147_v22  ;;  %v3382_v38 = vrot.slane %v3380_v14, 4  ;;  %v11840_v36 = vld [vmem:[#allocation2 + $0x13c] sm:$0xf]  ;;  %v3751_v33 = vld [vmem:[#allocation2 + $0x138] sm:$0xf] }
 0x283   :  { %v3886_v52 = vpop.permute.xlu1 %3885  ;;  %3536 = vrot.lane.b32.xlu0 %v3381_v34, %s10108_s13  ;;  %v1464_v3 = vunpack.c.l.b16 %v1288_v4  ;;  %v1465_v24 = vunpack.c.h.b16 %v1288_v4  ;;  %v1562_v28 = vpack.c.b16 %v1466_v29, %v1466_v29  ;;  %v3383_v34 = vrot.slane %v3097_v62, 5 }
 0x284   :  { %4052 = vst.msk [vmem:[#allocation3 + $0x68] sm:$0xf] %vm4025_vm14, %v3886_v52  ;;  %v4989_v1 = vpop.permute.xlu2 %4988  ;;  %v2583_v23 = vrot.slane %v2581_v11, 4  ;;  %v2586_v22 = vrot.slane %v2584_v63, 5  ;;  %v2557_v52 = vshrl.u32 %v1974_v7, 16  ;;  %v2560_v29 = vshll.u32 %v1974_v7, 16 }
 0x285   :  { %5164 = vst.msk [vmem:[#allocation3 + $0x44] sm:$0xf] %vm5146_vm15, %v4989_v1  ;;  %v3890_v53 = vpop.permute.xlu0 %3889  ;;  %v1560_v51 = vpack.c.b16 %v1464_v3, %v1464_v3  ;;  %v1561_v55 = vpack.c.b16 %v1465_v24, %v1465_v24  ;;  %v3384_v6 = vsel %vm10227_vm8, %v3382_v38, %v3383_v34  ;;  %v2590_v10 = vshll.u32 %v11840_v36, 16  ;;  %v3103_v38 = vld [vmem:[#allocation2 + $0x140] sm:$0x1] }
 0x286   :  { %1755 = vst.msk [vmem:[#allocation2 + $0x14c] sm:$0x1] %vm801_vm2, %v1562_v28  ;;  %v2587_v14 = vor.u32 %v2586_v22, %v2583_v23  ;;  %v2566_v4 = vshll.u32 %v1975_v26, 16  ;;  %v2559_v3 = vrot.slane %v2557_v52, 4  ;;  %v2562_v24 = vrot.slane %v2560_v29, 5 }
 0x287   :  { %1753 = vst.msk [vmem:[#allocation2 + $0x144] sm:$0xf] %vm798_vm1, %v1560_v51  ;;  %v1822_v28 = vld [vmem:[#allocation2 + $0x124] sm:$0xf]  ;;  %v11852_v13 = vrot.slane %v2590_v10, 5  ;;  %v9728_v51 = vrot.slane %v3098_v37, 9 }
 0x288   :  { %1754 = vst.msk [vmem:[#allocation2 + $0x148] sm:$0xf] %vm798_vm1, %v1561_v55  ;;  %v2568_v55 = vrot.slane %v2566_v4, 5  ;;  %v1824_v23 = vld [vmem:[#allocation2 + $0x130] sm:$0xf]  ;;  %vm6205_vm2 = vcmask 224448  }
 0x289   :  { %3532 = vrot.lane.b32.xlu1 %v3374_v41, %s10108_s13  ;;  %v2572_v41 = vrot.slane %v2570_v5, 4  ;;  %1886 = vst.msk [vmem:[#allocation3 + $0xb4] sm:$0xf] %vm798_vm1, %v1822_v28  ;;  %v3388_v61 = vsel %vm10227_vm8, %v9728_v51, %v3387_v9  ;;  %v4121_v10 = vld [vmem:[#allocation2 + $0x88] sm:$0xf] }
 0x28a   :  { %3917 = vrot.lane.b32.xlu2 %v3747_v59, %s10109_s23  ;;  %1888 = vst.msk [vmem:[#allocation3 + $0xbc] sm:$0xf] %vm798_vm1, %v1824_v23  ;;  %v3752_v4 = vld [vmem:[#allocation2 + $0x13c] sm:$0xf] }
 0x28b   :  { %v2829_v44 = vpop.permute.xlu1 %2828  ;;  %2862 = vrot.lane.b32.xlu0 %v2555_v0, %s10107_s30  ;;  %v2563_v0 = vor.u32 %v2562_v24, %v2559_v3  ;;  %v2573_v60 = vor.u32 %v2572_v41, %v2568_v55 }
 0x28c   :  { %2993 = vst.msk [vmem:[#allocation3 + $0x70] sm:$0xf] %vm2964_vm12, %v2829_v44  ;;  %v3894_v2 = vpop.permute.xlu2 %3893  ;;  %v2576_v44 = vshll.u32 %v1976_v19, 16 }
 0x28d   :  { %3669 = vst.msk [vmem:[#allocation3 + $0x70] sm:$0xf] %vm3640_vm13, %v11728_v54  ;;  %v2833_v46 = vpop.permute.xlu0 %2832  ;;  %v3391_v54 = vsel %vm10227_vm8, %v3389_v12, %v3390_v8  ;;  %v2564_v40 = vrot.slane %v2563_v0, 4  ;;  %v4120_v12 = vld [vmem:[#allocation2 + $0x84] sm:$0xf]  ;;  %v2574_v8 = vrot.slane %v2573_v60, 4 }
 0x28e   :  { %4054 = vst.msk [vmem:[#allocation3 + $0x70] sm:$0xf] %vm4025_vm14, %v3890_v53  ;;  %v2588_v53 = vrot.slane %v2587_v14, 4  ;;  %v2578_v9 = vrot.slane %v2576_v44, 5  ;;  %v4427_v30 = vshrl.u32 %v4120_v12, 16 }
 0x28f   :  { %2995 = vst.msk [vmem:[#allocation3 + $0x78] sm:$0xf] %vm2964_vm12, %v2833_v46  ;;  %v1981_v43 = vld [vmem:[#allocation2 + $0x148] sm:$0xf]  ;;  %v3102_v46 = vld [vmem:[#allocation2 + $0x13c] sm:$0xf]  ;;  %v2569_v31 = vsel %vm10215_vm5, %v2564_v40, %v2568_v55 }
 0x290   :  { %v2593_v59 = vsel %vm10215_vm5, %v2588_v53, %v11852_v13  ;;  %v2618_v62 = vshrl.u32 %v1981_v43, 16  ;;  %v2579_v11 = vsel %vm10215_vm5, %v2574_v8, %v2578_v9  ;;  %v3394_v63 = vrot.slane %v3102_v46, 5  ;;  %v11877_v18 = vld [vmem:[#allocation2 + $0x148] sm:$0xf]  ;;  %v1982_v14 = vld [vmem:[#allocation2 + $0x14c] sm:$0x1] }
 0x291   :  { %2858 = vrot.lane.b32.xlu1 %v2531_v16, %s10107_s30  ;;  %v4430_v16 = vshll.u32 %v4120_v12, 16  ;;  %v4429_v34 = vrot.slane %v4427_v30, 4  ;;  %v2624_v24 = vshll.u32 %v1982_v14, 16  ;;  %v4436_v53 = vshll.u32 %v4121_v10, 16  ;;  %v1980_v40 = vld [vmem:[#allocation2 + $0x144] sm:$0xf] }
 0x292   :  { %2860 = vrot.lane.b32.xlu2 %v2545_v45, %s10107_s30  ;;  %v3104_v45 = vld [vmem:[#allocation2 + $0x144] sm:$0xe]  ;;  %v3396_v29 = vrot.slane %v3394_v63, 4  ;;  %v4122_v8 = vld [vmem:[#allocation2 + $0x8c] sm:$0x1]  ;;  %v2605_v30 = vshrl.u32 %v1980_v40, 16 }
 0x293   :  { %v3892_v56 = vpop.permute.xlu1 %3891  ;;  %3542 = vrot.lane.b32.xlu0 %v3391_v54, %s10108_s13  ;;  %v2614_v54 = vshll.u32 %v1981_v43, 16  ;;  %v9730_v7 = vrot.slane %v3104_v45, 9  ;;  %v2626_v0 = vrot.slane %v2624_v24, 5  ;;  %v4438_v60 = vrot.slane %v4436_v53, 5  ;;  %v4130_v14 = vld [vmem:[#allocation2 + $0xac] sm:$0xf] }
 0x294   :  { %4055 = vst.msk [vmem:[#allocation3 + $0x74] sm:$0xf] %vm4025_vm14, %v3892_v56  ;;  %v3900_v58 = vpop.permute.xlu2 %3899  ;;  %v4512_v53 = vshrl.u32 %v4130_v14, 16 }
 0x295   :  { %v3896_v57 = vpop.permute.xlu0 %3895  ;;  %4059 = vst.msk [vmem:[#allocation3 + $0x84] sm:$0xf] %vm4025_vm14, %v3900_v58  ;;  %v4432_v58 = vrot.slane %v4430_v16, 5  ;;  %v11885_v26 = vrot.slane %v2614_v54, 5  ;;  %v2608_v16 = vshll.u32 %v1980_v40, 16 }
 0x296   :  { %v4125_v40 = vld [vmem:[#allocation2 + $0x98] sm:$0x1]  ;;  %v4514_v39 = vrot.slane %v4512_v53, 4  ;;  %v11972_v53 = vld [vmem:[#allocation2 + $0xc4] sm:$0xf] }
 0x297   :  { %v4433_v37 = vor.u32 %v4432_v58, %v4429_v34 }
 0x299   :  { %3538 = vrot.lane.b32.xlu1 %v3384_v6, %s10108_s13  ;;  %v2620_v6 = vrot.slane %v2618_v62, 4  ;;  %v4434_v19 = vrot.slane %v4433_v37, 4 }
 0x29a   :  { %3923 = vrot.lane.b32.xlu2 %v3750_v21, %s10109_s23  ;;  %v2594_v21 = vshrl.u32 %v11840_v36, 16 }
 0x29b   :  { %v3509_v1 = vpop.permute.xlu1 %3508  ;;  %3925 = vrot.lane.b32.xlu0 %v3751_v33, %s10109_s23  ;;  %v3397_v33 = vrot.slane %v3103_v38, 5  ;;  %v2621_v3 = vor.u32 %v2620_v6, %v11885_v26  ;;  %v4439_v9 = vsel %vm10215_vm5, %v4434_v19, %v4438_v60  ;;  %v4124_v38 = vld [vmem:[#allocation2 + $0x94] sm:$0xf]  ;;  %v2610_v6 = vrot.slane %v2608_v16, 5 }
 0x29c   :  { %3671 = vst.msk [vmem:[#allocation3 + $0x78] sm:$0xf] %vm3640_vm13, %v3509_v1  ;;  %v11850_v49 = vpop.permute.xlu2 %3516  ;;  %v3101_v1 = vld [vmem:[#allocation2 + $0x138] sm:$0xe]  ;;  %v2596_v55 = vrot.slane %v2594_v21, 4 }
 0x29d   :  { %4056 = vst.msk [vmem:[#allocation3 + $0x78] sm:$0xf] %vm4025_vm14, %v3894_v2  ;;  %v4991_v17 = vpop.permute.xlu0 %4990  ;;  %v3398_v28 = vsel %vm10227_vm8, %v3396_v29, %v3397_v33  ;;  %v9729_v36 = vrot.slane %v3101_v1, 9  ;;  %v11924_v21 = vld [vmem:[#allocation2 + $0xa0] sm:$0xf] }
 0x29e   :  { %5165 = vst.msk [vmem:[#allocation3 + $0x48] sm:$0xf] %vm5146_vm15, %v4991_v17  ;;  %v4440_v17 = vshrl.u32 %v4121_v10, 16  ;;  %v2597_v12 = vor.u32 %v2596_v55, %v11852_v13  ;;  %v4446_v13 = vshll.u32 %v4122_v8, 16  ;;  %v4484_v55 = vshll.u32 %v11924_v21, 16 }
 0x29f   :  { %v4131_v8 = vld [vmem:[#allocation2 + $0xb0] sm:$0x1] }
 0x2a0   :  { %v4442_v44 = vrot.slane %v4440_v17, 4  ;;  %v4448_v33 = vrot.slane %v4446_v13, 5  ;;  %v4123_v17 = vld [vmem:[#allocation2 + $0x90] sm:$0xf] }
 0x2a1   :  { %3921 = vrot.lane.b32.xlu1 %v3749_v27, %s10109_s23  ;;  %v2622_v27 = vrot.slane %v2621_v3, 4  ;;  %v4508_v3 = vshll.u32 %v4130_v14, 16  ;;  %v4454_v25 = vshll.u32 %v4123_v17, 16 }
 0x2a2   :  { %3540 = vrot.lane.b32.xlu2 %v3388_v61, %s10108_s13  ;;  %v4443_v62 = vor.u32 %v4442_v44, %v4438_v60 }
 0x2a3   :  { %v2835_v47 = vpop.permute.xlu1 %2834  ;;  %2868 = vrot.lane.b32.xlu0 %v2593_v59, %s10107_s30  ;;  %v1979_v59 = vld [vmem:[#allocation2 + $0x140] sm:$0x1]  ;;  %v2627_v43 = vsel %vm10215_vm5, %v2622_v27, %v2626_v0 }
 0x2a4   :  { %2996 = vst.msk [vmem:[#allocation3 + $0x7c] sm:$0xf] %vm2964_vm12, %v2835_v47  ;;  %v2843_v2 = vpop.permute.xlu2 %2842  ;;  %v4126_v47 = vld [vmem:[#allocation2 + $0x9c] sm:$0xf]  ;;  %v4444_v29 = vrot.slane %v4443_v62, 4 }
 0x2a5   :  { %3672 = vst.msk [vmem:[#allocation3 + $0x7c] sm:$0xf] %vm3640_vm13, %v11778_v15  ;;  %v3519_v50 = vpop.permute.xlu0 %3518  ;;  %v3754_v15 = vld [vmem:[#allocation2 + $0x148] sm:$0xf]  ;;  %v4475_v46 = vshrl.u32 %v4126_v47, 16 }
 0x2a6   :  { %4057 = vst.msk [vmem:[#allocation3 + $0x7c] sm:$0xf] %vm4025_vm14, %v3896_v57  ;;  %v3401_v57 = vrot.slane %v11877_v18, 5 }
 0x2a7   :  { %3000 = vst.msk [vmem:[#allocation3 + $0x8c] sm:$0xf] %vm2964_vm12, %v2843_v2  ;;  %v3395_v2 = vsel %vm10227_vm8, %v9729_v36, %v3394_v63  ;;  %v4477_v58 = vrot.slane %v4475_v46, 4  ;;  %v3106_v46 = vld [vmem:[#allocation2 + $0x14c] sm:$0x1] }
 0x2a8   :  { %3676 = vst.msk [vmem:[#allocation3 + $0x8c] sm:$0xf] %vm3640_vm13, %v3519_v50  ;;  %v3402_v5 = vsel %vm10227_vm8, %v9730_v7, %v3401_v57  ;;  %v2600_v50 = vshll.u32 %v1979_v59, 16  ;;  %v2607_v7 = vrot.slane %v2605_v30, 4  ;;  %v4129_v59 = vld [vmem:[#allocation2 + $0xa8] sm:$0xf] }
 0x2a9   :  { %2864 = vrot.lane.b32.xlu1 %v2569_v31, %s10107_s30  ;;  %v4478_v31 = vshll.u32 %v4126_v47, 16  ;;  %v11939_v47 = vrot.slane %v4508_v3, 5  ;;  %v4470_v30 = vshll.u32 %v4125_v40, 16 }
 0x2aa   :  { %2866 = vrot.lane.b32.xlu2 %v2579_v11, %s10107_s30  ;;  %v2598_v11 = vrot.slane %v2597_v12, 4  ;;  %v2602_v63 = vrot.slane %v2600_v50, 5  ;;  %v2611_v37 = vor.u32 %v2610_v6, %v2607_v7  ;;  %v11944_v50 = vrot.slane %v4484_v55, 5 }
 0x2ab   :  { %v4987_v56 = vpop.permute.xlu1 %4986  ;;  %3931 = vrot.lane.b32.xlu0 %v3754_v15, %s10109_s23  ;;  %v1823_v15 = vld [vmem:[#allocation2 + $0x12c] sm:$0xf]  ;;  %v4480_v23 = vrot.slane %v4478_v31, 5  ;;  %v4488_v6 = vshrl.u32 %v11924_v21, 16  ;;  %v4139_v21 = vld [vmem:[#allocation2 + $0xe8] sm:$0xf] }
 0x2ac   :  { %5163 = vst.msk [vmem:[#allocation3 + $0x40] sm:$0xf] %vm5146_vm15, %v4987_v56  ;;  %v11882_v22 = vpop.permute.xlu2 %3522  ;;  %v4119_v56 = vld [vmem:[#allocation2 + $0x80] sm:$0x1]  ;;  %v2603_v10 = vsel %vm10215_vm5, %v2598_v11, %v2602_v63  ;;  %v2612_v44 = vrot.slane %v2611_v37, 4  ;;  %v4515_v11 = vor.u32 %v4514_v39, %v11939_v47  ;;  %v4518_v63 = vshll.u32 %v4131_v8, 16 }
 0x2ad   :  { %v3902_v52 = vpop.permute.xlu0 %3901  ;;  %1887 = vst.msk [vmem:[#allocation3 + $0xb8] sm:$0xf] %vm798_vm1, %v1823_v15  ;;  %v4481_v1 = vor.u32 %v4480_v23, %v4477_v58  ;;  %v3403_v58 = vrot.slane %v3401_v57, 4  ;;  %v3404_v23 = vrot.slane %v3106_v46, 5 }
 0x2ae   :  { %v2617_v15 = vsel %vm10215_vm5, %v2612_v44, %v11885_v26  ;;  %v4516_v18 = vrot.slane %v4515_v11, 4  ;;  %v4520_v57 = vrot.slane %v4518_v63, 5 }
 0x2af   :  { %v4482_v60 = vrot.slane %v4481_v1, 4 }
 0x2b0   :  { %v4521_v55 = vsel %vm10215_vm5, %v4516_v18, %v4520_v57  ;;  %v1827_v18 = vld [vmem:[#allocation2 + $0x144] sm:$0xf] }
 0x2b1   :  { %3927 = vrot.lane.b32.xlu1 %v3752_v4, %s10109_s23  ;;  %v4464_v4 = vshrl.u32 %v4124_v38, 16  ;;  %v4487_v16 = vsel %vm10215_vm5, %v4482_v60, %v11944_v50  ;;  %1891 = vst.msk [vmem:[#allocation3 + $0xc8] sm:$0xf] %vm798_vm1, %v1827_v18 }
 0x2b2   :  { %3546 = vrot.lane.b32.xlu2 %v3398_v28, %s10108_s13  ;;  %v4449_v28 = vsel %vm10215_vm5, %v4444_v29, %v4448_v33  ;;  %v4133_v33 = vld [vmem:[#allocation2 + $0xb8] sm:$0xf] }
 0x2b3   :  { %v3898_v51 = vpop.permute.xlu1 %3897  ;;  %3548 = vrot.lane.b32.xlu0 %v3402_v5, %s10108_s13  ;;  %v3753_v5 = vld [vmem:[#allocation2 + $0x144] sm:$0xf]  ;;  %v4466_v0 = vrot.slane %v4464_v4, 4  ;;  %v4532_v37 = vshll.u32 %v4133_v33, 16  ;;  %v4536_v3 = vshrl.u32 %v4133_v33, 16 }
 0x2b4   :  { %4058 = vst.msk [vmem:[#allocation3 + $0x80] sm:$0xf] %vm4025_vm14, %v3898_v51  ;;  %v11900_v41 = vpop.permute.xlu2 %3905  ;;  %v4420_v51 = vrot.slane %v4419_v48, 4  ;;  %v4135_v48 = vld [vmem:[#allocation2 + $0xc0] sm:$0xf] }
 0x2b5   :  { %v2845_v61 = vpop.permute.xlu0 %2844  ;;  %v4550_v62 = vshll.u32 %v4135_v48, 16  ;;  %v11979_v40 = vrot.slane %v4532_v37, 5 }
 0x2b6   :  { %3001 = vst.msk [vmem:[#allocation3 + $0x90] sm:$0xf] %vm2964_vm12, %v2845_v61 }
 0x2b7   :  { %v4552_v4 = vrot.slane %v4550_v62, 5 }
 0x2b9   :  { %3544 = vrot.lane.b32.xlu1 %v3395_v2, %s10108_s13  ;;  %v4451_v2 = vshrl.u32 %v4123_v17, 16 }
 0x2ba   :  { %4994 = vrot.lane.b32.xlu2 %v4439_v9, %s10110_s24  ;;  %v4499_v9 = vshrl.u32 %v4129_v59, 16 }
 0x2bb   :  { %v2841_v54 = vpop.permute.xlu1 %2840  ;;  %2874 = vrot.lane.b32.xlu0 %v2627_v43, %s10107_s30  ;;  %v4502_v43 = vshll.u32 %v4129_v59, 16  ;;  %v4580_v59 = vshll.u32 %v4139_v21, 16 }
 0x2bc   :  { %2999 = vst.msk [vmem:[#allocation3 + $0x88] sm:$0xf] %vm2964_vm12, %v2841_v54  ;;  %v2849_v45 = vpop.permute.xlu2 %2848  ;;  %v4547_v54 = vshrl.u32 %v4135_v48, 16  ;;  %v4501_v26 = vrot.slane %v4499_v9, 4 }
 0x2bd   :  { %3675 = vst.msk [vmem:[#allocation3 + $0x88] sm:$0xf] %vm3640_vm13, %v11850_v49  ;;  %v11918_v34 = vpop.permute.xlu0 %3907  ;;  %v4422_v49 = vshll.u32 %v4119_v56, 16  ;;  %v4456_v56 = vrot.slane %v4454_v25, 5  ;;  %v4504_v7 = vrot.slane %v4502_v43, 5  ;;  %v4556_v25 = vshll.u32 %v11972_v53, 16 }
 0x2be   :  { %4060 = vst.msk [vmem:[#allocation3 + $0x88] sm:$0xf] %vm4025_vm14, %v3902_v52  ;;  %v4460_v52 = vshll.u32 %v4124_v38, 16  ;;  %v1825_v38 = vld [vmem:[#allocation2 + $0x138] sm:$0xf] }
 0x2bf   :  { %3003 = vst.msk [vmem:[#allocation3 + $0x98] sm:$0xf] %vm2964_vm12, %v2849_v45  ;;  %v4424_v36 = vrot.slane %v4422_v49, 5  ;;  %v4453_v45 = vrot.slane %v4451_v2, 4  ;;  %v4472_v49 = vrot.slane %v4470_v30, 5  ;;  %v4505_v1 = vor.u32 %v4504_v7, %v4501_v26 }
 0x2c0   :  { %v11937_v27 = vrot.slane %v4460_v52, 5  ;;  %v4549_v52 = vrot.slane %v4547_v54, 4  ;;  %1889 = vst.msk [vmem:[#allocation3 + $0xc0] sm:$0xf] %vm798_vm1, %v1825_v38  ;;  %v4538_v2 = vrot.slane %v4536_v3, 4  ;;  %v11988_v30 = vrot.slane %v4580_v59, 5 }
 0x2c1   :  { %2870 = vrot.lane.b32.xlu1 %v2603_v10, %s10107_s30  ;;  %v4425_v12 = vsel %vm10215_vm5, %v4420_v51, %v4424_v36  ;;  %v4132_v51 = vld [vmem:[#allocation2 + $0xb4] sm:$0xf]  ;;  %v4506_v44 = vrot.slane %v4505_v1, 4  ;;  %v4140_v54 = vld [vmem:[#allocation2 + $0xec] sm:$0x1] }
 0x2c2   :  { %3929 = vrot.lane.b32.xlu2 %v3753_v5, %s10109_s23  ;;  %v4467_v31 = vor.u32 %v4466_v0, %v11937_v27  ;;  %v4457_v5 = vor.u32 %v4456_v56, %v4453_v45  ;;  %v4553_v17 = vor.u32 %v4552_v4, %v4549_v52  ;;  %v4128_v0 = vld [vmem:[#allocation2 + $0xa4] sm:$0x1]  ;;  %v4523_v8 = vshrl.u32 %v4132_v51, 16  ;;  %v4142_v4 = vld [vmem:[#allocation2 + $0xf4] sm:$0xf]  ;;  %s10114_s23 = smov 32  }
 0x2c3   :  { %v3904_v24 = vpop.permute.xlu1 %3903  ;;  %4996 = vrot.lane.b32.xlu0 %v4449_v28, %s10110_s24  ;;  %v4526_v46 = vshll.u32 %v4132_v51, 16  ;;  %v4511_v11 = vsel %vm10215_vm5, %v4506_v44, %v11939_v47  ;;  %v4560_v47 = vshrl.u32 %v11972_v53, 16  ;;  %v4148_v53 = vld [vmem:[#allocation2 + $0x10c] sm:$0xf] }
 0x2c4   :  { %4061 = vst.msk [vmem:[#allocation3 + $0x8c] sm:$0xf] %vm4025_vm14, %v3904_v24  ;;  %v11935_v19 = vpop.permute.xlu2 %3911  ;;  %v4468_v10 = vrot.slane %v4467_v31, 4  ;;  %v4490_v24 = vrot.slane %v4488_v6, 4  ;;  %v4458_v60 = vrot.slane %v4457_v5, 4  ;;  %v4554_v43 = vrot.slane %v4553_v17, 4 }
 0x2c5   :  { %v3525_v61 = vpop.permute.xlu0 %3524  ;;  %v4138_v31 = vld [vmem:[#allocation2 + $0xe4] sm:$0xf]  ;;  %v4525_v45 = vrot.slane %v4523_v8, 4  ;;  %v4590_v6 = vshll.u32 %v4140_v54, 16  ;;  %v4528_v33 = vrot.slane %v4526_v46, 5  ;;  %v4608_v17 = vshrl.u32 %v4142_v4, 16 }
 0x2c6   :  { %3679 = vst.msk [vmem:[#allocation3 + $0x98] sm:$0xf] %vm3640_vm13, %v3525_v61  ;;  %v4473_v28 = vsel %vm10215_vm5, %v4468_v10, %v4472_v49  ;;  %v4584_v61 = vshrl.u32 %v4139_v21, 16  ;;  %v4491_v48 = vor.u32 %v4490_v24, %v11944_v50  ;;  %v4463_v50 = vsel %vm10215_vm5, %v4458_v60, %v11937_v27  ;;  %v4147_v46 = vld [vmem:[#allocation2 + $0x108] sm:$0xf] }
 0x2c7   :  { %v4592_v3 = vrot.slane %v4590_v6, 5  ;;  %v4529_v24 = vor.u32 %v4528_v33, %v4525_v45  ;;  %v4562_v59 = vrot.slane %v4560_v47, 4  ;;  %v4143_v54 = vld [vmem:[#allocation2 + $0xf8] sm:$0x1]  ;;  %v4149_v45 = vld [vmem:[#allocation2 + $0x110] sm:$0x1] }
 0x2c8   :  { %v4492_v63 = vrot.slane %v4491_v48, 4  ;;  %v4141_v48 = vld [vmem:[#allocation2 + $0xf0] sm:$0xf] }
 0x2c9   :  { %4992 = vrot.lane.b32.xlu1 %v4425_v12, %s10110_s24  ;;  %v4134_v12 = vld [vmem:[#allocation2 + $0xbc] sm:$0x1]  ;;  %v4530_v44 = vrot.slane %v4529_v24, 4 }
 0x2ca   :  { %2872 = vrot.lane.b32.xlu2 %v2617_v15, %s10107_s30  ;;  %v4494_v15 = vshll.u32 %v4128_v0, 16  ;;  %v4542_v62 = vshll.u32 %v4134_v12, 16  ;;  %s10112_s30 = smov 24  }
 0x2cb   :  { %v3521_v13 = vpop.permute.xlu1 %3520  ;;  %5002 = vrot.lane.b32.xlu0 %v4487_v16, %s10110_s24  ;;  %v4586_v16 = vrot.slane %v4584_v61, 4 }
 0x2cc   :  { %3677 = vst.msk [vmem:[#allocation3 + $0x90] sm:$0xf] %vm3640_vm13, %v3521_v13  ;;  %v11963_v29 = vpop.permute.xlu2 %3528  ;;  %v11996_v13 = vrot.slane %v4556_v25, 5  ;;  %v4544_v49 = vrot.slane %v4542_v62, 5  ;;  %v4656_v25 = vshrl.u32 %v4148_v53, 16 }
 0x2cd   :  { %4062 = vst.msk [vmem:[#allocation3 + $0x90] sm:$0xf] %vm4025_vm14, %v11900_v41  ;;  %v2851_v14 = vpop.permute.xlu0 %2850  ;;  %v3405_v41 = vsel %vm10227_vm8, %v3403_v58, %v3404_v23  ;;  %v4571_v58 = vshrl.u32 %v4138_v31, 16  ;;  %v4574_v23 = vshll.u32 %v4138_v31, 16  ;;  %v4587_v7 = vor.u32 %v4586_v16, %v11988_v30 }
 0x2ce   :  { %3004 = vst.msk [vmem:[#allocation3 + $0x9c] sm:$0xf] %vm2964_vm12, %v2851_v14  ;;  %v4559_v26 = vsel %vm10215_vm5, %v4554_v43, %v11996_v13  ;;  %v4496_v14 = vrot.slane %v4494_v15, 5  ;;  %v4610_v43 = vrot.slane %v4608_v17, 4 }
 0x2cf   :  { %v4573_v1 = vrot.slane %v4571_v58, 4  ;;  %v4576_v21 = vrot.slane %v4574_v23, 5  ;;  %v4588_v37 = vrot.slane %v4587_v7, 4  ;;  %v4643_v58 = vshrl.u32 %v4147_v46, 16 }
 0x2d0   :  { %v4646_v23 = vshll.u32 %v4147_v46, 16 }
 0x2d1   :  { %3550 = vrot.lane.b32.xlu1 %v3405_v41, %s10108_s13  ;;  %v4577_v0 = vor.u32 %v4576_v21, %v4573_v1  ;;  %v4593_v60 = vsel %vm10215_vm5, %v4588_v37, %v4592_v3  ;;  %s10113_s13 = smov 28  }
 0x2d2   :  { %5000 = vrot.lane.b32.xlu2 %v4473_v28, %s10110_s24  ;;  %v4497_v28 = vsel %vm10215_vm5, %v4492_v63, %v4496_v14  ;;  %v4153_v63 = vld [vmem:[#allocation2 + $0x120] sm:$0xf] }
 0x2d3   :  { %v2847_v36 = vpop.permute.xlu1 %2846  ;;  %5008 = vrot.lane.b32.xlu0 %v4521_v55, %s10110_s24  ;;  %v4691_v6 = vshrl.u32 %v4153_v63, 16  ;;  %v4694_v33 = vshll.u32 %v4153_v63, 16 }
 0x2d4   :  { %3002 = vst.msk [vmem:[#allocation3 + $0x94] sm:$0xf] %vm2964_vm12, %v2847_v36  ;;  %v2855_v39 = vpop.permute.xlu2 %2854  ;;  %v12021_v36 = vld [vmem:[#allocation2 + $0x100] sm:$0xf] }
 0x2d5   :  { %3678 = vst.msk [vmem:[#allocation3 + $0x94] sm:$0xf] %vm3640_vm13, %v11882_v22  ;;  %v3531_v9 = vpop.permute.xlu0 %3530  ;;  %v4144_v22 = vld [vmem:[#allocation2 + $0xfc] sm:$0xf]  ;;  %v4628_v8 = vshll.u32 %v12021_v36, 16  ;;  %v4693_v24 = vrot.slane %v4691_v6, 4 }
 0x2d6   :  { %4063 = vst.msk [vmem:[#allocation3 + $0x94] sm:$0xf] %vm4025_vm14, %v11918_v34  ;;  %v4539_v34 = vor.u32 %v4538_v2, %v11979_v40  ;;  %v4619_v56 = vshrl.u32 %v4144_v22, 16  ;;  %v4622_v38 = vshll.u32 %v4144_v22, 16  ;;  %v4137_v2 = vld [vmem:[#allocation2 + $0xc8] sm:$0x1] }
 0x2d7   :  { %3006 = vst.msk [vmem:[#allocation3 + $0xa4] sm:$0xf] %vm2964_vm12, %v2855_v39  ;;  %v4652_v39 = vshll.u32 %v4148_v53, 16  ;;  %v4578_v22 = vrot.slane %v4577_v0, 4  ;;  %v4566_v15 = vshll.u32 %v4137_v2, 16 }
 0x2d8   :  { %3682 = vst.msk [vmem:[#allocation3 + $0xa4] sm:$0xf] %vm3640_vm13, %v3531_v9  ;;  %v4540_v10 = vrot.slane %v4539_v34, 4  ;;  %v4621_v5 = vrot.slane %v4619_v56, 4  ;;  %v4624_v41 = vrot.slane %v4622_v38, 5  ;;  %v4535_v34 = vsel %vm10215_vm5, %v4530_v44, %v11979_v40 }
 0x2d9   :  { %4998 = vrot.lane.b32.xlu1 %v4463_v50, %s10110_s24  ;;  %v4563_v50 = vor.u32 %v4562_v59, %v11996_v13  ;;  %v12038_v62 = vrot.slane %v4652_v39, 5  ;;  %v4595_v56 = vshrl.u32 %v4141_v48, 16  ;;  %v4598_v38 = vshll.u32 %v4141_v48, 16  ;;  %v4151_v53 = vld [vmem:[#allocation2 + $0x118] sm:$0xf] }
 0x2da   :  { %5006 = vrot.lane.b32.xlu2 %v4511_v11, %s10110_s24  ;;  %v4545_v51 = vsel %vm10215_vm5, %v4540_v10, %v4544_v49  ;;  %v4625_v55 = vor.u32 %v4624_v41, %v4621_v5  ;;  %v4658_v11 = vrot.slane %v4656_v25, 4  ;;  %v12041_v13 = vrot.slane %v4628_v8, 5  ;;  %v12067_v44 = vld [vmem:[#allocation2 + $0x124] sm:$0xf]  ;;  %v4150_v48 = vld [vmem:[#allocation2 + $0x114] sm:$0xf] }
 0x2db   :  { %v3527_v27 = vpop.permute.xlu1 %3526  ;;  %5014 = vrot.lane.b32.xlu0 %v4559_v26, %s10110_s24  ;;  %v4614_v26 = vshll.u32 %v4143_v54, 16  ;;  %v4583_v40 = vsel %vm10215_vm5, %v4578_v22, %v11988_v30  ;;  %v4564_v7 = vrot.slane %v4563_v50, 4  ;;  %v4568_v10 = vrot.slane %v4566_v15, 5  ;;  %v4146_v50 = vld [vmem:[#allocation2 + $0x104] sm:$0x1] }
 0x2dc   :  { %3680 = vst.msk [vmem:[#allocation3 + $0x9c] sm:$0xf] %vm3640_vm13, %v3527_v27  ;;  %v12011_v52 = vpop.permute.xlu2 %3534  ;;  %v4626_v16 = vrot.slane %v4625_v55, 4  ;;  %v4659_v49 = vor.u32 %v4658_v11, %v12038_v62  ;;  %v4597_v18 = vrot.slane %v4595_v56, 4  ;;  %v4600_v30 = vrot.slane %v4598_v38, 5 }
 0x2dd   :  { %4065 = vst.msk [vmem:[#allocation3 + $0x9c] sm:$0xf] %vm4025_vm14, %v11935_v19  ;;  %v12013_v57 = vpop.permute.xlu0 %3913  ;;  %v4604_v19 = vshll.u32 %v4142_v4, 16  ;;  %v4662_v4 = vshll.u32 %v4149_v45, 16  ;;  %v4645_v5 = vrot.slane %v4643_v58, 4  ;;  %v4648_v41 = vrot.slane %v4646_v23, 5 }
 0x2de   :  { %v4631_v14 = vsel %vm10215_vm5, %v4626_v16, %v12041_v13  ;;  %v4616_v37 = vrot.slane %v4614_v26, 5  ;;  %v4632_v55 = vshrl.u32 %v12021_v36, 16  ;;  %v4601_v0 = vor.u32 %v4600_v30, %v4597_v18  ;;  %v4152_v38 = vld [vmem:[#allocation2 + $0x11c] sm:$0x1]  ;;  %v4158_v23 = vld [vmem:[#allocation2 + $0x134] sm:$0x1] }
 0x2df   :  { %v12031_v9 = vrot.slane %v4604_v19, 5  ;;  %v4660_v19 = vrot.slane %v4659_v49, 4  ;;  %v4664_v17 = vrot.slane %v4662_v4, 5  ;;  %v4649_v59 = vor.u32 %v4648_v41, %v4645_v5 }
 0x2e0   :  { %v4700_v22 = vshll.u32 %v12067_v44, 16  ;;  %v4670_v58 = vshll.u32 %v4150_v48, 16  ;;  %v4638_v6 = vshll.u32 %v4146_v50, 16  ;;  %v4734_v18 = vshll.u32 %v4158_v23, 16 }
 0x2e1   :  { %5004 = vrot.lane.b32.xlu1 %v4497_v28, %s10110_s24  ;;  %v4611_v27 = vor.u32 %v4610_v43, %v12031_v9  ;;  %v4696_v28 = vrot.slane %v4694_v33, 5  ;;  %v4665_v36 = vsel %vm10215_vm5, %v4660_v19, %v4664_v17  ;;  %v4602_v43 = vrot.slane %v4601_v0, 4  ;;  %v4162_v33 = vld [vmem:[#allocation2 + $0x144] sm:$0xf]  ;;  %v4166_v0 = vld [vmem:[#allocation2 + $0x154] sm:$0xf] }
 0x2e2   :  { %5012 = vrot.lane.b32.xlu2 %v4545_v51, %s10110_s24  ;;  %v4157_v51 = vld [vmem:[#allocation2 + $0x130] sm:$0xf]  ;;  %v4650_v46 = vrot.slane %v4649_v59, 4  ;;  %v4763_v41 = vshrl.u32 %v4162_v33, 16  ;;  %v4800_v50 = vshrl.u32 %v4166_v0, 16 }
 0x2e3   :  { %v3910_v61 = vpop.permute.xlu1 %3909  ;;  %5020 = vrot.lane.b32.xlu0 %v4593_v60, %s10110_s24  ;;  %v4612_v21 = vrot.slane %v4611_v27, 4  ;;  %v4697_v2 = vor.u32 %v4696_v28, %v4693_v24  ;;  %v4724_v39 = vshll.u32 %v4157_v51, 16  ;;  %v4728_v25 = vshrl.u32 %v4157_v51, 16  ;;  %v4156_v27 = vld [vmem:[#allocation2 + $0x12c] sm:$0xf] }
 0x2e4   :  { %4064 = vst.msk [vmem:[#allocation3 + $0x98] sm:$0xf] %vm4025_vm14, %v3910_v61  ;;  %v12028_v12 = vpop.permute.xlu2 %3917  ;;  %v4680_v61 = vshrl.u32 %v4151_v53, 16  ;;  %v4607_v26 = vsel %vm10215_vm5, %v4602_v43, %v12031_v9  ;;  %v4715_v9 = vshrl.u32 %v4156_v27, 16  ;;  %v4718_v30 = vshll.u32 %v4156_v27, 16 }
 0x2e5   :  { %v2857_v31 = vpop.permute.xlu0 %2856  ;;  %v4617_v60 = vsel %vm10215_vm5, %v4612_v21, %v4616_v37  ;;  %v4698_v63 = vrot.slane %v4697_v2, 4  ;;  %v12079_v45 = vrot.slane %v4724_v39, 5  ;;  %v4730_v56 = vrot.slane %v4728_v25, 4 }
 0x2e6   :  { %3007 = vst.msk [vmem:[#allocation3 + $0xa8] sm:$0xf] %vm2964_vm12, %v2857_v31  ;;  %v4634_v31 = vrot.slane %v4632_v55, 4  ;;  %v4682_v54 = vrot.slane %v4680_v61, 4  ;;  %v4640_v37 = vrot.slane %v4638_v6, 5  ;;  %v4736_v51 = vrot.slane %v4734_v18, 5 }
 0x2e7   :  { %v4731_v4 = vor.u32 %v4730_v56, %v12079_v45  ;;  %v4717_v55 = vrot.slane %v4715_v9, 4  ;;  %v4704_v2 = vshrl.u32 %v12067_v44, 16  ;;  %v4796_v39 = vshll.u32 %v4166_v0, 16  ;;  %v4171_v6 = vld [vmem:[#allocation2 + $0x168] sm:$0xf] }
 0x2e8   :  { %v1828_v0 = vld [vmem:[#allocation2 + $0x148] sm:$0xf] }
 0x2e9   :  { %5010 = vrot.lane.b32.xlu1 %v4535_v34, %s10110_s24  ;;  %v4667_v34 = vshrl.u32 %v4150_v48, 16  ;;  %v4732_v17 = vrot.slane %v4731_v4, 4  ;;  %v12111_v48 = vld [vmem:[#allocation2 + $0x148] sm:$0xf]  ;;  %1892 = vst.msk [vmem:[#allocation3 + $0xcc] sm:$0xf] %vm798_vm1, %v1828_v0 }
 0x2ea   :  { %5018 = vrot.lane.b32.xlu2 %v4583_v40, %s10110_s24  ;;  %v4655_v40 = vsel %vm10215_vm5, %v4650_v46, %v12038_v62  ;;  %v4772_v56 = vshll.u32 %v12111_v48, 16 }
 0x2eb   :  { %v2853_v47 = vpop.permute.xlu1 %2852  ;;  %5026 = vrot.lane.b32.xlu0 %v4631_v14, %s10110_s24  ;;  %v4669_v49 = vrot.slane %v4667_v34, 4  ;;  %v4706_v34 = vrot.slane %v4704_v2, 4 }
 0x2ec   :  { %3005 = vst.msk [vmem:[#allocation3 + $0xa0] sm:$0xf] %vm2964_vm12, %v2853_v47  ;;  %v2861_v1 = vpop.permute.xlu2 %2860  ;;  %v12090_v47 = vrot.slane %v4700_v22, 5  ;;  %v12134_v9 = vrot.slane %v4772_v56, 5 }
 0x2ed   :  { %3681 = vst.msk [vmem:[#allocation3 + $0xa0] sm:$0xf] %vm3640_vm13, %v11963_v29  ;;  %v12058_v3 = vpop.permute.xlu0 %3919  ;;  %v4569_v29 = vsel %vm10215_vm5, %v4564_v7, %v4568_v10  ;;  %v4635_v7 = vor.u32 %v4634_v31, %v12041_v13  ;;  %v4686_v10 = vshll.u32 %v4152_v38, 16  ;;  %v4672_v13 = vrot.slane %v4670_v58, 5  ;;  %v4167_v38 = vld [vmem:[#allocation2 + $0x158] sm:$0x1] }
 0x2ee   :  { %4066 = vst.msk [vmem:[#allocation3 + $0xa0] sm:$0xf] %vm4025_vm14, %v12013_v57  ;;  %v4676_v57 = vshll.u32 %v4151_v53, 16  ;;  %v4703_v62 = vsel %vm10215_vm5, %v4698_v63, %v12090_v47  ;;  %v4737_v31 = vsel %vm10215_vm5, %v4732_v17, %v4736_v51  ;;  %v4159_v58 = vld [vmem:[#allocation2 + $0x138] sm:$0xf] }
 0x2ef   :  { %3009 = vst.msk [vmem:[#allocation3 + $0xb0] sm:$0xf] %vm2964_vm12, %v2861_v1  ;;  %v4766_v1 = vshll.u32 %v4162_v33, 16  ;;  %v4636_v21 = vrot.slane %v4635_v7, 4  ;;  %v4688_v53 = vrot.slane %v4686_v10, 5  ;;  %v4673_v59 = vor.u32 %v4672_v13, %v4669_v49 }
 0x2f0   :  { %v12077_v15 = vrot.slane %v4676_v57, 5  ;;  %v4765_v57 = vrot.slane %v4763_v41, 4  ;;  %v4161_v10 = vld [vmem:[#allocation2 + $0x140] sm:$0x1]  ;;  %v4739_v4 = vshrl.u32 %v4159_v58, 16  ;;  %v4742_v18 = vshll.u32 %v4159_v58, 16 }
 0x2f1   :  { %5016 = vrot.lane.b32.xlu1 %v4569_v29, %s10110_s24  ;;  %v4720_v29 = vrot.slane %v4718_v30, 5  ;;  %v4768_v61 = vrot.slane %v4766_v1, 5  ;;  %v4674_v44 = vrot.slane %v4673_v59, 4  ;;  %v4758_v41 = vshll.u32 %v4161_v10, 16 }
 0x2f2   :  { %5024 = vrot.lane.b32.xlu2 %v4617_v60, %s10110_s24  ;;  %v4683_v14 = vor.u32 %v4682_v54, %v12077_v15  ;;  %v4160_v60 = vld [vmem:[#allocation2 + $0x13c] sm:$0xf]  ;;  %v4155_v54 = vld [vmem:[#allocation2 + $0x128] sm:$0x1]  ;;  %v4744_v17 = vrot.slane %v4742_v18, 5 }
 0x2f3   :  { %v3916_v8 = vpop.permute.xlu1 %3915  ;;  %5032 = vrot.lane.b32.xlu0 %v4665_v36, %s10110_s24  ;;  %v4748_v36 = vshll.u32 %v4160_v60, 16  ;;  %v4752_v43 = vshrl.u32 %v4160_v60, 16  ;;  %v4769_v22 = vor.u32 %v4768_v61, %v4765_v57  ;;  %v4710_v49 = vshll.u32 %v4155_v54, 16  ;;  %v4169_v60 = vld [vmem:[#allocation2 + $0x160] sm:$0xf] }
 0x2f4   :  { %4067 = vst.msk [vmem:[#allocation3 + $0xa4] sm:$0xf] %vm4025_vm14, %v3916_v8  ;;  %v12074_v16 = vpop.permute.xlu2 %3923  ;;  %v4684_v28 = vrot.slane %v4683_v14, 4  ;;  %v4721_v8 = vor.u32 %v4720_v29, %v4717_v55  ;;  %v4802_v14 = vrot.slane %v4800_v50, 4  ;;  %v4760_v61 = vrot.slane %v4758_v41, 5 }
 0x2f5   :  { %v3537_v11 = vpop.permute.xlu0 %3536  ;;  %v4754_v7 = vrot.slane %v4752_v43, 4  ;;  %v4770_v33 = vrot.slane %v4769_v22, 4  ;;  %v4175_v43 = vld [vmem:[#allocation2 + $0x178] sm:$0xf]  ;;  %v4824_v22 = vshrl.u32 %v4169_v60, 16 }
 0x2f6   :  { %3685 = vst.msk [vmem:[#allocation3 + $0xb0] sm:$0xf] %vm3640_vm13, %v3537_v11  ;;  %v4689_v25 = vsel %vm10215_vm5, %v4684_v28, %v4688_v53  ;;  %v4165_v11 = vld [vmem:[#allocation2 + $0x150] sm:$0xf]  ;;  %v4722_v27 = vrot.slane %v4721_v8, 4  ;;  %v4838_v28 = vshll.u32 %v4171_v6, 16 }
 0x2f7   :  { %v4787_v30 = vshrl.u32 %v4165_v11, 16  ;;  %v4712_v53 = vrot.slane %v4710_v49, 5  ;;  %v1826_v50 = vld [vmem:[#allocation2 + $0x13c] sm:$0xf]  ;;  %v4868_v56 = vshll.u32 %v4175_v43, 16  ;;  %v4826_v10 = vrot.slane %v4824_v22, 4 }
 0x2f8   :  { %1890 = vst.msk [vmem:[#allocation3 + $0xc4] sm:$0xf] %vm798_vm1, %v1826_v50  ;;  %v4174_v18 = vld [vmem:[#allocation2 + $0x174] sm:$0xf]  ;;  %v4178_v22 = vld [vmem:[#allocation2 + $0x184] sm:$0xf] }
 0x2f9   :  { %5022 = vrot.lane.b32.xlu1 %v4607_v26, %s10110_s24  ;;  %v12123_v26 = vrot.slane %v4796_v39, 5  ;;  %v4789_v55 = vrot.slane %v4787_v30, 4  ;;  %v4840_v39 = vrot.slane %v4838_v28, 5  ;;  %vm8405_vm1 = vcmask 1041408  }
 0x2fa   :  { %5030 = vrot.lane.b32.xlu2 %v4655_v40, %s10110_s24  ;;  %v12125_v40 = vrot.slane %v4748_v36, 5 }
 0x2fb   :  { %v3533_v5 = vpop.permute.xlu1 %3532  ;;  %5038 = vrot.lane.b32.xlu0 %v4703_v62, %s10110_s24  ;;  %v4806_v62 = vshll.u32 %v4167_v38, 16  ;;  %v4872_v38 = vshrl.u32 %v4175_v43, 16 }
 0x2fc   :  { %3683 = vst.msk [vmem:[#allocation3 + $0xa8] sm:$0xf] %vm3640_vm13, %v3533_v5  ;;  %v12102_v24 = vpop.permute.xlu2 %3540  ;;  %v4790_v5 = vshll.u32 %v4165_v11, 16  ;;  %v4755_v13 = vor.u32 %v4754_v7, %v12125_v40 }
 0x2fd   :  { %4068 = vst.msk [vmem:[#allocation3 + $0xa8] sm:$0xf] %vm4025_vm14, %v12028_v12  ;;  %v2863_v19 = vpop.permute.xlu0 %2862  ;;  %v4641_v12 = vsel %vm10215_vm5, %v4636_v21, %v4640_v37  ;;  %v4803_v21 = vor.u32 %v4802_v14, %v12123_v26  ;;  %v4835_v37 = vshrl.u32 %v4171_v6, 16  ;;  %v4808_v8 = vrot.slane %v4806_v62, 5 }
 0x2fe   :  { %3010 = vst.msk [vmem:[#allocation3 + $0xb4] sm:$0xf] %vm2964_vm12, %v2863_v19  ;;  %v4741_v19 = vrot.slane %v4739_v4, 4  ;;  %v4792_v29 = vrot.slane %v4790_v5, 5  ;;  %v4756_v57 = vrot.slane %v4755_v13, 4  ;;  %v12173_v5 = vrot.slane %v4868_v56, 5 }
 0x2ff   :  { %v4804_v2 = vrot.slane %v4803_v21, 4  ;;  %v4180_v4 = vld [vmem:[#allocation2 + $0x18c] sm:$0xf]  ;;  %v4176_v21 = vld [vmem:[#allocation2 + $0x17c] sm:$0x1] }
 0x300   :  { %v4745_v36 = vor.u32 %v4744_v17, %v4741_v19  ;;  %v4761_v54 = vsel %vm10215_vm5, %v4756_v57, %v4760_v61  ;;  %v4910_v28 = vshll.u32 %v4180_v4, 16  ;;  %v4878_v0 = vshll.u32 %v4176_v21, 16  ;;  %v4173_v56 = vld [vmem:[#allocation2 + $0x170] sm:$0x1]  ;;  %v4183_v21 = vld [vmem:[#allocation2 + $0x198] sm:$0xf] }
 0x301   :  { %5028 = vrot.lane.b32.xlu1 %v4641_v12, %s10110_s24  ;;  %v4837_v12 = vrot.slane %v4835_v37, 4  ;;  %v4809_v11 = vsel %vm10215_vm5, %v4804_v2, %v4808_v8  ;;  %v4907_v37 = vshrl.u32 %v4180_v4, 16  ;;  %v4854_v4 = vshll.u32 %v4173_v56, 16 }
 0x302   :  { %5036 = vrot.lane.b32.xlu2 %v4689_v25, %s10110_s24  ;;  %v4776_v25 = vshrl.u32 %v12111_v48, 16  ;;  %v4746_v58 = vrot.slane %v4745_v36, 4 }
 0x303   :  { %v2859_v46 = vpop.permute.xlu1 %2858  ;;  %5044 = vrot.lane.b32.xlu0 %v4737_v31, %s10110_s24  ;;  %v4793_v31 = vor.u32 %v4792_v29, %v4789_v55 }
 0x304   :  { %3008 = vst.msk [vmem:[#allocation3 + $0xac] sm:$0xf] %vm2964_vm12, %v2859_v46  ;;  %v2867_v63 = vpop.permute.xlu2 %2866  ;;  %v12158_v46 = vld [vmem:[#allocation2 + $0x16c] sm:$0xf]  ;;  %v4751_v13 = vsel %vm10215_vm5, %v4746_v58, %v12125_v40  ;;  %v4896_v58 = vshrl.u32 %v4178_v22, 16 }
 0x305   :  { %3684 = vst.msk [vmem:[#allocation3 + $0xac] sm:$0xf] %vm3640_vm13, %v12011_v52  ;;  %v3543_v23 = vpop.permute.xlu0 %3542  ;;  %v4679_v52 = vsel %vm10215_vm5, %v4674_v44, %v12077_v15  ;;  %v4727_v15 = vsel %vm10215_vm5, %v4722_v27, %v12079_v45  ;;  %v4820_v44 = vshll.u32 %v4169_v60, 16  ;;  %v4778_v27 = vrot.slane %v4776_v25, 4 }
 0x306   :  { %4069 = vst.msk [vmem:[#allocation3 + $0xac] sm:$0xf] %vm4025_vm14, %v12058_v3  ;;  %v4707_v3 = vor.u32 %v4706_v34, %v12090_v47  ;;  %v4775_v47 = vsel %vm10215_vm5, %v4770_v33, %v12134_v9  ;;  %v4168_v34 = vld [vmem:[#allocation2 + $0x15c] sm:$0xf]  ;;  %v4794_v6 = vrot.slane %v4793_v31, 4  ;;  %v4848_v50 = vshrl.u32 %v12158_v46, 16 }
 0x307   :  { %3012 = vst.msk [vmem:[#allocation3 + $0xbc] sm:$0xf] %vm2964_vm12, %v2867_v63  ;;  %v4841_v63 = vor.u32 %v4840_v39, %v4837_v12  ;;  %v4170_v33 = vld [vmem:[#allocation2 + $0x164] sm:$0x1]  ;;  %v12169_v14 = vrot.slane %v4820_v44, 5  ;;  %v4814_v62 = vshll.u32 %v4168_v34, 16 }
 0x308   :  { %3688 = vst.msk [vmem:[#allocation3 + $0xbc] sm:$0xf] %vm3640_vm13, %v3543_v23  ;;  %v4708_v45 = vrot.slane %v4707_v3, 4  ;;  %v4844_v23 = vshll.u32 %v12158_v46, 16  ;;  %v4811_v3 = vshrl.u32 %v4168_v34, 16  ;;  %v4799_v19 = vsel %vm10215_vm5, %v4794_v6, %v12123_v26 }
 0x309   :  { %5034 = vrot.lane.b32.xlu1 %v4679_v52, %s10110_s24  ;;  %v4164_v52 = vld [vmem:[#allocation2 + $0x14c] sm:$0x1]  ;;  %v4842_v30 = vrot.slane %v4841_v63, 4  ;;  %v4827_v17 = vor.u32 %v4826_v10, %v12169_v14  ;;  %v4830_v55 = vshll.u32 %v4170_v33, 16  ;;  %v4816_v60 = vrot.slane %v4814_v62, 5 }
 0x30a   :  { %5042 = vrot.lane.b32.xlu2 %v4727_v15, %s10110_s24  ;;  %v4874_v15 = vrot.slane %v4872_v38, 4  ;;  %v12178_v41 = vrot.slane %v4844_v23, 5  ;;  %v4813_v26 = vrot.slane %v4811_v3, 4  ;;  %v4909_v12 = vrot.slane %v4907_v37, 4  ;;  %v4184_v34 = vld [vmem:[#allocation2 + $0x19c] sm:$0xf] }
 0x30b   :  { %v3539_v1 = vpop.permute.xlu1 %3538  ;;  %5050 = vrot.lane.b32.xlu0 %v4775_v47, %s10110_s24  ;;  %v4782_v47 = vshll.u32 %v4164_v52, 16  ;;  %v4912_v39 = vrot.slane %v4910_v28, 5  ;;  %v4828_v36 = vrot.slane %v4827_v17, 4  ;;  %v4832_v43 = vrot.slane %v4830_v55, 5  ;;  %v12207_v63 = vld [vmem:[#allocation2 + $0x190] sm:$0xf] }
 0x30c   :  { %3686 = vst.msk [vmem:[#allocation3 + $0xb4] sm:$0xf] %vm3640_vm13, %v3539_v1  ;;  %v12149_v51 = vpop.permute.xlu2 %3546  ;;  %v4779_v1 = vor.u32 %v4778_v27, %v12134_v9  ;;  %v4847_v9 = vsel %vm10215_vm5, %v4842_v30, %v12178_v41  ;;  %v4875_v29 = vor.u32 %v4874_v15, %v12173_v5  ;;  %v4880_v44 = vrot.slane %v4878_v0, 5  ;;  %v4179_v15 = vld [vmem:[#allocation2 + $0x188] sm:$0x1] }
 0x30d   :  { %4071 = vst.msk [vmem:[#allocation3 + $0xb4] sm:$0xf] %vm4025_vm14, %v12074_v16  ;;  %v12151_v59 = vpop.permute.xlu0 %3925  ;;  %v4713_v16 = vsel %vm10215_vm5, %v4708_v45, %v4712_v53  ;;  %v4859_v45 = vshrl.u32 %v4174_v18, 16  ;;  %v4862_v53 = vshll.u32 %v4174_v18, 16  ;;  %v4784_v61 = vrot.slane %v4782_v47, 5 }
 0x30e   :  { %v4780_v57 = vrot.slane %v4779_v1, 4  ;;  %v4876_v31 = vrot.slane %v4875_v29, 4  ;;  %v4892_v38 = vshll.u32 %v4178_v22, 16  ;;  %v4940_v27 = vshll.u32 %v4184_v34, 16  ;;  %v4177_v18 = vld [vmem:[#allocation2 + $0x180] sm:$0xf] }
 0x30f   :  { %v4861_v25 = vrot.slane %v4859_v45, 4  ;;  %v4850_v52 = vrot.slane %v4848_v50, 4  ;;  %v4916_v3 = vshll.u32 %v12207_v63, 16  ;;  %v4185_v45 = vld [vmem:[#allocation2 + $0x1a0] sm:$0x1]  ;;  %v4934_v29 = vshll.u32 %v4183_v21, 16 }
 0x310   :  { %v4881_v46 = vsel %vm10215_vm5, %v4876_v31, %v4880_v44  ;;  %v12216_v62 = vrot.slane %v4892_v38, 5  ;;  %v12219_v1 = vrot.slane %v4940_v27, 5  ;;  %v4920_v22 = vshrl.u32 %v12207_v63, 16  ;;  %v4182_v38 = vld [vmem:[#allocation2 + $0x194] sm:$0x1] }
 0x311   :  { %5040 = vrot.lane.b32.xlu1 %v4713_v16, %s10110_s24  ;;  %v4864_v16 = vrot.slane %v4862_v53, 5  ;;  %v4851_v28 = vor.u32 %v4850_v52, %v12178_v41  ;;  %v4883_v53 = vshrl.u32 %v4177_v18, 16  ;;  %v12228_v17 = vrot.slane %v4916_v3, 5 }
 0x312   :  { %5048 = vrot.lane.b32.xlu2 %v4761_v54, %s10110_s24  ;;  %v4817_v54 = vor.u32 %v4816_v60, %v4813_v26  ;;  %v4922_v63 = vrot.slane %v4920_v22, 4  ;;  %v4926_v52 = vshll.u32 %v4182_v38, 16 }
 0x313   :  { %v3922_v48 = vpop.permute.xlu1 %3921  ;;  %5056 = vrot.lane.b32.xlu0 %v4809_v11, %s10110_s24  ;;  %v4865_v11 = vor.u32 %v4864_v16, %v4861_v25  ;;  %v4885_v26 = vrot.slane %v4883_v53, 4 }
 0x314   :  { %4070 = vst.msk [vmem:[#allocation3 + $0xb0] sm:$0xf] %vm4025_vm14, %v3922_v48  ;;  %v4995_v7 = vpop.permute.xlu2 %4994  ;;  %v4913_v48 = vor.u32 %v4912_v39, %v4909_v12  ;;  %v4818_v6 = vrot.slane %v4817_v54, 4 }
 0x315   :  { %5167 = vst.msk [vmem:[#allocation3 + $0x50] sm:$0xf] %vm5146_vm15, %v4995_v7  ;;  %v2869_v49 = vpop.permute.xlu0 %2868  ;;  %v4944_v7 = vshrl.u32 %v4184_v34, 16 }
 0x316   :  { %3013 = vst.msk [vmem:[#allocation3 + $0xc0] sm:$0xf] %vm2964_vm12, %v2869_v49  ;;  %v4914_v10 = vrot.slane %v4913_v48, 4  ;;  %v4866_v49 = vrot.slane %v4865_v11, 4  ;;  %v4823_v37 = vsel %vm10215_vm5, %v4818_v6, %v12169_v14 }
 0x317   :  { %v4946_v47 = vrot.slane %v4944_v7, 4  ;;  %v5212_v7 = vld [vmem:[#allocation2 + $0x10] sm:$0xf] }
 0x318   :  { %v4871_v55 = vsel %vm10215_vm5, %v4866_v49, %v12173_v5  ;;  %v4919_v14 = vsel %vm10215_vm5, %v4914_v10, %v12228_v17  ;;  %v4852_v5 = vrot.slane %v4851_v28, 4  ;;  %v5405_v3 = vrot.slane %v5212_v7, 5 }
 0x319   :  { %5046 = vrot.lane.b32.xlu1 %v4751_v13, %s10110_s24  ;;  %v4898_v13 = vrot.slane %v4896_v58, 4  ;;  %v4947_v41 = vor.u32 %v4946_v47, %v12219_v1  ;;  %v5213_v47 = vld [vmem:[#allocation2 + $0x14] sm:$0x1] }
 0x31a   :  { %5054 = vrot.lane.b32.xlu2 %v4799_v19, %s10110_s24  ;;  %v4886_v19 = vshll.u32 %v4177_v18, 16  ;;  %v5408_v53 = vrot.slane %v5213_v47, 5 }
 0x31b   :  { %v2865_v40 = vpop.permute.xlu1 %2864  ;;  %5062 = vrot.lane.b32.xlu0 %v4847_v9, %s10110_s24  ;;  %v4931_v9 = vshrl.u32 %v4183_v21, 16  ;;  %v4948_v31 = vrot.slane %v4947_v41, 4  ;;  %v12293_v41 = vld [vmem:[#allocation2 + $0x40] sm:$0xf] }
 0x31c   :  { %3011 = vst.msk [vmem:[#allocation3 + $0xb8] sm:$0xf] %vm2964_vm12, %v2865_v40  ;;  %v12195_v2 = vpop.permute.xlu2 %3929  ;;  %v4899_v40 = vor.u32 %v4898_v13, %v12216_v62  ;;  %v4888_v60 = vrot.slane %v4886_v19, 5  ;;  %v5211_v19 = vld [vmem:[#allocation2 + $0xc] sm:$0xe] }
 0x31d   :  { %3687 = vst.msk [vmem:[#allocation3 + $0xb8] sm:$0xf] %vm3640_vm13, %v12102_v24  ;;  %v12199_v8 = vpop.permute.xlu0 %3931  ;;  %v4785_v24 = vsel %vm10215_vm5, %v4780_v57, %v4784_v61  ;;  %v4950_v57 = vshll.u32 %v4185_v45, 16  ;;  %v4856_v61 = vrot.slane %v4854_v4, 5 }
 0x31e   :  { %4072 = vst.msk [vmem:[#allocation3 + $0xb8] sm:$0xf] %vm4025_vm14, %v12151_v59  ;;  %v4833_v59 = vsel %vm10215_vm5, %v4828_v36, %v4832_v43  ;;  %v4900_v25 = vrot.slane %v4899_v40, 4  ;;  %v4933_v36 = vrot.slane %v4931_v9, 4  ;;  %v4936_v43 = vrot.slane %v4934_v29, 5 }
 0x31f   :  { %v4952_v44 = vrot.slane %v4950_v57, 5  ;;  %v4857_v50 = vsel %vm10215_vm5, %v4852_v5, %v4856_v61  ;;  %v9737_v9 = vrot.slane %v5211_v19, 9  ;;  %v5223_v29 = vld [vmem:[#allocation2 + $0x3c] sm:$0xe]  ;;  %v5221_v61 = vld [vmem:[#allocation2 + $0x34] sm:$0xf] }
 0x320   :  { %v4937_v54 = vor.u32 %v4936_v43, %v4933_v36  ;;  %v9741_v5 = vrot.slane %v5223_v29, 9 }
 0x321   :  { %5052 = vrot.lane.b32.xlu1 %v4785_v24, %s10110_s24  ;;  %v4889_v24 = vor.u32 %v4888_v60, %v4885_v26  ;;  %v4953_v48 = vsel %vm10215_vm5, %v4948_v31, %v4952_v44  ;;  %v5406_v26 = vsel %vm10227_vm8, %v9737_v9, %v5405_v3  ;;  %v5227_v60 = vld [vmem:[#allocation2 + $0x4c] sm:$0xf]  ;;  %v5222_v31 = vld [vmem:[#allocation2 + $0x38] sm:$0x1] }
 0x322   :  { %5060 = vrot.lane.b32.xlu2 %v4833_v59, %s10110_s24  ;;  %v5214_v59 = vld [vmem:[#allocation2 + $0x18] sm:$0xe]  ;;  %v5440_v43 = vrot.slane %v5227_v60, 5 }
 0x323   :  { %v3928_v23 = vpop.permute.xlu1 %3927  ;;  %5068 = vrot.lane.b32.xlu0 %v4881_v46, %s10110_s24  ;;  %v4890_v11 = vrot.slane %v4889_v24, 4  ;;  %v4938_v46 = vrot.slane %v4937_v54, 4  ;;  %v9738_v27 = vrot.slane %v5214_v59, 9 }
 0x324   :  { %4073 = vst.msk [vmem:[#allocation3 + $0xbc] sm:$0xf] %vm4025_vm14, %v3928_v23  ;;  %v2873_v33 = vpop.permute.xlu2 %2872  ;;  %v12260_v23 = vld [vmem:[#allocation2 + $0x1c] sm:$0xf] }
 0x325   :  { %v3549_v30 = vpop.permute.xlu0 %3548  ;;  %3015 = vst.msk [vmem:[#allocation3 + $0xc8] sm:$0xf] %vm2964_vm12, %v2873_v33  ;;  %v4895_v6 = vsel %vm10215_vm5, %v4890_v11, %v12216_v62  ;;  %v5218_v33 = vld [vmem:[#allocation2 + $0x28] sm:$0xf]  ;;  %v4943_v10 = vsel %vm10215_vm5, %v4938_v46, %v12219_v1  ;;  %v5219_v62 = vld [vmem:[#allocation2 + $0x2c] sm:$0x1] }
 0x326   :  { %3691 = vst.msk [vmem:[#allocation3 + $0xc8] sm:$0xf] %vm3640_vm13, %v3549_v30  ;;  %v5419_v18 = vrot.slane %v5218_v33, 5  ;;  %v5407_v1 = vrot.slane %v5405_v3, 4  ;;  %v5422_v28 = vrot.slane %v5219_v62, 5 }
 0x327   :  { %4076 = vst.msk [vmem:[#allocation3 + $0xc8] sm:$0xf] %vm4025_vm14, %v10676_v35  ;;  %v4902_v35 = vshll.u32 %v4179_v15, 16  ;;  %v4928_v15 = vrot.slane %v4926_v52, 5  ;;  %v5226_v46 = vld [vmem:[#allocation2 + $0x48] sm:$0xe] }
 0x328   :  { %v9742_v33 = vrot.slane %v5226_v46, 9 }
 0x329   :  { %5058 = vrot.lane.b32.xlu1 %v4823_v37, %s10110_s24  ;;  %v4904_v16 = vrot.slane %v4902_v35, 5  ;;  %v5421_v37 = vrot.slane %v5419_v18, 4  ;;  %v5217_v35 = vld [vmem:[#allocation2 + $0x24] sm:$0xe] }
 0x32a   :  { %5066 = vrot.lane.b32.xlu2 %v4871_v55, %s10110_s24  ;;  %v9739_v57 = vrot.slane %v5217_v35, 9 }
 0x32b   :  { %v3545_v0 = vpop.permute.xlu1 %3544  ;;  %5074 = vrot.lane.b32.xlu0 %v4919_v14, %s10110_s24  ;;  %v5423_v40 = vsel %vm10227_vm8, %v5421_v37, %v5422_v28 }
 0x32c   :  { %3689 = vst.msk [vmem:[#allocation3 + $0xc0] sm:$0xf] %vm3640_vm13, %v3545_v0  ;;  %v5001_v12 = vpop.permute.xlu2 %5000 }
 0x32d   :  { %4074 = vst.msk [vmem:[#allocation3 + $0xc0] sm:$0xf] %vm4025_vm14, %v12195_v2  ;;  %v2875_v39 = vpop.permute.xlu0 %2874  ;;  %v4905_v2 = vsel %vm10215_vm5, %v4900_v25, %v4904_v16  ;;  %v5426_v25 = vrot.slane %v5221_v61, 5 }
 0x32e   :  { %5170 = vst.msk [vmem:[#allocation3 + $0x5c] sm:$0xf] %vm5146_vm15, %v5001_v12  ;;  %v5433_v12 = vrot.slane %v12293_v41, 5 }
 0x32f   :  { %3016 = vst.msk [vmem:[#allocation3 + $0xcc] sm:$0xf] %vm2964_vm12, %v2875_v39  ;;  %v5420_v39 = vsel %vm10227_vm8, %v9739_v57, %v5419_v18  ;;  %v5428_v54 = vrot.slane %v5426_v25, 4  ;;  %v6272_v18 = vld [vmem:[#allocation2 + $0x20] sm:$0x1] }
 0x330   :  { %v5434_v36 = vsel %vm10227_vm8, %v9741_v5, %v5433_v12  ;;  %v6386_v28 = vshll.u32 %v6272_v18, 16  ;;  %v6274_v57 = vld [vmem:[#allocation2 + $0x28] sm:$0xf]  ;;  %v5229_v5 = vld [vmem:[#allocation2 + $0x54] sm:$0xe] }
 0x331   :  { %5064 = vrot.lane.b32.xlu1 %v4857_v50, %s10110_s24  ;;  %v5228_v50 = vld [vmem:[#allocation2 + $0x50] sm:$0x1] }
 0x332   :  { %5072 = vrot.lane.b32.xlu2 %v4905_v2, %s10110_s24  ;;  %v5443_v11 = vrot.slane %v5228_v50, 5  ;;  %v6273_v50 = vld [vmem:[#allocation2 + $0x24] sm:$0xf] }
 0x333   :  { %v2871_v34 = vpop.permute.xlu1 %2870  ;;  %5080 = vrot.lane.b32.xlu0 %v4953_v48, %s10110_s24  ;;  %v5442_v48 = vrot.slane %v5440_v43, 4 }
 0x334   :  { %3014 = vst.msk [vmem:[#allocation3 + $0xc4] sm:$0xf] %vm2964_vm12, %v2871_v34  ;;  %v5007_v56 = vpop.permute.xlu2 %5006  ;;  %v5429_v34 = vrot.slane %v5222_v31, 5  ;;  %v7392_v31 = vld [vmem:[#allocation2 + $0x1c] sm:$0xf] }
 0x335   :  { %3690 = vst.msk [vmem:[#allocation3 + $0xc4] sm:$0xf] %vm3640_vm13, %v12149_v51  ;;  %v4997_v58 = vpop.permute.xlu0 %4996  ;;  %v4923_v51 = vor.u32 %v4922_v63, %v12228_v17  ;;  %v5409_v17 = vsel %vm10227_vm8, %v5407_v1, %v5408_v53  ;;  %v6271_v63 = vld [vmem:[#allocation2 + $0x1c] sm:$0xf]  ;;  %v5885_v1 = vld [vmem:[#allocation2 + $0x18] sm:$0xf] }
 0x336   :  { %4075 = vst.msk [vmem:[#allocation3 + $0xc4] sm:$0xf] %vm4025_vm14, %v12199_v8  ;;  %v5412_v8 = vrot.slane %v12260_v23, 5  ;;  %v5430_v38 = vsel %vm10227_vm8, %v5428_v54, %v5429_v34  ;;  %v5444_v23 = vsel %vm10227_vm8, %v5442_v48, %v5443_v11  ;;  %v6380_v7 = vshrl.u32 %v6271_v63, 16 }
 0x337   :  { %5168 = vst.msk [vmem:[#allocation3 + $0x54] sm:$0xf] %vm5146_vm15, %v4997_v58  ;;  %v4924_v30 = vrot.slane %v4923_v51, 4  ;;  %v5435_v53 = vrot.slane %v5433_v12, 4  ;;  %v7585_v34 = vrot.slane %v7392_v31, 5  ;;  %v6391_v48 = vshrl.u32 %v6273_v50, 16 }
 0x338   :  { %5173 = vst.msk [vmem:[#allocation3 + $0x68] sm:$0xf] %vm5146_vm15, %v5007_v56  ;;  %v5413_v4 = vsel %vm10227_vm8, %v9738_v27, %v5412_v8  ;;  %v5414_v44 = vrot.slane %v5412_v8, 4  ;;  %v5220_v56 = vld [vmem:[#allocation2 + $0x30] sm:$0xe]  ;;  %v6376_v27 = vshll.u32 %v6271_v63, 16 }
 0x339   :  { %5070 = vrot.lane.b32.xlu1 %v4895_v6, %s10110_s24  ;;  %v4929_v45 = vsel %vm10215_vm5, %v4924_v30, %v4928_v15  ;;  %v9740_v6 = vrot.slane %v5220_v56, 9  ;;  %v6270_v8 = vld [vmem:[#allocation2 + $0x18] sm:$0xf]  ;;  %v6382_v3 = vrot.slane %v6380_v7, 4  ;;  %v5225_v30 = vld [vmem:[#allocation2 + $0x44] sm:$0x1]  ;;  %v5441_v15 = vsel %vm10227_vm8, %v9742_v33, %v5440_v43 }
 0x33a   :  { %5078 = vrot.lane.b32.xlu2 %v4943_v10, %s10110_s24  ;;  %v12321_v10 = vrot.slane %v6376_v27, 5  ;;  %v6370_v47 = vshll.u32 %v6270_v8, 16  ;;  %v5436_v19 = vrot.slane %v5225_v30, 5  ;;  %v6394_v11 = vshll.u32 %v6273_v50, 16  ;;  %v5887_v63 = vld [vmem:[#allocation2 + $0x24] sm:$0xf] }
 0x33b   :  { %v4993_v49 = vpop.permute.xlu1 %4992  ;;  %5631 = vrot.lane.b32.xlu0 %v5413_v4, %s10111_s3  ;;  %v5427_v4 = vsel %vm10227_vm8, %v9740_v6, %v5426_v25  ;;  %v9743_v25 = vrot.slane %v5229_v5, 9  ;;  %v7587_v27 = vrot.slane %v7585_v34, 4  ;;  %v6393_v6 = vrot.slane %v6391_v48, 4 }
 0x33c   :  { %5166 = vst.msk [vmem:[#allocation3 + $0x4c] sm:$0xf] %vm5146_vm15, %v4993_v49  ;;  %v5013_v13 = vpop.permute.xlu2 %5012  ;;  %v5230_v49 = vld [vmem:[#allocation2 + $0x58] sm:$0xf]  ;;  %v6383_v37 = vor.u32 %v6382_v3, %v12321_v10  ;;  %v6372_v29 = vrot.slane %v6370_v47, 5  ;;  %v5437_v41 = vsel %vm10227_vm8, %v5435_v53, %v5436_v19 }
 0x33d   :  { %v5003_v21 = vpop.permute.xlu0 %5002  ;;  %5176 = vst.msk [vmem:[#allocation3 + $0x74] sm:$0xf] %vm5146_vm15, %v5013_v13  ;;  %v5447_v62 = vrot.slane %v5230_v49, 5  ;;  %v6367_v13 = vshrl.u32 %v6270_v8, 16  ;;  %v5886_v8 = vld [vmem:[#allocation2 + $0x1c] sm:$0xf] }
 0x33e   :  { %5171 = vst.msk [vmem:[#allocation3 + $0x60] sm:$0xf] %vm5146_vm15, %v5003_v21  ;;  %v7391_v3 = vld [vmem:[#allocation2 + $0x18] sm:$0xe]  ;;  %v6276_v53 = vld [vmem:[#allocation2 + $0x30] sm:$0xf] }
 0x33f   :  { %v6369_v9 = vrot.slane %v6367_v13, 4  ;;  %v9769_v13 = vrot.slane %v7391_v3, 9 }
 0x341   :  { %5076 = vrot.lane.b32.xlu1 %v4929_v45, %s10110_s24  ;;  %v5231_v45 = vld [vmem:[#allocation2 + $0x5c] sm:$0x1]  ;;  %v7586_v19 = vsel %vm10227_vm8, %v9769_v13, %v7585_v34 }
 0x342   :  { %5629 = vrot.lane.b32.xlu2 %v5409_v17, %s10111_s3  ;;  %v5450_v35 = vrot.slane %v5231_v45, 5 }
 0x343   :  { %v3551_v55 = vpop.permute.xlu1 %3550  ;;  %5637 = vrot.lane.b32.xlu0 %v5423_v40, %s10111_s3  ;;  %v5449_v40 = vrot.slane %v5447_v62, 4 }
 0x344   :  { %3692 = vst.msk [vmem:[#allocation3 + $0xcc] sm:$0xf] %vm3640_vm13, %v3551_v55  ;;  %v5019_v0 = vpop.permute.xlu2 %5018 }
 0x345   :  { %4077 = vst.msk [vmem:[#allocation3 + $0xcc] sm:$0xf] %vm4025_vm14, %v10593_v42  ;;  %v5009_v14 = vpop.permute.xlu0 %5008  ;;  %v5216_v42 = vld [vmem:[#allocation2 + $0x20] sm:$0x1]  ;;  %v5451_v61 = vsel %vm10227_vm8, %v5449_v40, %v5450_v35  ;;  %v6415_v35 = vshrl.u32 %v6276_v53, 16 }
 0x346   :  { %5179 = vst.msk [vmem:[#allocation3 + $0x80] sm:$0xf] %vm5146_vm15, %v5019_v0  ;;  %v5415_v22 = vrot.slane %v5216_v42, 5  ;;  %v6384_v0 = vrot.slane %v6383_v37, 4  ;;  %v6400_v42 = vshll.u32 %v6274_v57, 16 }
 0x347   :  { %5174 = vst.msk [vmem:[#allocation3 + $0x6c] sm:$0xf] %vm5146_vm15, %v5009_v14  ;;  %v6388_v14 = vrot.slane %v6386_v28, 5  ;;  %v7395_v37 = vld [vmem:[#allocation2 + $0x28] sm:$0xf] }
 0x348   :  { %v5416_v59 = vsel %vm10227_vm8, %v5414_v44, %v5415_v22  ;;  %v6402_v44 = vrot.slane %v6400_v42, 5  ;;  %v7592_v40 = vrot.slane %v7395_v37, 5 }
 0x349   :  { %5627 = vrot.lane.b32.xlu1 %v5406_v26, %s10111_s3  ;;  %v6373_v26 = vor.u32 %v6372_v29, %v6369_v9  ;;  %v6389_v12 = vsel %vm10215_vm5, %v6384_v0, %v6388_v14  ;;  %v6418_v9 = vshll.u32 %v6276_v53, 16  ;;  %v5889_v0 = vld [vmem:[#allocation2 + $0x30] sm:$0xf] }
 0x34a   :  { %5635 = vrot.lane.b32.xlu2 %v5420_v39, %s10111_s3  ;;  %v6404_v39 = vshrl.u32 %v6274_v57, 16  ;;  %v7396_v57 = vld [vmem:[#allocation2 + $0x2c] sm:$0x1] }
 0x34b   :  { %v4999_v16 = vpop.permute.xlu1 %4998  ;;  %5643 = vrot.lane.b32.xlu0 %v5434_v36, %s10111_s3  ;;  %v6374_v43 = vrot.slane %v6373_v26, 4  ;;  %v7594_v26 = vrot.slane %v7592_v40, 4  ;;  %v6420_v42 = vrot.slane %v6418_v9, 5 }
 0x34c   :  { %5169 = vst.msk [vmem:[#allocation3 + $0x58] sm:$0xf] %vm5146_vm15, %v4999_v16  ;;  %v5025_v24 = vpop.permute.xlu2 %5024  ;;  %v6406_v22 = vrot.slane %v6404_v39, 4 }
 0x34d   :  { %v5015_v2 = vpop.permute.xlu0 %5014  ;;  %5182 = vst.msk [vmem:[#allocation3 + $0x8c] sm:$0xf] %vm5146_vm15, %v5025_v24  ;;  %v5448_v24 = vsel %vm10227_vm8, %v9743_v25, %v5447_v62  ;;  %v6379_v54 = vsel %vm10215_vm5, %v6374_v43, %v12321_v10  ;;  %v6277_v10 = vld [vmem:[#allocation2 + $0x34] sm:$0xf]  ;;  %v7394_v43 = vld [vmem:[#allocation2 + $0x24] sm:$0xe] }
 0x34e   :  { %5177 = vst.msk [vmem:[#allocation3 + $0x78] sm:$0xf] %vm5146_vm15, %v5015_v2  ;;  %v6275_v2 = vld [vmem:[#allocation2 + $0x2c] sm:$0x1]  ;;  %v6407_v56 = vor.u32 %v6406_v22, %v6402_v44  ;;  %v6428_v62 = vshrl.u32 %v6277_v10, 16 }
 0x350   :  { %v6430_v45 = vrot.slane %v6428_v62, 4 }
 0x351   :  { %5633 = vrot.lane.b32.xlu1 %v5416_v59, %s10111_s3 }
 0x352   :  { %5641 = vrot.lane.b32.xlu2 %v5430_v38, %s10111_s3  ;;  %v6410_v38 = vshll.u32 %v6275_v2, 16 }
 0x353   :  { %v5005_v58 = vpop.permute.xlu1 %5004  ;;  %5649 = vrot.lane.b32.xlu0 %v5444_v23, %s10111_s3 }
 0x354   :  { %5172 = vst.msk [vmem:[#allocation3 + $0x64] sm:$0xf] %vm5146_vm15, %v5005_v58  ;;  %v5031_v51 = vpop.permute.xlu2 %5030  ;;  %v7393_v58 = vld [vmem:[#allocation2 + $0x20] sm:$0x1]  ;;  %v6412_v33 = vrot.slane %v6410_v38, 5 }
 0x355   :  { %v5021_v52 = vpop.permute.xlu0 %5020  ;;  %5185 = vst.msk [vmem:[#allocation3 + $0x98] sm:$0xf] %vm5146_vm15, %v5031_v51  ;;  %v7588_v7 = vrot.slane %v7393_v58, 5  ;;  %v6396_v51 = vrot.slane %v6394_v11, 5  ;;  %v6279_v38 = vld [vmem:[#allocation2 + $0x3c] sm:$0xf] }
 0x356   :  { %5180 = vst.msk [vmem:[#allocation3 + $0x84] sm:$0xf] %vm5146_vm15, %v5021_v52  ;;  %v6408_v52 = vrot.slane %v6407_v56, 4 }
 0x357   :  { %v7589_v49 = vsel %vm10227_vm8, %v7587_v27, %v7588_v7  ;;  %v6439_v7 = vshrl.u32 %v6279_v38, 16 }
 0x358   :  { %v6413_v30 = vsel %vm10215_vm5, %v6408_v52, %v6412_v33  ;;  %v5891_v52 = vld [vmem:[#allocation2 + $0x3c] sm:$0xf] }
 0x359   :  { %5639 = vrot.lane.b32.xlu1 %v5427_v4, %s10111_s3  ;;  %v6397_v4 = vor.u32 %v6396_v51, %v6393_v6  ;;  %v6442_v6 = vshll.u32 %v6279_v38, 16 }
 0x35a   :  { %5647 = vrot.lane.b32.xlu2 %v5441_v15, %s10111_s3  ;;  %v6424_v15 = vshll.u32 %v6277_v10, 16  ;;  %v7399_v10 = vld [vmem:[#allocation2 + $0x38] sm:$0x1] }
 0x35b   :  { %v5011_v21 = vpop.permute.xlu1 %5010  ;;  %6013 = vrot.lane.b32.xlu0 %v5885_v1, %s10112_s30  ;;  %v6398_v1 = vrot.slane %v6397_v4, 4 }
 0x35c   :  { %5175 = vst.msk [vmem:[#allocation3 + $0x70] sm:$0xf] %vm5146_vm15, %v5011_v21  ;;  %v5037_v17 = vpop.permute.xlu2 %5036  ;;  %v6426_v28 = vrot.slane %v6424_v15, 5  ;;  %v6444_v15 = vrot.slane %v6442_v6, 5 }
 0x35d   :  { %v5027_v55 = vpop.permute.xlu0 %5026  ;;  %5188 = vst.msk [vmem:[#allocation3 + $0xa4] sm:$0xf] %vm5146_vm15, %v5037_v17  ;;  %v6278_v17 = vld [vmem:[#allocation2 + $0x38] sm:$0x1] }
 0x35e   :  { %5183 = vst.msk [vmem:[#allocation3 + $0x90] sm:$0xf] %vm5146_vm15, %v5027_v55  ;;  %v6403_v55 = vsel %vm10215_vm5, %v6398_v1, %v6402_v44  ;;  %v6431_v14 = vor.u32 %v6430_v45, %v6426_v28  ;;  %v7397_v1 = vld [vmem:[#allocation2 + $0x30] sm:$0xe] }
 0x360   :  { %v6432_v39 = vrot.slane %v6431_v14, 4 }
 0x361   :  { %5645 = vrot.lane.b32.xlu1 %v5437_v41, %s10111_s3  ;;  %v6434_v41 = vshll.u32 %v6278_v17, 16 }
 0x362   :  { %5653 = vrot.lane.b32.xlu2 %v5451_v61, %s10111_s3 }
 0x363   :  { %v5017_v60 = vpop.permute.xlu1 %5016  ;;  %7136 = vrot.lane.b32.xlu0 %v6389_v12, %s10113_s13  ;;  %v6417_v12 = vrot.slane %v6415_v35, 4  ;;  %v6436_v25 = vrot.slane %v6434_v41, 5  ;;  %v6282_v41 = vld [vmem:[#allocation2 + $0x48] sm:$0xf] }
 0x364   :  { %5178 = vst.msk [vmem:[#allocation3 + $0x7c] sm:$0xf] %vm5146_vm15, %v5017_v60  ;;  %v5043_v16 = vpop.permute.xlu2 %5042  ;;  %v7595_v60 = vrot.slane %v7396_v57, 5 }
 0x365   :  { %v5033_v36 = vpop.permute.xlu0 %5032  ;;  %5191 = vst.msk [vmem:[#allocation3 + $0xb0] sm:$0xf] %vm5146_vm15, %v5043_v16  ;;  %v5888_v16 = vld [vmem:[#allocation2 + $0x28] sm:$0xf]  ;;  %v6421_v44 = vor.u32 %v6420_v42, %v6417_v12  ;;  %v6437_v50 = vsel %vm10215_vm5, %v6432_v39, %v6436_v25  ;;  %v6466_v12 = vshll.u32 %v6282_v41, 16 }
 0x366   :  { %5186 = vst.msk [vmem:[#allocation3 + $0x9c] sm:$0xf] %vm5146_vm15, %v5033_v36  ;;  %v6280_v36 = vld [vmem:[#allocation2 + $0x40] sm:$0xf]  ;;  %v7596_v31 = vsel %vm10227_vm8, %v7594_v26, %v7595_v60  ;;  %v6463_v60 = vshrl.u32 %v6282_v41, 16 }
 0x367   :  { %v6452_v2 = vshrl.u32 %v6280_v36, 16  ;;  %v6422_v11 = vrot.slane %v6421_v44, 4  ;;  %v5893_v39 = vld [vmem:[#allocation2 + $0x48] sm:$0xf] }
 0x369   :  { %5651 = vrot.lane.b32.xlu1 %v5448_v24, %s10111_s3  ;;  %v6448_v24 = vshll.u32 %v6280_v36, 16  ;;  %v6454_v56 = vrot.slane %v6452_v2, 4  ;;  %v7402_v36 = vld [vmem:[#allocation2 + $0x44] sm:$0x1] }
 0x36a   :  { %7134 = vrot.lane.b32.xlu2 %v6379_v54, %s10113_s13  ;;  %v9770_v54 = vrot.slane %v7394_v43, 9 }
 0x36b   :  { %v5023_v59 = vpop.permute.xlu1 %5022  ;;  %6017 = vrot.lane.b32.xlu0 %v5887_v63, %s10112_s30  ;;  %v6450_v63 = vrot.slane %v6448_v24, 5  ;;  %v6468_v24 = vrot.slane %v6466_v12, 5 }
 0x36c   :  { %5181 = vst.msk [vmem:[#allocation3 + $0x88] sm:$0xf] %vm5146_vm15, %v5023_v59  ;;  %v5049_v23 = vpop.permute.xlu2 %5048  ;;  %v7398_v59 = vld [vmem:[#allocation2 + $0x34] sm:$0xf]  ;;  %v7593_v58 = vsel %vm10227_vm8, %v9770_v54, %v7592_v40 }
 0x36d   :  { %v5039_v46 = vpop.permute.xlu0 %5038  ;;  %5194 = vst.msk [vmem:[#allocation3 + $0xbc] sm:$0xf] %vm5146_vm15, %v5049_v23  ;;  %v6281_v23 = vld [vmem:[#allocation2 + $0x44] sm:$0x1]  ;;  %v7599_v27 = vrot.slane %v7398_v59, 5  ;;  %v6455_v33 = vor.u32 %v6454_v56, %v6450_v63 }
 0x36e   :  { %5189 = vst.msk [vmem:[#allocation3 + $0xa8] sm:$0xf] %vm5146_vm15, %v5039_v46  ;;  %v6427_v46 = vsel %vm10215_vm5, %v6422_v11, %v6426_v28  ;;  %v7400_v11 = vld [vmem:[#allocation2 + $0x3c] sm:$0xe] }
 0x36f   :  { %v7601_v4 = vrot.slane %v7599_v27, 4  ;;  %v6456_v62 = vrot.slane %v6455_v33, 4 }
 0x371   :  { %6015 = vrot.lane.b32.xlu1 %v5886_v8, %s10112_s30  ;;  %v6458_v8 = vshll.u32 %v6281_v23, 16 }
 0x372   :  { %7809 = vrot.lane.b32.xlu2 %v7589_v49, %s10114_s23 }
 0x373   :  { %v5029_v18 = vpop.permute.xlu1 %5028  ;;  %7140 = vrot.lane.b32.xlu0 %v6413_v30, %s10113_s13  ;;  %v6441_v30 = vrot.slane %v6439_v7, 4  ;;  %v6460_v13 = vrot.slane %v6458_v8, 5  ;;  %v6285_v8 = vld [vmem:[#allocation2 + $0x54] sm:$0xf] }
 0x374   :  { %5184 = vst.msk [vmem:[#allocation3 + $0x94] sm:$0xf] %vm5146_vm15, %v5029_v18  ;;  %v5055_v47 = vpop.permute.xlu2 %5054  ;;  %v7602_v18 = vrot.slane %v7399_v10, 5 }
 0x375   :  { %v5045_v21 = vpop.permute.xlu0 %5044  ;;  %5197 = vst.msk [vmem:[#allocation3 + $0xc8] sm:$0xf] %vm5146_vm15, %v5055_v47  ;;  %v5890_v47 = vld [vmem:[#allocation2 + $0x34] sm:$0xf]  ;;  %v6445_v28 = vor.u32 %v6444_v15, %v6441_v30  ;;  %v6461_v53 = vsel %vm10215_vm5, %v6456_v62, %v6460_v13  ;;  %v6490_v30 = vshll.u32 %v6285_v8, 16 }
 0x376   :  { %5192 = vst.msk [vmem:[#allocation3 + $0xb4] sm:$0xf] %vm5146_vm15, %v5045_v21  ;;  %v6283_v21 = vld [vmem:[#allocation2 + $0x4c] sm:$0xf]  ;;  %v7603_v37 = vsel %vm10227_vm8, %v7601_v4, %v7602_v18  ;;  %v6487_v18 = vshrl.u32 %v6285_v8, 16 }
 0x377   :  { %v6476_v17 = vshrl.u32 %v6283_v21, 16  ;;  %v6446_v9 = vrot.slane %v6445_v28, 4  ;;  %v5895_v62 = vld [vmem:[#allocation2 + $0x54] sm:$0xf] }
 0x379   :  { %7807 = vrot.lane.b32.xlu1 %v7586_v19, %s10114_s23  ;;  %v6472_v19 = vshll.u32 %v6283_v21, 16  ;;  %v6478_v14 = vrot.slane %v6476_v17, 4  ;;  %v7405_v21 = vld [vmem:[#allocation2 + $0x50] sm:$0x1] }
 0x37a   :  { %7138 = vrot.lane.b32.xlu2 %v6403_v55, %s10113_s13  ;;  %v9771_v55 = vrot.slane %v7397_v1, 9 }
 0x37b   :  { %v5035_v29 = vpop.permute.xlu1 %5034  ;;  %6021 = vrot.lane.b32.xlu0 %v5889_v0, %s10112_s30  ;;  %v6474_v0 = vrot.slane %v6472_v19, 5  ;;  %v6492_v19 = vrot.slane %v6490_v30, 5 }
 0x37c   :  { %5187 = vst.msk [vmem:[#allocation3 + $0xa0] sm:$0xf] %vm5146_vm15, %v5035_v29  ;;  %v5061_v5 = vpop.permute.xlu2 %5060  ;;  %v7401_v29 = vld [vmem:[#allocation2 + $0x40] sm:$0xf]  ;;  %v7600_v57 = vsel %vm10227_vm8, %v9771_v55, %v7599_v27 }
 0x37d   :  { %v5051_v61 = vpop.permute.xlu0 %5050  ;;  %5200 = vst.msk [vmem:[#allocation3 + $0xd4] sm:$0xf] %vm5146_vm15, %v5061_v5  ;;  %v6284_v5 = vld [vmem:[#allocation2 + $0x50] sm:$0x1]  ;;  %v7606_v26 = vrot.slane %v7401_v29, 5  ;;  %v6479_v25 = vor.u32 %v6478_v14, %v6474_v0 }
 0x37e   :  { %5195 = vst.msk [vmem:[#allocation3 + $0xc0] sm:$0xf] %vm5146_vm15, %v5051_v61  ;;  %v6451_v61 = vsel %vm10215_vm5, %v6446_v9, %v6450_v63  ;;  %v7403_v9 = vld [vmem:[#allocation2 + $0x48] sm:$0xe] }
 0x37f   :  { %v7608_v44 = vrot.slane %v7606_v26, 4  ;;  %v6480_v2 = vrot.slane %v6479_v25, 4 }
 0x381   :  { %6019 = vrot.lane.b32.xlu1 %v5888_v16, %s10112_s30  ;;  %v6482_v16 = vshll.u32 %v6284_v5, 16 }
 0x382   :  { %7813 = vrot.lane.b32.xlu2 %v7596_v31, %s10114_s23 }
 0x383   :  { %v5041_v22 = vpop.permute.xlu1 %5040  ;;  %7144 = vrot.lane.b32.xlu0 %v6437_v50, %s10113_s13  ;;  %v6465_v50 = vrot.slane %v6463_v60, 4  ;;  %v6484_v54 = vrot.slane %v6482_v16, 5  ;;  %v6288_v16 = vld [vmem:[#allocation2 + $0x60] sm:$0xf] }
 0x384   :  { %5190 = vst.msk [vmem:[#allocation3 + $0xac] sm:$0xf] %vm5146_vm15, %v5041_v22  ;;  %v5067_v34 = vpop.permute.xlu2 %5066  ;;  %v7609_v22 = vrot.slane %v7402_v36, 5 }
 0x385   :  { %v5057_v48 = vpop.permute.xlu0 %5056  ;;  %5203 = vst.msk [vmem:[#allocation3 + $0xe0] sm:$0xf] %vm5146_vm15, %v5067_v34  ;;  %v5892_v34 = vld [vmem:[#allocation2 + $0x40] sm:$0xf]  ;;  %v6469_v63 = vor.u32 %v6468_v24, %v6465_v50  ;;  %v6485_v38 = vsel %vm10215_vm5, %v6480_v2, %v6484_v54  ;;  %v6514_v50 = vshll.u32 %v6288_v16, 16 }
 0x386   :  { %5198 = vst.msk [vmem:[#allocation3 + $0xcc] sm:$0xf] %vm5146_vm15, %v5057_v48  ;;  %v6286_v48 = vld [vmem:[#allocation2 + $0x58] sm:$0xf]  ;;  %v7610_v59 = vsel %vm10227_vm8, %v7608_v44, %v7609_v22  ;;  %v6511_v22 = vshrl.u32 %v6288_v16, 16 }
 0x387   :  { %v6500_v23 = vshrl.u32 %v6286_v48, 16  ;;  %v6470_v6 = vrot.slane %v6469_v63, 4  ;;  %v5897_v2 = vld [vmem:[#allocation2 + $0x60] sm:$0xf]  ;;  %v6291_v16 = vld [vmem:[#allocation2 + $0x6c] sm:$0xf] }
 0x389   :  { %7811 = vrot.lane.b32.xlu1 %v7593_v58, %s10114_s23  ;;  %v6496_v58 = vshll.u32 %v6286_v48, 16  ;;  %v6502_v33 = vrot.slane %v6500_v23, 4  ;;  %v7408_v48 = vld [vmem:[#allocation2 + $0x5c] sm:$0x1] }
 0x38a   :  { %7142 = vrot.lane.b32.xlu2 %v6427_v46, %s10113_s13  ;;  %v9772_v46 = vrot.slane %v7400_v11, 9 }
 0x38b   :  { %v5047_v51 = vpop.permute.xlu1 %5046  ;;  %6025 = vrot.lane.b32.xlu0 %v5891_v52, %s10112_s30  ;;  %v6498_v52 = vrot.slane %v6496_v58, 5  ;;  %v6516_v58 = vrot.slane %v6514_v50, 5  ;;  %v5234_v50 = vld [vmem:[#allocation2 + $0x68] sm:$0x1] }
 0x38c   :  { %5193 = vst.msk [vmem:[#allocation3 + $0xb8] sm:$0xf] %vm5146_vm15, %v5047_v51  ;;  %v5073_v3 = vpop.permute.xlu2 %5072  ;;  %v7404_v51 = vld [vmem:[#allocation2 + $0x4c] sm:$0xf]  ;;  %v7607_v10 = vsel %vm10227_vm8, %v9772_v46, %v7606_v26 }
 0x38d   :  { %v5063_v49 = vpop.permute.xlu0 %5062  ;;  %5206 = vst.msk [vmem:[#allocation3 + $0xec] sm:$0xf] %vm5146_vm15, %v5073_v3  ;;  %v6287_v3 = vld [vmem:[#allocation2 + $0x5c] sm:$0x1]  ;;  %v7613_v4 = vrot.slane %v7404_v51, 5  ;;  %v6503_v13 = vor.u32 %v6502_v33, %v6498_v52 }
 0x38e   :  { %5201 = vst.msk [vmem:[#allocation3 + $0xd8] sm:$0xf] %vm5146_vm15, %v5063_v49  ;;  %v6475_v49 = vsel %vm10215_vm5, %v6470_v6, %v6474_v0 }
 0x38f   :  { %v7615_v28 = vrot.slane %v7613_v4, 4  ;;  %v6504_v17 = vrot.slane %v6503_v13, 4 }
 0x391   :  { %6023 = vrot.lane.b32.xlu1 %v5890_v47, %s10112_s30  ;;  %v6506_v47 = vshll.u32 %v6287_v3, 16 }
 0x392   :  { %7817 = vrot.lane.b32.xlu2 %v7603_v37, %s10114_s23 }
 0x393   :  { %v5053_v45 = vpop.permute.xlu1 %5052  ;;  %7148 = vrot.lane.b32.xlu0 %v6461_v53, %s10113_s13  ;;  %v6489_v53 = vrot.slane %v6487_v18, 4  ;;  %v6508_v55 = vrot.slane %v6506_v47, 5  ;;  %v8132_v47 = vld [vmem:[%s14428_s4 + $0x10] sm:$0x3] }
 0x394   :  { %5196 = vst.msk [vmem:[#allocation3 + $0xc4] sm:$0xf] %vm5146_vm15, %v5053_v45  ;;  %v5079_v40 = vpop.permute.xlu2 %5078  ;;  %v7616_v45 = vrot.slane %v7405_v21, 5 }
 0x395   :  { %v5069_v35 = vpop.permute.xlu0 %5068  ;;  %5209 = vst.msk [vmem:[#allocation3 + $0xf8] sm:$0xf] %vm5146_vm15, %v5079_v40  ;;  %v5894_v40 = vld [vmem:[#allocation2 + $0x4c] sm:$0xf]  ;;  %v6493_v0 = vor.u32 %v6492_v19, %v6489_v53  ;;  %v6509_v41 = vsel %vm10215_vm5, %v6504_v17, %v6508_v55  ;;  %v7411_v53 = vld [vmem:[#allocation2 + $0x68] sm:$0x1] }
 0x396   :  { %5204 = vst.msk [vmem:[#allocation3 + $0xe4] sm:$0xf] %vm5146_vm15, %v5069_v35  ;;  %v6289_v35 = vld [vmem:[#allocation2 + $0x64] sm:$0xf]  ;;  %v7617_v29 = vsel %vm10227_vm8, %v7615_v28, %v7616_v45 }
 0x397   :  { %v6524_v5 = vshrl.u32 %v6289_v35, 16  ;;  %v6494_v12 = vrot.slane %v6493_v0, 4  ;;  %v5898_v0 = vld [vmem:[#allocation2 + $0x64] sm:$0xf] }
 0x399   :  { %7815 = vrot.lane.b32.xlu1 %v7600_v57, %s10114_s23  ;;  %v6520_v57 = vshll.u32 %v6289_v35, 16  ;;  %v6526_v25 = vrot.slane %v6524_v5, 4  ;;  %v7630_v35 = vrot.slane %v7411_v53, 5  ;;  %v5235_v53 = vld [vmem:[#allocation2 + $0x6c] sm:$0xe] }
 0x39a   :  { %7146 = vrot.lane.b32.xlu2 %v6451_v61, %s10113_s13  ;;  %v9773_v61 = vrot.slane %v7403_v9, 9 }
 0x39b   :  { %v5059_v42 = vpop.permute.xlu1 %5058  ;;  %6029 = vrot.lane.b32.xlu0 %v5893_v39, %s10112_s30  ;;  %v6522_v39 = vrot.slane %v6520_v57, 5 }
 0x39c   :  { %5199 = vst.msk [vmem:[#allocation3 + $0xd0] sm:$0xf] %vm5146_vm15, %v5059_v42  ;;  %v5630_v43 = vpop.permute.xlu2 %5629  ;;  %v7407_v42 = vld [vmem:[#allocation2 + $0x58] sm:$0xf]  ;;  %v7614_v36 = vsel %vm10227_vm8, %v9773_v61, %v7613_v4  ;;  %v12465_v4 = vld [vmem:[#allocation2 + $0x64] sm:$0xf] }
 0x39d   :  { %v5075_v31 = vpop.permute.xlu0 %5074  ;;  %5821 = vst.msk [vmem:[#allocation3 + $0x4] sm:$0xf] %vm5819_vm0, %v5630_v43  ;;  %v6290_v43 = vld [vmem:[#allocation2 + $0x68] sm:$0x1]  ;;  %v7620_v44 = vrot.slane %v7407_v42, 5  ;;  %v6527_v54 = vor.u32 %v6526_v25, %v6522_v39  ;;  %v5454_v13 = vrot.slane %v12465_v4, 5 }
 0x39e   :  { %5207 = vst.msk [vmem:[#allocation3 + $0xf0] sm:$0xf] %vm5146_vm15, %v5075_v31  ;;  %v6499_v31 = vsel %vm10215_vm5, %v6494_v12, %v6498_v52  ;;  %v10066_v12 = vld [vmem:[%s14428_s4] sm:$0xff] }
 0x39f   :  { %v7622_v63 = vrot.slane %v7620_v44, 4  ;;  %v6528_v23 = vrot.slane %v6527_v54, 4  ;;  %v5236_v54 = vld [vmem:[#allocation2 + $0x70] sm:$0xf] }
 0x3a1   :  { %6027 = vrot.lane.b32.xlu1 %v5892_v34, %s10112_s30  ;;  %v6530_v34 = vshll.u32 %v6290_v43, 16  ;;  %v12499_v43 = vld [vmem:[#allocation2 + $0x70] sm:$0xf] }
 0x3a2   :  { %7821 = vrot.lane.b32.xlu2 %v7610_v59, %s10114_s23 }
 0x3a3   :  { %v5065_v56 = vpop.permute.xlu1 %5064  ;;  %7152 = vrot.lane.b32.xlu0 %v6485_v38, %s10113_s13  ;;  %v6513_v38 = vrot.slane %v6511_v22, 4  ;;  %v6532_v46 = vrot.slane %v6530_v34, 5  ;;  %v6535_v34 = vshrl.u32 %v6291_v16, 16 }
 0x3a4   :  { %5202 = vst.msk [vmem:[#allocation3 + $0xdc] sm:$0xf] %vm5146_vm15, %v5065_v56  ;;  %v5636_v27 = vpop.permute.xlu2 %5635  ;;  %v7623_v56 = vrot.slane %v7408_v48, 5  ;;  %v6538_v48 = vshll.u32 %v6291_v16, 16 }
 0x3a5   :  { %v5081_v7 = vpop.permute.xlu0 %5080  ;;  %5824 = vst.msk [vmem:[#allocation3 + $0x10] sm:$0xf] %vm5819_vm0, %v5636_v27  ;;  %v5896_v27 = vld [vmem:[#allocation2 + $0x58] sm:$0xf]  ;;  %v6517_v51 = vor.u32 %v6516_v58, %v6513_v38  ;;  %v6533_v33 = vsel %vm10215_vm5, %v6528_v23, %v6532_v46  ;;  %v5457_v38 = vrot.slane %v5234_v50, 5 }
 0x3a6   :  { %5210 = vst.msk [vmem:[#allocation3 + $0xfc] sm:$0xf] %vm5146_vm15, %v5081_v7  ;;  %v7406_v7 = vld [vmem:[#allocation2 + $0x54] sm:$0xe]  ;;  %v7624_v6 = vsel %vm10227_vm8, %v7622_v63, %v7623_v56  ;;  %v5899_v63 = vld [vmem:[#allocation2 + $0x6c] sm:$0xf] }
 0x3a7   :  { %v9774_v8 = vrot.slane %v7406_v7, 9  ;;  %v6518_v18 = vrot.slane %v6517_v51, 4  ;;  %v5456_v56 = vrot.slane %v5454_v13, 4  ;;  %v5461_v7 = vrot.slane %v5236_v54, 5  ;;  %v7415_v54 = vld [vmem:[#allocation2 + $0x78] sm:$0xe] }
 0x3a9   :  { %7819 = vrot.lane.b32.xlu1 %v7607_v10, %s10114_s23  ;;  %v5232_v10 = vld [vmem:[#allocation2 + $0x60] sm:$0xe]  ;;  %v6523_v21 = vsel %vm10215_vm5, %v6518_v18, %v6522_v39  ;;  %v7412_v39 = vld [vmem:[#allocation2 + $0x6c] sm:$0xe]  ;;  %v5463_v18 = vrot.slane %v5461_v7, 4 }
 0x3aa   :  { %7150 = vrot.lane.b32.xlu2 %v6475_v49, %s10113_s13  ;;  %v9744_v30 = vrot.slane %v5232_v10, 9  ;;  %v9776_v22 = vrot.slane %v7412_v39, 9 }
 0x3ab   :  { %v5071_v15 = vpop.permute.xlu1 %5070  ;;  %6033 = vrot.lane.b32.xlu0 %v5895_v62, %s10112_s30  ;;  %v7621_v62 = vsel %vm10227_vm8, %v9774_v8, %v7620_v44  ;;  %v6540_v8 = vrot.slane %v6538_v48, 5 }
 0x3ac   :  { %5205 = vst.msk [vmem:[#allocation3 + $0xe8] sm:$0xf] %vm5146_vm15, %v5071_v15  ;;  %v5642_v1 = vpop.permute.xlu2 %5641  ;;  %v7410_v15 = vld [vmem:[#allocation2 + $0x64] sm:$0xf]  ;;  %v5455_v45 = vsel %vm10227_vm8, %v9744_v30, %v5454_v13  ;;  %v5458_v13 = vsel %vm10227_vm8, %v5456_v56, %v5457_v38  ;;  %v5239_v56 = vld [vmem:[#allocation2 + $0x7c] sm:$0xf] }
 0x3ad   :  { %v5632_v37 = vpop.permute.xlu0 %5631  ;;  %5827 = vst.msk [vmem:[#allocation3 + $0x1c] sm:$0xf] %vm5819_vm0, %v5642_v1  ;;  %v7627_v1 = vrot.slane %v7410_v15, 5 }
 0x3ae   :  { %5822 = vst.msk [vmem:[#allocation3 + $0x8] sm:$0xf] %vm5819_vm0, %v5632_v37  ;;  %v8302_v37 = vunpack.c.l.b16 %v8132_v47 }
 0x3b0   :  { %v8305_v19 = vpack.c.b16 %v8302_v37, %v8302_v37 }
 0x3b1   :  { %6031 = vrot.lane.b32.xlu1 %v5894_v40, %s10112_s30  ;;  %v7629_v40 = vrot.slane %v7627_v1, 4 }
 0x3b2   :  { %7825 = vrot.lane.b32.xlu2 %v7617_v29, %s10114_s23  ;;  %v8407_v9 = vsel %vm8405_vm1, %v8305_v19, 0  ;;  %v6292_v29 = vld [vmem:[#allocation2 + $0x70] sm:$0xf] }
 0x3b3   :  { %v5077_v14 = vpop.permute.xlu1 %5076  ;;  %7156 = vrot.lane.b32.xlu0 %v6509_v41, %s10113_s13  ;;  %8414 = vmatpush.bf16.msra.mxu1 %v8407_v9  ;;  %v7409_v41 = vld [vmem:[#allocation2 + $0x60] sm:$0xe]  ;;  %v7631_v57 = vsel %vm10227_vm8, %v7629_v40, %v7630_v35  ;;  %v6544_v5 = vshll.u32 %v6292_v29, 16  ;;  %v6548_v61 = vshrl.u32 %v6292_v29, 16 }
 0x3b4   :  { %5208 = vst.msk [vmem:[#allocation3 + $0xf4] sm:$0xf] %vm5146_vm15, %v5077_v14  ;;  %v5648_v26 = vpop.permute.xlu2 %5647  ;;  %10069 = vmatpush.bf16.msrb.mxu3 %v8407_v9  ;;  %v10067_v14 = vld [vmem:[%s14428_s4 + $0x8] sm:$0xff]  ;;  %v9775_v42 = vrot.slane %v7409_v41, 9  ;;  %v9745_v9 = vrot.slane %v5235_v53, 9 }
 0x3b5   :  { %v5638_v60 = vpop.permute.xlu0 %5637  ;;  %5830 = vst.msk [vmem:[#allocation3 + $0x28] sm:$0xf] %vm5819_vm0, %v5648_v26  ;;  %v6550_v44 = vrot.slane %v6548_v61, 4 }
 0x3b6   :  { %5825 = vst.msk [vmem:[#allocation3 + $0x14] sm:$0xf] %vm5819_vm0, %v5638_v60  ;;  %v5900_v60 = vld [vmem:[#allocation2 + $0x70] sm:$0xf] }
 0x3b7   :  { %8415 = vmatpush.bf16.msra.mxu1 %v10067_v14 }
 0x3b8   :  { %10070 = vmatpush.bf16.msrb.mxu3 %v10067_v14  ;;  %v7416_v14 = vld [vmem:[#allocation2 + $0x7c] sm:$0xf] }
 0x3b9   :  { %7823 = vrot.lane.b32.xlu1 %v7614_v36, %s10114_s23 }
 0x3ba   :  { %7154 = vrot.lane.b32.xlu2 %v6499_v31, %s10113_s13  ;;  %v12501_v31 = vrot.slane %v6544_v5, 5  ;;  %v5462_v5 = vsel %vm10227_vm8, %v9745_v9, %v5461_v7  ;;  %v5901_v7 = vld [vmem:[#allocation2 + $0x78] sm:$0xf] }
 0x3bb   :  { %v5628_v24 = vpop.permute.xlu1 %5627  ;;  %6037 = vrot.lane.b32.xlu0 %v5897_v2, %s10112_s30  ;;  %8416 = vmatpush.bf16.msra.mxu1 %v10066_v12  ;;  %v7628_v2 = vsel %vm10227_vm8, %v9775_v42, %v7627_v1  ;;  %v6295_v1 = vld [vmem:[#allocation2 + $0x7c] sm:$0xf]  ;;  %v7417_v42 = vld [vmem:[#allocation2 + $0x80] sm:$0x1] }
 0x3bc   :  { %5820 = vst.msk [vmem:[#allocation3] sm:$0xf] %vm5819_vm0, %v5628_v24  ;;  %v5654_v11 = vpop.permute.xlu2 %5653  ;;  %v6293_v24 = vld [vmem:[#allocation2 + $0x74] sm:$0x1]  ;;  %10071 = vmatpush.bf16.msrb.mxu3 %v10066_v12  ;;  %v6551_v58 = vor.u32 %v6550_v44, %v12501_v31  ;;  %v6568_v40 = vshll.u32 %v6295_v1, 16 }
 0x3bd   :  { %v5644_v59 = vpop.permute.xlu0 %5643  ;;  %5833 = vst.msk [vmem:[#allocation3 + $0x34] sm:$0xf] %vm5819_vm0, %v5654_v11  ;;  %v6294_v11 = vld [vmem:[#allocation2 + $0x78] sm:$0xf]  ;;  %v6554_v23 = vshll.u32 %v6293_v24, 16 }
 0x3be   :  { %5828 = vst.msk [vmem:[#allocation3 + $0x20] sm:$0xf] %vm5819_vm0, %v5644_v59  ;;  %v7634_v59 = vrot.slane %v12499_v43, 5  ;;  %v6562_v51 = vshll.u32 %v6294_v11, 16  ;;  %v12534_v41 = vrot.slane %v6568_v40, 5  ;;  %v6572_v43 = vshrl.u32 %v6295_v1, 16 }
 0x3bf   :  { %v6556_v4 = vrot.slane %v6554_v23, 5  ;;  %v6298_v44 = vld [vmem:[#allocation2 + $0x88] sm:$0xf]  ;;  %v5238_v40 = vld [vmem:[#allocation2 + $0x78] sm:$0xe] }
 0x3c0   :  { %v6596_v48 = vshrl.u32 %v6298_v44, 16 }
 0x3c1   :  { %6035 = vrot.lane.b32.xlu1 %v5896_v27, %s10112_s30  ;;  %v7635_v27 = vsel %vm10227_vm8, %v9776_v22, %v7634_v59  ;;  %v5902_v22 = vld [vmem:[#allocation2 + $0x7c] sm:$0xf] }
 0x3c2   :  { %7829 = vrot.lane.b32.xlu2 %v7624_v6, %s10114_s23  ;;  %v6559_v6 = vshrl.u32 %v6294_v11, 16  ;;  %v6574_v11 = vrot.slane %v6572_v43, 4 }
 0x3c3   :  { %v5634_v52 = vpop.permute.xlu1 %5633  ;;  %7160 = vrot.lane.b32.xlu0 %v6533_v33, %s10113_s13  ;;  %v6537_v33 = vrot.slane %v6535_v34, 4  ;;  %v6592_v34 = vshll.u32 %v6298_v44, 16 }
 0x3c4   :  { %5823 = vst.msk [vmem:[#allocation3 + $0xc] sm:$0xf] %vm5819_vm0, %v5634_v52  ;;  %v7135_v3 = vpop.permute.xlu2 %7134  ;;  %v5237_v52 = vld [vmem:[#allocation2 + $0x74] sm:$0x1]  ;;  %v6561_v15 = vrot.slane %v6559_v6, 4  ;;  %v6575_v6 = vor.u32 %v6574_v11, %v12534_v41 }
 0x3c5   :  { %v5650_v49 = vpop.permute.xlu0 %5649  ;;  %v5464_v30 = vrot.slane %v5237_v52, 5  ;;  %v6541_v47 = vor.u32 %v6540_v8, %v6537_v33  ;;  %v6594_v23 = vrot.slane %v6592_v34, 5  ;;  %v6299_v52 = vld [vmem:[#allocation2 + $0x8c] sm:$0x1]  ;;  %v5468_v8 = vrot.slane %v5239_v56, 5 }
 0x3c6   :  { %5831 = vst.msk [vmem:[#allocation3 + $0x2c] sm:$0xf] %vm5819_vm0, %v5650_v49  ;;  %v6552_v49 = vrot.slane %v6551_v58, 4  ;;  %v9777_v58 = vrot.slane %v7415_v54, 9  ;;  %v5904_v54 = vld [vmem:[#allocation2 + $0x88] sm:$0xf] }
 0x3c7   :  { %v6542_v19 = vrot.slane %v6541_v47, 4  ;;  %v5470_v1 = vrot.slane %v5468_v8, 4  ;;  %v7418_v34 = vld [vmem:[#allocation2 + $0x84] sm:$0xe]  ;;  %v5906_v56 = vld [vmem:[#allocation2 + $0x94] sm:$0xf] }
 0x3c9   :  { %7827 = vrot.lane.b32.xlu1 %v7621_v62, %s10114_s23  ;;  %v6564_v62 = vrot.slane %v6562_v51, 5 }
 0x3ca   :  { %7158 = vrot.lane.b32.xlu2 %v6523_v21, %s10113_s13  ;;  %v6557_v21 = vsel %vm10215_vm5, %v6552_v49, %v6556_v4 }
 0x3cb   :  { %v5640_v28 = vpop.permute.xlu1 %5639  ;;  %5655 = vrot.lane.b32.xlu0 %v5455_v45, %s10111_s3  ;;  %v6565_v45 = vor.u32 %v6564_v62, %v6561_v15  ;;  %v5240_v15 = vld [vmem:[#allocation2 + $0x80] sm:$0x1]  ;;  %v6576_v62 = vrot.slane %v6575_v6, 4  ;;  %v12609_v6 = vld [vmem:[#allocation2 + $0x94] sm:$0xf] }
 0x3cc   :  { %5826 = vst.msk [vmem:[#allocation3 + $0x18] sm:$0xf] %vm5819_vm0, %v5640_v28  ;;  %v12482_v17 = vpop.permute.xlu2 %7809  ;;  %v5465_v28 = vsel %vm10227_vm8, %v5463_v18, %v5464_v30  ;;  %v6602_v30 = vshll.u32 %v6299_v52, 16 }
 0x3cd   :  { %v6014_v55 = vpop.permute.xlu0 %6013  ;;  %v6566_v29 = vrot.slane %v6565_v45, 4 }
 0x3ce   :  { %6206 = vst.msk [vmem:[#allocation3] sm:$0xf] %vm6205_vm2, %v6014_v55 }
 0x3cf   :  { %7327 = vst.msk [vmem:[#allocation3] sm:$0xf] %vm7326_vm3, %v7135_v3 }
 0x3d1   :  { %6039 = vrot.lane.b32.xlu1 %v5898_v0, %s10112_s30  ;;  %v6547_v0 = vsel %vm10215_vm5, %v6542_v19, %v12501_v31  ;;  %v6604_v19 = vrot.slane %v6602_v30, 5  ;;  %v6303_v30 = vld [vmem:[#allocation2 + $0x9c] sm:$0xf] }
 0x3d2   :  { %7833 = vrot.lane.b32.xlu2 %v7631_v57, %s10114_s23  ;;  %v7414_v57 = vld [vmem:[#allocation2 + $0x74] sm:$0x1] }
 0x3d3   :  { %v5646_v26 = vpop.permute.xlu1 %5645  ;;  %6043 = vrot.lane.b32.xlu0 %v5900_v60, %s10112_s30  ;;  %v7636_v60 = vrot.slane %v7634_v59, 4  ;;  %v7637_v12 = vrot.slane %v7414_v57, 5  ;;  %v5241_v57 = vld [vmem:[#allocation2 + $0x84] sm:$0xe] }
 0x3d4   :  { %5829 = vst.msk [vmem:[#allocation3 + $0x24] sm:$0xf] %vm5819_vm0, %v5646_v26  ;;  %v7139_v25 = vpop.permute.xlu2 %7138  ;;  %v7641_v26 = vrot.slane %v7416_v14, 5 }
 0x3d5   :  { %v7137_v36 = vpop.permute.xlu0 %7136  ;;  %v7638_v31 = vsel %vm10227_vm8, %v7636_v60, %v7637_v12  ;;  %v9747_v60 = vrot.slane %v5241_v57, 9  ;;  %v7419_v12 = vld [vmem:[#allocation2 + $0x88] sm:$0xf] }
 0x3d6   :  { %v7643_v16 = vrot.slane %v7641_v26, 4  ;;  %v7642_v33 = vsel %vm10227_vm8, %v9777_v58, %v7641_v26  ;;  %v9778_v58 = vrot.slane %v7418_v34, 9  ;;  %v7425_v34 = vld [vmem:[#allocation2 + $0xa0] sm:$0xf] }
 0x3d9   :  { %7831 = vrot.lane.b32.xlu1 %v7628_v2, %s10114_s23 }
 0x3da   :  { %6041 = vrot.lane.b32.xlu2 %v5899_v63, %s10112_s30  ;;  %v6296_v63 = vld [vmem:[#allocation2 + $0x80] sm:$0x1] }
 0x3db   :  { %v5652_v46 = vpop.permute.xlu1 %5651  ;;  %7835 = vrot.lane.b32.xlu0 %v7635_v27, %s10114_s23  ;;  %v6297_v27 = vld [vmem:[#allocation2 + $0x84] sm:$0xf]  ;;  %v6578_v51 = vshll.u32 %v6296_v63, 16 }
 0x3dc   :  { %5832 = vst.msk [vmem:[#allocation3 + $0x30] sm:$0xf] %vm5819_vm0, %v5652_v46  ;;  %v12513_v10 = vpop.permute.xlu2 %7813  ;;  %v6598_v46 = vrot.slane %v6596_v48, 4  ;;  %v6586_v49 = vshll.u32 %v6297_v27, 16 }
 0x3dd   :  { %v6018_v3 = vpop.permute.xlu0 %6017 }
 0x3de   :  { %6208 = vst.msk [vmem:[#allocation3 + $0x8] sm:$0xf] %vm6205_vm2, %v6018_v3  ;;  %v6583_v3 = vshrl.u32 %v6297_v27, 16  ;;  %v6599_v18 = vor.u32 %v6598_v46, %v6594_v23  ;;  %v6588_v45 = vrot.slane %v6586_v49, 5  ;;  %v6300_v27 = vld [vmem:[#allocation2 + $0x90] sm:$0xf] }
 0x3df   :  { %7329 = vst.msk [vmem:[#allocation3 + $0x8] sm:$0xf] %vm7326_vm3, %v7139_v25 }
 0x3e0   :  { %v6600_v53 = vrot.slane %v6599_v18, 4  ;;  %v6610_v18 = vshll.u32 %v6300_v27, 16 }
 0x3e1   :  { %5657 = vrot.lane.b32.xlu1 %v5458_v13, %s10111_s3  ;;  %v6580_v13 = vrot.slane %v6578_v51, 5 }
 0x3e2   :  { %7164 = vrot.lane.b32.xlu2 %v6557_v21, %s10113_s13 }
 0x3e3   :  { %v6016_v37 = vpop.permute.xlu1 %6015  ;;  %5661 = vrot.lane.b32.xlu0 %v5465_v28, %s10111_s3  ;;  %v6585_v28 = vrot.slane %v6583_v3, 4  ;;  %v6302_v3 = vld [vmem:[#allocation2 + $0x98] sm:$0x1] }
 0x3e4   :  { %6207 = vst.msk [vmem:[#allocation3 + $0x4] sm:$0xf] %vm6205_vm2, %v6016_v37  ;;  %v7143_v55 = vpop.permute.xlu2 %7142  ;;  %v5471_v37 = vrot.slane %v5240_v15, 5  ;;  %v7655_v15 = vrot.slane %v12609_v6, 5 }
 0x3e5   :  { %7328 = vst.msk [vmem:[#allocation3 + $0x4] sm:$0xf] %vm7326_vm3, %v7137_v36  ;;  %v7141_v35 = vpop.permute.xlu0 %7140  ;;  %v7644_v36 = vrot.slane %v7417_v42, 5  ;;  %v6589_v9 = vor.u32 %v6588_v45, %v6585_v28 }
 0x3e6   :  { %8001 = vst.msk [vmem:[#allocation3 + $0x4] sm:$0xf] %vm7999_vm4, %v12482_v17  ;;  %v6571_v17 = vsel %vm10215_vm5, %v6566_v29, %v12534_v41  ;;  %v9746_v41 = vrot.slane %v5238_v40, 9 }
 0x3e7   :  { %v7645_v24 = vsel %vm10227_vm8, %v7643_v16, %v7644_v36  ;;  %v6590_v26 = vrot.slane %v6589_v9, 4  ;;  %v7648_v36 = vrot.slane %v7419_v12, 5  ;;  %v6304_v12 = vld [vmem:[#allocation2 + $0xa0] sm:$0xf] }
 0x3e8   :  { %v5469_v42 = vsel %vm10227_vm8, %v9746_v41, %v5468_v8  ;;  %v5243_v8 = vld [vmem:[#allocation2 + $0x8c] sm:$0x1] }
 0x3e9   :  { %7162 = vrot.lane.b32.xlu1 %v6547_v0, %s10113_s13  ;;  %v6605_v0 = vsel %vm10215_vm5, %v6600_v53, %v6604_v19  ;;  %v6595_v16 = vsel %vm10215_vm5, %v6590_v26, %v6594_v23  ;;  %v7421_v23 = vld [vmem:[#allocation2 + $0x90] sm:$0xe]  ;;  %v7649_v49 = vsel %vm10227_vm8, %v9778_v58, %v7648_v36  ;;  %v6631_v53 = vshrl.u32 %v6303_v30, 16 }
 0x3ea   :  { %5659 = vrot.lane.b32.xlu2 %v5462_v5, %s10111_s3  ;;  %v6634_v19 = vshll.u32 %v6303_v30, 16 }
 0x3eb   :  { %v7808_v61 = vpop.permute.xlu1 %7807  ;;  %7166 = vrot.lane.b32.xlu0 %v6571_v17, %s10113_s13  ;;  %v5242_v17 = vld [vmem:[#allocation2 + $0x88] sm:$0xf] }
 0x3ec   :  { %8000 = vst.msk [vmem:[#allocation3] sm:$0xf] %vm7999_vm4, %v7808_v61  ;;  %v12544_v39 = vpop.permute.xlu2 %7817 }
 0x3ed   :  { %v6022_v25 = vpop.permute.xlu0 %6021 }
 0x3ee   :  { %6210 = vst.msk [vmem:[#allocation3 + $0x10] sm:$0xf] %vm6205_vm2, %v6022_v25  ;;  %v5475_v25 = vrot.slane %v5242_v17, 5 }
 0x3ef   :  { %7331 = vst.msk [vmem:[#allocation3 + $0x10] sm:$0xf] %vm7326_vm3, %v7143_v55  ;;  %v6581_v55 = vsel %vm10215_vm5, %v6576_v62, %v6580_v13  ;;  %v5905_v62 = vld [vmem:[#allocation2 + $0x90] sm:$0xf] }
 0x3f0   :  { %v5477_v13 = vrot.slane %v5475_v25, 4 }
 0x3f1   :  { %7837 = vrot.lane.b32.xlu1 %v7638_v31, %s10114_s23  ;;  %v5476_v31 = vsel %vm10227_vm8, %v9747_v60, %v5475_v25 }
 0x3f2   :  { %6047 = vrot.lane.b32.xlu2 %v5902_v22, %s10112_s30 }
 0x3f3   :  { %v6020_v50 = vpop.permute.xlu1 %6019  ;;  %v10034_v2 = vld [vmem:[#allocation3] sm:$0xff]  ;;  %7841 = vrot.lane.b32.xlu0 %v7645_v24, %s10114_s23 }
 0x3f4   :  { %6209 = vst.msk [vmem:[#allocation3 + $0xc] sm:$0xf] %vm6205_vm2, %v6020_v50  ;;  %9937 = vmatmul.msk.bf16.vlgmr.msra.gmra.mxu1 %vm8308_vm6, %v10034_v2  ;;  %v7147_v59 = vpop.permute.xlu2 %7146  ;;  %v7650_v50 = vrot.slane %v7648_v36, 4  ;;  %v6301_v2 = vld [vmem:[#allocation2 + $0x94] sm:$0xf] }
 0x3f5   :  { %7330 = vst.msk [vmem:[#allocation3 + $0xc] sm:$0xf] %vm7326_vm3, %v7141_v35  ;;  %v7145_v38 = vpop.permute.xlu0 %7144  ;;  %v5472_v35 = vsel %vm10227_vm8, %v5470_v1, %v5471_v37  ;;  %v6616_v11 = vshll.u32 %v6301_v2, 16  ;;  %v6626_v1 = vshll.u32 %v6302_v3, 16 }
 0x3f6   :  { %8003 = vst.msk [vmem:[#allocation3 + $0xc] sm:$0xf] %vm7999_vm4, %v12513_v10  ;;  %v5903_v10 = vld [vmem:[#allocation2 + $0x84] sm:$0xf] }
 0x3f7   :  { %v6618_v51 = vrot.slane %v6616_v11, 5  ;;  %v7423_v11 = vld [vmem:[#allocation2 + $0x98] sm:$0x1] }
 0x3f8   :  { %v7658_v58 = vrot.slane %v7423_v11, 5  ;;  %v5250_v11 = vld [vmem:[#allocation2 + $0xa8] sm:$0xe] }
 0x3f9   :  { %6045 = vrot.lane.b32.xlu1 %v5901_v7, %s10112_s30 }
 0x3fa   :  { %7839 = vrot.lane.b32.xlu2 %v7642_v33, %s10114_s23  ;;  %v9779_v33 = vrot.slane %v7421_v23, 9  ;;  %v7426_v23 = vld [vmem:[#allocation2 + $0xa4] sm:$0x1] }
 0x3fb   :  { %v7812_v4 = vpop.permute.xlu1 %7811  ;;  %6049 = vrot.lane.b32.xlu0 %v5903_v10, %s10112_s30  ;;  %v6607_v10 = vshrl.u32 %v6300_v27, 16  ;;  %v7665_v6 = vrot.slane %v7426_v23, 5 }
 0x3fc   :  { %8002 = vst.msk [vmem:[#allocation3 + $0x8] sm:$0xf] %vm7999_vm4, %v7812_v4  ;;  %v12567_v47 = vpop.permute.xlu2 %7821  ;;  %v5245_v4 = vld [vmem:[#allocation2 + $0x94] sm:$0xf]  ;;  %v7656_v28 = vsel %vm10227_vm8, %v9779_v33, %v7655_v15  ;;  %v6307_v33 = vld [vmem:[#allocation2 + $0xac] sm:$0xf] }
 0x3fd   :  { %v6026_v21 = vpop.permute.xlu0 %6025  ;;  %v5482_v45 = vrot.slane %v5245_v4, 5  ;;  %v6609_v40 = vrot.slane %v6607_v10, 4  ;;  %v7424_v10 = vld [vmem:[#allocation2 + $0x9c] sm:$0xe]  ;;  %v6668_v30 = vshrl.u32 %v6307_v33, 16 }
 0x3fe   :  { %6212 = vst.msk [vmem:[#allocation3 + $0x18] sm:$0xf] %vm6205_vm2, %v6026_v21 }
 0x3ff   :  { %7333 = vst.msk [vmem:[#allocation3 + $0x18] sm:$0xf] %vm7326_vm3, %v7147_v59  ;;  %v6620_v59 = vshrl.u32 %v6301_v2, 16  ;;  %v5484_v41 = vrot.slane %v5482_v45, 4 }
 0x401   :  { %7168 = vrot.lane.b32.xlu1 %v6581_v55, %s10113_s13  ;;  %v6622_v52 = vrot.slane %v6620_v59, 4  ;;  %v5246_v55 = vld [vmem:[#allocation2 + $0x98] sm:$0x1] }
 0x402   :  { %5665 = vrot.lane.b32.xlu2 %v5472_v35, %s10111_s3  ;;  %v6612_v35 = vrot.slane %v6610_v18, 5  ;;  %v5485_v57 = vrot.slane %v5246_v55, 5  ;;  %v6664_v18 = vshll.u32 %v6307_v33, 16 }
 0x403   :  { %v6024_v29 = vpop.permute.xlu1 %6023  ;;  %v10035_v14 = vld [vmem:[#allocation3 + $0x8] sm:$0xff]  ;;  %7172 = vrot.lane.b32.xlu0 %v6605_v0, %s10113_s13  ;;  %v6623_v21 = vor.u32 %v6622_v52, %v6618_v51 }
 0x404   :  { %6211 = vst.msk [vmem:[#allocation3 + $0x14] sm:$0xf] %vm6205_vm2, %v6024_v29  ;;  %9938 = vmatmul.msk.bf16.gmra.mxu1 %vm8308_vm6, %v10035_v14  ;;  %v7151_v5 = vpop.permute.xlu2 %7150  ;;  %v6628_v14 = vrot.slane %v6626_v1, 5  ;;  %v6613_v26 = vor.u32 %v6612_v35, %v6609_v40  ;;  %v5486_v25 = vsel %vm10227_vm8, %v5484_v41, %v5485_v57  ;;  %v12664_v1 = vrot.slane %v6664_v18, 5  ;;  %v6308_v40 = vld [vmem:[#allocation2 + $0xb0] sm:$0x1] }
 0x405   :  { %7332 = vst.msk [vmem:[#allocation3 + $0x14] sm:$0xf] %vm7326_vm3, %v7145_v38  ;;  %v7149_v61 = vpop.permute.xlu0 %7148  ;;  %v6624_v0 = vrot.slane %v6623_v21, 4  ;;  %v9780_v21 = vrot.slane %v7424_v10, 9  ;;  %v5909_v41 = vld [vmem:[#allocation2 + $0xa8] sm:$0xf] }
 0x406   :  { %8005 = vst.msk [vmem:[#allocation3 + $0x14] sm:$0xf] %vm7999_vm4, %v12544_v39  ;;  %v7420_v39 = vld [vmem:[#allocation2 + $0x8c] sm:$0x1]  ;;  %v7427_v18 = vld [vmem:[#allocation2 + $0xa8] sm:$0xe] }
 0x407   :  { %v7651_v24 = vrot.slane %v7420_v39, 5  ;;  %v6629_v60 = vsel %vm10215_vm5, %v6624_v0, %v6628_v14  ;;  %v5910_v10 = vld [vmem:[#allocation2 + $0xac] sm:$0xf] }
 0x409   :  { %5663 = vrot.lane.b32.xlu1 %v5469_v42, %s10111_s3  ;;  %v7652_v48 = vsel %vm10227_vm8, %v7650_v50, %v7651_v24 }
 0x40a   :  { %7170 = vrot.lane.b32.xlu2 %v6595_v16, %s10113_s13 }
 0x40b   :  { %v7816_v43 = vpop.permute.xlu1 %7815  ;;  %5667 = vrot.lane.b32.xlu0 %v5476_v31, %s10111_s3  ;;  %v6614_v31 = vrot.slane %v6613_v26, 4 }
 0x40c   :  { %8004 = vst.msk [vmem:[#allocation3 + $0x10] sm:$0xf] %vm7999_vm4, %v7816_v43  ;;  %v12595_v44 = vpop.permute.xlu2 %7825  ;;  %v5244_v43 = vld [vmem:[#allocation2 + $0x90] sm:$0xe] }
 0x40d   :  { %v6030_v22 = vpop.permute.xlu0 %6029  ;;  %v9748_v24 = vrot.slane %v5244_v43, 9 }
 0x40e   :  { %6214 = vst.msk [vmem:[#allocation3 + $0x20] sm:$0xf] %vm6205_vm2, %v6030_v22  ;;  %v6640_v22 = vshll.u32 %v6304_v12, 16 }
 0x40f   :  { %7335 = vst.msk [vmem:[#allocation3 + $0x20] sm:$0xf] %vm7326_vm3, %v7151_v5  ;;  %v6633_v5 = vrot.slane %v6631_v53, 4  ;;  %v5483_v59 = vsel %vm10227_vm8, %v9748_v24, %v5482_v45  ;;  %v6306_v45 = vld [vmem:[#allocation2 + $0xa8] sm:$0xf] }
 0x410   :  { %v5907_v53 = vld [vmem:[#allocation2 + $0x9c] sm:$0xf]  ;;  %v6655_v0 = vshrl.u32 %v6306_v45, 16  ;;  %v6658_v14 = vshll.u32 %v6306_v45, 16 }
 0x411   :  { %6051 = vrot.lane.b32.xlu1 %v5904_v54, %s10112_s30  ;;  %v6619_v54 = vsel %vm10215_vm5, %v6614_v31, %v6618_v51  ;;  %v6644_v51 = vshrl.u32 %v6304_v12, 16 }
 0x412   :  { %7845 = vrot.lane.b32.xlu2 %v7652_v48, %s10114_s23  ;;  %v6642_v48 = vrot.slane %v6640_v22, 5  ;;  %v5247_v22 = vld [vmem:[#allocation2 + $0x9c] sm:$0xe] }
 0x413   :  { %v6028_v63 = vpop.permute.xlu1 %6027  ;;  %v10036_v38 = vld [vmem:[#allocation3 + $0x10] sm:$0xff]  ;;  %6055 = vrot.lane.b32.xlu0 %v5906_v56, %s10112_s30 }
 0x414   :  { %6213 = vst.msk [vmem:[#allocation3 + $0x1c] sm:$0xf] %vm6205_vm2, %v6028_v63  ;;  %9939 = vmatmul.msk.bf16.gmra.mxu1 %vm8308_vm6, %v10036_v38  ;;  %v7155_v46 = vpop.permute.xlu2 %7154  ;;  %v7657_v38 = vrot.slane %v7655_v15, 4  ;;  %v6646_v15 = vrot.slane %v6644_v51, 4 }
 0x415   :  { %7334 = vst.msk [vmem:[#allocation3 + $0x1c] sm:$0xf] %vm7326_vm3, %v7149_v61  ;;  %v7153_v7 = vpop.permute.xlu0 %7152  ;;  %v6636_v61 = vrot.slane %v6634_v19, 5 }
 0x416   :  { %8007 = vst.msk [vmem:[#allocation3 + $0x1c] sm:$0xf] %vm7999_vm4, %v12567_v47  ;;  %v5478_v47 = vrot.slane %v5243_v8, 5  ;;  %v7659_v52 = vsel %vm10227_vm8, %v7657_v38, %v7658_v58  ;;  %v5908_v8 = vld [vmem:[#allocation2 + $0xa0] sm:$0xf]  ;;  %v6647_v19 = vor.u32 %v6646_v15, %v6642_v48  ;;  %v9750_v38 = vrot.slane %v5250_v11, 9 }
 0x417   :  { %v6637_v36 = vor.u32 %v6636_v61, %v6633_v5  ;;  %v6674_v5 = vshll.u32 %v6308_v40, 16  ;;  %v5249_v61 = vld [vmem:[#allocation2 + $0xa4] sm:$0x1]  ;;  %v7428_v58 = vld [vmem:[#allocation2 + $0xac] sm:$0xf] }
 0x418   :  { %v5479_v17 = vsel %vm10227_vm8, %v5477_v13, %v5478_v47  ;;  %v6305_v13 = vld [vmem:[#allocation2 + $0xa4] sm:$0x1]  ;;  %v12715_v40 = vld [vmem:[#allocation2 + $0xb8] sm:$0xf] }
 0x419   :  { %7843 = vrot.lane.b32.xlu1 %v7649_v49, %s10114_s23  ;;  %v6638_v2 = vrot.slane %v6637_v36, 4  ;;  %v6650_v55 = vshll.u32 %v6305_v13, 16  ;;  %v6660_v36 = vrot.slane %v6658_v14, 5  ;;  %v6676_v31 = vrot.slane %v6674_v5, 5  ;;  %v6309_v13 = vld [vmem:[#allocation2 + $0xb4] sm:$0xf] }
 0x41a   :  { %6053 = vrot.lane.b32.xlu2 %v5905_v62, %s10112_s30  ;;  %v6311_v14 = vld [vmem:[#allocation2 + $0xbc] sm:$0x1]  ;;  %v6312_v5 = vld [vmem:[#allocation2 + $0xc0] sm:$0xf] }
 0x41b   :  { %v7820_v37 = vpop.permute.xlu1 %7819  ;;  %7847 = vrot.lane.b32.xlu0 %v7656_v28, %s10114_s23  ;;  %v6643_v56 = vsel %vm10215_vm5, %v6638_v2, %v6642_v48  ;;  %v5248_v28 = vld [vmem:[#allocation2 + $0xa0] sm:$0xf]  ;;  %v6652_v26 = vrot.slane %v6650_v55, 5  ;;  %v9749_v48 = vrot.slane %v5247_v22, 9 }
 0x41c   :  { %8006 = vst.msk [vmem:[#allocation3 + $0x18] sm:$0xf] %vm7999_vm4, %v7820_v37  ;;  %v12620_v9 = vpop.permute.xlu2 %7829  ;;  %v6670_v37 = vrot.slane %v6668_v30, 4 }
 0x41d   :  { %v6034_v29 = vpop.permute.xlu0 %6033 }
 0x41e   :  { %6216 = vst.msk [vmem:[#allocation3 + $0x28] sm:$0xf] %vm6205_vm2, %v6034_v29  ;;  %v5489_v29 = vrot.slane %v5248_v28, 5  ;;  %v6671_v57 = vor.u32 %v6670_v37, %v12664_v1  ;;  %v9781_v37 = vrot.slane %v7427_v18, 9  ;;  %v7430_v28 = vld [vmem:[#allocation2 + $0xb4] sm:$0xe] }
 0x41f   :  { %7337 = vst.msk [vmem:[#allocation3 + $0x28] sm:$0xf] %vm7326_vm3, %v7155_v46  ;;  %v7434_v18 = vld [vmem:[#allocation2 + $0xc4] sm:$0xf] }
 0x420   :  { %v6672_v43 = vrot.slane %v6671_v57, 4  ;;  %v5490_v23 = vsel %vm10227_vm8, %v9749_v48, %v5489_v29  ;;  %v5254_v57 = vld [vmem:[#allocation2 + $0xb8] sm:$0xf] }
 0x421   :  { %5669 = vrot.lane.b32.xlu1 %v5479_v17, %s10111_s3  ;;  %v6648_v17 = vrot.slane %v6647_v19, 4  ;;  %v6679_v19 = vshrl.u32 %v6309_v13, 16 }
 0x422   :  { %7176 = vrot.lane.b32.xlu2 %v6629_v60, %s10113_s13 }
 0x423   :  { %v6032_v42 = vpop.permute.xlu1 %6031  ;;  %v10037_v16 = vld [vmem:[#allocation3 + $0x18] sm:$0xff]  ;;  %5673 = vrot.lane.b32.xlu0 %v5486_v25, %s10111_s3  ;;  %v5492_v25 = vrot.slane %v5249_v61, 5  ;;  %v7676_v61 = vrot.slane %v12715_v40, 5  ;;  %v6681_v22 = vrot.slane %v6679_v19, 4  ;;  %v6316_v40 = vld [vmem:[#allocation2 + $0xd0] sm:$0xf] }
 0x424   :  { %6215 = vst.msk [vmem:[#allocation3 + $0x24] sm:$0xf] %vm6205_vm2, %v6032_v42  ;;  %9940 = vmatmul.msk.bf16.gmra.mxu1 %vm8308_vm6, %v10037_v16  ;;  %v7159_v39 = vpop.permute.xlu2 %7158  ;;  %v5491_v42 = vrot.slane %v5489_v29, 4  ;;  %v6657_v16 = vrot.slane %v6655_v0, 4  ;;  %v9782_v0 = vrot.slane %v7430_v28, 9 }
 0x425   :  { %7336 = vst.msk [vmem:[#allocation3 + $0x24] sm:$0xf] %vm7326_vm3, %v7153_v7  ;;  %v7157_v50 = vpop.permute.xlu0 %7156 }
 0x426   :  { %8009 = vst.msk [vmem:[#allocation3 + $0x24] sm:$0xf] %vm7999_vm4, %v12595_v44  ;;  %v7662_v44 = vrot.slane %v7425_v34, 5  ;;  %v6661_v24 = vor.u32 %v6660_v36, %v6657_v16  ;;  %v7677_v16 = vsel %vm10227_vm8, %v9782_v0, %v7676_v61  ;;  %v5503_v36 = vrot.slane %v5254_v57, 5 }
 0x428   :  { %v7664_v7 = vrot.slane %v7662_v44, 4  ;;  %v7663_v35 = vsel %vm10227_vm8, %v9780_v21, %v7662_v44  ;;  %v6662_v44 = vrot.slane %v6661_v24, 4  ;;  %v5912_v21 = vld [vmem:[#allocation2 + $0xb8] sm:$0xf]  ;;  %v5505_v48 = vrot.slane %v5503_v36, 4 }
 0x429   :  { %7174 = vrot.lane.b32.xlu1 %v6619_v54, %s10113_s13  ;;  %v6677_v54 = vsel %vm10215_vm5, %v6672_v43, %v6676_v31  ;;  %v6703_v43 = vshrl.u32 %v6312_v5, 16  ;;  %v6706_v31 = vshll.u32 %v6312_v5, 16  ;;  %v5914_v5 = vld [vmem:[#allocation2 + $0xc4] sm:$0xf] }
 0x42a   :  { %5671 = vrot.lane.b32.xlu2 %v5483_v59, %s10111_s3  ;;  %v7666_v49 = vsel %vm10227_vm8, %v7664_v7, %v7665_v6  ;;  %v6667_v7 = vsel %vm10215_vm5, %v6662_v44, %v12664_v1  ;;  %v7669_v6 = vrot.slane %v7428_v58, 5 }
 0x42b   :  { %v7824_v63 = vpop.permute.xlu1 %7823  ;;  %7178 = vrot.lane.b32.xlu0 %v6643_v56, %s10113_s13  ;;  %v5251_v56 = vld [vmem:[#allocation2 + $0xac] sm:$0xf] }
 0x42c   :  { %8008 = vst.msk [vmem:[#allocation3 + $0x20] sm:$0xf] %vm7999_vm4, %v7824_v63  ;;  %v12648_v46 = vpop.permute.xlu2 %7833 }
 0x42d   :  { %v6038_v27 = vpop.permute.xlu0 %6037 }
 0x42e   :  { %6218 = vst.msk [vmem:[#allocation3 + $0x30] sm:$0xf] %vm6205_vm2, %v6038_v27  ;;  %v5496_v27 = vrot.slane %v5251_v56, 5 }
 0x42f   :  { %7339 = vst.msk [vmem:[#allocation3 + $0x30] sm:$0xf] %vm7326_vm3, %v7159_v39  ;;  %v6653_v39 = vsel %vm10215_vm5, %v6648_v17, %v6652_v26  ;;  %v5911_v17 = vld [vmem:[#allocation2 + $0xb4] sm:$0xf] }
 0x430   :  { %v5498_v26 = vrot.slane %v5496_v27, 4 }
 0x431   :  { %7849 = vrot.lane.b32.xlu1 %v7659_v52, %s10114_s23  ;;  %v7429_v52 = vld [vmem:[#allocation2 + $0xb0] sm:$0x1] }
 0x432   :  { %6059 = vrot.lane.b32.xlu2 %v5908_v8, %s10112_s30 }
 0x433   :  { %v6036_v3 = vpop.permute.xlu1 %6035  ;;  %v10038_v4 = vld [vmem:[#allocation3 + $0x20] sm:$0xff]  ;;  %7853 = vrot.lane.b32.xlu0 %v7666_v49, %s10114_s23  ;;  %v7672_v49 = vrot.slane %v7429_v52, 5 }
 0x434   :  { %6217 = vst.msk [vmem:[#allocation3 + $0x2c] sm:$0xf] %vm6205_vm2, %v6036_v3  ;;  %9941 = vmatmul.msk.bf16.gmra.mxu1 %vm8308_vm6, %v10038_v4  ;;  %v6042_v62 = vpop.permute.xlu2 %6041  ;;  %v7671_v3 = vrot.slane %v7669_v6, 4  ;;  %v6310_v4 = vld [vmem:[#allocation2 + $0xb8] sm:$0xf] }
 0x435   :  { %7338 = vst.msk [vmem:[#allocation3 + $0x2c] sm:$0xf] %vm7326_vm3, %v7157_v50  ;;  %v7161_v47 = vpop.permute.xlu0 %7160  ;;  %v5493_v50 = vsel %vm10227_vm8, %v5491_v42, %v5492_v25  ;;  %v6688_v15 = vshll.u32 %v6310_v4, 16  ;;  %v6698_v42 = vshll.u32 %v6311_v14, 16 }
 0x436   :  { %8011 = vst.msk [vmem:[#allocation3 + $0x2c] sm:$0xf] %vm7999_vm4, %v12620_v9  ;;  %v7673_v30 = vsel %vm10227_vm8, %v7671_v3, %v7672_v49 }
 0x439   :  { %6057 = vrot.lane.b32.xlu1 %v5907_v53, %s10112_s30  ;;  %v5252_v53 = vld [vmem:[#allocation2 + $0xb0] sm:$0x1] }
 0x43a   :  { %7851 = vrot.lane.b32.xlu2 %v7663_v35, %s10114_s23  ;;  %v12717_v35 = vrot.slane %v6688_v15, 5  ;;  %v7432_v15 = vld [vmem:[#allocation2 + $0xbc] sm:$0x1] }
 0x43b   :  { %v7828_v9 = vpop.permute.xlu1 %7827  ;;  %6061 = vrot.lane.b32.xlu0 %v5909_v41, %s10112_s30  ;;  %v7670_v41 = vsel %vm10227_vm8, %v9781_v37, %v7669_v6  ;;  %v7678_v37 = vrot.slane %v7676_v61, 4  ;;  %v7679_v28 = vrot.slane %v7432_v15, 5 }
 0x43c   :  { %8010 = vst.msk [vmem:[#allocation3 + $0x28] sm:$0xf] %vm7999_vm4, %v7828_v9  ;;  %v12673_v60 = vpop.permute.xlu2 %7164  ;;  %v6682_v9 = vshll.u32 %v6309_v13, 16 }
 0x43d   :  { %v5656_v12 = vpop.permute.xlu0 %5655  ;;  %v7680_v14 = vsel %vm10227_vm8, %v7678_v37, %v7679_v28  ;;  %v5256_v28 = vld [vmem:[#allocation2 + $0xc0] sm:$0xe] }
 0x43e   :  { %5834 = vst.msk [vmem:[#allocation3 + $0x38] sm:$0xf] %vm5819_vm0, %v5656_v12 }
 0x43f   :  { %6220 = vst.msk [vmem:[#allocation3 + $0x38] sm:$0xf] %vm6205_vm2, %v6042_v62  ;;  %v6692_v62 = vshrl.u32 %v6310_v4, 16 }
 0x441   :  { %7180 = vrot.lane.b32.xlu1 %v6653_v39, %s10113_s13  ;;  %v6694_v29 = vrot.slane %v6692_v62, 4  ;;  %v5255_v39 = vld [vmem:[#allocation2 + $0xbc] sm:$0x1] }
 0x442   :  { %5677 = vrot.lane.b32.xlu2 %v5493_v50, %s10111_s3  ;;  %v6684_v50 = vrot.slane %v6682_v9, 5  ;;  %v5506_v11 = vrot.slane %v5255_v39, 5  ;;  %v6736_v9 = vshll.u32 %v6316_v40, 16  ;;  %v6317_v39 = vld [vmem:[#allocation2 + $0xd4] sm:$0x1] }
 0x443   :  { %v6040_v2 = vpop.permute.xlu1 %6039  ;;  %v10039_v34 = vld [vmem:[#allocation3 + $0x28] sm:$0xff]  ;;  %7184 = vrot.lane.b32.xlu0 %v6677_v54, %s10113_s13  ;;  %v6695_v12 = vor.u32 %v6694_v29, %v12717_v35 }
 0x444   :  { %6219 = vst.msk [vmem:[#allocation3 + $0x34] sm:$0xf] %vm6205_vm2, %v6040_v2  ;;  %9942 = vmatmul.msk.bf16.gmra.mxu1 %vm8308_vm6, %v10039_v34  ;;  %v5660_v59 = vpop.permute.xlu2 %5659  ;;  %v6700_v34 = vrot.slane %v6698_v42, 5  ;;  %v6685_v44 = vor.u32 %v6684_v50, %v6681_v22  ;;  %v5507_v6 = vsel %vm10227_vm8, %v5505_v48, %v5506_v11  ;;  %v12789_v50 = vld [vmem:[%s14430_s6] ss:$0 sm:$0xff] }
 0x445   :  { %7340 = vst.msk [vmem:[#allocation3 + $0x34] sm:$0xf] %vm7326_vm3, %v7161_v47  ;;  %v6044_v63 = vpop.permute.xlu0 %6043  ;;  %v6696_v54 = vrot.slane %v6695_v12, 4 }
 0x446   :  { %8013 = vst.msk [vmem:[#allocation3 + $0x34] sm:$0xf] %vm7999_vm4, %v12648_v46  ;;  %v5497_v46 = vsel %vm10227_vm8, %v9750_v38, %v5496_v27  ;;  %v8810_v38 = vld [vmem:[%s14431_s7] sm:$0x3]  ;;  %v6313_v27 = vld [vmem:[#allocation2 + $0xc4] sm:$0xf] }
 0x447   :  { %5836 = vst.msk [vmem:[#allocation3 + $0x40] sm:$0xf] %vm5819_vm0, %v5660_v59  ;;  %v6705_v59 = vrot.slane %v6703_v43, 4  ;;  %v8909_v58 = vsel %vm8405_vm1, %v8810_v38, 0  ;;  %v6686_v52 = vrot.slane %v6685_v44, 4  ;;  %v6716_v0 = vshrl.u32 %v6313_v27, 16 }
 0x448   :  { %8918 = vmatpush.bf16.msra.mxu2 %v8909_v58  ;;  %10072 = vmatpush.bf16.msra.mxu3 %v8909_v58 }
 0x449   :  { %5675 = vrot.lane.b32.xlu1 %v5490_v23, %s10111_s3  ;;  %v6701_v23 = vsel %vm10215_vm5, %v6696_v54, %v6700_v34  ;;  %v6718_v12 = vrot.slane %v6716_v0, 4  ;;  %v5913_v54 = vld [vmem:[#allocation2 + $0xc0] sm:$0xf] }
 0x44a   :  { %7182 = vrot.lane.b32.xlu2 %v6667_v7, %s10113_s13 }
 0x44b   :  { %v7832_v51 = vpop.permute.xlu1 %7831  ;;  %5679 = vrot.lane.b32.xlu0 %v5497_v46, %s10111_s3  ;;  %v5253_v46 = vld [vmem:[#allocation2 + $0xb4] sm:$0xe] }
 0x44c   :  { %8012 = vst.msk [vmem:[#allocation3 + $0x30] sm:$0xf] %vm7999_vm4, %v7832_v51  ;;  %v6048_v33 = vpop.permute.xlu2 %6047  ;;  %v9751_v49 = vrot.slane %v5253_v46, 9 }
 0x44d   :  { %v7836_v8 = vpop.permute.xlu0 %7835 }
 0x44e   :  { %v5504_v62 = vsel %vm10227_vm8, %v9751_v49, %v5503_v36  ;;  %v6315_v36 = vld [vmem:[#allocation2 + $0xcc] sm:$0xf] }
 0x44f   :  { %v6727_v48 = vshrl.u32 %v6315_v36, 16  ;;  %v6730_v11 = vshll.u32 %v6315_v36, 16 }
 0x451   :  { %6063 = vrot.lane.b32.xlu1 %v5910_v10, %s10112_s30  ;;  %v6691_v10 = vsel %vm10215_vm5, %v6686_v52, %v12717_v35 }
 0x452   :  { %7857 = vrot.lane.b32.xlu2 %v7673_v30, %s10114_s23 }
 0x453   :  { %v5658_v47 = vpop.permute.xlu1 %5657  ;;  %v10040_v1 = vld [vmem:[#allocation3 + $0x30] sm:$0xff]  ;;  %6067 = vrot.lane.b32.xlu0 %v5912_v21, %s10112_s30 }
 0x454   :  { %5835 = vst.msk [vmem:[#allocation3 + $0x3c] sm:$0xf] %vm5819_vm0, %v5658_v47  ;;  %9943 = vmatmul.msk.bf16.gmra.mxu1 %vm8308_vm6, %v10040_v1  ;;  %v12711_v45 = vpop.permute.xlu2 %7839  ;;  %v7683_v1 = vrot.slane %v7434_v18, 5 }
 0x455   :  { %6221 = vst.msk [vmem:[#allocation3 + $0x3c] sm:$0xf] %vm6205_vm2, %v6044_v63  ;;  %v5662_v55 = vpop.permute.xlu0 %5661  ;;  %v6708_v63 = vrot.slane %v6706_v31, 5 }
 0x456   :  { %7342 = vst.msk [vmem:[#allocation3 + $0x3c] sm:$0xf] %vm7326_vm3, %v12673_v60  ;;  %v5499_v60 = vrot.slane %v5252_v53, 5  ;;  %v7435_v53 = vld [vmem:[#allocation2 + $0xc8] sm:$0x1]  ;;  %v7685_v35 = vrot.slane %v7683_v1, 4 }
 0x457   :  { %5837 = vst.msk [vmem:[#allocation3 + $0x44] sm:$0xf] %vm5819_vm0, %v5662_v55  ;;  %v6709_v51 = vor.u32 %v6708_v63, %v6705_v59  ;;  %v7686_v29 = vrot.slane %v7435_v53, 5  ;;  %v5915_v59 = vld [vmem:[#allocation2 + $0xcc] sm:$0xf] }
 0x458   :  { %6223 = vst.msk [vmem:[#allocation3 + $0x44] sm:$0xf] %vm6205_vm2, %v6048_v33  ;;  %v5500_v56 = vsel %vm10227_vm8, %v5498_v26, %v5499_v60  ;;  %v7433_v26 = vld [vmem:[#allocation2 + $0xc0] sm:$0xe]  ;;  %v6314_v60 = vld [vmem:[#allocation2 + $0xc8] sm:$0x1] }
 0x459   :  { %7855 = vrot.lane.b32.xlu1 %v7670_v41, %s10114_s23  ;;  %v6710_v4 = vrot.slane %v6709_v51, 4  ;;  %v6740_v41 = vshrl.u32 %v6316_v40, 16  ;;  %v9783_v31 = vrot.slane %v7433_v26, 9  ;;  %v5258_v51 = vld [vmem:[#allocation2 + $0xc8] sm:$0x1] }
 0x45a   :  { %6065 = vrot.lane.b32.xlu2 %v5911_v17, %s10112_s30  ;;  %v12775_v17 = vld [vmem:[%s14429_s5] ss:$0 sm:$0xff] }
 0x45b   :  { %v7163_v25 = vpop.permute.xlu1 %7162  ;;  %7859 = vrot.lane.b32.xlu0 %v7677_v16, %s10114_s23  ;;  %v6742_v16 = vrot.slane %v6740_v41, 4  ;;  %v7684_v38 = vsel %vm10227_vm8, %v9783_v31, %v7683_v1  ;;  %v7437_v41 = vld [vmem:[#allocation2 + $0xd0] sm:$0xf] }
 0x45c   :  { %7341 = vst.msk [vmem:[#allocation3 + $0x38] sm:$0xf] %vm7326_vm3, %v7163_v25  ;;  %v5666_v24 = vpop.permute.xlu2 %5665  ;;  %v12783_v25 = vrot.slane %v6736_v9, 5  ;;  %v12825_v9 = vld [vmem:[#allocation2 + $0xe8] sm:$0xf] }
 0x45d   :  { %8014 = vst.msk [vmem:[#allocation3 + $0x38] sm:$0xf] %vm7999_vm4, %v7836_v8  ;;  %v7167_v2 = vpop.permute.xlu0 %7166  ;;  %v6712_v8 = vshll.u32 %v6313_v27, 16  ;;  %v5517_v26 = vrot.slane %v12825_v9, 5  ;;  %v5285_v9 = vld [vmem:[#allocation2 + $0x14c] sm:$0x1] }
 0x45e   :  { %5839 = vst.msk [vmem:[#allocation3 + $0x4c] sm:$0xf] %vm5819_vm0, %v5666_v24  ;;  %v6722_v24 = vshll.u32 %v6314_v60, 16  ;;  %v6743_v63 = vor.u32 %v6742_v16, %v12783_v25 }
 0x45f   :  { %v12753_v30 = vrot.slane %v6712_v8, 5  ;;  %v6729_v8 = vrot.slane %v6727_v48, 4 }
 0x461   :  { %5681 = vrot.lane.b32.xlu1 %v5500_v56, %s10111_s3  ;;  %v6715_v47 = vsel %vm10215_vm5, %v6710_v4, %v12753_v30  ;;  %v6719_v34 = vor.u32 %v6718_v12, %v12753_v30  ;;  %v6746_v56 = vshll.u32 %v6317_v39, 16  ;;  %v7690_v12 = vrot.slane %v7437_v41, 5 }
 0x462   :  { %7188 = vrot.lane.b32.xlu2 %v6701_v23, %s10113_s13 }
 0x463   :  { %v7838_v7 = vpop.permute.xlu1 %7837  ;;  %5685 = vrot.lane.b32.xlu0 %v5507_v6, %s10111_s3  ;;  %v6724_v6 = vrot.slane %v6722_v24, 5  ;;  %v6720_v52 = vrot.slane %v6719_v34, 4  ;;  %v6748_v18 = vrot.slane %v6746_v56, 5 }
 0x464   :  { %8015 = vst.msk [vmem:[#allocation3 + $0x3c] sm:$0xf] %vm7999_vm4, %v7838_v7  ;;  %v12747_v33 = vpop.permute.xlu2 %7170 }
 0x465   :  { %v7842_v3 = vpop.permute.xlu0 %7841 }
 0x469   :  { %7186 = vrot.lane.b32.xlu1 %v6691_v10, %s10113_s13  ;;  %v6744_v10 = vrot.slane %v6743_v63, 4 }
 0x46a   :  { %5683 = vrot.lane.b32.xlu2 %v5504_v62, %s10111_s3  ;;  %v5513_v62 = vrot.slane %v5258_v51, 5  ;;  %v7439_v51 = vld [vmem:[#allocation2 + $0xf0] sm:$0xe] }
 0x46b   :  { %v6046_v13 = vpop.permute.xlu1 %6045  ;;  %v10041_v21 = vld [vmem:[#allocation3 + $0x38] sm:$0xff]  ;;  %7190 = vrot.lane.b32.xlu0 %v6715_v47, %s10113_s13 }
 0x46c   :  { %6222 = vst.msk [vmem:[#allocation3 + $0x40] sm:$0xf] %vm6205_vm2, %v6046_v13  ;;  %9944 = vmatmul.msk.bf16.gmra.mxu1 %vm8308_vm6, %v10041_v21  ;;  %v12765_v19 = vpop.permute.xlu2 %7845  ;;  %v6725_v21 = vsel %vm10215_vm5, %v6720_v52, %v6724_v6 }
 0x46d   :  { %7343 = vst.msk [vmem:[#allocation3 + $0x40] sm:$0xf] %vm7326_vm3, %v7167_v2  ;;  %v6050_v55 = vpop.permute.xlu0 %6049  ;;  %v12791_v2 = vld [vmem:[#allocation2 + $0xc4] sm:$0xf] }
 0x46e   :  { %8016 = vst.msk [vmem:[#allocation3 + $0x40] sm:$0xf] %vm7999_vm4, %v12711_v45  ;;  %v7687_v45 = vsel %vm10227_vm8, %v7685_v35, %v7686_v29  ;;  %v5510_v58 = vrot.slane %v12791_v2, 5  ;;  %v9752_v35 = vrot.slane %v5256_v28, 9  ;;  %v5259_v29 = vld [vmem:[#allocation2 + $0xe4] sm:$0xe] }
 0x470   :  { %v5512_v15 = vrot.slane %v5510_v58, 4 }
 0x471   :  { %7861 = vrot.lane.b32.xlu1 %v7680_v14, %s10114_s23  ;;  %v8418_v57 = vpop.f32.mrf.mxu1 }
 0x472   :  { %6071 = vrot.lane.b32.xlu2 %v5914_v5, %s10112_s30  ;;  %v8582_v22 = vmul.f32 %v12775_v17, %v8418_v57 }
 0x473   :  { %v7169_v61 = vpop.permute.xlu1 %7168  ;;  %7865 = vrot.lane.b32.xlu0 %v7687_v45, %s10114_s23  ;;  %v5511_v45 = vsel %vm10227_vm8, %v9752_v35, %v5510_v58 }
 0x474   :  { %7344 = vst.msk [vmem:[#allocation3 + $0x44] sm:$0xf] %vm7326_vm3, %v7169_v61  ;;  %v6054_v42 = vpop.permute.xlu2 %6053  ;;  %v8650_v23 = vadd.f32 %v12789_v50, %v8582_v22  ;;  %v9753_v61 = vrot.slane %v5259_v29, 9 }
 0x475   :  { %8017 = vst.msk [vmem:[#allocation3 + $0x44] sm:$0xf] %vm7999_vm4, %v7842_v3  ;;  %v7173_v43 = vpop.permute.xlu0 %7172  ;;  %v6732_v3 = vrot.slane %v6730_v11, 5  ;;  %v7436_v11 = vld [vmem:[#allocation2 + $0xcc] sm:$0xe] }
 0x476   :  { %v8714_v13 = vmax.f32 %v8650_v23, 0.0  ;;  %v5518_v31 = vsel %vm10227_vm8, %v9753_v61, %v5517_v26 }
 0x477   :  { %v6733_v1 = vor.u32 %v6732_v3, %v6729_v8  ;;  %v5261_v8 = vld [vmem:[#allocation2 + $0xec] sm:$0x1]  ;;  %v6318_v3 = vld [vmem:[#allocation2 + $0xf0] sm:$0xf] }
 0x478   :  { %v5520_v35 = vrot.slane %v5261_v8, 5  ;;  %v12907_v8 = vld [vmem:[#allocation2 + $0x154] sm:$0xf] }
 0x479   :  { %6069 = vrot.lane.b32.xlu1 %v5913_v54, %s10112_s30  ;;  %v8420_v44 = vpop.f32.mrf.mxu1  ;;  %v6734_v0 = vrot.slane %v6733_v1, 4  ;;  %v5916_v54 = vld [vmem:[#allocation2 + $0xd0] sm:$0xf]  ;;  %v6754_v1 = vshll.u32 %v6318_v3, 16 }
 0x47a   :  { %v8583_v7 = vmul.f32 %v12775_v17, %v8420_v44  ;;  %7863 = vrot.lane.b32.xlu2 %v7684_v38, %s10114_s23  ;;  %v9784_v38 = vrot.slane %v7436_v11, 9  ;;  %v6343_v11 = vld [vmem:[#allocation2 + $0x154] sm:$0xf] }
 0x47b   :  { %v5664_v27 = vpop.permute.xlu1 %5663  ;;  %6073 = vrot.lane.b32.xlu0 %v5915_v59, %s10112_s30  ;;  %v6739_v60 = vsel %vm10215_vm5, %v6734_v0, %v12783_v25  ;;  %v7692_v25 = vrot.slane %v7690_v12, 4  ;;  %v6319_v59 = vld [vmem:[#allocation2 + $0xf4] sm:$0xf] }
 0x47c   :  { %5838 = vst.msk [vmem:[#allocation3 + $0x48] sm:$0xf] %vm5819_vm0, %v5664_v27  ;;  %v10042_v46 = vld [vmem:[#allocation3 + $0x40] sm:$0xff]  ;;  %v8651_v49 = vadd.f32 %v12789_v50, %v8583_v7  ;;  %v12806_v4 = vpop.permute.xlu2 %7176  ;;  %v6760_v58 = vshll.u32 %v6319_v59, 16  ;;  %v6764_v23 = vshrl.u32 %v6319_v59, 16 }
 0x47d   :  { %6224 = vst.msk [vmem:[#allocation3 + $0x48] sm:$0xf] %vm6205_vm2, %v6050_v55  ;;  %v5668_v30 = vpop.permute.xlu0 %5667  ;;  %9945 = vmatmul.msk.bf16.gmra.mxu1 %vm8308_vm6, %v10042_v46  ;;  %v5514_v55 = vsel %vm10227_vm8, %v5512_v15, %v5513_v62  ;;  %v5918_v7 = vld [vmem:[#allocation2 + $0xf4] sm:$0xf]  ;;  %v6342_v46 = vld [vmem:[#allocation2 + $0x150] sm:$0xf] }
 0x47e   :  { %7345 = vst.msk [vmem:[#allocation3 + $0x48] sm:$0xf] %vm7326_vm3, %v12747_v33  ;;  %v8715_v47 = vmax.f32 %v8651_v49, 0.0  ;;  %v6749_v33 = vsel %vm10215_vm5, %v6744_v10, %v6748_v18  ;;  %v7691_v10 = vsel %vm10227_vm8, %v9784_v38, %v7690_v12  ;;  %v12863_v18 = vld [vmem:[#allocation2 + $0xf4] sm:$0xf]  ;;  %v6766_v15 = vrot.slane %v6764_v23, 4 }
 0x47f   :  { %5840 = vst.msk [vmem:[#allocation3 + $0x50] sm:$0xf] %vm5819_vm0, %v5668_v30  ;;  %v12865_v30 = vrot.slane %v6760_v58, 5  ;;  %v6946_v28 = vshll.u32 %v6342_v46, 16  ;;  %v6952_v23 = vshll.u32 %v6343_v11, 16 }
 0x480   :  { %6226 = vst.msk [vmem:[#allocation3 + $0x50] sm:$0xf] %vm6205_vm2, %v6054_v42  ;;  %v8778_v37 = vpack.c.bf16 %v8715_v47, %v8714_v13  ;;  %v7438_v42 = vld [vmem:[#allocation2 + $0xd4] sm:$0x1]  ;;  %v9785_v13 = vrot.slane %v7439_v51, 9 }
 0x481   :  { %7192 = vrot.lane.b32.xlu1 %v6725_v21, %s10113_s13  ;;  %v8423_v53 = vpop.f32.mrf.mxu1  ;;  %v7693_v39 = vrot.slane %v7438_v42, 5  ;;  %v6320_v47 = vld [vmem:[#allocation2 + $0xf8] sm:$0x1]  ;;  %v12870_v21 = vld [vmem:[#allocation2 + $0x148] sm:$0xf]  ;;  %v6767_v29 = vor.u32 %v6766_v15, %v12865_v30 }
 0x482   :  { %5689 = vrot.lane.b32.xlu2 %v5514_v55, %s10111_s3  ;;  %9969 = vmatmul.msk.bf16.vlgmr.msra.gmra.mxu2 %vm8811_vm7, %v8778_v37  ;;  %v8584_v5 = vmul.f32 %v12775_v17, %v8423_v53  ;;  %v6943_v37 = vshrl.u32 %v6342_v46, 16  ;;  %v5917_v55 = vld [vmem:[#allocation2 + $0xf0] sm:$0xf]  ;;  %v6770_v0 = vshll.u32 %v6320_v47, 16  ;;  %v5573_v61 = vrot.slane %v12870_v21, 5 }
 0x483   :  { %v6052_v40 = vpop.permute.xlu1 %6051  ;;  %7196 = vrot.lane.b32.xlu0 %v6749_v33, %s10113_s13  ;;  %v7694_v63 = vsel %vm10227_vm8, %v7692_v25, %v7693_v39  ;;  %v7697_v33 = vrot.slane %v12863_v18, 5 }
 0x484   :  { %6225 = vst.msk [vmem:[#allocation3 + $0x4c] sm:$0xf] %vm6205_vm2, %v6052_v40  ;;  %v5672_v14 = vpop.permute.xlu2 %5671  ;;  %v8652_v16 = vadd.f32 %v12789_v50, %v8584_v5  ;;  %v5519_v40 = vrot.slane %v5517_v26, 4  ;;  %v6756_v26 = vrot.slane %v6754_v1, 5  ;;  %v5575_v39 = vrot.slane %v5573_v61, 4 }
 0x485   :  { %7346 = vst.msk [vmem:[#allocation3 + $0x4c] sm:$0xf] %vm7326_vm3, %v7173_v43  ;;  %v6056_v57 = vpop.permute.xlu0 %6055  ;;  %v7698_v5 = vsel %vm10227_vm8, %v9785_v13, %v7697_v33  ;;  %v7699_v1 = vrot.slane %v7697_v33, 4  ;;  %v6322_v33 = vld [vmem:[#allocation2 + $0x100] sm:$0xf] }
 0x486   :  { %8019 = vst.msk [vmem:[#allocation3 + $0x4c] sm:$0xf] %vm7999_vm4, %v12765_v19  ;;  %v8716_v34 = vmax.f32 %v8652_v16, 0.0  ;;  %v6772_v16 = vrot.slane %v6770_v0, 5 }
 0x487   :  { %5842 = vst.msk [vmem:[#allocation3 + $0x58] sm:$0xf] %vm5819_vm0, %v5672_v14 }
 0x489   :  { %5687 = vrot.lane.b32.xlu1 %v5511_v45, %s10111_s3  ;;  %v8425_v19 = vpop.f32.mrf.mxu1 }
 0x48a   :  { %v8585_v43 = vmul.f32 %v12775_v17, %v8425_v19  ;;  %7194 = vrot.lane.b32.xlu2 %v6739_v60, %s10113_s13  ;;  %v6768_v19 = vrot.slane %v6767_v29, 4 }
 0x48b   :  { %v7844_v36 = vpop.permute.xlu1 %7843  ;;  %5691 = vrot.lane.b32.xlu0 %v5518_v31, %s10111_s3 }
 0x48c   :  { %8018 = vst.msk [vmem:[#allocation3 + $0x48] sm:$0xf] %vm7999_vm4, %v7844_v36  ;;  %v8653_v22 = vadd.f32 %v12789_v50, %v8585_v43  ;;  %v6060_v24 = vpop.permute.xlu2 %6059  ;;  %v6945_v36 = vrot.slane %v6943_v37, 4  ;;  %v6948_v43 = vrot.slane %v6946_v28, 5 }
 0x48d   :  { %v7848_v2 = vpop.permute.xlu0 %7847 }
 0x48e   :  { %v8717_v48 = vmax.f32 %v8653_v22, 0.0  ;;  %v5576_v22 = vrot.slane %v5285_v9, 5 }
 0x490   :  { %v8779_v56 = vpack.c.bf16 %v8717_v48, %v8716_v34  ;;  %v6773_v48 = vsel %vm10215_vm5, %v6768_v19, %v6772_v16 }
 0x491   :  { %6075 = vrot.lane.b32.xlu1 %v5916_v54, %s10112_s30  ;;  %v8428_v44 = vpop.f32.mrf.mxu1 }
 0x492   :  { %7869 = vrot.lane.b32.xlu2 %v7694_v63, %s10114_s23  ;;  %9970 = vmatmul.msk.bf16.gmra.mxu2 %vm8811_vm7, %v8779_v56  ;;  %v8586_v62 = vmul.f32 %v12775_v17, %v8428_v44  ;;  %v5577_v63 = vsel %vm10227_vm8, %v5575_v39, %v5576_v22  ;;  %v6949_v56 = vor.u32 %v6948_v43, %v6945_v36  ;;  %v5283_v44 = vld [vmem:[#allocation2 + $0x144] sm:$0xe]  ;;  %v6344_v36 = vld [vmem:[#allocation2 + $0x158] sm:$0x1]  ;;  %v12947_v39 = vld [vmem:[#allocation2 + $0xf4] sm:$0xf] }
 0x493   :  { %v5670_v27 = vpop.permute.xlu1 %5669  ;;  %v10043_v6 = vld [vmem:[#allocation3 + $0x48] sm:$0xff]  ;;  %6079 = vrot.lane.b32.xlu0 %v5918_v7, %s10112_s30  ;;  %v9761_v7 = vrot.slane %v5283_v44, 9 }
 0x494   :  { %5841 = vst.msk [vmem:[#allocation3 + $0x54] sm:$0xf] %vm5819_vm0, %v5670_v27  ;;  %9946 = vmatmul.msk.bf16.gmra.mxu1 %vm8308_vm6, %v10043_v6  ;;  %v12857_v52 = vpop.permute.xlu2 %7851  ;;  %v8654_v14 = vadd.f32 %v12789_v50, %v8586_v62  ;;  %v6950_v51 = vrot.slane %v6949_v56, 4  ;;  %v6321_v22 = vld [vmem:[#allocation2 + $0xfc] sm:$0xf] }
 0x495   :  { %6227 = vst.msk [vmem:[#allocation3 + $0x54] sm:$0xf] %vm6205_vm2, %v6056_v57  ;;  %v5674_v49 = vpop.permute.xlu0 %5673  ;;  %v5574_v15 = vsel %vm10227_vm8, %v9761_v7, %v5573_v61  ;;  %v5934_v61 = vld [vmem:[#allocation2 + $0x154] sm:$0xf]  ;;  %v6778_v56 = vshll.u32 %v6321_v22, 16 }
 0x496   :  { %7348 = vst.msk [vmem:[#allocation3 + $0x54] sm:$0xf] %vm7326_vm3, %v12806_v4  ;;  %v6751_v4 = vshrl.u32 %v6318_v3, 16  ;;  %v8718_v31 = vmax.f32 %v8654_v14, 0.0  ;;  %v12910_v3 = vrot.slane %v6952_v23, 5  ;;  %v6956_v14 = vshrl.u32 %v6343_v11, 16 }
 0x497   :  { %5843 = vst.msk [vmem:[#allocation3 + $0x5c] sm:$0xf] %vm5819_vm0, %v5674_v49  ;;  %v7441_v49 = vld [vmem:[#allocation2 + $0xf8] sm:$0x1] }
 0x498   :  { %6229 = vst.msk [vmem:[#allocation3 + $0x5c] sm:$0xf] %vm6205_vm2, %v6060_v24  ;;  %v6753_v45 = vrot.slane %v6751_v4, 4  ;;  %v5521_v24 = vsel %vm10227_vm8, %v5519_v40, %v5520_v35  ;;  %v7753_v4 = vrot.slane %v12907_v8, 5  ;;  %v7700_v37 = vrot.slane %v7441_v49, 5 }
 0x499   :  { %7867 = vrot.lane.b32.xlu1 %v7691_v10, %s10114_s23  ;;  %v8430_v53 = vpop.f32.mrf.mxu1  ;;  %v7465_v40 = vld [vmem:[#allocation2 + $0x158] sm:$0x1] }
 0x49a   :  { %v8587_v57 = vmul.f32 %v12775_v17, %v8430_v53  ;;  %6077 = vrot.lane.b32.xlu2 %v5917_v55, %s10112_s30  ;;  %v6757_v54 = vor.u32 %v6756_v26, %v6753_v45  ;;  %v7755_v0 = vrot.slane %v7753_v4, 4  ;;  %v7701_v18 = vsel %vm10227_vm8, %v7699_v1, %v7700_v37  ;;  %v7463_v45 = vld [vmem:[#allocation2 + $0x150] sm:$0xe] }
 0x49b   :  { %v7175_v41 = vpop.permute.xlu1 %7174  ;;  %7871 = vrot.lane.b32.xlu0 %v7698_v5, %s10114_s23  ;;  %v6784_v26 = vshll.u32 %v6322_v33, 16  ;;  %v9793_v16 = vrot.slane %v7463_v45, 9 }
 0x49c   :  { %7347 = vst.msk [vmem:[#allocation3 + $0x50] sm:$0xf] %vm7326_vm3, %v7175_v41  ;;  %v8655_v60 = vadd.f32 %v12789_v50, %v8587_v57  ;;  %v5678_v12 = vpop.permute.xlu2 %5677  ;;  %v6758_v38 = vrot.slane %v6757_v54, 4  ;;  %v7756_v41 = vrot.slane %v7465_v40, 5 }
 0x49d   :  { %8020 = vst.msk [vmem:[#allocation3 + $0x50] sm:$0xf] %vm7999_vm4, %v7848_v2  ;;  %v7179_v42 = vpop.permute.xlu0 %7178  ;;  %v7754_v11 = vsel %vm10227_vm8, %v9793_v16, %v7753_v4 }
 0x49e   :  { %5845 = vst.msk [vmem:[#allocation3 + $0x64] sm:$0xf] %vm5819_vm0, %v5678_v12  ;;  %v8719_v25 = vmax.f32 %v8655_v60, 0.0  ;;  %v6763_v46 = vsel %vm10215_vm5, %v6758_v38, %v12865_v30  ;;  %v6955_v30 = vsel %vm10215_vm5, %v6950_v51, %v12910_v3  ;;  %v6788_v60 = vshrl.u32 %v6322_v33, 16  ;;  %v5264_v51 = vld [vmem:[#allocation2 + $0xf8] sm:$0x1] }
 0x49f   :  { %v6958_v12 = vrot.slane %v6956_v14, 4 }
 0x4a0   :  { %v8780_v2 = vpack.c.bf16 %v8719_v25, %v8718_v31  ;;  %v12945_v31 = vrot.slane %v6784_v26, 5  ;;  %v6790_v25 = vrot.slane %v6788_v60, 4  ;;  %v7443_v26 = vld [vmem:[#allocation2 + $0x100] sm:$0xf] }
 0x4a1   :  { %5693 = vrot.lane.b32.xlu1 %v5521_v24, %s10111_s3  ;;  %v8433_v34 = vpop.f32.mrf.mxu1  ;;  %v5933_v24 = vld [vmem:[#allocation2 + $0x150] sm:$0xf]  ;;  %v6959_v54 = vor.u32 %v6958_v12, %v12910_v3 }
 0x4a2   :  { %7200 = vrot.lane.b32.xlu2 %v6773_v48, %s10113_s13  ;;  %9971 = vmatmul.msk.bf16.gmra.mxu2 %vm8811_vm7, %v8780_v2  ;;  %v8588_v6 = vmul.f32 %v12775_v17, %v8433_v34  ;;  %v6323_v2 = vld [vmem:[#allocation2 + $0x104] sm:$0x1]  ;;  %v6962_v34 = vshll.u32 %v6344_v36, 16  ;;  %v6791_v7 = vor.u32 %v6790_v25, %v12945_v31 }
 0x4a3   :  { %v7850_v59 = vpop.permute.xlu1 %7849  ;;  %5725 = vrot.lane.b32.xlu0 %v5577_v63, %s10111_s3  ;;  %v6775_v63 = vshrl.u32 %v6321_v22, 16  ;;  %v6960_v8 = vrot.slane %v6959_v54, 4  ;;  %v7444_v25 = vld [vmem:[#allocation2 + $0x104] sm:$0x1] }
 0x4a4   :  { %8021 = vst.msk [vmem:[#allocation3 + $0x54] sm:$0xf] %vm7999_vm4, %v7850_v59  ;;  %v12901_v58 = vpop.permute.xlu2 %7182  ;;  %v8656_v62 = vadd.f32 %v12789_v50, %v8588_v6  ;;  %v5524_v59 = vrot.slane %v12947_v39, 5  ;;  %v6794_v6 = vshll.u32 %v6323_v2, 16  ;;  %v6792_v1 = vrot.slane %v6791_v7, 4 }
 0x4a5   :  { %v7854_v27 = vpop.permute.xlu0 %7853  ;;  %v7707_v54 = vrot.slane %v7444_v25, 5 }
 0x4a6   :  { %v8720_v35 = vmax.f32 %v8656_v62, 0.0  ;;  %v5526_v62 = vrot.slane %v5524_v59, 4  ;;  %v6796_v37 = vrot.slane %v6794_v6, 5  ;;  %v5936_v6 = vld [vmem:[#allocation2 + $0x160] sm:$0xf] }
 0x4a8   :  { %v6797_v14 = vsel %vm10215_vm5, %v6792_v1, %v6796_v37  ;;  %v6347_v1 = vld [vmem:[#allocation2 + $0x164] sm:$0x1] }
 0x4a9   :  { %7198 = vrot.lane.b32.xlu1 %v6763_v46, %s10113_s13  ;;  %v8435_v10 = vpop.f32.mrf.mxu1 }
 0x4aa   :  { %v8589_v47 = vmul.f32 %v12775_v17, %v8435_v10  ;;  %5723 = vrot.lane.b32.xlu2 %v5574_v15, %s10111_s3  ;;  %v6964_v10 = vrot.slane %v6962_v34, 5 }
 0x4ab   :  { %v6058_v13 = vpop.permute.xlu1 %6057  ;;  %v10044_v21 = vld [vmem:[#allocation3 + $0x50] sm:$0xff]  ;;  %7230 = vrot.lane.b32.xlu0 %v6955_v30, %s10113_s13  ;;  %v6780_v30 = vrot.slane %v6778_v56, 5 }
 0x4ac   :  { %6228 = vst.msk [vmem:[#allocation3 + $0x58] sm:$0xf] %vm6205_vm2, %v6058_v13  ;;  %v8657_v28 = vadd.f32 %v12789_v50, %v8589_v47  ;;  %9947 = vmatmul.msk.bf16.gmra.mxu1 %vm8308_vm6, %v10044_v21  ;;  %v12928_v53 = vpop.permute.xlu2 %7857  ;;  %v5527_v13 = vrot.slane %v5264_v51, 5  ;;  %v6777_v47 = vrot.slane %v6775_v63, 4  ;;  %v7442_v63 = vld [vmem:[#allocation2 + $0xfc] sm:$0xe] }
 0x4ad   :  { %7349 = vst.msk [vmem:[#allocation3 + $0x58] sm:$0xf] %vm7326_vm3, %v7179_v42  ;;  %v6062_v55 = vpop.permute.xlu0 %6061 }
 0x4ae   :  { %8022 = vst.msk [vmem:[#allocation3 + $0x58] sm:$0xf] %vm7999_vm4, %v12857_v52  ;;  %v8721_v29 = vmax.f32 %v8657_v28, 0.0  ;;  %v7757_v52 = vsel %vm10227_vm8, %v7755_v0, %v7756_v41  ;;  %v6965_v28 = vsel %vm10215_vm5, %v6960_v8, %v6964_v10  ;;  %v12980_v41 = vld [vmem:[#allocation2 + $0x154] sm:$0xf]  ;;  %v9786_v8 = vrot.slane %v7442_v63, 9 }
 0x4af   :  { %v5580_v45 = vrot.slane %v12980_v41, 5  ;;  %v6345_v10 = vld [vmem:[#allocation2 + $0x15c] sm:$0xf] }
 0x4b0   :  { %v8781_v57 = vpack.c.bf16 %v8721_v29, %v8720_v35  ;;  %v5528_v35 = vsel %vm10227_vm8, %v5526_v62, %v5527_v13  ;;  %v6781_v29 = vor.u32 %v6780_v30, %v6777_v47 }
 0x4b1   :  { %7873 = vrot.lane.b32.xlu1 %v7701_v18, %s10114_s23  ;;  %v8438_v5 = vpop.f32.mrf.mxu1  ;;  %v5286_v18 = vld [vmem:[#allocation2 + $0x150] sm:$0xe] }
 0x4b2   :  { %6111 = vrot.lane.b32.xlu2 %v5934_v61, %s10112_s30  ;;  %9972 = vmatmul.msk.bf16.gmra.mxu2 %vm8811_vm7, %v8781_v57  ;;  %v8590_v43 = vmul.f32 %v12775_v17, %v8438_v5  ;;  %v6782_v61 = vrot.slane %v6781_v29, 4  ;;  %v5288_v29 = vld [vmem:[#allocation2 + $0x158] sm:$0x1] }
 0x4b3   :  { %v7181_v9 = vpop.permute.xlu1 %7180  ;;  %7905 = vrot.lane.b32.xlu0 %v7757_v52, %s10114_s23  ;;  %v9762_v52 = vrot.slane %v5286_v18, 9  ;;  %v6986_v18 = vshll.u32 %v6347_v1, 16 }
 0x4b4   :  { %7350 = vst.msk [vmem:[#allocation3 + $0x5c] sm:$0xf] %vm7326_vm3, %v7181_v9  ;;  %v6066_v42 = vpop.permute.xlu2 %6065  ;;  %v8658_v44 = vadd.f32 %v12789_v50, %v8590_v43 }
 0x4b5   :  { %8023 = vst.msk [vmem:[#allocation3 + $0x5c] sm:$0xf] %vm7999_vm4, %v7854_v27  ;;  %v12942_v19 = vpop.permute.xlu0 %7184  ;;  %v5919_v27 = vld [vmem:[#allocation2 + $0xfc] sm:$0xf]  ;;  %v5581_v43 = vsel %vm10227_vm8, %v9762_v52, %v5580_v45 }
 0x4b6   :  { %v8722_v21 = vmax.f32 %v8658_v44, 0.0 }
 0x4b9   :  { %6109 = vrot.lane.b32.xlu1 %v5933_v24, %s10112_s30  ;;  %v8440_v48 = vpop.f32.mrf.mxu1 }
 0x4ba   :  { %v8591_v23 = vmul.f32 %v12775_v17, %v8440_v48  ;;  %7903 = vrot.lane.b32.xlu2 %v7754_v11, %s10114_s23  ;;  %v6346_v48 = vld [vmem:[#allocation2 + $0x160] sm:$0xf] }
 0x4bb   :  { %v5676_v38 = vpop.permute.xlu1 %5675  ;;  %6081 = vrot.lane.b32.xlu0 %v5919_v27, %s10112_s30  ;;  %v5920_v11 = vld [vmem:[#allocation2 + $0x100] sm:$0xf]  ;;  %v6980_v27 = vshrl.u32 %v6346_v48, 16 }
 0x4bc   :  { %5844 = vst.msk [vmem:[#allocation3 + $0x60] sm:$0xf] %vm5819_vm0, %v5676_v38  ;;  %v10045_v46 = vld [vmem:[#allocation3 + $0x58] sm:$0xff]  ;;  %v8659_v3 = vadd.f32 %v12789_v50, %v8591_v23  ;;  %v12962_v49 = vpop.permute.xlu2 %7188  ;;  %v13010_v38 = vld [vmem:[#allocation2 + $0x160] sm:$0xf]  ;;  %v6976_v23 = vshll.u32 %v6346_v48, 16 }
 0x4bd   :  { %6230 = vst.msk [vmem:[#allocation3 + $0x60] sm:$0xf] %vm6205_vm2, %v6062_v55  ;;  %v5680_v15 = vpop.permute.xlu0 %5679  ;;  %9948 = vmatmul.msk.bf16.gmra.mxu1 %vm8308_vm6, %v10045_v46  ;;  %v5262_v55 = vld [vmem:[#allocation2 + $0xf0] sm:$0xe]  ;;  %v7466_v46 = vld [vmem:[#allocation2 + $0x15c] sm:$0xe] }
 0x4be   :  { %7351 = vst.msk [vmem:[#allocation3 + $0x60] sm:$0xf] %vm7326_vm3, %v12901_v58  ;;  %v8723_v4 = vmax.f32 %v8659_v3, 0.0  ;;  %v9754_v33 = vrot.slane %v5262_v55, 9  ;;  %v9794_v62 = vrot.slane %v7466_v46, 9  ;;  %v7760_v13 = vrot.slane %v13010_v38, 5 }
 0x4bf   :  { %5846 = vst.msk [vmem:[#allocation3 + $0x68] sm:$0xf] %vm5819_vm0, %v5680_v15  ;;  %v13023_v47 = vrot.slane %v6976_v23, 5  ;;  %v6982_v30 = vrot.slane %v6980_v27, 4  ;;  %v6325_v48 = vld [vmem:[#allocation2 + $0x10c] sm:$0xf] }
 0x4c0   :  { %6232 = vst.msk [vmem:[#allocation3 + $0x68] sm:$0xf] %vm6205_vm2, %v6066_v42  ;;  %v8782_v58 = vpack.c.bf16 %v8723_v4, %v8722_v21  ;;  %v5525_v60 = vsel %vm10227_vm8, %v9754_v33, %v5524_v59  ;;  %v7704_v42 = vrot.slane %v7443_v26, 5  ;;  %v13027_v4 = vld [vmem:[#allocation2 + $0x100] sm:$0xf]  ;;  %v5582_v26 = vrot.slane %v5580_v45, 4 }
 0x4c1   :  { %7232 = vrot.lane.b32.xlu1 %v6965_v28, %s10113_s13  ;;  %v8443_v40 = vpop.f32.mrf.mxu1  ;;  %v6970_v28 = vshll.u32 %v6345_v10, 16  ;;  %v6808_v27 = vshll.u32 %v6325_v48, 16 }
 0x4c2   :  { %5697 = vrot.lane.b32.xlu2 %v5528_v35, %s10111_s3  ;;  %9973 = vmatmul.msk.bf16.gmra.mxu2 %vm8811_vm7, %v8782_v58  ;;  %v8592_v9 = vmul.f32 %v12775_v17, %v8443_v40  ;;  %v7706_v24 = vrot.slane %v7704_v42, 4  ;;  %v7705_v37 = vsel %vm10227_vm8, %v9786_v8, %v7704_v42  ;;  %v6324_v58 = vld [vmem:[#allocation2 + $0x108] sm:$0xf]  ;;  %v7761_v40 = vsel %vm10227_vm8, %v9794_v62, %v7760_v13  ;;  %v5935_v35 = vld [vmem:[#allocation2 + $0x15c] sm:$0xf] }
 0x4c3   :  { %v6064_v0 = vpop.permute.xlu1 %6063  ;;  %7204 = vrot.lane.b32.xlu0 %v6797_v14, %s10113_s13  ;;  %v6983_v14 = vor.u32 %v6982_v30, %v13023_v47  ;;  %v6802_v52 = vshll.u32 %v6324_v58, 16  ;;  %v7446_v8 = vld [vmem:[#allocation2 + $0x10c] sm:$0xf] }
 0x4c4   :  { %6231 = vst.msk [vmem:[#allocation3 + $0x64] sm:$0xf] %vm6205_vm2, %v6064_v0  ;;  %v5684_v57 = vpop.permute.xlu2 %5683  ;;  %v7708_v44 = vsel %vm10227_vm8, %v7706_v24, %v7707_v54  ;;  %v5531_v0 = vrot.slane %v13027_v4, 5 }
 0x4c5   :  { %7352 = vst.msk [vmem:[#allocation3 + $0x64] sm:$0xf] %vm7326_vm3, %v12942_v19  ;;  %v6068_v5 = vpop.permute.xlu0 %6067  ;;  %v8660_v19 = vadd.f32 %v12789_v50, %v8592_v9  ;;  %v6799_v9 = vshrl.u32 %v6324_v58, 16  ;;  %v6984_v25 = vrot.slane %v6983_v14, 4  ;;  %v6804_v45 = vrot.slane %v6802_v52, 5 }
 0x4c6   :  { %8025 = vst.msk [vmem:[#allocation3 + $0x64] sm:$0xf] %vm7999_vm4, %v12928_v53  ;;  %v6787_v53 = vsel %vm10215_vm5, %v6782_v61, %v12945_v31  ;;  %v5267_v61 = vld [vmem:[#allocation2 + $0x104] sm:$0x1]  ;;  %v6812_v14 = vshrl.u32 %v6325_v48, 16 }
 0x4c7   :  { %5848 = vst.msk [vmem:[#allocation3 + $0x70] sm:$0xf] %vm5819_vm0, %v5684_v57  ;;  %v8724_v2 = vmax.f32 %v8660_v19, 0.0  ;;  %v5583_v19 = vrot.slane %v5288_v29, 5  ;;  %v6801_v41 = vrot.slane %v6799_v9, 4 }
 0x4c8   :  { %v7445_v9 = vld [vmem:[#allocation2 + $0x108] sm:$0xe] }
 0x4c9   :  { %5695 = vrot.lane.b32.xlu1 %v5525_v60, %s10111_s3  ;;  %v8445_v12 = vpop.f32.mrf.mxu1  ;;  %v5584_v54 = vsel %vm10227_vm8, %v5582_v26, %v5583_v19  ;;  %v6805_v63 = vor.u32 %v6804_v45, %v6801_v41  ;;  %v6814_v26 = vrot.slane %v6812_v14, 4  ;;  %v13100_v19 = vld [vmem:[#allocation2 + $0x160] sm:$0xf]  ;;  %v6350_v45 = vld [vmem:[#allocation2 + $0x170] sm:$0x1] }
 0x4ca   :  { %v8593_v36 = vmul.f32 %v12775_v17, %v8445_v12  ;;  %7202 = vrot.lane.b32.xlu2 %v6787_v53, %s10113_s13  ;;  %v6972_v12 = vrot.slane %v6970_v28, 5  ;;  %v7447_v28 = vld [vmem:[#allocation2 + $0x110] sm:$0x1] }
 0x4cb   :  { %v7856_v16 = vpop.permute.xlu1 %7855  ;;  %5727 = vrot.lane.b32.xlu0 %v5581_v43, %s10111_s3  ;;  %v5534_v43 = vrot.slane %v5267_v61, 5  ;;  %v7714_v29 = vrot.slane %v7447_v28, 5 }
 0x4cc   :  { %8024 = vst.msk [vmem:[#allocation3 + $0x60] sm:$0xf] %vm7999_vm4, %v7856_v16  ;;  %v8661_v31 = vadd.f32 %v12789_v50, %v8593_v36  ;;  %v6072_v39 = vpop.permute.xlu2 %6071  ;;  %v5533_v36 = vrot.slane %v5531_v0, 4 }
 0x4cd   :  { %v13005_v22 = vpop.permute.xlu0 %7859 }
 0x4ce   :  { %v8725_v34 = vmax.f32 %v8661_v31, 0.0  ;;  %v6988_v31 = vrot.slane %v6986_v18, 5  ;;  %v5922_v18 = vld [vmem:[#allocation2 + $0x10c] sm:$0xf] }
 0x4d0   :  { %v8783_v59 = vpack.c.bf16 %v8725_v34, %v8724_v2  ;;  %v6989_v34 = vsel %vm10215_vm5, %v6984_v25, %v6988_v31  ;;  %v6348_v31 = vld [vmem:[#allocation2 + $0x168] sm:$0xf] }
 0x4d1   :  { %6083 = vrot.lane.b32.xlu1 %v5920_v11, %s10112_s30  ;;  %v8448_v56 = vpop.f32.mrf.mxu1 }
 0x4d2   :  { %7877 = vrot.lane.b32.xlu2 %v7708_v44, %s10114_s23  ;;  %9974 = vmatmul.msk.bf16.gmra.mxu2 %vm8811_vm7, %v8783_v59  ;;  %v8594_v21 = vmul.f32 %v12775_v17, %v8448_v56  ;;  %v5535_v59 = vsel %vm10227_vm8, %v5533_v36, %v5534_v43  ;;  %v5265_v56 = vld [vmem:[#allocation2 + $0xfc] sm:$0xe] }
 0x4d3   :  { %v5682_v7 = vpop.permute.xlu1 %5681  ;;  %v10046_v51 = vld [vmem:[#allocation3 + $0x60] sm:$0xff]  ;;  %6115 = vrot.lane.b32.xlu0 %v5936_v6, %s10112_s30  ;;  %v9755_v6 = vrot.slane %v5265_v56, 9  ;;  %v7010_v56 = vshll.u32 %v6350_v45, 16 }
 0x4d4   :  { %5847 = vst.msk [vmem:[#allocation3 + $0x6c] sm:$0xf] %vm5819_vm0, %v5682_v7  ;;  %9949 = vmatmul.msk.bf16.gmra.mxu1 %vm8308_vm6, %v10046_v51  ;;  %v13018_v3 = vpop.permute.xlu2 %7863  ;;  %v8662_v33 = vadd.f32 %v12789_v50, %v8594_v21  ;;  %v6806_v51 = vrot.slane %v6805_v63, 4  ;;  %v7471_v45 = vld [vmem:[#allocation2 + $0x170] sm:$0x1] }
 0x4d5   :  { %6233 = vst.msk [vmem:[#allocation3 + $0x6c] sm:$0xf] %vm6205_vm2, %v6068_v5  ;;  %v5686_v15 = vpop.permute.xlu0 %5685  ;;  %v5532_v30 = vsel %vm10227_vm8, %v9755_v6, %v5531_v0  ;;  %v6349_v0 = vld [vmem:[#allocation2 + $0x16c] sm:$0xf] }
 0x4d6   :  { %7354 = vst.msk [vmem:[#allocation3 + $0x6c] sm:$0xf] %vm7326_vm3, %v12962_v49  ;;  %v6967_v49 = vshrl.u32 %v6345_v10, 16  ;;  %v13067_v10 = vrot.slane %v6808_v27, 5  ;;  %v7004_v52 = vshrl.u32 %v6349_v0, 16 }
 0x4d7   :  { %5849 = vst.msk [vmem:[#allocation3 + $0x74] sm:$0xf] %vm5819_vm0, %v5686_v15  ;;  %v7468_v15 = vld [vmem:[#allocation2 + $0x164] sm:$0x1] }
 0x4d8   :  { %6235 = vst.msk [vmem:[#allocation3 + $0x74] sm:$0xf] %vm6205_vm2, %v6072_v39  ;;  %v6969_v60 = vrot.slane %v6967_v49, 4  ;;  %v8726_v39 = vmax.f32 %v8662_v33, 0.0  ;;  %v6811_v4 = vsel %vm10215_vm5, %v6806_v51, %v13067_v10  ;;  %v7763_v49 = vrot.slane %v7468_v15, 5 }
 0x4d9   :  { %7875 = vrot.lane.b32.xlu1 %v7705_v37, %s10114_s23  ;;  %v8450_v55 = vpop.f32.mrf.mxu1  ;;  %v7711_v37 = vrot.slane %v7446_v8, 5  ;;  %v7000_v33 = vshll.u32 %v6349_v0, 16  ;;  %v7006_v25 = vrot.slane %v7004_v52, 4 }
 0x4da   :  { %v8595_v5 = vmul.f32 %v12775_v17, %v8450_v55  ;;  %6113 = vrot.lane.b32.xlu2 %v5935_v35, %s10112_s30  ;;  %v6973_v2 = vor.u32 %v6972_v12, %v6969_v60 }
 0x4db   :  { %v7187_v57 = vpop.permute.xlu1 %7186  ;;  %7907 = vrot.lane.b32.xlu0 %v7761_v40, %s10114_s23  ;;  %v7713_v35 = vrot.slane %v7711_v37, 4  ;;  %v13102_v43 = vrot.slane %v7000_v33, 5 }
 0x4dc   :  { %7353 = vst.msk [vmem:[#allocation3 + $0x68] sm:$0xf] %vm7326_vm3, %v7187_v57  ;;  %v8663_v53 = vadd.f32 %v12789_v50, %v8595_v5  ;;  %v5690_v42 = vpop.permute.xlu2 %5689  ;;  %v6974_v44 = vrot.slane %v6973_v2, 4  ;;  %v5587_v2 = vrot.slane %v13100_v19, 5 }
 0x4dd   :  { %8026 = vst.msk [vmem:[#allocation3 + $0x68] sm:$0xf] %vm7999_vm4, %v13005_v22  ;;  %v7191_v16 = vpop.permute.xlu0 %7190  ;;  %v7715_v61 = vsel %vm10227_vm8, %v7713_v35, %v7714_v29  ;;  %v7007_v63 = vor.u32 %v7006_v25, %v13102_v43  ;;  %v13141_v35 = vld [vmem:[%s14432_s8] ss:$0 sm:$0xff] }
 0x4de   :  { %5851 = vst.msk [vmem:[#allocation3 + $0x7c] sm:$0xf] %vm5819_vm0, %v5690_v42  ;;  %v8727_v24 = vmax.f32 %v8663_v53, 0.0  ;;  %v6979_v46 = vsel %vm10215_vm5, %v6974_v44, %v13023_v47  ;;  %v7762_v47 = vrot.slane %v7760_v13, 4  ;;  %v6326_v53 = vld [vmem:[#allocation2 + $0x110] sm:$0x1] }
 0x4df   :  { %v6818_v41 = vshll.u32 %v6326_v53, 16  ;;  %v5291_v44 = vld [vmem:[#allocation2 + $0x164] sm:$0x1]  ;;  %v5589_v8 = vrot.slane %v5587_v2, 4  ;;  %v13146_v29 = vld [vmem:[%s14430_s6] ss:$0 sm:$0xff] }
 0x4e0   :  { %v8784_v22 = vpack.c.bf16 %v8727_v24, %v8726_v39  ;;  %v7764_v38 = vsel %vm10227_vm8, %v7762_v47, %v7763_v49  ;;  %v5921_v39 = vld [vmem:[#allocation2 + $0x108] sm:$0xf]  ;;  %v6815_v24 = vor.u32 %v6814_v26, %v13067_v10  ;;  %v5590_v10 = vrot.slane %v5291_v44, 5  ;;  %v13169_v53 = vld [vmem:[#allocation2 + $0x16c] sm:$0xf] }
 0x4e1   :  { %5729 = vrot.lane.b32.xlu1 %v5584_v54, %s10111_s3  ;;  %v6820_v6 = vrot.slane %v6818_v41, 5 }
 0x4e2   :  { %7236 = vrot.lane.b32.xlu2 %v6989_v34, %s10113_s13  ;;  %9975 = vmatmul.msk.bf16.gmra.mxu2 %vm8811_vm7, %v8784_v22  ;;  %v6991_v22 = vshrl.u32 %v6348_v31, 16  ;;  %v6994_v34 = vshll.u32 %v6348_v31, 16  ;;  %v5591_v47 = vsel %vm10227_vm8, %v5589_v8, %v5590_v10 }
 0x4e3   :  { %v7862_v11 = vpop.permute.xlu1 %7861  ;;  %5701 = vrot.lane.b32.xlu0 %v5535_v59, %s10111_s3 }
 0x4e4   :  { %8027 = vst.msk [vmem:[#allocation3 + $0x6c] sm:$0xf] %vm7999_vm4, %v7862_v11  ;;  %v13061_v23 = vpop.permute.xlu2 %7194  ;;  %v5937_v11 = vld [vmem:[#allocation2 + $0x168] sm:$0xf]  ;;  %v6993_v15 = vrot.slane %v6991_v22, 4 }
 0x4e5   :  { %v7866_v7 = vpop.permute.xlu0 %7865 }
 0x4e9   :  { %7234 = vrot.lane.b32.xlu1 %v6979_v46, %s10113_s13  ;;  %v8453_v62 = vpop.f32.mrf.mxu1 }
 0x4ea   :  { %5699 = vrot.lane.b32.xlu2 %v5532_v30, %s10111_s3  ;;  %v8596_v40 = vmul.f32 %v12775_v17, %v8453_v62  ;;  %v6996_v62 = vrot.slane %v6994_v34, 5  ;;  %v7008_v30 = vrot.slane %v7007_v63, 4  ;;  %v7770_v34 = vrot.slane %v7471_v45, 5  ;;  %v6328_v63 = vld [vmem:[#allocation2 + $0x118] sm:$0xf] }
 0x4eb   :  { %v6070_v21 = vpop.permute.xlu1 %6069  ;;  %v10047_v1 = vld [vmem:[#allocation3 + $0x68] sm:$0xff]  ;;  %7206 = vrot.lane.b32.xlu0 %v6811_v4, %s10113_s13  ;;  %v13126_v4 = vld [vmem:[%s14429_s5] ss:$0 sm:$0xff]  ;;  %v6832_v8 = vshll.u32 %v6328_v63, 16  ;;  %v6836_v10 = vshrl.u32 %v6328_v63, 16 }
 0x4ec   :  { %6234 = vst.msk [vmem:[#allocation3 + $0x70] sm:$0xf] %vm6205_vm2, %v6070_v21  ;;  %9950 = vmatmul.msk.bf16.gmra.mxu1 %vm8308_vm6, %v10047_v1  ;;  %v13081_v58 = vpop.permute.xlu2 %7869  ;;  %v8664_v57 = vadd.f32 %v12789_v50, %v8596_v40  ;;  %v7012_v21 = vrot.slane %v7010_v56, 5  ;;  %v6997_v49 = vor.u32 %v6996_v62, %v6993_v15  ;;  %v5938_v56 = vld [vmem:[#allocation2 + $0x16c] sm:$0xf] }
 0x4ed   :  { %7355 = vst.msk [vmem:[#allocation3 + $0x70] sm:$0xf] %vm7326_vm3, %v7191_v16  ;;  %v6074_v55 = vpop.permute.xlu0 %6073 }
 0x4ee   :  { %8028 = vst.msk [vmem:[#allocation3 + $0x70] sm:$0xf] %vm7999_vm4, %v13018_v3  ;;  %v8728_v16 = vmax.f32 %v8664_v57, 0.0  ;;  %v13160_v57 = vld [vmem:[%s14433_s9] ss:$0 sm:$0xff]  ;;  %v6998_v52 = vrot.slane %v6997_v49, 4 }
 0x4ef   :  { %v6351_v49 = vld [vmem:[#allocation2 + $0x174] sm:$0xf] }
 0x4f0   :  { %v7003_v25 = vsel %vm10215_vm5, %v6998_v52, %v13102_v43 }
 0x4f1   :  { %7909 = vrot.lane.b32.xlu1 %v7764_v38, %s10114_s23  ;;  %v8455_v13 = vpop.f32.mrf.mxu1  ;;  %v36_v38 = vld [vmem:[%s14425_s0] sm:$0xff]  }
 0x4f2   :  { %v8597_v3 = vmul.f32 %v12775_v17, %v8455_v13  ;;  %6087 = vrot.lane.b32.xlu2 %v5922_v18, %s10112_s30  ;;  %v9787_v17 = vrot.slane %v7445_v9, 9  ;;  %v5268_v18 = vld [vmem:[#allocation2 + $0x108] sm:$0xe]  ;;  %v13165_v9 = vld [vmem:[#allocation2 + $0x10c] sm:$0xf] }
 0x4f3   :  { %v7193_v5 = vpop.permute.xlu1 %7192  ;;  %7881 = vrot.lane.b32.xlu0 %v7715_v61, %s10114_s23 }
 0x4f4   :  { %7356 = vst.msk [vmem:[#allocation3 + $0x74] sm:$0xf] %vm7326_vm3, %v7193_v5  ;;  %v8665_v60 = vadd.f32 %v12789_v50, %v8597_v3  ;;  %v6078_v12 = vpop.permute.xlu2 %6077  ;;  %v7712_v54 = vsel %vm10227_vm8, %v9787_v17, %v7711_v37  ;;  %v5289_v37 = vld [vmem:[#allocation2 + $0x15c] sm:$0xe] }
 0x4f5   :  { %8029 = vst.msk [vmem:[#allocation3 + $0x74] sm:$0xf] %vm7999_vm4, %v7866_v7  ;;  %v13098_v42 = vpop.permute.xlu0 %7196  ;;  %v6816_v7 = vrot.slane %v6815_v24, 4  ;;  %v9763_v13 = vrot.slane %v5289_v37, 9 }
 0x4f6   :  { %v8729_v36 = vmax.f32 %v8665_v60, 0.0  ;;  %v9216_v60 = vunpack.c.l.bf16 %v36_v38 }
 0x4f7   :  { %v6821_v1 = vsel %vm10215_vm5, %v6816_v7, %v6820_v6 }
 0x4f8   :  { %v8785_v50 = vpack.c.bf16 %v8729_v36, %v8728_v16  ;;  %v5538_v36 = vrot.slane %v13165_v9, 5 }
 0x4f9   :  { %6085 = vrot.lane.b32.xlu1 %v5921_v39, %s10112_s30  ;;  %v7767_v39 = vrot.slane %v13169_v53, 5 }
 0x4fa   :  { %7879 = vrot.lane.b32.xlu2 %v7712_v54, %s10114_s23  ;;  %v8458_v59 = vpop.f32.mrf.mxu1  ;;  %9976 = vmatmul.msk.bf16.gmra.mxu2 %vm8811_vm7, %v8785_v50 }
 0x4fb   :  { %v5688_v48 = vpop.permute.xlu1 %5687  ;;  %6117 = vrot.lane.b32.xlu0 %v5937_v11, %s10112_s30  ;;  %v7769_v22 = vrot.slane %v7767_v39, 4 }
 0x4fc   :  { %5850 = vst.msk [vmem:[#allocation3 + $0x78] sm:$0xf] %vm5819_vm0, %v5688_v48  ;;  %v10048_v27 = vld [vmem:[#allocation3 + $0x70] sm:$0xff]  ;;  %v13115_v51 = vpop.permute.xlu2 %7200 }
 0x4fd   :  { %6236 = vst.msk [vmem:[#allocation3 + $0x78] sm:$0xf] %vm6205_vm2, %v6074_v55  ;;  %v5692_v46 = vpop.permute.xlu0 %5691  ;;  %9951 = vmatmul.msk.bf16.gmra.mxu1 %vm8308_vm6, %v10048_v27  ;;  %v7013_v55 = vsel %vm10215_vm5, %v7008_v30, %v7012_v21  ;;  %v7469_v27 = vld [vmem:[#allocation2 + $0x168] sm:$0xe]  ;;  %v7771_v6 = vsel %vm10227_vm8, %v7769_v22, %v7770_v34  ;;  %v5924_v30 = vld [vmem:[#allocation2 + $0x118] sm:$0xf] }
 0x4fe   :  { %7357 = vst.msk [vmem:[#allocation3 + $0x78] sm:$0xf] %vm7326_vm3, %v13061_v23  ;;  %v8598_v23 = vmul.f32 %v13126_v4, %v8458_v59  ;;  %v9217_v59 = vunpack.c.h.bf16 %v36_v38  ;;  %v9795_v37 = vrot.slane %v7469_v27, 9  ;;  %v5540_v34 = vrot.slane %v5538_v36, 4 }
 0x4ff   :  { %5852 = vst.msk [vmem:[#allocation3 + $0x80] sm:$0xf] %vm5819_vm0, %v5692_v46  ;;  %v13203_v46 = vld [vmem:[#allocation2 + $0x16c] sm:$0xf] }
 0x500   :  { %6238 = vst.msk [vmem:[#allocation3 + $0x80] sm:$0xf] %vm6205_vm2, %v6078_v12  ;;  %v8666_v0 = vadd.f32 %v13146_v29, %v8598_v23  ;;  %v9756_v12 = vrot.slane %v5268_v18, 9  ;;  %v7448_v23 = vld [vmem:[#allocation2 + $0x114] sm:$0xe]  ;;  %v13222_v18 = vrot.slane %v6832_v8, 5 }
 0x501   :  { %7208 = vrot.lane.b32.xlu1 %v6821_v1, %s10113_s13  ;;  %v13211_v1 = vld [vmem:[%s14425_s0 + $0x8] sm:$0xff]   ;;  %v9788_v38 = vrot.slane %v7448_v23, 9 }
 0x502   :  { %5733 = vrot.lane.b32.xlu2 %v5591_v47, %s10111_s3  ;;  %v8460_v40 = vpop.f32.mrf.mxu1  ;;  %v5539_v19 = vsel %vm10227_vm8, %v9756_v12, %v5538_v36  ;;  %v6327_v47 = vld [vmem:[#allocation2 + $0x114] sm:$0xf]  ;;  %v9218_v52 = vunpack.c.l.bf16 %v13211_v1 }
 0x503   :  { %v6076_v28 = vpop.permute.xlu1 %6075  ;;  %7240 = vrot.lane.b32.xlu0 %v7013_v55, %s10113_s13  ;;  %v8599_v14 = vmul.f32 %v13126_v4, %v8460_v40  ;;  %v13217_v40 = vld [vmem:[#allocation2 + $0x118] sm:$0xf]  ;;  %v6823_v12 = vshrl.u32 %v6327_v47, 16 }
 0x504   :  { %6237 = vst.msk [vmem:[#allocation3 + $0x7c] sm:$0xf] %vm6205_vm2, %v6076_v28  ;;  %v5724_v33 = vpop.permute.xlu2 %5723 }
 0x505   :  { %7358 = vst.msk [vmem:[#allocation3 + $0x7c] sm:$0xf] %vm7326_vm3, %v13098_v42  ;;  %v8667_v5 = vadd.f32 %v13146_v29, %v8599_v14  ;;  %v6080_v3 = vpop.permute.xlu0 %6079  ;;  %v8920_v61 = vpop.f32.mrf.mxu2  ;;  %v8730_v42 = vmax.f32 %v8666_v0, 0.0 }
 0x506   :  { %8031 = vst.msk [vmem:[#allocation3 + $0x7c] sm:$0xf] %vm7999_vm4, %v13081_v58  ;;  %v9084_v26 = vmul.f32 %v13141_v35, %v8920_v61  ;;  %v5588_v58 = vsel %vm10227_vm8, %v9763_v13, %v5587_v2  ;;  %v5594_v13 = vrot.slane %v13203_v46, 5 }
 0x507   :  { %5868 = vst.msk [vmem:[#allocation3 + $0xc0] sm:$0xf] %vm5819_vm0, %v5724_v33  ;;  %v8731_v17 = vmax.f32 %v8667_v5, 0.0  ;;  %v6838_v33 = vrot.slane %v6836_v10, 4  ;;  %v9219_v10 = vunpack.c.h.bf16 %v13211_v1 }
 0x508   :  { %v9152_v16 = vadd.f32 %v13160_v57, %v9084_v26  ;;  %v6329_v26 = vld [vmem:[#allocation2 + $0x11c] sm:$0x1] }
 0x509   :  { %5731 = vrot.lane.b32.xlu1 %v5588_v58, %s10111_s3  ;;  %v8786_v31 = vpack.c.bf16 %v8731_v17, %v8730_v42  ;;  %v6826_v42 = vshll.u32 %v6327_v47, 16  ;;  %v7718_v58 = vrot.slane %v13217_v40, 5 }
 0x50a   :  { %v9280_v24 = vadd.f32 %v9216_v60, %v9152_v16  ;;  %7238 = vrot.lane.b32.xlu2 %v7003_v25, %s10113_s13  ;;  %v5294_v60 = vld [vmem:[#allocation2 + $0x170] sm:$0x1]  ;;  %v7015_v25 = vshrl.u32 %v6351_v49, 16 }
 0x50b   :  { %v7868_v41 = vpop.permute.xlu1 %7867  ;;  %5703 = vrot.lane.b32.xlu0 %v5539_v19, %s10111_s3  ;;  %9977 = vmatmul.msk.bf16.gmra.mxu2 %vm8811_vm7, %v8786_v31  ;;  %v5270_v16 = vld [vmem:[#allocation2 + $0x110] sm:$0x1]  ;;  %v5923_v31 = vld [vmem:[#allocation2 + $0x114] sm:$0xf]  ;;  %v7018_v19 = vshll.u32 %v6351_v49, 16  ;;  %v7719_v22 = vsel %vm10227_vm8, %v9788_v38, %v7718_v58  ;;  %v5597_v27 = vrot.slane %v5294_v60, 5 }
 0x50c   :  { %8030 = vst.msk [vmem:[#allocation3 + $0x78] sm:$0xf] %vm7999_vm4, %v7868_v41  ;;  %v9344_v43 = vmax.f32 %v9280_v24, 0.0  ;;  %v6112_v50 = vpop.permute.xlu2 %6111  ;;  %v6839_v24 = vor.u32 %v6838_v33, %v13222_v18  ;;  %v6842_v41 = vshll.u32 %v6329_v26, 16  ;;  %v7720_v46 = vrot.slane %v7718_v58, 4 }
 0x50d   :  { %v13190_v54 = vpop.permute.xlu0 %7871  ;;  %v8922_v2 = vpop.f32.mrf.mxu2 }
 0x50e   :  { %v9408_v48 = vpack.c.bf16 %v9344_v43, %v9344_v43  ;;  %v9085_v11 = vmul.f32 %v13141_v35, %v8922_v2  ;;  %v6840_v9 = vrot.slane %v6839_v24, 4  ;;  %v6844_v36 = vrot.slane %v6842_v41, 5 }
 0x510   :  { %9473 = vst.msk [vmem:[%s14434_s10] sm:$0xf] %vm9472_vm9, %v9408_v48  ;;  %v9153_v44 = vadd.f32 %v13160_v57, %v9085_v11  ;;  %v5541_v48 = vrot.slane %v5270_v16, 5  ;;  %v6825_v11 = vrot.slane %v6823_v12, 4  ;;  %v6845_v49 = vsel %vm10215_vm5, %v6840_v9, %v6844_v36 }
 0x511   :  { %6119 = vrot.lane.b32.xlu1 %v5938_v56, %s10112_s30  ;;  %v8463_v7 = vpop.f32.mrf.mxu1 }
 0x512   :  { %v9281_v15 = vadd.f32 %v9217_v59, %v9153_v44  ;;  %7913 = vrot.lane.b32.xlu2 %v7771_v6, %s10114_s23  ;;  %v6828_v59 = vrot.slane %v6826_v42, 5 }
 0x513   :  { %v5694_v62 = vpop.permute.xlu1 %5693  ;;  %v10049_v21 = vld [vmem:[#allocation3 + $0x78] sm:$0xff]  ;;  %6091 = vrot.lane.b32.xlu0 %v5924_v30, %s10112_s30 }
 0x514   :  { %5853 = vst.msk [vmem:[#allocation3 + $0x84] sm:$0xf] %vm5819_vm0, %v5694_v62  ;;  %v9345_v28 = vmax.f32 %v9281_v15, 0.0  ;;  %9952 = vmatmul.msk.bf16.gmra.mxu1 %vm8308_vm6, %v10049_v21  ;;  %v13215_v55 = vpop.permute.xlu2 %7903  ;;  %v7020_v15 = vrot.slane %v7018_v19, 5  ;;  %v7450_v19 = vld [vmem:[#allocation2 + $0x11c] sm:$0x1] }
 0x515   :  { %6239 = vst.msk [vmem:[#allocation3 + $0x84] sm:$0xf] %vm6205_vm2, %v6080_v3  ;;  %v5726_v0 = vpop.permute.xlu0 %5725  ;;  %v8925_v14 = vpop.f32.mrf.mxu2  ;;  %v8600_v3 = vmul.f32 %v13126_v4, %v8463_v7  ;;  %v7017_v7 = vrot.slane %v7015_v25, 4 }
 0x516   :  { %7360 = vst.msk [vmem:[#allocation3 + $0x84] sm:$0xf] %vm7326_vm3, %v13115_v51  ;;  %v9409_v5 = vpack.c.bf16 %v9345_v28, %v9345_v28  ;;  %v9086_v61 = vmul.f32 %v13141_v35, %v8925_v14  ;;  %v7768_v51 = vsel %vm10227_vm8, %v9795_v37, %v7767_v39  ;;  %v5596_v39 = vrot.slane %v5594_v13, 4  ;;  %v13270_v28 = vld [vmem:[#allocation2 + $0x178] sm:$0xf] }
 0x517   :  { %5869 = vst.msk [vmem:[#allocation3 + $0xc4] sm:$0xf] %vm5819_vm0, %v5726_v0  ;;  %v8668_v45 = vadd.f32 %v13146_v29, %v8600_v3  ;;  %v6829_v37 = vor.u32 %v6828_v59, %v6825_v11  ;;  %v7021_v33 = vor.u32 %v7020_v15, %v7017_v7  ;;  %v40_v3 = vld [vmem:[%s14425_s0 + $0x10] sm:$0xff]   ;;  %v5940_v15 = vld [vmem:[#allocation2 + $0x178] sm:$0xf] }
 0x518   :  { %6255 = vst.msk [vmem:[#allocation3 + $0xc4] sm:$0xf] %vm6205_vm2, %v6112_v50  ;;  %v9154_v17 = vadd.f32 %v13160_v57, %v9086_v61  ;;  %v5598_v38 = vsel %vm10227_vm8, %v5596_v39, %v5597_v27  ;;  %v9220_v25 = vunpack.c.l.bf16 %v40_v3 }
 0x519   :  { %9474 = vst.msk [vmem:[%s14434_s10 + $0x4] sm:$0xf] %vm9472_vm9, %v9409_v5  ;;  %7911 = vrot.lane.b32.xlu1 %v7768_v51, %s10114_s23  ;;  %v8465_v53 = vpop.f32.mrf.mxu1  ;;  %v8732_v62 = vmax.f32 %v8668_v45, 0.0  ;;  %v5292_v5 = vld [vmem:[#allocation2 + $0x168] sm:$0xe]  ;;  %v6830_v61 = vrot.slane %v6829_v37, 4 }
 0x51a   :  { %v9282_v43 = vadd.f32 %v9218_v52, %v9154_v17  ;;  %v8601_v2 = vmul.f32 %v13126_v4, %v8465_v53  ;;  %6089 = vrot.lane.b32.xlu2 %v5923_v31, %s10112_s30  ;;  %v7024_v51 = vshll.u32 %v13270_v28, 16  ;;  %v9764_v42 = vrot.slane %v5292_v5, 9  ;;  %v13285_v31 = vld [vmem:[#allocation2 + $0x178] sm:$0xf]  ;;  %v6353_v5 = vld [vmem:[#allocation2 + $0x17c] sm:$0x1] }
 0x51b   :  { %v7199_v50 = vpop.permute.xlu1 %7198  ;;  %7883 = vrot.lane.b32.xlu0 %v7719_v22, %s10114_s23  ;;  %v7022_v53 = vrot.slane %v7021_v33, 4  ;;  %v6835_v39 = vsel %vm10215_vm5, %v6830_v61, %v13222_v18  ;;  %v7774_v18 = vrot.slane %v13285_v31, 5 }
 0x51c   :  { %7359 = vst.msk [vmem:[#allocation3 + $0x80] sm:$0xf] %vm7326_vm3, %v7199_v50  ;;  %v9346_v63 = vmax.f32 %v9282_v43, 0.0  ;;  %v8669_v56 = vadd.f32 %v13146_v29, %v8601_v2  ;;  %v5698_v44 = vpop.permute.xlu2 %5697  ;;  %v13296_v41 = vrot.slane %v7024_v51, 5  ;;  %v5595_v43 = vsel %vm10227_vm8, %v9764_v42, %v5594_v13 }
 0x51d   :  { %8032 = vst.msk [vmem:[#allocation3 + $0x80] sm:$0xf] %vm7999_vm4, %v13190_v54  ;;  %v7231_v6 = vpop.permute.xlu0 %7230  ;;  %v8927_v8 = vpop.f32.mrf.mxu2  ;;  %v5542_v54 = vsel %vm10227_vm8, %v5540_v34, %v5541_v48  ;;  %v7474_v48 = vld [vmem:[#allocation2 + $0x17c] sm:$0x1]  ;;  %v7721_v13 = vrot.slane %v7450_v19, 5  ;;  %v7034_v19 = vshll.u32 %v6353_v5, 16 }
 0x51e   :  { %5855 = vst.msk [vmem:[#allocation3 + $0x8c] sm:$0xf] %vm5819_vm0, %v5698_v44  ;;  %v9410_v30 = vpack.c.bf16 %v9346_v63, %v9346_v63  ;;  %v8733_v21 = vmax.f32 %v8669_v56, 0.0  ;;  %v9087_v23 = vmul.f32 %v13141_v35, %v8927_v8  ;;  %v7027_v22 = vsel %vm10215_vm5, %v7022_v53, %v13296_v41  ;;  %v6331_v8 = vld [vmem:[#allocation2 + $0x124] sm:$0xf] }
 0x51f   :  { %v7776_v44 = vrot.slane %v7774_v18, 4  ;;  %v7777_v27 = vrot.slane %v7474_v48, 5  ;;  %v7722_v9 = vsel %vm10227_vm8, %v7720_v46, %v7721_v13  ;;  %v13352_v53 = vld [vmem:[#allocation2 + $0x118] sm:$0xf]  ;;  %v44_v5 = vld [vmem:[%s14425_s0 + $0x20] sm:$0xff]  }
 0x520   :  { %9475 = vst.msk [vmem:[%s14434_s10 + $0x8] sm:$0xf] %vm9472_vm9, %v9410_v30  ;;  %v9155_v47 = vadd.f32 %v13160_v57, %v9087_v23  ;;  %v8787_v1 = vpack.c.bf16 %v8733_v21, %v8732_v62  ;;  %v7472_v62 = vld [vmem:[#allocation2 + $0x174] sm:$0xe]  ;;  %v6856_v30 = vshll.u32 %v6331_v8, 16  ;;  %v6860_v21 = vshrl.u32 %v6331_v8, 16 }
 0x521   :  { %5705 = vrot.lane.b32.xlu1 %v5542_v54, %s10111_s3  ;;  %v9796_v33 = vrot.slane %v7472_v62, 9 }
 0x522   :  { %v9283_v0 = vadd.f32 %v9219_v10, %v9155_v47  ;;  %7212 = vrot.lane.b32.xlu2 %v6845_v49, %s10113_s13  ;;  %9978 = vmatmul.msk.bf16.gmra.mxu2 %vm8811_vm7, %v8787_v1  ;;  %v7028_v10 = vshrl.u32 %v13270_v28, 16  ;;  %v7778_v1 = vsel %vm10227_vm8, %v7776_v44, %v7777_v27  ;;  %v13340_v49 = vld [vmem:[%s14425_s0 + $0x18] sm:$0xff]   ;;  %v13349_v51 = vrot.slane %v6856_v30, 5 }
 0x523   :  { %v7874_v14 = vpop.permute.xlu1 %7873  ;;  %5737 = vrot.lane.b32.xlu0 %v5598_v38, %s10111_s3  ;;  %v9223_v30 = vunpack.c.h.bf16 %v13340_v49 }
 0x524   :  { %8033 = vst.msk [vmem:[#allocation3 + $0x84] sm:$0xf] %vm7999_vm4, %v7874_v14  ;;  %v9347_v52 = vmax.f32 %v9283_v0, 0.0  ;;  %v13281_v26 = vpop.permute.xlu2 %7202  ;;  %v7030_v28 = vrot.slane %v7028_v10, 4 }
 0x525   :  { %v7906_v60 = vpop.permute.xlu0 %7905  ;;  %v8930_v12 = vpop.f32.mrf.mxu2 }
 0x526   :  { %v9411_v17 = vpack.c.bf16 %v9347_v52, %v9347_v52  ;;  %v9088_v16 = vmul.f32 %v13141_v35, %v8930_v12  ;;  %v9222_v52 = vunpack.c.l.bf16 %v13340_v49  ;;  %v6862_v12 = vrot.slane %v6860_v21, 4 }
 0x528   :  { %9476 = vst.msk [vmem:[%s14434_s10 + $0xc] sm:$0xf] %vm9472_vm9, %v9411_v17  ;;  %v9156_v24 = vadd.f32 %v13160_v57, %v9088_v16 }
 0x529   :  { %7210 = vrot.lane.b32.xlu1 %v6835_v39, %s10113_s13  ;;  %v8468_v45 = vpop.f32.mrf.mxu1  ;;  %v5939_v39 = vld [vmem:[#allocation2 + $0x174] sm:$0xf] }
 0x52a   :  { %v9284_v50 = vadd.f32 %v9220_v25, %v9156_v24  ;;  %5735 = vrot.lane.b32.xlu2 %v5595_v43, %s10111_s3  ;;  %v8602_v58 = vmul.f32 %v13126_v4, %v8468_v45  ;;  %v7031_v24 = vor.u32 %v7030_v28, %v13296_v41  ;;  %v6332_v45 = vld [vmem:[#allocation2 + $0x128] sm:$0x1]  ;;  %v5273_v41 = vld [vmem:[#allocation2 + $0x11c] sm:$0x1] }
 0x52b   :  { %v6110_v2 = vpop.permute.xlu1 %6109  ;;  %v10050_v34 = vld [vmem:[#allocation3 + $0x80] sm:$0xff]  ;;  %7242 = vrot.lane.b32.xlu0 %v7027_v22, %s10113_s13  ;;  %v6863_v22 = vor.u32 %v6862_v12, %v13349_v51  ;;  %v6866_v31 = vshll.u32 %v6332_v45, 16  ;;  %v9224_v45 = vunpack.c.l.bf16 %v44_v5 }
 0x52c   :  { %6254 = vst.msk [vmem:[#allocation3 + $0xc0] sm:$0xf] %vm6205_vm2, %v6110_v2  ;;  %v9348_v11 = vmax.f32 %v9284_v50, 0.0  ;;  %9953 = vmatmul.msk.bf16.gmra.mxu1 %vm8308_vm6, %v10050_v34  ;;  %v13313_v59 = vpop.permute.xlu2 %7877  ;;  %v8670_v23 = vadd.f32 %v13146_v29, %v8602_v58  ;;  %v7775_v50 = vsel %vm10227_vm8, %v9796_v33, %v7774_v18  ;;  %v5545_v34 = vrot.slane %v13352_v53, 5 }
 0x52d   :  { %7375 = vst.msk [vmem:[#allocation3 + $0xc0] sm:$0xf] %vm7326_vm3, %v7231_v6  ;;  %v13317_v63 = vpop.permute.xlu0 %6081  ;;  %v8932_v56 = vpop.f32.mrf.mxu2  ;;  %v9221_v6 = vunpack.c.h.bf16 %v40_v3  ;;  %v7032_v27 = vrot.slane %v7031_v24, 4  ;;  %v6868_v21 = vrot.slane %v6866_v31, 5  ;;  %v6355_v31 = vld [vmem:[#allocation2 + $0x184] sm:$0xf] }
 0x52e   :  { %8048 = vst.msk [vmem:[#allocation3 + $0xc0] sm:$0xf] %vm7999_vm4, %v13215_v55  ;;  %v9412_v40 = vpack.c.bf16 %v9348_v11, %v9348_v11  ;;  %v9089_v7 = vmul.f32 %v13141_v35, %v8932_v56  ;;  %v8734_v42 = vmax.f32 %v8670_v23, 0.0  ;;  %v5925_v56 = vld [vmem:[#allocation2 + $0x120] sm:$0xf] }
 0x530   :  { %9477 = vst.msk [vmem:[%s14434_s10 + $0x10] sm:$0xf] %vm9472_vm9, %v9412_v40  ;;  %v9157_v55 = vadd.f32 %v13160_v57, %v9089_v7  ;;  %v7036_v40 = vrot.slane %v7034_v19, 5 }
 0x531   :  { %7885 = vrot.lane.b32.xlu1 %v7722_v9, %s10114_s23  ;;  %v8470_v36 = vpop.f32.mrf.mxu1  ;;  %v6864_v9 = vrot.slane %v6863_v22, 4 }
 0x532   :  { %v9285_v54 = vadd.f32 %v9221_v6, %v9157_v55  ;;  %v8603_v47 = vmul.f32 %v13126_v4, %v8470_v36  ;;  %6123 = vrot.lane.b32.xlu2 %v5940_v15, %s10112_s30  ;;  %v5548_v6 = vrot.slane %v5273_v41, 5  ;;  %v5547_v55 = vrot.slane %v5545_v34, 4 }
 0x533   :  { %v7233_v37 = vpop.permute.xlu1 %7232  ;;  %7917 = vrot.lane.b32.xlu0 %v7778_v1, %s10114_s23  ;;  %v7037_v23 = vsel %vm10215_vm5, %v7032_v27, %v7036_v40 }
 0x534   :  { %7376 = vst.msk [vmem:[#allocation3 + $0xc4] sm:$0xf] %vm7326_vm3, %v7233_v37  ;;  %v9349_v0 = vmax.f32 %v9285_v54, 0.0  ;;  %v8671_v14 = vadd.f32 %v13146_v29, %v8603_v47  ;;  %v6114_v38 = vpop.permute.xlu2 %6113  ;;  %v5271_v37 = vld [vmem:[#allocation2 + $0x114] sm:$0xe]  ;;  %v5549_v47 = vsel %vm10227_vm8, %v5547_v55, %v5548_v6  ;;  %v7048_v55 = vshll.u32 %v6355_v31, 16 }
 0x535   :  { %8049 = vst.msk [vmem:[#allocation3 + $0xc4] sm:$0xf] %vm7999_vm4, %v7906_v60  ;;  %v13346_v3 = vpop.permute.xlu0 %7204  ;;  %v8935_v61 = vpop.f32.mrf.mxu2  ;;  %v6330_v60 = vld [vmem:[#allocation2 + $0x120] sm:$0xf] }
 0x536   :  { %v9413_v17 = vpack.c.bf16 %v9349_v0, %v9349_v0  ;;  %v8735_v16 = vmax.f32 %v8671_v14, 0.0  ;;  %v9090_v25 = vmul.f32 %v13141_v35, %v8935_v61  ;;  %v6847_v48 = vshrl.u32 %v6330_v60, 16 }
 0x537   :  { %v6850_v46 = vshll.u32 %v6330_v60, 16  ;;  %v6869_v0 = vsel %vm10215_vm5, %v6864_v9, %v6868_v21  ;;  %v9757_v61 = vrot.slane %v5271_v37, 9  ;;  %v13410_v60 = vld [vmem:[#allocation2 + $0x178] sm:$0xf]  ;;  %v5926_v9 = vld [vmem:[#allocation2 + $0x124] sm:$0xf] }
 0x538   :  { %9478 = vst.msk [vmem:[%s14434_s10 + $0x14] sm:$0xf] %vm9472_vm9, %v9413_v17  ;;  %v9158_v43 = vadd.f32 %v13160_v57, %v9090_v25  ;;  %v8788_v2 = vpack.c.bf16 %v8735_v16, %v8734_v42  ;;  %v6849_v36 = vrot.slane %v6847_v48, 4  ;;  %v5601_v41 = vrot.slane %v13410_v60, 5  ;;  %v7475_v21 = vld [vmem:[#allocation2 + $0x180] sm:$0xe] }
 0x539   :  { %6121 = vrot.lane.b32.xlu1 %v5939_v39, %s10112_s30  ;;  %v6852_v15 = vrot.slane %v6850_v46, 5 }
 0x53a   :  { %v9286_v13 = vadd.f32 %v9222_v52, %v9158_v43  ;;  %7915 = vrot.lane.b32.xlu2 %v7775_v50, %s10114_s23  ;;  %v8473_v44 = vpop.f32.mrf.mxu1  ;;  %9979 = vmatmul.msk.bf16.gmra.mxu2 %vm8811_vm7, %v8788_v2  ;;  %v5295_v52 = vld [vmem:[#allocation2 + $0x174] sm:$0xe]  ;;  %v13414_v50 = vld [vmem:[#allocation2 + $0x124] sm:$0xf] }
 0x53b   :  { %v5696_v11 = vpop.permute.xlu1 %5695  ;;  %6093 = vrot.lane.b32.xlu0 %v5925_v56, %s10112_s30  ;;  %v6853_v1 = vor.u32 %v6852_v15, %v6849_v36  ;;  %v9765_v43 = vrot.slane %v5295_v52, 9  ;;  %v7725_v53 = vrot.slane %v13414_v50, 5  ;;  %v7453_v56 = vld [vmem:[#allocation2 + $0x128] sm:$0x1]  ;;  %v7052_v36 = vshrl.u32 %v6355_v31, 16 }
 0x53c   :  { %5854 = vst.msk [vmem:[#allocation3 + $0x88] sm:$0xf] %vm5819_vm0, %v5696_v11  ;;  %v10058_v18 = vld [vmem:[#allocation3 + $0xc0] sm:$0xff]  ;;  %v9350_v58 = vmax.f32 %v9286_v13, 0.0  ;;  %v13373_v7 = vpop.permute.xlu2 %7236 }
 0x53d   :  { %6240 = vst.msk [vmem:[#allocation3 + $0x88] sm:$0xf] %vm6205_vm2, %v13317_v63  ;;  %v5728_v8 = vpop.permute.xlu0 %5727  ;;  %9961 = vmatmul.msk.bf16.vlgmr.msrb.gmra.mxu3 %vm8308_vm6, %v10058_v18  ;;  %v8937_v10 = vpop.f32.mrf.mxu2  ;;  %v6854_v39 = vrot.slane %v6853_v1, 4  ;;  %v5602_v11 = vsel %vm10227_vm8, %v9765_v43, %v5601_v41  ;;  %v7727_v40 = vrot.slane %v7725_v53, 4  ;;  %v13456_v1 = vld [vmem:[%s14425_s0 + $0x28] sm:$0xff]  }
 0x53e   :  { %7361 = vst.msk [vmem:[#allocation3 + $0x88] sm:$0xf] %vm7326_vm3, %v13281_v26  ;;  %v9414_v62 = vpack.c.bf16 %v9350_v58, %v9350_v58  ;;  %v9091_v63 = vmul.f32 %v13141_v35, %v8937_v10  ;;  %v8604_v26 = vmul.f32 %v13126_v4, %v8473_v44  ;;  %v7728_v58 = vrot.slane %v7453_v56, 5 }
 0x53f   :  { %5870 = vst.msk [vmem:[#allocation3 + $0xc8] sm:$0xf] %vm5819_vm0, %v5728_v8  ;;  %v6859_v48 = vsel %vm10215_vm5, %v6854_v39, %v13349_v51  ;;  %v9225_v10 = vunpack.c.h.bf16 %v44_v5  ;;  %v9797_v5 = vrot.slane %v7475_v21, 9  ;;  %v9226_v39 = vunpack.c.l.bf16 %v13456_v1 }
 0x540   :  { %6256 = vst.msk [vmem:[#allocation3 + $0xc8] sm:$0xf] %vm6205_vm2, %v6114_v38  ;;  %v9159_v54 = vadd.f32 %v13160_v57, %v9091_v63  ;;  %v8672_v38 = vadd.f32 %v13146_v29, %v8604_v26  ;;  %v9227_v60 = vunpack.c.h.bf16 %v13456_v1 }
 0x541   :  { %9479 = vst.msk [vmem:[%s14434_s10 + $0x18] sm:$0xf] %vm9472_vm9, %v9414_v62  ;;  %7244 = vrot.lane.b32.xlu1 %v7037_v23, %s10113_s13  ;;  %v7451_v62 = vld [vmem:[#allocation2 + $0x120] sm:$0xe] }
 0x542   :  { %v9287_v49 = vadd.f32 %v9223_v30, %v9159_v54  ;;  %5709 = vrot.lane.b32.xlu2 %v5549_v47, %s10111_s3  ;;  %v8475_v14 = vpop.f32.mrf.mxu1  ;;  %v7729_v30 = vsel %vm10227_vm8, %v7727_v40, %v7728_v58  ;;  %v5942_v54 = vld [vmem:[#allocation2 + $0x184] sm:$0xf]  ;;  %v6354_v47 = vld [vmem:[#allocation2 + $0x180] sm:$0xf]  ;;  %v5603_v40 = vrot.slane %v5601_v41, 4 }
 0x543   :  { %v6084_v28 = vpop.permute.xlu1 %6083  ;;  %7216 = vrot.lane.b32.xlu0 %v6869_v0, %s10113_s13  ;;  %v8605_v33 = vmul.f32 %v13126_v4, %v8475_v14  ;;  %v7054_v0 = vrot.slane %v7052_v36, 4  ;;  %v7039_v43 = vshrl.u32 %v6354_v47, 16  ;;  %v7042_v50 = vshll.u32 %v6354_v47, 16 }
 0x544   :  { %6241 = vst.msk [vmem:[#allocation3 + $0x8c] sm:$0xf] %vm6205_vm2, %v6084_v28  ;;  %v9351_v12 = vmax.f32 %v9287_v49, 0.0  ;;  %v5700_v42 = vpop.permute.xlu2 %5699  ;;  %v9789_v49 = vrot.slane %v7451_v62, 9  ;;  %v13458_v28 = vrot.slane %v7048_v55, 5 }
 0x545   :  { %7362 = vst.msk [vmem:[#allocation3 + $0x8c] sm:$0xf] %vm7326_vm3, %v13346_v3  ;;  %v8673_v17 = vadd.f32 %v13146_v29, %v8605_v33  ;;  %v6116_v16 = vpop.permute.xlu0 %6115  ;;  %v8940_v25 = vpop.f32.mrf.mxu2  ;;  %v8736_v3 = vmax.f32 %v8672_v38, 0.0  ;;  %v13464_v33 = vld [vmem:[#allocation2 + $0x184] sm:$0xf] }
 0x546   :  { %8035 = vst.msk [vmem:[#allocation3 + $0x8c] sm:$0xf] %vm7999_vm4, %v13313_v59  ;;  %v9415_v24 = vpack.c.bf16 %v9351_v12, %v9351_v12  ;;  %v9092_v19 = vmul.f32 %v13141_v35, %v8940_v25  ;;  %v5546_v59 = vsel %vm10227_vm8, %v9757_v61, %v5545_v34  ;;  %v13468_v12 = vld [vmem:[#allocation2 + $0x124] sm:$0xf] }
 0x547   :  { %5856 = vst.msk [vmem:[#allocation3 + $0x90] sm:$0xf] %vm5819_vm0, %v5700_v42  ;;  %v8737_v2 = vmax.f32 %v8673_v17, 0.0  ;;  %v6356_v42 = vld [vmem:[#allocation2 + $0x188] sm:$0x1] }
 0x548   :  { %9480 = vst.msk [vmem:[%s14434_s10 + $0x1c] sm:$0xf] %vm9472_vm9, %v9415_v24  ;;  %v9160_v22 = vadd.f32 %v13160_v57, %v9092_v19  ;;  %v5297_v24 = vld [vmem:[#allocation2 + $0x17c] sm:$0x1]  ;;  %v6333_v19 = vld [vmem:[#allocation2 + $0x12c] sm:$0xf] }
 0x549   :  { %5707 = vrot.lane.b32.xlu1 %v5546_v59, %s10111_s3  ;;  %v8789_v46 = vpack.c.bf16 %v8737_v2, %v8736_v3  ;;  %v7781_v2 = vrot.slane %v13464_v33, 5  ;;  %v5552_v59 = vrot.slane %v13468_v12, 5 }
 0x54a   :  { %v9288_v13 = vadd.f32 %v9224_v45, %v9160_v22  ;;  %7214 = vrot.lane.b32.xlu2 %v6859_v48, %s10113_s13  ;;  %v7055_v45 = vor.u32 %v7054_v0, %v13458_v28  ;;  %v7058_v22 = vshll.u32 %v6356_v42, 16 }
 0x54b   :  { %v7876_v34 = vpop.permute.xlu1 %7875  ;;  %5739 = vrot.lane.b32.xlu0 %v5602_v11, %s10111_s3  ;;  %9980 = vmatmul.msk.bf16.gmra.mxu2 %vm8811_vm7, %v8789_v46  ;;  %v5941_v46 = vld [vmem:[#allocation2 + $0x180] sm:$0xf]  ;;  %v7782_v31 = vsel %vm10227_vm8, %v9797_v5, %v7781_v2  ;;  %v5554_v36 = vrot.slane %v5552_v59, 4  ;;  %v7783_v12 = vrot.slane %v7781_v2, 4 }
 0x54c   :  { %8034 = vst.msk [vmem:[#allocation3 + $0x88] sm:$0xf] %vm7999_vm4, %v7876_v34  ;;  %v9352_v51 = vmax.f32 %v9288_v13, 0.0  ;;  %v6088_v44 = vpop.permute.xlu2 %6087  ;;  %v6871_v13 = vshrl.u32 %v6333_v19, 16  ;;  %v6874_v34 = vshll.u32 %v6333_v19, 16  ;;  %v7056_v58 = vrot.slane %v7055_v45, 4 }
 0x54d   :  { %v13439_v18 = vpop.permute.xlu0 %7907  ;;  %v8942_v27 = vpop.f32.mrf.mxu2 }
 0x54e   :  { %v9416_v6 = vpack.c.bf16 %v9352_v51, %v9352_v51  ;;  %v9093_v8 = vmul.f32 %v13141_v35, %v8942_v27  ;;  %v5276_v27 = vld [vmem:[#allocation2 + $0x128] sm:$0x1]  ;;  %v6876_v21 = vrot.slane %v6874_v34, 5 }
 0x54f   :  { %v5555_v41 = vrot.slane %v5276_v27, 5 }
 0x550   :  { %9481 = vst.msk [vmem:[%s14434_s10 + $0x20] sm:$0xf] %vm9472_vm9, %v9416_v6  ;;  %v9161_v15 = vadd.f32 %v13160_v57, %v9093_v8  ;;  %v7041_v6 = vrot.slane %v7039_v43, 4  ;;  %v7044_v8 = vrot.slane %v7042_v50, 5 }
 0x551   :  { %6095 = vrot.lane.b32.xlu1 %v5926_v9, %s10112_s30  ;;  %v8478_v63 = vpop.f32.mrf.mxu1 }
 0x552   :  { %v9289_v26 = vadd.f32 %v9225_v10, %v9161_v15  ;;  %7889 = vrot.lane.b32.xlu2 %v7729_v30, %s10114_s23  ;;  %v8606_v25 = vmul.f32 %v13126_v4, %v8478_v63  ;;  %v7060_v15 = vrot.slane %v7058_v22, 5  ;;  %v6873_v30 = vrot.slane %v6871_v13, 4 }
 0x553   :  { %v5730_v23 = vpop.permute.xlu1 %5729  ;;  %v10051_v37 = vld [vmem:[#allocation3 + $0x88] sm:$0xff]  ;;  %6127 = vrot.lane.b32.xlu0 %v5942_v54, %s10112_s30  ;;  %v7045_v47 = vor.u32 %v7044_v8, %v7041_v6 }
 0x554   :  { %5871 = vst.msk [vmem:[#allocation3 + $0xcc] sm:$0xf] %vm5819_vm0, %v5730_v23  ;;  %v9353_v14 = vmax.f32 %v9289_v26, 0.0  ;;  %9954 = vmatmul.msk.bf16.gmra.mxu1 %vm8308_vm6, %v10051_v37  ;;  %v13462_v38 = vpop.permute.xlu2 %7879  ;;  %v8674_v11 = vadd.f32 %v13146_v29, %v8606_v25  ;;  %v7061_v0 = vsel %vm10215_vm5, %v7056_v58, %v7060_v15  ;;  %v6877_v42 = vor.u32 %v6876_v21, %v6873_v30  ;;  %v48_v25 = vld [vmem:[%s14425_s0 + $0x30] sm:$0xff]  }
 0x555   :  { %6257 = vst.msk [vmem:[#allocation3 + $0xcc] sm:$0xf] %vm6205_vm2, %v6116_v16  ;;  %v5702_v61 = vpop.permute.xlu0 %5701  ;;  %v8945_v52 = vpop.f32.mrf.mxu2  ;;  %v9228_v22 = vunpack.c.l.bf16 %v48_v25  ;;  %v7456_v58 = vld [vmem:[#allocation2 + $0x134] sm:$0x1] }
 0x556   :  { %7378 = vst.msk [vmem:[#allocation3 + $0xcc] sm:$0xf] %vm7326_vm3, %v13373_v7  ;;  %v9417_v17 = vpack.c.bf16 %v9353_v14, %v9353_v14  ;;  %v9094_v16 = vmul.f32 %v13141_v35, %v8945_v52  ;;  %v7726_v7 = vsel %vm10227_vm8, %v9789_v49, %v7725_v53  ;;  %v5604_v53 = vrot.slane %v5297_v24, 5  ;;  %v13515_v14 = vld [vmem:[#allocation2 + $0x130] sm:$0xf] }
 0x557   :  { %5857 = vst.msk [vmem:[#allocation3 + $0x94] sm:$0xf] %vm5819_vm0, %v5702_v61  ;;  %v8738_v26 = vmax.f32 %v8674_v11, 0.0  ;;  %v5556_v52 = vsel %vm10227_vm8, %v5554_v36, %v5555_v41  ;;  %v6880_v19 = vshll.u32 %v13515_v14, 16  ;;  %v7477_v11 = vld [vmem:[#allocation2 + $0x188] sm:$0x1] }
 0x558   :  { %6243 = vst.msk [vmem:[#allocation3 + $0x94] sm:$0xf] %vm6205_vm2, %v6088_v44  ;;  %v9162_v3 = vadd.f32 %v13160_v57, %v9094_v16  ;;  %v5605_v37 = vsel %vm10227_vm8, %v5603_v40, %v5604_v53  ;;  %v7046_v16 = vrot.slane %v7045_v47, 4  ;;  %v7735_v36 = vrot.slane %v7456_v58, 5  ;;  %v7454_v47 = vld [vmem:[#allocation2 + $0x12c] sm:$0xe] }
 0x559   :  { %9482 = vst.msk [vmem:[%s14434_s10 + $0x24] sm:$0xf] %vm9472_vm9, %v9417_v17  ;;  %7887 = vrot.lane.b32.xlu1 %v7726_v7, %s10114_s23  ;;  %v8480_v48 = vpop.f32.mrf.mxu1  ;;  %v5274_v17 = vld [vmem:[#allocation2 + $0x120] sm:$0xe]  ;;  %v13541_v34 = vrot.slane %v6880_v19, 5 }
 0x55a   :  { %v9290_v56 = vadd.f32 %v9226_v39, %v9162_v3  ;;  %v8607_v44 = vmul.f32 %v13126_v4, %v8480_v48  ;;  %6125 = vrot.lane.b32.xlu2 %v5941_v46, %s10112_s30  ;;  %v9758_v43 = vrot.slane %v5274_v17, 9  ;;  %v6878_v48 = vrot.slane %v6877_v42, 4  ;;  %v13530_v46 = vld [vmem:[#allocation2 + $0x130] sm:$0xf]  ;;  %v13600_v17 = vld [vmem:[#allocation2 + $0x184] sm:$0xf] }
 0x55b   :  { %v7235_v51 = vpop.permute.xlu1 %7234  ;;  %7919 = vrot.lane.b32.xlu0 %v7782_v31, %s10114_s23  ;;  %v7051_v53 = vsel %vm10215_vm5, %v7046_v16, %v13458_v28  ;;  %v7732_v28 = vrot.slane %v13530_v46, 5 }
 0x55c   :  { %7377 = vst.msk [vmem:[#allocation3 + $0xc8] sm:$0xf] %vm7326_vm3, %v7235_v51  ;;  %v9354_v10 = vmax.f32 %v9290_v56, 0.0  ;;  %v8675_v9 = vadd.f32 %v13146_v29, %v8607_v44  ;;  %v5734_v55 = vpop.permute.xlu2 %5733  ;;  %v5553_v51 = vsel %vm10227_vm8, %v9758_v43, %v5552_v59  ;;  %v6883_v27 = vsel %vm10215_vm5, %v6878_v48, %v13541_v34 }
 0x55d   :  { %8050 = vst.msk [vmem:[#allocation3 + $0xc8] sm:$0xf] %vm7999_vm4, %v13439_v18  ;;  %v7207_v62 = vpop.permute.xlu0 %7206  ;;  %v8947_v63 = vpop.f32.mrf.mxu2  ;;  %v7784_v59 = vrot.slane %v7477_v11, 5 }
 0x55e   :  { %5873 = vst.msk [vmem:[#allocation3 + $0xd4] sm:$0xf] %vm5819_vm0, %v5734_v55  ;;  %v9418_v23 = vpack.c.bf16 %v9354_v10, %v9354_v10  ;;  %v8739_v54 = vmax.f32 %v8675_v9, 0.0  ;;  %v9095_v18 = vmul.f32 %v13141_v35, %v8947_v63  ;;  %v7734_v55 = vrot.slane %v7732_v28, 4  ;;  %v6358_v63 = vld [vmem:[#allocation2 + $0x190] sm:$0xf] }
 0x55f   :  { %v7785_v41 = vsel %vm10227_vm8, %v7783_v12, %v7784_v59  ;;  %v7072_v21 = vshll.u32 %v6358_v63, 16 }
 0x560   :  { %9483 = vst.msk [vmem:[%s14434_s10 + $0x28] sm:$0xf] %vm9472_vm9, %v9418_v23  ;;  %v8790_v49 = vpack.c.bf16 %v8739_v54, %v8738_v26  ;;  %v9163_v1 = vadd.f32 %v13160_v57, %v9095_v18  ;;  %v13581_v18 = vld [vmem:[%s14429_s5] ss:$0 sm:$0xff] }
 0x561   :  { %5741 = vrot.lane.b32.xlu1 %v5605_v37, %s10111_s3  ;;  %v13598_v42 = vrot.slane %v7072_v21, 5 }
 0x562   :  { %v9291_v5 = vadd.f32 %v9227_v60, %v9163_v1  ;;  %7248 = vrot.lane.b32.xlu2 %v7061_v0, %s10113_s13  ;;  %9981 = vmatmul.msk.bf16.gmra.mxu2 %vm8811_vm7, %v8790_v49  ;;  %v6884_v60 = vshrl.u32 %v13515_v14, 16  ;;  %v13593_v1 = vld [vmem:[%s14430_s6] ss:$0 sm:$0xff] }
 0x563   :  { %v7910_v61 = vpop.permute.xlu1 %7909  ;;  %5713 = vrot.lane.b32.xlu0 %v5556_v52, %s10111_s3  ;;  %v9790_v52 = vrot.slane %v7454_v47, 9 }
 0x564   :  { %8051 = vst.msk [vmem:[#allocation3 + $0xcc] sm:$0xf] %vm7999_vm4, %v7910_v61  ;;  %v9355_v39 = vmax.f32 %v9291_v5, 0.0  ;;  %v13526_v24 = vpop.permute.xlu2 %7238  ;;  %v6335_v5 = vld [vmem:[#allocation2 + $0x134] sm:$0x1] }
 0x565   :  { %v7882_v7 = vpop.permute.xlu0 %7881  ;;  %v8950_v45 = vpop.f32.mrf.mxu2  ;;  %v7733_v48 = vsel %vm10227_vm8, %v9790_v52, %v7732_v28  ;;  %v13621_v28 = vld [vmem:[%s14425_s0 + $0x38] sm:$0xff]  }
 0x566   :  { %v9419_v50 = vpack.c.bf16 %v9355_v39, %v9355_v39  ;;  %v9096_v3 = vmul.f32 %v13141_v35, %v8950_v45  ;;  %v5927_v45 = vld [vmem:[#allocation2 + $0x12c] sm:$0xf] }
 0x568   :  { %9484 = vst.msk [vmem:[%s14434_s10 + $0x2c] sm:$0xf] %vm9472_vm9, %v9419_v50  ;;  %v9164_v13 = vadd.f32 %v13160_v57, %v9096_v3  ;;  %v6890_v50 = vshll.u32 %v6335_v5, 16  ;;  %v6359_v3 = vld [vmem:[#allocation2 + $0x194] sm:$0x1] }
 0x569   :  { %7246 = vrot.lane.b32.xlu1 %v7051_v53, %s10113_s13  ;;  %v8483_v56 = vpop.f32.mrf.mxu1  ;;  %v5608_v53 = vrot.slane %v13600_v17, 5 }
 0x56a   :  { %v9292_v44 = vadd.f32 %v9228_v22, %v9164_v13  ;;  %5711 = vrot.lane.b32.xlu2 %v5553_v51, %s10111_s3  ;;  %v8608_v2 = vmul.f32 %v13126_v4, %v8483_v56  ;;  %v5928_v4 = vld [vmem:[#allocation2 + $0x130] sm:$0xf]  ;;  %v5943_v56 = vld [vmem:[#allocation2 + $0x18c] sm:$0xf]  ;;  %v6892_v58 = vrot.slane %v6890_v50, 5 }
 0x56b   :  { %v6086_v31 = vpop.permute.xlu1 %6085  ;;  %v10059_v40 = vld [vmem:[#allocation3 + $0xc8] sm:$0xff]  ;;  %7218 = vrot.lane.b32.xlu0 %v6883_v27, %s10113_s13  ;;  %v5300_v27 = vld [vmem:[#allocation2 + $0x188] sm:$0x1] }
 0x56c   :  { %6242 = vst.msk [vmem:[#allocation3 + $0x90] sm:$0xf] %vm6205_vm2, %v6086_v31  ;;  %v9356_v6 = vmax.f32 %v9292_v44, 0.0  ;;  %v13557_v8 = vpop.permute.xlu2 %7913  ;;  %9962 = vmatmul.msk.bf16.gmra.mxu3 %vm8308_vm6, %v10059_v40  ;;  %v8676_v26 = vadd.f32 %v13146_v29, %v8608_v2  ;;  %v6886_v29 = vrot.slane %v6884_v60, 4  ;;  %v7082_v31 = vshll.u32 %v6359_v3, 16 }
 0x56d   :  { %7363 = vst.msk [vmem:[#allocation3 + $0x90] sm:$0xf] %vm7326_vm3, %v7207_v62  ;;  %v13562_v10 = vpop.permute.xlu0 %6117  ;;  %v8952_v9 = vpop.f32.mrf.mxu2  ;;  %v9229_v62 = vunpack.c.h.bf16 %v48_v25 }
 0x56e   :  { %8036 = vst.msk [vmem:[#allocation3 + $0x90] sm:$0xf] %vm7999_vm4, %v13462_v38  ;;  %v9420_v33 = vpack.c.bf16 %v9356_v6, %v9356_v6  ;;  %v9097_v15 = vmul.f32 %v13141_v35, %v8952_v9  ;;  %v7076_v35 = vshrl.u32 %v6358_v63, 16  ;;  %v8740_v25 = vmax.f32 %v8676_v26, 0.0 }
 0x56f   :  { %v6887_v43 = vor.u32 %v6886_v29, %v13541_v34  ;;  %v5610_v9 = vrot.slane %v5608_v53, 4  ;;  %v5277_v29 = vld [vmem:[#allocation2 + $0x12c] sm:$0xe] }
 0x570   :  { %9485 = vst.msk [vmem:[%s14434_s10 + $0x30] sm:$0xf] %vm9472_vm9, %v9420_v33  ;;  %v9165_v38 = vadd.f32 %v13160_v57, %v9097_v15  ;;  %v7736_v57 = vsel %vm10227_vm8, %v7734_v55, %v7735_v36  ;;  %v7078_v19 = vrot.slane %v7076_v35, 4  ;;  %v5611_v55 = vrot.slane %v5300_v27, 5 }
 0x571   :  { %7921 = vrot.lane.b32.xlu1 %v7785_v41, %s10114_s23  ;;  %v8485_v30 = vpop.f32.mrf.mxu1  ;;  %v6888_v40 = vrot.slane %v6887_v43, 4  ;;  %v13647_v41 = vld [vmem:[%s14433_s9] ss:$0 sm:$0xff] }
 0x572   :  { %v9293_v23 = vadd.f32 %v9229_v62, %v9165_v38  ;;  %v8609_v37 = vmul.f32 %v13581_v18, %v8485_v30  ;;  %6099 = vrot.lane.b32.xlu2 %v5928_v4, %s10112_s30  ;;  %v7079_v44 = vor.u32 %v7078_v19, %v13598_v42  ;;  %v7084_v62 = vrot.slane %v7082_v31, 5  ;;  %v5298_v30 = vld [vmem:[#allocation2 + $0x180] sm:$0xe] }
 0x573   :  { %v7209_v54 = vpop.permute.xlu1 %7208  ;;  %7893 = vrot.lane.b32.xlu0 %v7736_v57, %s10114_s23  ;;  %v6893_v60 = vsel %vm10215_vm5, %v6888_v40, %v6892_v58  ;;  %v5612_v4 = vsel %vm10227_vm8, %v5610_v9, %v5611_v55  ;;  %v9766_v47 = vrot.slane %v5298_v30, 9  ;;  %v6337_v58 = vld [vmem:[#allocation2 + $0x13c] sm:$0xf]  ;;  %v5944_v9 = vld [vmem:[#allocation2 + $0x190] sm:$0xf] }
 0x574   :  { %7364 = vst.msk [vmem:[#allocation3 + $0x94] sm:$0xf] %vm7326_vm3, %v7209_v54  ;;  %v9357_v49 = vmax.f32 %v9293_v23, 0.0  ;;  %v8677_v0 = vadd.f32 %v13593_v1, %v8609_v37  ;;  %v6090_v14 = vpop.permute.xlu2 %6089  ;;  %v7080_v15 = vrot.slane %v7079_v44, 4  ;;  %v13698_v44 = vld [vmem:[%s14425_s0 + $0x40] sm:$0xff]  }
 0x575   :  { %8037 = vst.msk [vmem:[#allocation3 + $0x94] sm:$0xf] %vm7999_vm4, %v7882_v7  ;;  %v13596_v61 = vpop.permute.xlu0 %7240  ;;  %v6357_v7 = vld [vmem:[#allocation2 + $0x18c] sm:$0xf] }
 0x576   :  { %v9421_v16 = vpack.c.bf16 %v9357_v49, %v9357_v49  ;;  %v8741_v39 = vmax.f32 %v8677_v0, 0.0  ;;  %v7063_v13 = vshrl.u32 %v6357_v7, 16  ;;  %v7066_v11 = vshll.u32 %v6357_v7, 16  ;;  %v7478_v55 = vld [vmem:[#allocation2 + $0x18c] sm:$0xe] }
 0x577   :  { %v7085_v23 = vsel %vm10215_vm5, %v7080_v15, %v7084_v62  ;;  %v9231_v7 = vunpack.c.h.bf16 %v13621_v28  ;;  %v6908_v15 = vshrl.u32 %v6337_v58, 16 }
 0x578   :  { %9486 = vst.msk [vmem:[%s14434_s10 + $0x34] sm:$0xf] %vm9472_vm9, %v9421_v16  ;;  %v8791_v22 = vpack.c.bf16 %v8741_v39, %v8740_v25  ;;  %v7065_v36 = vrot.slane %v7063_v13, 4  ;;  %v7068_v33 = vrot.slane %v7066_v11, 5  ;;  %v13665_v25 = vld [vmem:[#allocation2 + $0x130] sm:$0xf] }
 0x579   :  { %6097 = vrot.lane.b32.xlu1 %v5927_v45, %s10112_s30  ;;  %v9759_v45 = vrot.slane %v5277_v29, 9  ;;  %v6910_v29 = vrot.slane %v6908_v15, 4 }
 0x57a   :  { %7891 = vrot.lane.b32.xlu2 %v7733_v48, %s10114_s23  ;;  %v8488_v51 = vpop.f32.mrf.mxu1  ;;  %9982 = vmatmul.msk.bf16.gmra.mxu2 %vm8811_vm7, %v8791_v22  ;;  %v7069_v21 = vor.u32 %v7068_v33, %v7065_v36  ;;  %v5559_v22 = vrot.slane %v13665_v25, 5 }
 0x57b   :  { %v5732_v34 = vpop.permute.xlu1 %5731  ;;  %6129 = vrot.lane.b32.xlu0 %v5943_v56, %s10112_s30  ;;  %v8610_v63 = vmul.f32 %v13581_v18, %v8488_v51  ;;  %v7480_v56 = vld [vmem:[#allocation2 + $0x194] sm:$0x1] }
 0x57c   :  { %5872 = vst.msk [vmem:[#allocation3 + $0xd0] sm:$0xf] %vm5819_vm0, %v5732_v34  ;;  %v10052_v46 = vld [vmem:[#allocation3 + $0x90] sm:$0xff]  ;;  %v13625_v12 = vpop.permute.xlu2 %7212  ;;  %v7070_v16 = vrot.slane %v7069_v21, 4  ;;  %v5560_v34 = vsel %vm10227_vm8, %v9759_v45, %v5559_v22  ;;  %v13715_v21 = vld [vmem:[#allocation2 + $0x190] sm:$0xf] }
 0x57d   :  { %6258 = vst.msk [vmem:[#allocation3 + $0xd0] sm:$0xf] %vm6205_vm2, %v13562_v10  ;;  %v5704_v59 = vpop.permute.xlu0 %5703  ;;  %9955 = vmatmul.msk.bf16.gmra.mxu1 %vm8308_vm6, %v10052_v46  ;;  %v8955_v6 = vpop.f32.mrf.mxu2  ;;  %v13636_v10 = vld [vmem:[%s14432_s8] ss:$0 sm:$0xff]  ;;  %v8678_v37 = vadd.f32 %v13593_v1, %v8610_v63  ;;  %v7791_v46 = vrot.slane %v7480_v56, 5 }
 0x57e   :  { %7379 = vst.msk [vmem:[#allocation3 + $0xd0] sm:$0xf] %vm7326_vm3, %v13526_v24  ;;  %v9098_v2 = vmul.f32 %v13636_v10, %v8955_v6  ;;  %v9230_v24 = vunpack.c.l.bf16 %v13621_v28  ;;  %v7075_v13 = vsel %vm10215_vm5, %v7070_v16, %v13598_v42  ;;  %v9232_v6 = vunpack.c.l.bf16 %v13698_v44  ;;  %v5930_v63 = vld [vmem:[#allocation2 + $0x13c] sm:$0xf] }
 0x57f   :  { %5858 = vst.msk [vmem:[#allocation3 + $0x98] sm:$0xf] %vm5819_vm0, %v5704_v59  ;;  %v8742_v43 = vmax.f32 %v8678_v37, 0.0 }
 0x580   :  { %6244 = vst.msk [vmem:[#allocation3 + $0x98] sm:$0xf] %vm6205_vm2, %v6090_v14  ;;  %v9166_v38 = vadd.f32 %v13647_v41, %v9098_v2 }
 0x581   :  { %7220 = vrot.lane.b32.xlu1 %v6893_v60, %s10113_s13 }
 0x582   :  { %v9294_v35 = vadd.f32 %v9230_v24, %v9166_v38  ;;  %5745 = vrot.lane.b32.xlu2 %v5612_v4, %s10111_s3  ;;  %v8490_v54 = vpop.f32.mrf.mxu1  ;;  %v6904_v24 = vshll.u32 %v6337_v58, 16  ;;  %v9798_v38 = vrot.slane %v7478_v55, 9  ;;  %v7457_v4 = vld [vmem:[#allocation2 + $0x138] sm:$0xe] }
 0x583   :  { %v6120_v26 = vpop.permute.xlu1 %6119  ;;  %7252 = vrot.lane.b32.xlu0 %v7085_v23, %s10113_s13  ;;  %v8611_v57 = vmul.f32 %v13581_v18, %v8490_v54  ;;  %v13721_v23 = vld [vmem:[#allocation2 + $0x13c] sm:$0xf]  ;;  %v6360_v54 = vld [vmem:[#allocation2 + $0x198] sm:$0xf] }
 0x584   :  { %6259 = vst.msk [vmem:[#allocation3 + $0xd4] sm:$0xf] %vm6205_vm2, %v6120_v26  ;;  %v9358_v49 = vmax.f32 %v9294_v35, 0.0  ;;  %v5736_v0 = vpop.permute.xlu2 %5735  ;;  %v6336_v35 = vld [vmem:[#allocation2 + $0x138] sm:$0xf]  ;;  %v7739_v45 = vrot.slane %v13721_v23, 5 }
 0x585   :  { %7380 = vst.msk [vmem:[#allocation3 + $0xd4] sm:$0xf] %vm7326_vm3, %v13596_v61  ;;  %v8679_v14 = vadd.f32 %v13593_v1, %v8611_v57  ;;  %v6092_v5 = vpop.permute.xlu0 %6091  ;;  %v8957_v52 = vpop.f32.mrf.mxu2  ;;  %v13670_v61 = vld [vmem:[#allocation2 + $0x190] sm:$0xf]  ;;  %v6895_v16 = vshrl.u32 %v6336_v35, 16 }
 0x586   :  { %8053 = vst.msk [vmem:[#allocation3 + $0xd4] sm:$0xf] %vm7999_vm4, %v13557_v8  ;;  %v9422_v39 = vpack.c.bf16 %v9358_v49, %v9358_v49  ;;  %v9099_v19 = vmul.f32 %v13636_v10, %v8957_v52  ;;  %v5609_v8 = vsel %vm10227_vm8, %v9766_v47, %v5608_v53  ;;  %v7788_v17 = vrot.slane %v13670_v61, 5  ;;  %v6338_v52 = vld [vmem:[#allocation2 + $0x140] sm:$0x1] }
 0x587   :  { %5874 = vst.msk [vmem:[#allocation3 + $0xd8] sm:$0xf] %vm5819_vm0, %v5736_v0  ;;  %v8743_v50 = vmax.f32 %v8679_v14, 0.0  ;;  %v13725_v47 = vrot.slane %v6904_v24, 5  ;;  %v5279_v61 = vld [vmem:[#allocation2 + $0x134] sm:$0x1] }
 0x588   :  { %9487 = vst.msk [vmem:[%s14434_s10 + $0x38] sm:$0xf] %vm9472_vm9, %v9422_v39  ;;  %v9167_v3 = vadd.f32 %v13647_v41, %v9099_v19  ;;  %v7790_v27 = vrot.slane %v7788_v17, 4  ;;  %v7789_v14 = vsel %vm10227_vm8, %v9798_v38, %v7788_v17  ;;  %v9233_v19 = vunpack.c.h.bf16 %v13698_v44  ;;  %v5303_v44 = vld [vmem:[#allocation2 + $0x194] sm:$0x1] }
 0x589   :  { %5743 = vrot.lane.b32.xlu1 %v5609_v8, %s10111_s3  ;;  %v8792_v48 = vpack.c.bf16 %v8743_v50, %v8742_v43  ;;  %v5615_v43 = vrot.slane %v13715_v21, 5  ;;  %v7087_v50 = vshrl.u32 %v6360_v54, 16  ;;  %v6914_v17 = vshll.u32 %v6338_v52, 16 }
 0x58a   :  { %v9295_v11 = vadd.f32 %v9231_v7, %v9167_v3  ;;  %7250 = vrot.lane.b32.xlu2 %v7075_v13, %s10113_s13  ;;  %v7792_v2 = vsel %vm10227_vm8, %v7790_v27, %v7791_v46  ;;  %v6898_v7 = vshll.u32 %v6336_v35, 16  ;;  %v6911_v13 = vor.u32 %v6910_v29, %v13725_v47 }
 0x58b   :  { %v7912_v53 = vpop.permute.xlu1 %7911  ;;  %5715 = vrot.lane.b32.xlu0 %v5560_v34, %s10111_s3  ;;  %9983 = vmatmul.msk.bf16.gmra.mxu2 %vm8811_vm7, %v8792_v48  ;;  %v5929_v48 = vld [vmem:[#allocation2 + $0x138] sm:$0xf]  ;;  %v5562_v46 = vrot.slane %v5279_v61, 5  ;;  %v7089_v24 = vrot.slane %v7087_v50, 4  ;;  %v7741_v21 = vrot.slane %v7739_v45, 4 }
 0x58c   :  { %8052 = vst.msk [vmem:[#allocation3 + $0xd0] sm:$0xf] %vm7999_vm4, %v7912_v53  ;;  %v9359_v51 = vmax.f32 %v9295_v11, 0.0  ;;  %v6124_v42 = vpop.permute.xlu2 %6123  ;;  %v7090_v11 = vshll.u32 %v6360_v54, 16  ;;  %v6912_v55 = vrot.slane %v6911_v13, 4 }
 0x58d   :  { %v13700_v31 = vpop.permute.xlu0 %7883 }
 0x58e   :  { %v9423_v28 = vpack.c.bf16 %v9359_v51, %v9359_v51  ;;  %v8960_v40 = vpop.f32.mrf.mxu2  ;;  %v7092_v15 = vrot.slane %v7090_v11, 5 }
 0x58f   :  { %v9100_v59 = vmul.f32 %v13636_v10, %v8960_v40  ;;  %v6900_v40 = vrot.slane %v6898_v7, 5 }
 0x590   :  { %9488 = vst.msk [vmem:[%s14434_s10 + $0x3c] sm:$0xf] %vm9472_vm9, %v9423_v28  ;;  %v6897_v28 = vrot.slane %v6895_v16, 4  ;;  %v7093_v54 = vor.u32 %v7092_v15, %v7089_v24  ;;  %v7481_v15 = vld [vmem:[#allocation2 + $0x198] sm:$0xe] }
 0x591   :  { %6131 = vrot.lane.b32.xlu1 %v5944_v9, %s10112_s30  ;;  %v9168_v36 = vadd.f32 %v13647_v41, %v9100_v59  ;;  %v8493_v33 = vpop.f32.mrf.mxu1  ;;  %v5618_v9 = vrot.slane %v5303_v44, 5 }
 0x592   :  { %7925 = vrot.lane.b32.xlu2 %v7792_v2, %s10114_s23  ;;  %v8612_v49 = vmul.f32 %v13581_v18, %v8493_v33 }
 0x593   :  { %v5706_v62 = vpop.permute.xlu1 %5705  ;;  %v10060_v60 = vld [vmem:[#allocation3 + $0xd0] sm:$0xff]  ;;  %v9296_v30 = vadd.f32 %v9232_v6, %v9168_v36  ;;  %6103 = vrot.lane.b32.xlu0 %v5930_v63, %s10112_s30  ;;  %v5617_v6 = vrot.slane %v5615_v43, 4  ;;  %v6916_v36 = vrot.slane %v6914_v17, 5  ;;  %v6901_v63 = vor.u32 %v6900_v40, %v6897_v28 }
 0x594   :  { %5859 = vst.msk [vmem:[#allocation3 + $0x9c] sm:$0xf] %vm5819_vm0, %v5706_v62  ;;  %v13718_v26 = vpop.permute.xlu2 %7915  ;;  %9963 = vmatmul.msk.bf16.gmra.mxu3 %vm8308_vm6, %v10060_v60  ;;  %v8680_v53 = vadd.f32 %v13593_v1, %v8612_v49 }
 0x595   :  { %6245 = vst.msk [vmem:[#allocation3 + $0x9c] sm:$0xf] %vm6205_vm2, %v6092_v5  ;;  %v9360_v37 = vmax.f32 %v9296_v30, 0.0  ;;  %v5738_v57 = vpop.permute.xlu0 %5737  ;;  %v9791_v5 = vrot.slane %v7457_v4, 9  ;;  %v6917_v38 = vsel %vm10215_vm5, %v6912_v55, %v6916_v36  ;;  %v13769_v30 = vld [vmem:[#allocation2 + $0x19c] sm:$0xf]  ;;  %v5619_v35 = vsel %vm10227_vm8, %v5617_v6, %v5618_v9 }
 0x596   :  { %7366 = vst.msk [vmem:[#allocation3 + $0x9c] sm:$0xf] %vm7326_vm3, %v13625_v12  ;;  %v8962_v0 = vpop.f32.mrf.mxu2  ;;  %v8744_v33 = vmax.f32 %v8680_v53, 0.0  ;;  %v6902_v29 = vrot.slane %v6901_v63, 4  ;;  %v5946_v9 = vld [vmem:[#allocation2 + $0x19c] sm:$0xf] }
 0x597   :  { %5875 = vst.msk [vmem:[#allocation3 + $0xdc] sm:$0xf] %vm5819_vm0, %v5738_v57  ;;  %v9424_v39 = vpack.c.bf16 %v9360_v37, %v9360_v37  ;;  %v9101_v12 = vmul.f32 %v13636_v10, %v8962_v0  ;;  %v7740_v51 = vsel %vm10227_vm8, %v9791_v5, %v7739_v45  ;;  %v5301_v37 = vld [vmem:[#allocation2 + $0x18c] sm:$0xe]  ;;  %v7096_v0 = vshll.u32 %v13769_v30, 16 }
 0x598   :  { %6261 = vst.msk [vmem:[#allocation3 + $0xdc] sm:$0xf] %vm6205_vm2, %v6124_v42  ;;  %v5561_v42 = vrot.slane %v5559_v22, 4  ;;  %v54_v57 = vld [vmem:[%s14425_s0 + $0x48] sm:$0xff]   ;;  %v9767_v52 = vrot.slane %v5301_v37, 9  ;;  %v6907_v7 = vsel %vm10215_vm5, %v6902_v29, %v13725_v47 }
 0x599   :  { %7923 = vrot.lane.b32.xlu1 %v7789_v14, %s10114_s23  ;;  %9489 = vst.msk [vmem:[%s14434_s10 + $0x40] sm:$0xf] %vm9472_vm9, %v9424_v39  ;;  %v9169_v8 = vadd.f32 %v13647_v41, %v9101_v12  ;;  %v8495_v3 = vpop.f32.mrf.mxu1  ;;  %v9234_v39 = vunpack.c.l.bf16 %v54_v57  ;;  %v7094_v12 = vrot.slane %v7093_v54, 4  ;;  %v13791_v50 = vrot.slane %v7096_v0, 5  ;;  %v13840_v37 = vld [vmem:[#allocation2 + $0x13c] sm:$0xf] }
 0x59a   :  { %v8613_v56 = vmul.f32 %v13581_v18, %v8495_v3  ;;  %6101 = vrot.lane.b32.xlu2 %v5929_v48, %s10112_s30  ;;  %v5616_v48 = vsel %vm10227_vm8, %v9767_v52, %v5615_v43  ;;  %v9235_v40 = vunpack.c.h.bf16 %v54_v57  ;;  %v6339_v52 = vld [vmem:[#allocation2 + $0x144] sm:$0xf] }
 0x59b   :  { %v7211_v34 = vpop.permute.xlu1 %7210  ;;  %v9297_v27 = vadd.f32 %v9233_v19, %v9169_v8  ;;  %7895 = vrot.lane.b32.xlu0 %v7740_v51, %s10114_s23  ;;  %v13784_v19 = vld [vmem:[#allocation2 + $0x19c] sm:$0xf]  ;;  %v7459_v8 = vld [vmem:[#allocation2 + $0x140] sm:$0x1]  ;;  %v7099_v47 = vsel %vm10215_vm5, %v7094_v12, %v13791_v50  ;;  %v6341_v12 = vld [vmem:[#allocation2 + $0x14c] sm:$0x1] }
 0x59c   :  { %7365 = vst.msk [vmem:[#allocation3 + $0x98] sm:$0xf] %vm7326_vm3, %v7211_v34  ;;  %v8681_v58 = vadd.f32 %v13593_v1, %v8613_v56  ;;  %v5710_v59 = vpop.permute.xlu2 %5709  ;;  %v7795_v13 = vrot.slane %v13784_v19, 5  ;;  %v7483_v34 = vld [vmem:[#allocation2 + $0x1a0] sm:$0x1]  ;;  %v7742_v43 = vrot.slane %v7459_v8, 5 }
 0x59d   :  { %8038 = vst.msk [vmem:[#allocation3 + $0x98] sm:$0xf] %vm7999_vm4, %v13700_v31  ;;  %v9361_v25 = vmax.f32 %v9297_v27, 0.0  ;;  %v7243_v22 = vpop.permute.xlu0 %7242  ;;  %v5563_v31 = vsel %vm10227_vm8, %v5561_v42, %v5562_v46  ;;  %v7798_v46 = vrot.slane %v7483_v34, 5  ;;  %v5566_v8 = vrot.slane %v13840_v37, 5 }
 0x59e   :  { %5861 = vst.msk [vmem:[#allocation3 + $0xa4] sm:$0xf] %vm5819_vm0, %v5710_v59  ;;  %v8745_v2 = vmax.f32 %v8681_v58, 0.0  ;;  %v7797_v27 = vrot.slane %v7795_v13, 4  ;;  %v6340_v58 = vld [vmem:[#allocation2 + $0x148] sm:$0xf]  ;;  %v7743_v6 = vsel %vm10227_vm8, %v7741_v21, %v7742_v43 }
 0x59f   :  { %v9425_v62 = vpack.c.bf16 %v9361_v25, %v9361_v25  ;;  %v7100_v59 = vshrl.u32 %v13769_v30, 16  ;;  %v6928_v55 = vshll.u32 %v6340_v58, 16  ;;  %v6362_v30 = vld [vmem:[#allocation2 + $0x1a0] sm:$0x1]  ;;  %v7461_v37 = vld [vmem:[#allocation2 + $0x148] sm:$0xf] }
 0x5a0   :  { %v8793_v60 = vpack.c.bf16 %v8745_v2, %v8744_v33 }
 0x5a1   :  { %5717 = vrot.lane.b32.xlu1 %v5563_v31, %s10111_s3  ;;  %9490 = vst.msk [vmem:[%s14434_s10 + $0x44] sm:$0xf] %vm9472_vm9, %v9425_v62  ;;  %v6932_v62 = vshrl.u32 %v6340_v58, 16  ;;  %v7102_v31 = vrot.slane %v7100_v59, 4  ;;  %v13838_v54 = vrot.slane %v6928_v55, 5 }
 0x5a2   :  { %7224 = vrot.lane.b32.xlu2 %v6917_v38, %s10113_s13  ;;  %9984 = vmatmul.msk.bf16.gmra.mxu2 %vm8811_vm7, %v8793_v60 }
 0x5a3   :  { %v7886_v4 = vpop.permute.xlu1 %7885  ;;  %5749 = vrot.lane.b32.xlu0 %v5619_v35, %s10111_s3  ;;  %v9799_v35 = vrot.slane %v7481_v15, 9 }
 0x5a4   :  { %8039 = vst.msk [vmem:[#allocation3 + $0x9c] sm:$0xf] %vm7999_vm4, %v7886_v4  ;;  %v13780_v49 = vpop.permute.xlu2 %7214 }
 0x5a5   :  { %v7918_v14 = vpop.permute.xlu0 %7917  ;;  %v8965_v5 = vpop.f32.mrf.mxu2 }
 0x5a6   :  { %v9102_v16 = vmul.f32 %v13636_v10, %v8965_v5  ;;  %v6934_v5 = vrot.slane %v6932_v62, 4 }
 0x5a8   :  { %v9170_v61 = vadd.f32 %v13647_v41, %v9102_v16  ;;  %v5945_v16 = vld [vmem:[#allocation2 + $0x198] sm:$0xf] }
 0x5a9   :  { %7222 = vrot.lane.b32.xlu1 %v6907_v7, %s10113_s13  ;;  %v8498_v3 = vpop.f32.mrf.mxu1 }
 0x5aa   :  { %v9298_v17 = vadd.f32 %v9234_v39, %v9170_v61  ;;  %5747 = vrot.lane.b32.xlu2 %v5616_v48, %s10111_s3  ;;  %v8614_v45 = vmul.f32 %v13581_v18, %v8498_v3  ;;  %v7103_v39 = vor.u32 %v7102_v31, %v13791_v50  ;;  %v7796_v61 = vsel %vm10227_vm8, %v9799_v35, %v7795_v13  ;;  %v56_v13 = vld [vmem:[%s14425_s0 + $0x50] sm:$0xff]   ;;  %v13886_v31 = vld [vmem:[#allocation2 + $0x19c] sm:$0xf] }
 0x5ab   :  { %v6122_v11 = vpop.permute.xlu1 %6121  ;;  %v10053_v53 = vld [vmem:[#allocation3 + $0x98] sm:$0xff]  ;;  %7254 = vrot.lane.b32.xlu0 %v7099_v47, %s10113_s13  ;;  %v6919_v3 = vshrl.u32 %v6339_v52, 16  ;;  %v6922_v48 = vshll.u32 %v6339_v52, 16  ;;  %v6938_v47 = vshll.u32 %v6341_v12, 16 }
 0x5ac   :  { %6260 = vst.msk [vmem:[#allocation3 + $0xd8] sm:$0xf] %vm6205_vm2, %v6122_v11  ;;  %v9362_v56 = vmax.f32 %v9298_v17, 0.0  ;;  %9956 = vmatmul.msk.bf16.gmra.mxu1 %vm8308_vm6, %v10053_v53  ;;  %v13808_v51 = vpop.permute.xlu2 %7889  ;;  %v8682_v36 = vadd.f32 %v13593_v1, %v8614_v45  ;;  %v5931_v17 = vld [vmem:[#allocation2 + $0x144] sm:$0xf]  ;;  %v6935_v11 = vor.u32 %v6934_v5, %v13838_v54  ;;  %v7104_v34 = vrot.slane %v7103_v39, 4 }
 0x5ad   :  { %7381 = vst.msk [vmem:[#allocation3 + $0xd8] sm:$0xf] %vm7326_vm3, %v7243_v22  ;;  %v13812_v42 = vpop.permute.xlu0 %6093  ;;  %v8967_v44 = vpop.f32.mrf.mxu2  ;;  %v7799_v22 = vsel %vm10227_vm8, %v7797_v27, %v7798_v46  ;;  %v5282_v53 = vld [vmem:[#allocation2 + $0x140] sm:$0x1]  ;;  %v5568_v27 = vrot.slane %v5566_v8, 4  ;;  %v6924_v45 = vrot.slane %v6922_v48, 5 }
 0x5ae   :  { %8054 = vst.msk [vmem:[#allocation3 + $0xd8] sm:$0xf] %vm7999_vm4, %v13718_v26  ;;  %v9426_v23 = vpack.c.bf16 %v9362_v56, %v9362_v56  ;;  %v9103_v28 = vmul.f32 %v13636_v10, %v8967_v44  ;;  %v8746_v57 = vmax.f32 %v8682_v36, 0.0  ;;  %v5569_v46 = vrot.slane %v5282_v53, 5  ;;  %v7462_v39 = vld [vmem:[#allocation2 + $0x14c] sm:$0x1] }
 0x5af   :  { %v6936_v58 = vrot.slane %v6935_v11, 4  ;;  %v5932_v11 = vld [vmem:[#allocation2 + $0x148] sm:$0xf] }
 0x5b0   :  { %9491 = vst.msk [vmem:[%s14434_s10 + $0x48] sm:$0xf] %vm9472_vm9, %v9426_v23  ;;  %v9171_v26 = vadd.f32 %v13647_v41, %v9103_v28  ;;  %v6921_v23 = vrot.slane %v6919_v3, 4 }
 0x5b1   :  { %7897 = vrot.lane.b32.xlu1 %v7743_v6, %s10114_s23  ;;  %v8500_v25 = vpop.f32.mrf.mxu1  ;;  %v5280_v6 = vld [vmem:[#allocation2 + $0x138] sm:$0xe] }
 0x5b2   :  { %v9299_v33 = vadd.f32 %v9235_v40, %v9171_v26  ;;  %v8615_v24 = vmul.f32 %v13581_v18, %v8500_v25  ;;  %6135 = vrot.lane.b32.xlu2 %v5946_v9, %s10112_s30  ;;  %v9236_v40 = vunpack.c.l.bf16 %v56_v13  ;;  %v5570_v26 = vsel %vm10227_vm8, %v5568_v27, %v5569_v46 }
 0x5b3   :  { %v7245_v2 = vpop.permute.xlu1 %7244  ;;  %7929 = vrot.lane.b32.xlu0 %v7799_v22, %s10114_s23  ;;  %v6925_v25 = vor.u32 %v6924_v45, %v6921_v23  ;;  %v9760_v36 = vrot.slane %v5280_v6, 9 }
 0x5b4   :  { %7382 = vst.msk [vmem:[#allocation3 + $0xdc] sm:$0xf] %vm7326_vm3, %v7245_v2  ;;  %v9363_v63 = vmax.f32 %v9299_v33, 0.0  ;;  %v8683_v60 = vadd.f32 %v13593_v1, %v8615_v24  ;;  %v6126_v38 = vpop.permute.xlu2 %6125  ;;  %v5304_v33 = vld [vmem:[#allocation2 + $0x198] sm:$0xe] }
 0x5b5   :  { %8055 = vst.msk [vmem:[#allocation3 + $0xdc] sm:$0xf] %vm7999_vm4, %v7918_v14  ;;  %v13836_v4 = vpop.permute.xlu0 %7216  ;;  %v7106_v14 = vshll.u32 %v6362_v30, 16  ;;  %v9237_v30 = vunpack.c.h.bf16 %v56_v13  ;;  %v9768_v35 = vrot.slane %v5304_v33, 9 }
 0x5b6   :  { %v9427_v29 = vpack.c.bf16 %v9363_v63, %v9363_v63  ;;  %v8747_v0 = vmax.f32 %v8683_v60, 0.0  ;;  %v6926_v63 = vrot.slane %v6925_v25, 4 }
 0x5b7   :  { %v7108_v21 = vrot.slane %v7106_v14, 5 }
 0x5b8   :  { %9492 = vst.msk [vmem:[%s14434_s10 + $0x4c] sm:$0xf] %vm9472_vm9, %v9427_v29  ;;  %v8794_v7 = vpack.c.bf16 %v8747_v0, %v8746_v57  ;;  %v5622_v57 = vrot.slane %v13886_v31, 5  ;;  %v6931_v29 = vsel %vm10215_vm5, %v6926_v63, %v13838_v54  ;;  %v7746_v0 = vrot.slane %v7461_v37, 5  ;;  %v58_v54 = vld [vmem:[%s14425_s0 + $0x58] sm:$0xff]  }
 0x5b9   :  { %6133 = vrot.lane.b32.xlu1 %v5945_v16, %s10112_s30  ;;  %v13944_v63 = vld [vmem:[#allocation2 + $0x1a8] sm:$0xf] }
 0x5ba   :  { %7927 = vrot.lane.b32.xlu2 %v7796_v61, %s10114_s23  ;;  %9985 = vmatmul.msk.bf16.gmra.mxu2 %vm8811_vm7, %v8794_v7  ;;  %v5623_v16 = vsel %vm10227_vm8, %v9768_v35, %v5622_v57  ;;  %v7748_v61 = vrot.slane %v7746_v0, 4  ;;  %v5624_v35 = vrot.slane %v5622_v57, 4 }
 0x5bb   :  { %v5708_v50 = vpop.permute.xlu1 %5707  ;;  %6105 = vrot.lane.b32.xlu0 %v5931_v17, %s10112_s30  ;;  %v9238_v17 = vunpack.c.l.bf16 %v58_v54 }
 0x5bc   :  { %5860 = vst.msk [vmem:[#allocation3 + $0xa0] sm:$0xf] %vm5819_vm0, %v5708_v50  ;;  %v10061_v19 = vld [vmem:[#allocation3 + $0xd8] sm:$0xff]  ;;  %v13863_v43 = vpop.permute.xlu2 %7248 }
 0x5bd   :  { %6246 = vst.msk [vmem:[#allocation3 + $0xa0] sm:$0xf] %vm6205_vm2, %v13812_v42  ;;  %v5740_v56 = vpop.permute.xlu0 %5739  ;;  %9964 = vmatmul.msk.bf16.gmra.mxu3 %vm8308_vm6, %v10061_v19  ;;  %v8970_v44 = vpop.f32.mrf.mxu2  ;;  %v6940_v42 = vrot.slane %v6938_v47, 5  ;;  %v7460_v47 = vld [vmem:[#allocation2 + $0x144] sm:$0xe] }
 0x5be   :  { %7367 = vst.msk [vmem:[#allocation3 + $0xa0] sm:$0xf] %vm7326_vm3, %v13780_v49  ;;  %v9104_v28 = vmul.f32 %v13636_v10, %v8970_v44  ;;  %v7109_v49 = vsel %vm10215_vm5, %v7104_v34, %v7108_v21  ;;  %v5948_v34 = vld [vmem:[#allocation2 + $0x1a8] sm:$0xf]  ;;  %v6363_v44 = vld [vmem:[#allocation2 + $0x1a4] sm:$0xf] }
 0x5bf   :  { %5876 = vst.msk [vmem:[#allocation3 + $0xe0] sm:$0xf] %vm5819_vm0, %v5740_v56  ;;  %v6941_v55 = vsel %vm10215_vm5, %v6936_v58, %v6940_v42  ;;  %v9792_v46 = vrot.slane %v7460_v47, 9  ;;  %v7114_v58 = vshll.u32 %v6363_v44, 16 }
 0x5c0   :  { %6262 = vst.msk [vmem:[#allocation3 + $0xe0] sm:$0xf] %vm6205_vm2, %v6126_v38  ;;  %v9172_v59 = vadd.f32 %v13647_v41, %v9104_v28 }
 0x5c1   :  { %7256 = vrot.lane.b32.xlu1 %v7109_v49, %s10113_s13  ;;  %v7747_v25 = vsel %vm10227_vm8, %v9792_v46, %v7746_v0 }
 0x5c2   :  { %v9300_v22 = vadd.f32 %v9236_v40, %v9172_v59  ;;  %5721 = vrot.lane.b32.xlu2 %v5570_v26, %s10111_s3  ;;  %v7111_v40 = vshrl.u32 %v6363_v44, 16  ;;  %v9239_v26 = vunpack.c.h.bf16 %v58_v54 }
 0x5c3   :  { %v6096_v9 = vpop.permute.xlu1 %6095  ;;  %7228 = vrot.lane.b32.xlu0 %v6941_v55, %s10113_s13 }
 0x5c4   :  { %6247 = vst.msk [vmem:[#allocation3 + $0xa4] sm:$0xf] %vm6205_vm2, %v6096_v9  ;;  %v9364_v2 = vmax.f32 %v9300_v22, 0.0  ;;  %v5712_v24 = vpop.permute.xlu2 %5711  ;;  %v7485_v22 = vld [vmem:[#allocation2 + $0x1a8] sm:$0xf]  ;;  %v7113_v33 = vrot.slane %v7111_v40, 4 }
 0x5c5   :  { %7368 = vst.msk [vmem:[#allocation3 + $0xa4] sm:$0xf] %vm7326_vm3, %v13836_v4  ;;  %v6128_v15 = vpop.permute.xlu0 %6127  ;;  %v8972_v62 = vpop.f32.mrf.mxu2  ;;  %v5567_v4 = vsel %vm10227_vm8, %v9760_v36, %v5566_v8  ;;  %v7749_v8 = vrot.slane %v7462_v39, 5  ;;  %v7484_v9 = vld [vmem:[#allocation2 + $0x1a4] sm:$0xe] }
 0x5c6   :  { %8041 = vst.msk [vmem:[#allocation3 + $0xa4] sm:$0xf] %vm7999_vm4, %v13808_v51  ;;  %v9428_v60 = vpack.c.bf16 %v9364_v2, %v9364_v2  ;;  %v9105_v38 = vmul.f32 %v13636_v10, %v8972_v62  ;;  %v7116_v2 = vrot.slane %v7114_v58, 5 }
 0x5c7   :  { %5862 = vst.msk [vmem:[#allocation3 + $0xa8] sm:$0xf] %vm5819_vm0, %v5712_v24  ;;  %v7750_v13 = vsel %vm10227_vm8, %v7748_v61, %v7749_v8 }
 0x5c8   :  { %9493 = vst.msk [vmem:[%s14434_s10 + $0x50] sm:$0xf] %vm9472_vm9, %v9428_v60  ;;  %v9173_v51 = vadd.f32 %v13647_v41, %v9105_v38  ;;  %v7802_v60 = vrot.slane %v7485_v22, 5  ;;  %v9800_v38 = vrot.slane %v7484_v9, 9 }
 0x5c9   :  { %5719 = vrot.lane.b32.xlu1 %v5567_v4, %s10111_s3 }
 0x5ca   :  { %v9301_v5 = vadd.f32 %v9237_v30, %v9173_v51  ;;  %7226 = vrot.lane.b32.xlu2 %v6931_v29, %s10113_s13  ;;  %v7803_v29 = vsel %vm10227_vm8, %v9800_v38, %v7802_v60 }
 0x5cb   :  { %v7888_v52 = vpop.permute.xlu1 %7887  ;;  %5751 = vrot.lane.b32.xlu0 %v5623_v16, %s10111_s3 }
 0x5cc   :  { %8040 = vst.msk [vmem:[#allocation3 + $0xa0] sm:$0xf] %vm7999_vm4, %v7888_v52  ;;  %v9365_v14 = vmax.f32 %v9301_v5, 0.0  ;;  %v6100_v12 = vpop.permute.xlu2 %6099  ;;  %v7117_v5 = vor.u32 %v7116_v2, %v7113_v33  ;;  %v7120_v52 = vshll.u32 %v13944_v63, 16 }
 0x5cd   :  { %v7920_v7 = vpop.permute.xlu0 %7919 }
 0x5ce   :  { %v9429_v3 = vpack.c.bf16 %v9365_v14, %v9365_v14  ;;  %v8975_v48 = vpop.f32.mrf.mxu2  ;;  %v7118_v14 = vrot.slane %v7117_v5, 4 }
 0x5cf   :  { %v9106_v50 = vmul.f32 %v13636_v10, %v8975_v48 }
 0x5d0   :  { %9494 = vst.msk [vmem:[%s14434_s10 + $0x54] sm:$0xf] %vm9472_vm9, %v9429_v3 }
 0x5d1   :  { %6107 = vrot.lane.b32.xlu1 %v5932_v11, %s10112_s30  ;;  %v9174_v53 = vadd.f32 %v13647_v41, %v9106_v50  ;;  %v8503_v19 = vpop.f32.mrf.mxu1  ;;  %v7486_v11 = vld [vmem:[#allocation2 + $0x1ac] sm:$0x1] }
 0x5d2   :  { %7901 = vrot.lane.b32.xlu2 %v7750_v13, %s10114_s23  ;;  %v8616_v42 = vmul.f32 %v13581_v18, %v8503_v19  ;;  %v7804_v19 = vrot.slane %v7802_v60, 4  ;;  %v7805_v13 = vrot.slane %v7486_v11, 5  ;;  %v62_v60 = vld [vmem:[%s14425_s0 + $0x68] sm:$0xff]  }
 0x5d3   :  { %v5742_v21 = vpop.permute.xlu1 %5741  ;;  %v10054_v56 = vld [vmem:[#allocation3 + $0xa0] sm:$0xff]  ;;  %v9302_v27 = vadd.f32 %v9238_v17, %v9174_v53  ;;  %6139 = vrot.lane.b32.xlu0 %v5948_v34, %s10112_s30  ;;  %v5947_v53 = vld [vmem:[#allocation2 + $0x1a4] sm:$0xf] }
 0x5d4   :  { %5877 = vst.msk [vmem:[#allocation3 + $0xe4] sm:$0xf] %vm5819_vm0, %v5742_v21  ;;  %9957 = vmatmul.msk.bf16.gmra.mxu1 %vm8308_vm6, %v10054_v56  ;;  %v13926_v23 = vpop.permute.xlu2 %7891  ;;  %v8684_v24 = vadd.f32 %v13593_v1, %v8616_v42  ;;  %v7806_v40 = vsel %vm10227_vm8, %v7804_v19, %v7805_v13  ;;  %v64_v19 = vld [vmem:[%s14425_s0 + $0x70] sm:$0xff]  }
 0x5d5   :  { %6263 = vst.msk [vmem:[#allocation3 + $0xe4] sm:$0xf] %vm6205_vm2, %v6128_v15  ;;  %v9366_v45 = vmax.f32 %v9302_v27, 0.0  ;;  %v5714_v28 = vpop.permute.xlu0 %5713  ;;  %v7124_v27 = vshrl.u32 %v13944_v63, 16 }
 0x5d6   :  { %7384 = vst.msk [vmem:[#allocation3 + $0xe4] sm:$0xf] %vm7326_vm3, %v13863_v43  ;;  %v8977_v49 = vpop.f32.mrf.mxu2  ;;  %v5306_v43 = vld [vmem:[#allocation2 + $0x1a0] sm:$0x1]  ;;  %v8748_v31 = vmax.f32 %v8684_v24, 0.0 }
 0x5d7   :  { %5863 = vst.msk [vmem:[#allocation3 + $0xac] sm:$0xf] %vm5819_vm0, %v5714_v28  ;;  %v9430_v59 = vpack.c.bf16 %v9366_v45, %v9366_v45  ;;  %v9107_v6 = vmul.f32 %v13636_v10, %v8977_v49  ;;  %v5625_v37 = vrot.slane %v5306_v43, 5 }
 0x5d8   :  { %6249 = vst.msk [vmem:[#allocation3 + $0xac] sm:$0xf] %vm6205_vm2, %v6100_v12  ;;  %v7122_v12 = vrot.slane %v7120_v52, 5  ;;  %v14018_v52 = vld [vmem:[%s14430_s6] ss:$0 sm:$0xff] }
 0x5d9   :  { %7899 = vrot.lane.b32.xlu1 %v7747_v25, %s10114_s23  ;;  %9495 = vst.msk [vmem:[%s14434_s10 + $0x58] sm:$0xf] %vm9472_vm9, %v9430_v59  ;;  %v9175_v55 = vadd.f32 %v13647_v41, %v9107_v6  ;;  %v8505_v36 = vpop.f32.mrf.mxu1  ;;  %v5626_v39 = vsel %vm10227_vm8, %v5624_v35, %v5625_v37  ;;  %v6365_v6 = vld [vmem:[#allocation2 + $0x1ac] sm:$0x1]  ;;  %v9242_v37 = vunpack.c.l.bf16 %v62_v60 }
 0x5da   :  { %v8617_v62 = vmul.f32 %v13581_v18, %v8505_v36  ;;  %v7123_v48 = vsel %vm10215_vm5, %v7118_v14, %v7122_v12  ;;  %6137 = vrot.lane.b32.xlu2 %v5947_v53, %s10112_s30 }
 0x5db   :  { %v7247_v15 = vpop.permute.xlu1 %7246  ;;  %v9303_v30 = vadd.f32 %v9239_v26, %v9175_v55  ;;  %7931 = vrot.lane.b32.xlu0 %v7803_v29, %s10114_s23  ;;  %v7130_v26 = vshll.u32 %v6365_v6, 16  ;;  %v9245_v6 = vunpack.c.h.bf16 %v64_v19 }
 0x5dc   :  { %7383 = vst.msk [vmem:[#allocation3 + $0xe0] sm:$0xf] %vm7326_vm3, %v7247_v15  ;;  %v8685_v4 = vadd.f32 %v13593_v1, %v8617_v62  ;;  %v5746_v51 = vpop.permute.xlu2 %5745 }
 0x5dd   :  { %8056 = vst.msk [vmem:[#allocation3 + $0xe0] sm:$0xf] %vm7999_vm4, %v7920_v7  ;;  %v9367_v18 = vmax.f32 %v9303_v30, 0.0  ;;  %v7219_v0 = vpop.permute.xlu0 %7218  ;;  %v60_v7 = vld [vmem:[%s14425_s0 + $0x60] sm:$0xff]   ;;  %v7132_v22 = vrot.slane %v7130_v26, 5 }
 0x5de   :  { %5879 = vst.msk [vmem:[#allocation3 + $0xec] sm:$0xf] %vm5819_vm0, %v5746_v51  ;;  %v8749_v57 = vmax.f32 %v8685_v4, 0.0  ;;  %v9240_v17 = vunpack.c.l.bf16 %v60_v7  ;;  %v9241_v49 = vunpack.c.h.bf16 %v60_v7  ;;  %v14010_v4 = vld [vmem:[%s14429_s5] ss:$0 sm:$0xff] }
 0x5df   :  { %v9431_v16 = vpack.c.bf16 %v9367_v18, %v9367_v18 }
 0x5e0   :  { %v8795_v1 = vpack.c.bf16 %v8749_v57, %v8748_v31 }
 0x5e1   :  { %5753 = vrot.lane.b32.xlu1 %v5626_v39, %s10111_s3  ;;  %9496 = vst.msk [vmem:[%s14434_s10 + $0x5c] sm:$0xf] %vm9472_vm9, %v9431_v16 }
 0x5e2   :  { %9986 = vmatmul.msk.bf16.gmra.mxu2 %vm8811_vm7, %v8795_v1 }
 0x5e3   :  { %v7922_v54 = vpop.permute.xlu1 %7921 }
 0x5e4   :  { %8057 = vst.msk [vmem:[#allocation3 + $0xe4] sm:$0xf] %vm7999_vm4, %v7922_v54  ;;  %v7251_v61 = vpop.permute.xlu2 %7250 }
 0x5e5   :  { %v7894_v8 = vpop.permute.xlu0 %7893  ;;  %v8980_v3 = vpop.f32.mrf.mxu2 }
 0x5e6   :  { %v9108_v50 = vmul.f32 %v13636_v10, %v8980_v3 }
 0x5e8   :  { %v9176_v47 = vadd.f32 %v13647_v41, %v9108_v50 }
 0x5e9   :  { %7258 = vrot.lane.b32.xlu1 %v7123_v48, %s10113_s13 }
 0x5ea   :  { %v9304_v34 = vadd.f32 %v9240_v17, %v9176_v47 }
 0x5eb   :  { %v6098_v21 = vpop.permute.xlu1 %6097  ;;  %v10062_v56 = vld [vmem:[#allocation3 + $0xe0] sm:$0xff] }
 0x5ec   :  { %6248 = vst.msk [vmem:[#allocation3 + $0xa8] sm:$0xf] %vm6205_vm2, %v6098_v21  ;;  %v9368_v44 = vmax.f32 %v9304_v34, 0.0  ;;  %v7926_v46 = vpop.permute.xlu2 %7925  ;;  %9965 = vmatmul.msk.bf16.gmra.mxu3 %vm8308_vm6, %v10062_v56 }
 0x5ed   :  { %7369 = vst.msk [vmem:[#allocation3 + $0xa8] sm:$0xf] %vm7326_vm3, %v7219_v0  ;;  %v6130_v45 = vpop.permute.xlu0 %6129  ;;  %v8982_v28 = vpop.f32.mrf.mxu2 }
 0x5ee   :  { %8042 = vst.msk [vmem:[#allocation3 + $0xa8] sm:$0xf] %vm7999_vm4, %v13926_v23  ;;  %v9432_v58 = vpack.c.bf16 %v9368_v44, %v9368_v44  ;;  %v9109_v42 = vmul.f32 %v13636_v10, %v8982_v28  ;;  %v7126_v23 = vrot.slane %v7124_v27, 4  ;;  %v9244_v44 = vunpack.c.l.bf16 %v64_v19 }
 0x5f0   :  { %9497 = vst.msk [vmem:[%s14434_s10 + $0x60] sm:$0xf] %vm9472_vm9, %v9432_v58  ;;  %v9177_v59 = vadd.f32 %v13647_v41, %v9109_v42  ;;  %v7127_v32 = vor.u32 %v7126_v23, %v7122_v12  ;;  %v14063_v23 = vld [vmem:[%s14433_s9] ss:$0 sm:$0xff] }
 0x5f1   :  { %7933 = vrot.lane.b32.xlu1 %v7806_v40, %s10114_s23 }
 0x5f2   :  { %v9305_v25 = vadd.f32 %v9241_v49, %v9177_v59  ;;  %v7128_v36 = vrot.slane %v7127_v32, 4 }
 0x5f3   :  { %v7221_v43 = vpop.permute.xlu1 %7220 }
 0x5f4   :  { %7370 = vst.msk [vmem:[#allocation3 + $0xac] sm:$0xf] %vm7326_vm3, %v7221_v43  ;;  %v9369_v9 = vmax.f32 %v9305_v25, 0.0  ;;  %v6102_v55 = vpop.permute.xlu2 %6101  ;;  %v7133_v24 = vsel %vm10215_vm5, %v7128_v36, %v7132_v22 }
 0x5f5   :  { %8043 = vst.msk [vmem:[#allocation3 + $0xac] sm:$0xf] %vm7999_vm4, %v7894_v8  ;;  %v7253_v33 = vpop.permute.xlu0 %7252  ;;  %7260 = vrot.lane.b32.xlu2 %v7133_v24, %s10113_s13 }
 0x5f6   :  { %v9433_v2 = vpack.c.bf16 %v9369_v9, %v9369_v9 }
 0x5f8   :  { %9498 = vst.msk [vmem:[%s14434_s10 + $0x64] sm:$0xf] %vm9472_vm9, %v9433_v2 }
 0x5fa   :  { %v8508_v62 = vpop.f32.mrf.mxu1 }
 0x5fb   :  { %v5744_v15 = vpop.permute.xlu1 %5743  ;;  %v8618_v51 = vmul.f32 %v14010_v4, %v8508_v62 }
 0x5fc   :  { %5878 = vst.msk [vmem:[#allocation3 + $0xe8] sm:$0xf] %vm5819_vm0, %v5744_v15  ;;  %v10055_v63 = vld [vmem:[#allocation3 + $0xa8] sm:$0xff]  ;;  %v7225_v20 = vpop.permute.xlu2 %7224 }
 0x5fd   :  { %6264 = vst.msk [vmem:[#allocation3 + $0xe8] sm:$0xf] %vm6205_vm2, %v6130_v45  ;;  %v5716_v38 = vpop.permute.xlu0 %5715  ;;  %9958 = vmatmul.msk.bf16.gmra.mxu1 %vm8308_vm6, %v10055_v63  ;;  %v8985_v30 = vpop.f32.mrf.mxu2  ;;  %v8686_v31 = vadd.f32 %v14018_v52, %v8618_v51 }
 0x5fe   :  { %7385 = vst.msk [vmem:[#allocation3 + $0xe8] sm:$0xf] %vm7326_vm3, %v7251_v61  ;;  %v9110_v35 = vmul.f32 %v13636_v10, %v8985_v30  ;;  %v9243_v61 = vunpack.c.h.bf16 %v62_v60 }
 0x5ff   :  { %5864 = vst.msk [vmem:[#allocation3 + $0xb0] sm:$0xf] %vm5819_vm0, %v5716_v38  ;;  %v8750_v8 = vmax.f32 %v8686_v31, 0.0 }
 0x600   :  { %6250 = vst.msk [vmem:[#allocation3 + $0xb0] sm:$0xf] %vm6205_vm2, %v6102_v55  ;;  %v9178_v29 = vadd.f32 %v13647_v41, %v9110_v35 }
 0x602   :  { %v9306_v18 = vadd.f32 %v9242_v37, %v9178_v29  ;;  %v8510_v5 = vpop.f32.mrf.mxu1 }
 0x603   :  { %v6132_v0 = vpop.permute.xlu1 %6131  ;;  %v8619_v57 = vmul.f32 %v14010_v4, %v8510_v5 }
 0x604   :  { %6265 = vst.msk [vmem:[#allocation3 + $0xec] sm:$0xf] %vm6205_vm2, %v6132_v0  ;;  %v9370_v16 = vmax.f32 %v9306_v18, 0.0  ;;  %v5748_v39 = vpop.permute.xlu2 %5747 }
 0x605   :  { %7386 = vst.msk [vmem:[#allocation3 + $0xec] sm:$0xf] %vm7326_vm3, %v7253_v33  ;;  %v8687_v1 = vadd.f32 %v14018_v52, %v8619_v57  ;;  %v6104_v14 = vpop.permute.xlu0 %6103  ;;  %v8987_v12 = vpop.f32.mrf.mxu2  ;;  %v66_v33 = vld [vmem:[%s14425_s0 + $0x78] sm:$0xff]  }
 0x606   :  { %8059 = vst.msk [vmem:[#allocation3 + $0xec] sm:$0xf] %vm7999_vm4, %v7926_v46  ;;  %v9434_v54 = vpack.c.bf16 %v9370_v16, %v9370_v16  ;;  %v9111_v7 = vmul.f32 %v13636_v10, %v8987_v12  ;;  %v9246_v62 = vunpack.c.l.bf16 %v66_v33  ;;  %v9247_v5 = vunpack.c.h.bf16 %v66_v33 }
 0x607   :  { %5880 = vst.msk [vmem:[#allocation3 + $0xf0] sm:$0xf] %vm5819_vm0, %v5748_v39  ;;  %v8751_v3 = vmax.f32 %v8687_v1, 0.0 }
 0x608   :  { %9499 = vst.msk [vmem:[%s14434_s10 + $0x68] sm:$0xf] %vm9472_vm9, %v9434_v54  ;;  %v9179_v48 = vadd.f32 %v13647_v41, %v9111_v7 }
 0x609   :  { %v8796_v50 = vpack.c.bf16 %v8751_v3, %v8750_v8 }
 0x60a   :  { %v9307_v17 = vadd.f32 %v9243_v61, %v9179_v48 }
 0x60b   :  { %v7924_v11 = vpop.permute.xlu1 %7923  ;;  %9987 = vmatmul.msk.bf16.gmra.mxu2 %vm8811_vm7, %v8796_v50 }
 0x60c   :  { %8058 = vst.msk [vmem:[#allocation3 + $0xe8] sm:$0xf] %vm7999_vm4, %v7924_v11  ;;  %v9371_v47 = vmax.f32 %v9307_v17, 0.0  ;;  %v6136_v53 = vpop.permute.xlu2 %6135 }
 0x60d   :  { %v7896_v13 = vpop.permute.xlu0 %7895 }
 0x60e   :  { %v9435_v34 = vpack.c.bf16 %v9371_v47, %v9371_v47  ;;  %v8990_v21 = vpop.f32.mrf.mxu2 }
 0x60f   :  { %v9112_v56 = vmul.f32 %v13636_v10, %v8990_v21 }
 0x610   :  { %9500 = vst.msk [vmem:[%s14434_s10 + $0x6c] sm:$0xf] %vm9472_vm9, %v9435_v34 }
 0x611   :  { %v9180_v27 = vadd.f32 %v13647_v41, %v9112_v56  ;;  %v14053_v41 = vld [vmem:[%s14432_s8] ss:$0 sm:$0xff] }
 0x613   :  { %v5718_v46 = vpop.permute.xlu1 %5717  ;;  %v10063_v45 = vld [vmem:[#allocation3 + $0xe8] sm:$0xff]  ;;  %v9308_v28 = vadd.f32 %v9244_v44, %v9180_v27 }
 0x614   :  { %5865 = vst.msk [vmem:[#allocation3 + $0xb4] sm:$0xf] %vm5819_vm0, %v5718_v46  ;;  %v7928_v40 = vpop.permute.xlu2 %7927  ;;  %9966 = vmatmul.msk.bf16.gmra.mxu3 %vm8308_vm6, %v10063_v45 }
 0x615   :  { %6251 = vst.msk [vmem:[#allocation3 + $0xb4] sm:$0xf] %vm6205_vm2, %v6104_v14  ;;  %v9372_v58 = vmax.f32 %v9308_v28, 0.0  ;;  %v5750_v10 = vpop.permute.xlu0 %5749 }
 0x616   :  { %7372 = vst.msk [vmem:[#allocation3 + $0xb4] sm:$0xf] %vm7326_vm3, %v7225_v20  ;;  %v8992_v42 = vpop.f32.mrf.mxu2 }
 0x617   :  { %5881 = vst.msk [vmem:[#allocation3 + $0xf4] sm:$0xf] %vm5819_vm0, %v5750_v10  ;;  %v9436_v49 = vpack.c.bf16 %v9372_v58, %v9372_v58  ;;  %v9113_v59 = vmul.f32 %v14053_v41, %v8992_v42 }
 0x618   :  { %6267 = vst.msk [vmem:[#allocation3 + $0xf4] sm:$0xf] %vm6205_vm2, %v6136_v53  ;;  %v68_v53 = vld [vmem:[%s14425_s0 + $0x80] sm:$0xff]  }
 0x619   :  { %9501 = vst.msk [vmem:[%s14434_s10 + $0x70] sm:$0xf] %vm9472_vm9, %v9436_v49  ;;  %v9181_v26 = vadd.f32 %v14063_v23, %v9113_v59  ;;  %v9248_v21 = vunpack.c.l.bf16 %v68_v53  ;;  %v9249_v42 = vunpack.c.h.bf16 %v68_v53 }
 0x61b   :  { %v7223_v25 = vpop.permute.xlu1 %7222  ;;  %v9309_v43 = vadd.f32 %v9245_v6, %v9181_v26 }
 0x61c   :  { %7371 = vst.msk [vmem:[#allocation3 + $0xb0] sm:$0xf] %vm7326_vm3, %v7223_v25  ;;  %v5722_v32 = vpop.permute.xlu2 %5721 }
 0x61d   :  { %8044 = vst.msk [vmem:[#allocation3 + $0xb0] sm:$0xf] %vm7999_vm4, %v7896_v13  ;;  %v9373_v22 = vmax.f32 %v9309_v43, 0.0  ;;  %v7255_v9 = vpop.permute.xlu0 %7254 }
 0x61e   :  { %5867 = vst.msk [vmem:[#allocation3 + $0xbc] sm:$0xf] %vm5819_vm0, %v5722_v32 }
 0x61f   :  { %v9437_v55 = vpack.c.bf16 %v9373_v22, %v9373_v22 }
 0x621   :  { %9502 = vst.msk [vmem:[%s14434_s10 + $0x74] sm:$0xf] %vm9472_vm9, %v9437_v55 }
 0x623   :  { %v7898_v36 = vpop.permute.xlu1 %7897 }
 0x624   :  { %8045 = vst.msk [vmem:[#allocation3 + $0xb4] sm:$0xf] %vm7999_vm4, %v7898_v36  ;;  %v7227_v57 = vpop.permute.xlu2 %7226 }
 0x625   :  { %v7930_v2 = vpop.permute.xlu0 %7929  ;;  %v8995_v24 = vpop.f32.mrf.mxu2 }
 0x626   :  { %v9114_v15 = vmul.f32 %v14053_v41, %v8995_v24 }
 0x628   :  { %v9182_v63 = vadd.f32 %v14063_v23, %v9114_v15 }
 0x629   :  { %v8513_v60 = vpop.f32.mrf.mxu1 }
 0x62a   :  { %v9310_v20 = vadd.f32 %v9246_v62, %v9182_v63  ;;  %v8620_v18 = vmul.f32 %v14010_v4, %v8513_v60 }
 0x62b   :  { %v6134_v38 = vpop.permute.xlu1 %6133  ;;  %v10056_v30 = vld [vmem:[#allocation3 + $0xb0] sm:$0xff] }
 0x62c   :  { %6266 = vst.msk [vmem:[#allocation3 + $0xf0] sm:$0xf] %vm6205_vm2, %v6134_v38  ;;  %v9374_v35 = vmax.f32 %v9310_v20, 0.0  ;;  %9959 = vmatmul.msk.bf16.gmra.mxu1 %vm8308_vm6, %v10056_v30  ;;  %v8688_v39 = vadd.f32 %v14018_v52, %v8620_v18  ;;  %v7902_v11 = vpop.permute.xlu2 %7901 }
 0x62d   :  { %7387 = vst.msk [vmem:[#allocation3 + $0xf0] sm:$0xf] %vm7326_vm3, %v7255_v9  ;;  %v6106_v37 = vpop.permute.xlu0 %6105  ;;  %v8997_v51 = vpop.f32.mrf.mxu2 }
 0x62e   :  { %8060 = vst.msk [vmem:[#allocation3 + $0xf0] sm:$0xf] %vm7999_vm4, %v7928_v40  ;;  %v9438_v29 = vpack.c.bf16 %v9374_v35, %v9374_v35  ;;  %v9115_v0 = vmul.f32 %v14053_v41, %v8997_v51  ;;  %v8752_v8 = vmax.f32 %v8688_v39, 0.0  ;;  %v14113_v40 = vpop.f32.mrf.mxu3 }
 0x630   :  { %9503 = vst.msk [vmem:[%s14434_s10 + $0x78] sm:$0xf] %vm9472_vm9, %v9438_v29  ;;  %v9183_v31 = vadd.f32 %v14063_v23, %v9115_v0  ;;  %v70_v29 = vld [vmem:[%s14425_s0 + $0x88] sm:$0xff]  }
 0x631   :  { %v8515_v16 = vpop.f32.mrf.mxu1 }
 0x632   :  { %v9311_v1 = vadd.f32 %v9247_v5, %v9183_v31  ;;  %v8621_v12 = vmul.f32 %v14010_v4, %v8515_v16  ;;  %v9250_v5 = vunpack.c.l.bf16 %v70_v29 }
 0x633   :  { %v7257_v14 = vpop.permute.xlu1 %7256 }
 0x634   :  { %7388 = vst.msk [vmem:[#allocation3 + $0xf4] sm:$0xf] %vm7326_vm3, %v7257_v14  ;;  %v9375_v54 = vmax.f32 %v9311_v1, 0.0  ;;  %v8689_v7 = vadd.f32 %v14018_v52, %v8621_v12  ;;  %v6138_v46 = vpop.permute.xlu2 %6137 }
 0x635   :  { %8061 = vst.msk [vmem:[#allocation3 + $0xf4] sm:$0xf] %vm7999_vm4, %v7930_v2  ;;  %v7229_v61 = vpop.permute.xlu0 %7228 }
 0x636   :  { %v9439_v3 = vpack.c.bf16 %v9375_v54, %v9375_v54  ;;  %v8753_v48 = vmax.f32 %v8689_v7, 0.0  ;;  %v14123_v32 = vpop.f32.mrf.mxu3 }
 0x638   :  { %9504 = vst.msk [vmem:[%s14434_s10 + $0x7c] sm:$0xf] %vm9472_vm9, %v9439_v3  ;;  %v8797_v50 = vpack.c.bf16 %v8753_v48, %v8752_v8 }
 0x63a   :  { %9988 = vmatmul.msk.bf16.gmra.mxu2 %vm8811_vm7, %v8797_v50 }
 0x63b   :  { %v5720_v17 = vpop.permute.xlu1 %5719 }
 0x63c   :  { %5866 = vst.msk [vmem:[#allocation3 + $0xb8] sm:$0xf] %vm5819_vm0, %v5720_v17  ;;  %v10064_v47 = vld [vmem:[#allocation3 + $0xf0] sm:$0xff] }
 0x63d   :  { %6252 = vst.msk [vmem:[#allocation3 + $0xb8] sm:$0xf] %vm6205_vm2, %v6106_v37  ;;  %v5752_v19 = vpop.permute.xlu0 %5751  ;;  %9967 = vmatmul.msk.bf16.gmra.mxu3 %vm8308_vm6, %v10064_v47  ;;  %v9000_v13 = vpop.f32.mrf.mxu2 }
 0x63e   :  { %7373 = vst.msk [vmem:[#allocation3 + $0xb8] sm:$0xf] %vm7326_vm3, %v7227_v57  ;;  %v9116_v34 = vmul.f32 %v14053_v41, %v9000_v13  ;;  %v8543_v2 = vpop.f32.mrf.mxu3 }
 0x63f   :  { %5882 = vst.msk [vmem:[#allocation3 + $0xf8] sm:$0xf] %vm5819_vm0, %v5752_v19  ;;  %v8632_v8 = vmul.f32 %v14010_v4, %v8543_v2 }
 0x640   :  { %v9184_v56 = vadd.f32 %v14063_v23, %v9116_v34  ;;  %6268 = vst.msk [vmem:[#allocation3 + $0xf8] sm:$0xf] %vm6205_vm2, %v6138_v46 }
 0x641   :  { %v8700_v17 = vadd.f32 %v14018_v52, %v8632_v8 }
 0x642   :  { %v9312_v44 = vadd.f32 %v9248_v21, %v9184_v56 }
 0x643   :  { %v6108_v27 = vpop.permute.xlu1 %6107  ;;  %v8764_v13 = vmax.f32 %v8700_v17, 0.0 }
 0x644   :  { %6253 = vst.msk [vmem:[#allocation3 + $0xbc] sm:$0xf] %vm6205_vm2, %v6108_v27  ;;  %v9376_v45 = vmax.f32 %v9312_v44, 0.0 }
 0x645   :  { %7374 = vst.msk [vmem:[#allocation3 + $0xbc] sm:$0xf] %vm7326_vm3, %v7229_v61  ;;  %v9002_v28 = vpop.f32.mrf.mxu2  ;;  %v6140_v43 = vpop.permute.xlu0 %6139  ;;  %v9251_v61 = vunpack.c.h.bf16 %v70_v29 }
 0x646   :  { %8047 = vst.msk [vmem:[#allocation3 + $0xbc] sm:$0xf] %vm7999_vm4, %v7902_v11  ;;  %v9440_v58 = vpack.c.bf16 %v9376_v45, %v9376_v45  ;;  %v9117_v10 = vmul.f32 %v14053_v41, %v9002_v28  ;;  %v8545_v51 = vpop.f32.mrf.mxu3 }
 0x647   :  { %v8633_v12 = vmul.f32 %v14010_v4, %v8545_v51 }
 0x648   :  { %9505 = vst.msk [vmem:[%s14434_s10 + $0x80] sm:$0xf] %vm9472_vm9, %v9440_v58  ;;  %v9185_v49 = vadd.f32 %v14063_v23, %v9117_v10 }
 0x649   :  { %v8701_v48 = vadd.f32 %v14018_v52, %v8633_v12 }
 0x64a   :  { %v9313_v59 = vadd.f32 %v9249_v42, %v9185_v49 }
 0x64b   :  { %v7900_v6 = vpop.permute.xlu1 %7899  ;;  %v8765_v53 = vmax.f32 %v8701_v48, 0.0 }
 0x64c   :  { %8046 = vst.msk [vmem:[#allocation3 + $0xb8] sm:$0xf] %vm7999_vm4, %v7900_v6  ;;  %v9377_v26 = vmax.f32 %v9313_v59, 0.0 }
 0x64d   :  { %v7932_v15 = vpop.permute.xlu0 %7931  ;;  %v8803_v34 = vpack.c.bf16 %v8765_v53, %v8764_v13 }
 0x64e   :  { %v9441_v25 = vpack.c.bf16 %v9377_v26, %v9377_v26  ;;  %v8548_v39 = vpop.f32.mrf.mxu3 }
 0x64f   :  { %v7261_v36 = vpop.permute.xlu2 %7260  ;;  %v8634_v46 = vmul.f32 %v14010_v4, %v8548_v39 }
 0x650   :  { %9506 = vst.msk [vmem:[%s14434_s10 + $0x84] sm:$0xf] %vm9472_vm9, %v9441_v25 }
 0x651   :  { %v8518_v22 = vpop.f32.mrf.mxu1  ;;  %v8702_v42 = vadd.f32 %v14018_v52, %v8634_v46 }
 0x652   :  { %v8622_v33 = vmul.f32 %v14010_v4, %v8518_v22 }
 0x653   :  { %v5754_v9 = vpop.permute.xlu1 %5753  ;;  %v10057_v55 = vld [vmem:[#allocation3 + $0xb8] sm:$0xff] }
 0x654   :  { %5883 = vst.msk [vmem:[#allocation3 + $0xfc] sm:$0xf] %vm5819_vm0, %v5754_v9  ;;  %9960 = vmatmul.msk.bf16.gmra.mxu1 %vm8308_vm6, %v10057_v55  ;;  %v8690_v62 = vadd.f32 %v14018_v52, %v8622_v33  ;;  %v72_v55 = vld [vmem:[%s14425_s0 + $0x90] sm:$0xff]  }
 0x655   :  { %6269 = vst.msk [vmem:[#allocation3 + $0xfc] sm:$0xf] %vm6205_vm2, %v6140_v43  ;;  %v8766_v43 = vmax.f32 %v8702_v42, 0.0  ;;  %v74_v42 = vld [vmem:[%s14425_s0 + $0x98] sm:$0xff]  }
 0x656   :  { %7390 = vst.msk [vmem:[#allocation3 + $0xfc] sm:$0xf] %vm7326_vm3, %v7261_v36  ;;  %v8754_v38 = vmax.f32 %v8690_v62, 0.0  ;;  %v8550_v47 = vpop.f32.mrf.mxu3 }
 0x657   :  { %v8635_v44 = vmul.f32 %v14010_v4, %v8550_v47 }
 0x659   :  { %v8520_v24 = vpop.f32.mrf.mxu1  ;;  %v8703_v45 = vadd.f32 %v14018_v52, %v8635_v44 }
 0x65a   :  { %v8623_v60 = vmul.f32 %v14010_v4, %v8520_v24 }
 0x65b   :  { %v7259_v63 = vpop.permute.xlu1 %7258  ;;  %v8767_v59 = vmax.f32 %v8703_v45, 0.0 }
 0x65c   :  { %7389 = vst.msk [vmem:[#allocation3 + $0xf8] sm:$0xf] %vm7326_vm3, %v7259_v63  ;;  %v8691_v20 = vadd.f32 %v14018_v52, %v8623_v60 }
 0x65d   :  { %8062 = vst.msk [vmem:[#allocation3 + $0xf8] sm:$0xf] %vm7999_vm4, %v7932_v15  ;;  %v8804_v9 = vpack.c.bf16 %v8767_v59, %v8766_v43  ;;  %v9252_v15 = vunpack.c.l.bf16 %v72_v55 }
 0x65e   :  { %v8755_v30 = vmax.f32 %v8691_v20, 0.0  ;;  %v8553_v56 = vpop.f32.mrf.mxu3 }
 0x65f   :  { %v8636_v62 = vmul.f32 %v14010_v4, %v8553_v56 }
 0x660   :  { %v8798_v35 = vpack.c.bf16 %v8755_v30, %v8754_v38 }
 0x661   :  { %v8704_v38 = vadd.f32 %v14018_v52, %v8636_v62 }
 0x662   :  { %9989 = vmatmul.msk.bf16.gmra.mxu2 %vm8811_vm7, %v8798_v35 }
 0x663   :  { %v7934_v37 = vpop.permute.xlu1 %7933 }
 0x664   :  { %8063 = vst.msk [vmem:[#allocation3 + $0xfc] sm:$0xf] %vm7999_vm4, %v7934_v37 }
 0x665   :  { %v9005_v18 = vpop.f32.mrf.mxu2 }
 0x666   :  { %v9118_v0 = vmul.f32 %v14053_v41, %v9005_v18  ;;  %v8555_v6 = vpop.f32.mrf.mxu3  ;;  %v9253_v18 = vunpack.c.h.bf16 %v72_v55 }
 0x667   :  { %v8637_v36 = vmul.f32 %v14010_v4, %v8555_v6  ;;  %v9254_v6 = vunpack.c.l.bf16 %v74_v42 }
 0x668   :  { %v9186_v31 = vadd.f32 %v14063_v23, %v9118_v0  ;;  %v8768_v0 = vmax.f32 %v8704_v38, 0.0 }
 0x669   :  { %v8705_v60 = vadd.f32 %v14018_v52, %v8637_v36 }
 0x66a   :  { %v9314_v57 = vadd.f32 %v9250_v5, %v9186_v31 }
 0x66b   :  { %v10065_v16 = vld [vmem:[#allocation3 + $0xf8] sm:$0xff]  ;;  %v8769_v35 = vmax.f32 %v8705_v60, 0.0 }
 0x66c   :  { %v9378_v1 = vmax.f32 %v9314_v57, 0.0  ;;  %9968 = vmatmul.msk.bf16.gmra.mxu3 %vm8308_vm6, %v10065_v16 }
 0x66d   :  { %v9007_v14 = vpop.f32.mrf.mxu2  ;;  %v8805_v57 = vpack.c.bf16 %v8769_v35, %v8768_v0 }
 0x66e   :  { %v9442_v54 = vpack.c.bf16 %v9378_v1, %v9378_v1  ;;  %v9119_v7 = vmul.f32 %v14053_v41, %v9007_v14 }
 0x66f   :  { %v8558_v2 = vpop.f32.mrf.mxu3 }
 0x670   :  { %9507 = vst.msk [vmem:[%s14434_s10 + $0x88] sm:$0xf] %vm9472_vm9, %v9442_v54  ;;  %v9187_v3 = vadd.f32 %v14063_v23, %v9119_v7  ;;  %v8638_v12 = vmul.f32 %v14010_v4, %v8558_v2  ;;  %v9255_v2 = vunpack.c.h.bf16 %v74_v42 }
 0x672   :  { %v9315_v50 = vadd.f32 %v9251_v61, %v9187_v3  ;;  %v8706_v61 = vadd.f32 %v14018_v52, %v8638_v12  ;;  %v8631_v12 = vmul.f32 %v14010_v4, %v14123_v32 }
 0x674   :  { %v9379_v11 = vmax.f32 %v9315_v50, 0.0  ;;  %v8770_v3 = vmax.f32 %v8706_v61, 0.0 }
 0x676   :  { %v9443_v19 = vpack.c.bf16 %v9379_v11, %v9379_v11 }
 0x677   :  { %v8560_v5 = vpop.f32.mrf.mxu3 }
 0x678   :  { %9508 = vst.msk [vmem:[%s14434_s10 + $0x8c] sm:$0xf] %vm9472_vm9, %v9443_v19  ;;  %v8639_v1 = vmul.f32 %v14010_v4, %v8560_v5 }
 0x67a   :  { %v8523_v21 = vpop.f32.mrf.mxu1  ;;  %v8707_v7 = vadd.f32 %v14018_v52, %v8639_v1 }
 0x67b   :  { %v8624_v27 = vmul.f32 %v14010_v4, %v8523_v21 }
 0x67c   :  { %9994 = vmatmul.msk.bf16.vlgmr.msra.gmra.mxu3 %vm8811_vm7, %v8803_v34  ;;  %v8771_v8 = vmax.f32 %v8707_v7, 0.0  ;;  %v8630_v7 = vmul.f32 %v14010_v4, %v14113_v40 }
 0x67d   :  { %v8692_v58 = vadd.f32 %v14018_v52, %v8624_v27 }
 0x67e   :  { %v8806_v50 = vpack.c.bf16 %v8771_v8, %v8770_v3  ;;  %v8699_v3 = vadd.f32 %v14018_v52, %v8631_v12 }
 0x67f   :  { %v8756_v26 = vmax.f32 %v8692_v58, 0.0 }
 0x682   :  { %v8525_v28 = vpop.f32.mrf.mxu1 }
 0x683   :  { %v8625_v10 = vmul.f32 %v14010_v4, %v8525_v28 }
 0x685   :  { %v8693_v49 = vadd.f32 %v14018_v52, %v8625_v10 }
 0x687   :  { %v8757_v25 = vmax.f32 %v8693_v49, 0.0 }
 0x689   :  { %v8799_v22 = vpack.c.bf16 %v8757_v25, %v8756_v26 }
 0x68b   :  { %9990 = vmatmul.msk.bf16.gmra.mxu2 %vm8811_vm7, %v8799_v22 }
 0x68c   :  { %9995 = vmatmul.msk.bf16.gmra.mxu3 %vm8811_vm7, %v8804_v9 }
 0x68e   :  { %v9010_v33 = vpop.f32.mrf.mxu2 }
 0x68f   :  { %v9120_v24 = vmul.f32 %v14053_v41, %v9010_v33 }
 0x691   :  { %v9188_v63 = vadd.f32 %v14063_v23, %v9120_v24 }
 0x693   :  { %v9316_v20 = vadd.f32 %v9252_v15, %v9188_v63 }
 0x695   :  { %v9380_v30 = vmax.f32 %v9316_v20, 0.0 }
 0x696   :  { %v9012_v37 = vpop.f32.mrf.mxu2 }
 0x697   :  { %v9444_v51 = vpack.c.bf16 %v9380_v30, %v9380_v30  ;;  %v9121_v29 = vmul.f32 %v14053_v41, %v9012_v37  ;;  %v8563_v54 = vpop.f32.mrf.mxu3 }
 0x698   :  { %v8640_v53 = vmul.f32 %v14010_v4, %v8563_v54 }
 0x699   :  { %9509 = vst.msk [vmem:[%s14434_s10 + $0x90] sm:$0xf] %vm9472_vm9, %v9444_v51  ;;  %v9189_v31 = vadd.f32 %v14063_v23, %v9121_v29 }
 0x69a   :  { %v8708_v56 = vadd.f32 %v14018_v52, %v8640_v53 }
 0x69b   :  { %v9317_v16 = vadd.f32 %v9253_v18, %v9189_v31 }
 0x69c   :  { %9996 = vmatmul.msk.bf16.gmra.mxu3 %vm8811_vm7, %v8805_v57  ;;  %v8772_v28 = vmax.f32 %v8708_v56, 0.0 }
 0x69d   :  { %v9381_v39 = vmax.f32 %v9317_v16, 0.0 }
 0x69f   :  { %v9445_v14 = vpack.c.bf16 %v9381_v39, %v9381_v39  ;;  %v8565_v17 = vpop.f32.mrf.mxu3 }
 0x6a0   :  { %v8641_v11 = vmul.f32 %v14010_v4, %v8565_v17 }
 0x6a1   :  { %9510 = vst.msk [vmem:[%s14434_s10 + $0x94] sm:$0xf] %vm9472_vm9, %v9445_v14  ;;  %v76_v14 = vld [vmem:[%s14425_s0 + $0xa0] sm:$0xff]  }
 0x6a2   :  { %v8709_v13 = vadd.f32 %v14018_v52, %v8641_v11  ;;  %v9256_v8 = vunpack.c.l.bf16 %v76_v14  ;;  %v8763_v11 = vmax.f32 %v8699_v3, 0.0 }
 0x6a4   :  { %v8773_v27 = vmax.f32 %v8709_v13, 0.0 }
 0x6a6   :  { %v8807_v10 = vpack.c.bf16 %v8773_v27, %v8772_v28 }
 0x6a9   :  { %v8528_v48 = vpop.f32.mrf.mxu1 }
 0x6aa   :  { %v8626_v47 = vmul.f32 %v14010_v4, %v8528_v48 }
 0x6ac   :  { %9997 = vmatmul.msk.bf16.gmra.mxu3 %vm8811_vm7, %v8806_v50  ;;  %v8694_v34 = vadd.f32 %v14018_v52, %v8626_v47  ;;  %v8698_v50 = vadd.f32 %v14018_v52, %v8630_v7 }
 0x6ae   :  { %v8758_v46 = vmax.f32 %v8694_v34, 0.0  ;;  %v9257_v34 = vunpack.c.h.bf16 %v76_v14 }
 0x6b1   :  { %v8530_v19 = vpop.f32.mrf.mxu1 }
 0x6b2   :  { %v8627_v21 = vmul.f32 %v14010_v4, %v8530_v19  ;;  %v8762_v19 = vmax.f32 %v8698_v50, 0.0 }
 0x6b4   :  { %v8695_v44 = vadd.f32 %v14018_v52, %v8627_v21  ;;  %v8802_v40 = vpack.c.bf16 %v8763_v11, %v8762_v19 }
 0x6b6   :  { %v8759_v45 = vmax.f32 %v8695_v44, 0.0 }
 0x6b8   :  { %v8800_v58 = vpack.c.bf16 %v8759_v45, %v8758_v46 }
 0x6ba   :  { %9991 = vmatmul.msk.bf16.gmra.mxu2 %vm8811_vm7, %v8800_v58 }
 0x6bc   :  { %9998 = vmatmul.msk.bf16.gmra.mxu3 %vm8811_vm7, %v8807_v10 }
 0x6bd   :  { %v9015_v49 = vpop.f32.mrf.mxu2 }
 0x6be   :  { %v9122_v59 = vmul.f32 %v14053_v41, %v9015_v49 }
 0x6c0   :  { %v9190_v26 = vadd.f32 %v14063_v23, %v9122_v59  ;;  %v8568_v25 = vpop.f32.mrf.mxu3 }
 0x6c1   :  { %v8642_v9 = vmul.f32 %v14010_v4, %v8568_v25 }
 0x6c2   :  { %v9318_v43 = vadd.f32 %v9254_v6, %v9190_v26  ;;  %v86_v6 = vld [vmem:[%s14425_s0 + $0xc8] sm:$0xff]  }
 0x6c3   :  { %v8710_v62 = vadd.f32 %v14018_v52, %v8642_v9 }
 0x6c4   :  { %v9382_v22 = vmax.f32 %v9318_v43, 0.0 }
 0x6c5   :  { %v9017_v55 = vpop.f32.mrf.mxu2  ;;  %v8774_v30 = vmax.f32 %v8710_v62, 0.0  ;;  %v78_v62 = vld [vmem:[%s14425_s0 + $0xa8] sm:$0xff]  }
 0x6c6   :  { %v9446_v36 = vpack.c.bf16 %v9382_v22, %v9382_v22  ;;  %v9123_v33 = vmul.f32 %v14053_v41, %v9017_v55  ;;  %v9266_v22 = vunpack.c.l.bf16 %v86_v6  ;;  %v9259_v12 = vunpack.c.h.bf16 %v78_v62 }
 0x6c8   :  { %9511 = vst.msk [vmem:[%s14434_s10 + $0x98] sm:$0xf] %vm9472_vm9, %v9446_v36  ;;  %v9191_v24 = vadd.f32 %v14063_v23, %v9123_v33  ;;  %v8570_v15 = vpop.f32.mrf.mxu3 }
 0x6c9   :  { %v8643_v63 = vmul.f32 %v14010_v4, %v8570_v15 }
 0x6ca   :  { %v9319_v60 = vadd.f32 %v9255_v2, %v9191_v24  ;;  %v9267_v2 = vunpack.c.h.bf16 %v86_v6 }
 0x6cb   :  { %v8711_v20 = vadd.f32 %v14018_v52, %v8643_v63  ;;  %v88_v63 = vld [vmem:[%s14425_s0 + $0xd0] sm:$0xff]  }
 0x6cc   :  { %v9383_v38 = vmax.f32 %v9319_v60, 0.0 }
 0x6cd   :  { %v8775_v35 = vmax.f32 %v8711_v20, 0.0 }
 0x6ce   :  { %v9447_v37 = vpack.c.bf16 %v9383_v38, %v9383_v38 }
 0x6cf   :  { %v8808_v51 = vpack.c.bf16 %v8775_v35, %v8774_v30  ;;  %v9258_v30 = vunpack.c.l.bf16 %v78_v62  ;;  %v94_v62 = vld [vmem:[%s14425_s0 + $0xe8] sm:$0xff]  }
 0x6d0   :  { %9512 = vst.msk [vmem:[%s14434_s10 + $0x9c] sm:$0xf] %vm9472_vm9, %v9447_v37 }
 0x6d1   :  { %v8533_v29 = vpop.f32.mrf.mxu1  ;;  %9999 = vmatmul.msk.bf16.gmra.mxu3 %vm8811_vm7, %v8808_v51 }
 0x6d2   :  { %v8628_v18 = vmul.f32 %v14010_v4, %v8533_v29  ;;  %v9268_v29 = vunpack.c.l.bf16 %v88_v63 }
 0x6d4   :  { %v8696_v5 = vadd.f32 %v14018_v52, %v8628_v18 }
 0x6d6   :  { %v8760_v16 = vmax.f32 %v8696_v5, 0.0 }
 0x6d9   :  { %v8535_v0 = vpop.f32.mrf.mxu1 }
 0x6da   :  { %v8629_v31 = vmul.f32 %v14010_v4, %v8535_v0 }
 0x6dc   :  { %v8697_v57 = vadd.f32 %v14018_v52, %v8629_v31 }
 0x6de   :  { %v8761_v39 = vmax.f32 %v8697_v57, 0.0 }
 0x6e0   :  { %v8801_v1 = vpack.c.bf16 %v8761_v39, %v8760_v16 }
 0x6e2   :  { %9992 = vmatmul.msk.bf16.gmra.mxu2 %vm8811_vm7, %v8801_v1 }
 0x6e5   :  { %v9020_v54 = vpop.f32.mrf.mxu2 }
 0x6e6   :  { %v9124_v61 = vmul.f32 %v14053_v41, %v9020_v54 }
 0x6e8   :  { %v9192_v48 = vadd.f32 %v14063_v23, %v9124_v61 }
 0x6ea   :  { %v9320_v17 = vadd.f32 %v9256_v8, %v9192_v48  ;;  %v9269_v8 = vunpack.c.h.bf16 %v88_v63 }
 0x6ec   :  { %v9384_v47 = vmax.f32 %v9320_v17, 0.0 }
 0x6ed   :  { %v9022_v53 = vpop.f32.mrf.mxu2 }
 0x6ee   :  { %v9448_v13 = vpack.c.bf16 %v9384_v47, %v9384_v47  ;;  %v9125_v32 = vmul.f32 %v14053_v41, %v9022_v53  ;;  %v90_v47 = vld [vmem:[%s14425_s0 + $0xd8] sm:$0xff]  }
 0x6ef   :  { %v8573_v21 = vpop.f32.mrf.mxu3 }
 0x6f0   :  { %9513 = vst.msk [vmem:[%s14434_s10 + $0xa0] sm:$0xf] %vm9472_vm9, %v9448_v13  ;;  %v9193_v56 = vadd.f32 %v14063_v23, %v9125_v32  ;;  %v8644_v46 = vmul.f32 %v14010_v4, %v8573_v21  ;;  %v9270_v21 = vunpack.c.l.bf16 %v90_v47 }
 0x6f2   :  { %v9321_v44 = vadd.f32 %v9257_v34, %v9193_v56  ;;  %9993 = vmatmul.msk.bf16.gmra.mxu2 %vm8811_vm7, %v8802_v40  ;;  %v8712_v58 = vadd.f32 %v14018_v52, %v8644_v46 }
 0x6f4   :  { %v9385_v27 = vmax.f32 %v9321_v44, 0.0  ;;  %v8776_v49 = vmax.f32 %v8712_v58, 0.0 }
 0x6f6   :  { %v9449_v45 = vpack.c.bf16 %v9385_v27, %v9385_v27 }
 0x6f7   :  { %v8575_v28 = vpop.f32.mrf.mxu3 }
 0x6f8   :  { %9514 = vst.msk [vmem:[%s14434_s10 + $0xa4] sm:$0xf] %vm9472_vm9, %v9449_v45  ;;  %v8645_v10 = vmul.f32 %v14010_v4, %v8575_v28  ;;  %v9271_v28 = vunpack.c.h.bf16 %v90_v47 }
 0x6fa   :  { %v8713_v42 = vadd.f32 %v14018_v52, %v8645_v10 }
 0x6fc   :  { %v8777_v59 = vmax.f32 %v8713_v42, 0.0  ;;  %v92_v42 = vld [vmem:[%s14425_s0 + $0xe0] sm:$0xff]  }
 0x6fe   :  { %v8809_v26 = vpack.c.bf16 %v8777_v59, %v8776_v49 }
 0x6ff   :  { %v9045_v25 = vpop.f32.mrf.mxu3 }
 0x700   :  { %v9134_v43 = vmul.f32 %v14053_v41, %v9045_v25  ;;  %10000 = vmatmul.msk.bf16.gmra.mxu3 %vm8811_vm7, %v8809_v26  ;;  %v9272_v25 = vunpack.c.l.bf16 %v92_v42 }
 0x702   :  { %v9202_v9 = vadd.f32 %v14063_v23, %v9134_v43 }
 0x704   :  { %v9330_v55 = vadd.f32 %v9266_v22, %v9202_v9 }
 0x706   :  { %v9394_v36 = vmax.f32 %v9330_v55, 0.0 }
 0x707   :  { %v9047_v4 = vpop.f32.mrf.mxu3 }
 0x708   :  { %v9458_v33 = vpack.c.bf16 %v9394_v36, %v9394_v36  ;;  %v9135_v52 = vmul.f32 %v14053_v41, %v9047_v4 }
 0x70a   :  { %9523 = vst.msk [vmem:[%s14434_s10 + $0xc8] sm:$0xf] %vm9472_vm9, %v9458_v33  ;;  %v9203_v24 = vadd.f32 %v14063_v23, %v9135_v52  ;;  %v9273_v33 = vunpack.c.h.bf16 %v92_v42 }
 0x70c   :  { %v9331_v15 = vadd.f32 %v9267_v2, %v9203_v24  ;;  %v80_v2 = vld [vmem:[%s14425_s0 + $0xb0] sm:$0xff]  }
 0x70e   :  { %v9395_v60 = vmax.f32 %v9331_v15, 0.0  ;;  %v9025_v20 = vpop.f32.mrf.mxu2 }
 0x70f   :  { %v9126_v38 = vmul.f32 %v14053_v41, %v9025_v20  ;;  %v9050_v35 = vpop.f32.mrf.mxu3  ;;  %v9260_v20 = vunpack.c.l.bf16 %v80_v2 }
 0x710   :  { %v9459_v37 = vpack.c.bf16 %v9395_v60, %v9395_v60  ;;  %v9136_v51 = vmul.f32 %v14053_v41, %v9050_v35 }
 0x711   :  { %v9194_v18 = vadd.f32 %v14063_v23, %v9126_v38 }
 0x712   :  { %9524 = vst.msk [vmem:[%s14434_s10 + $0xcc] sm:$0xf] %vm9472_vm9, %v9459_v37  ;;  %v9204_v0 = vadd.f32 %v14063_v23, %v9136_v51  ;;  %v9274_v51 = vunpack.c.l.bf16 %v94_v62 }
 0x713   :  { %v9322_v5 = vadd.f32 %v9258_v30, %v9194_v18 }
 0x714   :  { %v9332_v31 = vadd.f32 %v9268_v29, %v9204_v0 }
 0x715   :  { %v9386_v57 = vmax.f32 %v9322_v5, 0.0 }
 0x716   :  { %v9396_v16 = vmax.f32 %v9332_v31, 0.0  ;;  %v9027_v39 = vpop.f32.mrf.mxu2 }
 0x717   :  { %v9450_v1 = vpack.c.bf16 %v9386_v57, %v9386_v57  ;;  %v9127_v14 = vmul.f32 %v14053_v41, %v9027_v39  ;;  %v9052_v54 = vpop.f32.mrf.mxu3 }
 0x718   :  { %v9460_v7 = vpack.c.bf16 %v9396_v16, %v9396_v16  ;;  %v9137_v61 = vmul.f32 %v14053_v41, %v9052_v54 }
 0x719   :  { %9515 = vst.msk [vmem:[%s14434_s10 + $0xa8] sm:$0xf] %vm9472_vm9, %v9450_v1  ;;  %v9195_v3 = vadd.f32 %v14063_v23, %v9127_v14  ;;  %v9261_v1 = vunpack.c.h.bf16 %v80_v2 }
 0x71a   :  { %9525 = vst.msk [vmem:[%s14434_s10 + $0xd0] sm:$0xf] %vm9472_vm9, %v9460_v7  ;;  %v9205_v48 = vadd.f32 %v14063_v23, %v9137_v61  ;;  %v9275_v61 = vunpack.c.h.bf16 %v94_v62 }
 0x71b   :  { %v9323_v50 = vadd.f32 %v9259_v12, %v9195_v3 }
 0x71c   :  { %v9333_v17 = vadd.f32 %v9269_v8, %v9205_v48 }
 0x71d   :  { %v9387_v11 = vmax.f32 %v9323_v50, 0.0 }
 0x71e   :  { %v9397_v53 = vmax.f32 %v9333_v17, 0.0 }
 0x71f   :  { %v9451_v19 = vpack.c.bf16 %v9387_v11, %v9387_v11  ;;  %v9055_v13 = vpop.f32.mrf.mxu3 }
 0x720   :  { %v9461_v32 = vpack.c.bf16 %v9397_v53, %v9397_v53  ;;  %v9138_v34 = vmul.f32 %v14053_v41, %v9055_v13  ;;  %v96_v53 = vld [vmem:[%s14425_s0 + $0xf0] sm:$0xff]  }
 0x721   :  { %9516 = vst.msk [vmem:[%s14434_s10 + $0xac] sm:$0xf] %vm9472_vm9, %v9451_v19 }
 0x722   :  { %9526 = vst.msk [vmem:[%s14434_s10 + $0xd4] sm:$0xf] %vm9472_vm9, %v9461_v32  ;;  %v9206_v40 = vadd.f32 %v14063_v23, %v9138_v34  ;;  %v9276_v32 = vunpack.c.l.bf16 %v96_v53 }
 0x724   :  { %v9334_v56 = vadd.f32 %v9270_v21, %v9206_v40 }
 0x726   :  { %v9398_v44 = vmax.f32 %v9334_v56, 0.0 }
 0x727   :  { %v9057_v27 = vpop.f32.mrf.mxu3 }
 0x728   :  { %v9462_v46 = vpack.c.bf16 %v9398_v44, %v9398_v44  ;;  %v9139_v45 = vmul.f32 %v14053_v41, %v9057_v27 }
 0x72a   :  { %9527 = vst.msk [vmem:[%s14434_s10 + $0xd8] sm:$0xf] %vm9472_vm9, %v9462_v46  ;;  %v9207_v58 = vadd.f32 %v14063_v23, %v9139_v45  ;;  %v9277_v46 = vunpack.c.h.bf16 %v96_v53 }
 0x72c   :  { %v9335_v10 = vadd.f32 %v9271_v28, %v9207_v58 }
 0x72e   :  { %v9399_v49 = vmax.f32 %v9335_v10, 0.0  ;;  %v82_v10 = vld [vmem:[%s14425_s0 + $0xb8] sm:$0xff]  }
 0x72f   :  { %v9060_v59 = vpop.f32.mrf.mxu3 }
 0x730   :  { %v9463_v6 = vpack.c.bf16 %v9399_v49, %v9399_v49  ;;  %v9140_v26 = vmul.f32 %v14053_v41, %v9060_v59 }
 0x732   :  { %9528 = vst.msk [vmem:[%s14434_s10 + $0xdc] sm:$0xf] %vm9472_vm9, %v9463_v6  ;;  %v9208_v43 = vadd.f32 %v14063_v23, %v9140_v26  ;;  %v9262_v6 = vunpack.c.l.bf16 %v82_v10 }
 0x734   :  { %v9336_v22 = vadd.f32 %v9272_v25, %v9208_v43 }
 0x736   :  { %v9400_v9 = vmax.f32 %v9336_v22, 0.0 }
 0x737   :  { %v9062_v55 = vpop.f32.mrf.mxu3 }
 0x738   :  { %v9464_v36 = vpack.c.bf16 %v9400_v9, %v9400_v9  ;;  %v9141_v4 = vmul.f32 %v14053_v41, %v9062_v55 }
 0x73a   :  { %9529 = vst.msk [vmem:[%s14434_s10 + $0xe0] sm:$0xf] %vm9472_vm9, %v9464_v36  ;;  %v9209_v52 = vadd.f32 %v14063_v23, %v9141_v4  ;;  %v9263_v36 = vunpack.c.h.bf16 %v82_v10 }
 0x73c   :  { %v9337_v24 = vadd.f32 %v9273_v33, %v9209_v52  ;;  %v84_v52 = vld [vmem:[%s14425_s0 + $0xc0] sm:$0xff]  }
 0x73d   :  { %v9030_v15 = vpop.f32.mrf.mxu2 }
 0x73e   :  { %v9401_v63 = vmax.f32 %v9337_v24, 0.0  ;;  %v9128_v60 = vmul.f32 %v14053_v41, %v9030_v15 }
 0x73f   :  { %v9065_v38 = vpop.f32.mrf.mxu3 }
 0x740   :  { %v9465_v30 = vpack.c.bf16 %v9401_v63, %v9401_v63  ;;  %v9196_v35 = vadd.f32 %v14063_v23, %v9128_v60  ;;  %v9142_v37 = vmul.f32 %v14053_v41, %v9065_v38  ;;  %v9264_v63 = vunpack.c.l.bf16 %v84_v52 }
 0x742   :  { %9530 = vst.msk [vmem:[%s14434_s10 + $0xe4] sm:$0xf] %vm9472_vm9, %v9465_v30  ;;  %v9324_v29 = vadd.f32 %v9260_v20, %v9196_v35  ;;  %v9210_v18 = vadd.f32 %v14063_v23, %v9142_v37 }
 0x744   :  { %v9388_v0 = vmax.f32 %v9324_v29, 0.0  ;;  %v9338_v5 = vadd.f32 %v9274_v51, %v9210_v18  ;;  %v9265_v51 = vunpack.c.h.bf16 %v84_v52  ;;  %v98_v18 = vld [vmem:[%s14425_s0 + $0xf8] sm:$0xff]  }
 0x745   :  { %v9032_v31 = vpop.f32.mrf.mxu2 }
 0x746   :  { %v9452_v57 = vpack.c.bf16 %v9388_v0, %v9388_v0  ;;  %v9402_v16 = vmax.f32 %v9338_v5, 0.0  ;;  %v9129_v39 = vmul.f32 %v14053_v41, %v9032_v31 }
 0x747   :  { %v9067_v14 = vpop.f32.mrf.mxu3 }
 0x748   :  { %9517 = vst.msk [vmem:[%s14434_s10 + $0xb0] sm:$0xf] %vm9472_vm9, %v9452_v57  ;;  %v9466_v12 = vpack.c.bf16 %v9402_v16, %v9402_v16  ;;  %v9197_v54 = vadd.f32 %v14063_v23, %v9129_v39  ;;  %v9143_v7 = vmul.f32 %v14053_v41, %v9067_v14  ;;  %v9278_v16 = vunpack.c.l.bf16 %v98_v18 }
 0x74a   :  { %9531 = vst.msk [vmem:[%s14434_s10 + $0xe8] sm:$0xf] %vm9472_vm9, %v9466_v12  ;;  %v9325_v8 = vadd.f32 %v9261_v1, %v9197_v54  ;;  %v9211_v3 = vadd.f32 %v14063_v23, %v9143_v7 }
 0x74c   :  { %v9389_v48 = vmax.f32 %v9325_v8, 0.0  ;;  %v9339_v50 = vadd.f32 %v9275_v61, %v9211_v3  ;;  %v9279_v8 = vunpack.c.h.bf16 %v98_v18 }
 0x74e   :  { %v9453_v17 = vpack.c.bf16 %v9389_v48, %v9389_v48  ;;  %v9403_v11 = vmax.f32 %v9339_v50, 0.0 }
 0x750   :  { %9518 = vst.msk [vmem:[%s14434_s10 + $0xb4] sm:$0xf] %vm9472_vm9, %v9453_v17  ;;  %v9467_v47 = vpack.c.bf16 %v9403_v11, %v9403_v11 }
 0x752   :  { %9532 = vst.msk [vmem:[%s14434_s10 + $0xec] sm:$0xf] %vm9472_vm9, %v9467_v47 }
 0x754   :  { %v9070_v19 = vpop.f32.mrf.mxu3 }
 0x755   :  { %v9144_v13 = vmul.f32 %v14053_v41, %v9070_v19 }
 0x757   :  { %v9212_v34 = vadd.f32 %v14063_v23, %v9144_v13 }
 0x759   :  { %v9340_v21 = vadd.f32 %v9276_v32, %v9212_v34 }
 0x75b   :  { %v9404_v40 = vmax.f32 %v9340_v21, 0.0 }
 0x75c   :  { %v9072_v56 = vpop.f32.mrf.mxu3 }
 0x75d   :  { %v9468_v44 = vpack.c.bf16 %v9404_v40, %v9404_v40  ;;  %v9145_v27 = vmul.f32 %v14053_v41, %v9072_v56 }
 0x75f   :  { %9533 = vst.msk [vmem:[%s14434_s10 + $0xf0] sm:$0xf] %vm9472_vm9, %v9468_v44  ;;  %v9213_v45 = vadd.f32 %v14063_v23, %v9145_v27 }
 0x761   :  { %v9341_v28 = vadd.f32 %v9277_v46, %v9213_v45 }
 0x763   :  { %v9405_v58 = vmax.f32 %v9341_v28, 0.0 }
 0x765   :  { %v9469_v42 = vpack.c.bf16 %v9405_v58, %v9405_v58  ;;  %v9035_v49 = vpop.f32.mrf.mxu2 }
 0x766   :  { %v9130_v59 = vmul.f32 %v14053_v41, %v9035_v49 }
 0x767   :  { %9534 = vst.msk [vmem:[%s14434_s10 + $0xf4] sm:$0xf] %vm9472_vm9, %v9469_v42 }
 0x768   :  { %v9198_v26 = vadd.f32 %v14063_v23, %v9130_v59 }
 0x76a   :  { %v9326_v25 = vadd.f32 %v9262_v6, %v9198_v26 }
 0x76c   :  { %v9390_v43 = vmax.f32 %v9326_v25, 0.0 }
 0x76d   :  { %v9037_v22 = vpop.f32.mrf.mxu2 }
 0x76e   :  { %v9454_v9 = vpack.c.bf16 %v9390_v43, %v9390_v43  ;;  %v9131_v55 = vmul.f32 %v14053_v41, %v9037_v22 }
 0x770   :  { %9519 = vst.msk [vmem:[%s14434_s10 + $0xb8] sm:$0xf] %vm9472_vm9, %v9454_v9  ;;  %v9199_v4 = vadd.f32 %v14063_v23, %v9131_v55 }
 0x772   :  { %v9327_v33 = vadd.f32 %v9263_v36, %v9199_v4 }
 0x774   :  { %v9391_v2 = vmax.f32 %v9327_v33, 0.0 }
 0x775   :  { %v9040_v24 = vpop.f32.mrf.mxu2 }
 0x776   :  { %v9455_v15 = vpack.c.bf16 %v9391_v2, %v9391_v2  ;;  %v9132_v62 = vmul.f32 %v14053_v41, %v9040_v24 }
 0x778   :  { %9520 = vst.msk [vmem:[%s14434_s10 + $0xbc] sm:$0xf] %vm9472_vm9, %v9455_v15  ;;  %v9200_v60 = vadd.f32 %v14063_v23, %v9132_v62 }
 0x77a   :  { %v9328_v20 = vadd.f32 %v9264_v63, %v9200_v60 }
 0x77c   :  { %v9392_v38 = vmax.f32 %v9328_v20, 0.0 }
 0x77d   :  { %v9042_v30 = vpop.f32.mrf.mxu2 }
 0x77e   :  { %v9456_v35 = vpack.c.bf16 %v9392_v38, %v9392_v38  ;;  %v9133_v37 = vmul.f32 %v14053_v41, %v9042_v30 }
 0x780   :  { %9521 = vst.msk [vmem:[%s14434_s10 + $0xc0] sm:$0xf] %vm9472_vm9, %v9456_v35  ;;  %v9201_v29 = vadd.f32 %v14063_v23, %v9133_v37 }
 0x782   :  { %v9329_v0 = vadd.f32 %v9265_v51, %v9201_v29 }
 0x783   :  { %v9075_v5 = vpop.f32.mrf.mxu3 }
 0x784   :  { %v9393_v31 = vmax.f32 %v9329_v0, 0.0  ;;  %v9146_v57 = vmul.f32 %v14053_v41, %v9075_v5 }
 0x786   :  { %v9457_v39 = vpack.c.bf16 %v9393_v31, %v9393_v31  ;;  %v9214_v1 = vadd.f32 %v14063_v23, %v9146_v57 }
 0x788   :  { %9522 = vst.msk [vmem:[%s14434_s10 + $0xc4] sm:$0xf] %vm9472_vm9, %v9457_v39  ;;  %v9342_v14 = vadd.f32 %v9278_v16, %v9214_v1 }
 0x78a   :  { %v9406_v12 = vmax.f32 %v9342_v14, 0.0 }
 0x78b   :  { %v9077_v54 = vpop.f32.mrf.mxu3 }
 0x78c   :  { %v9470_v7 = vpack.c.bf16 %v9406_v12, %v9406_v12  ;;  %v9147_v61 = vmul.f32 %v14053_v41, %v9077_v54 }
 0x78e   :  { %9535 = vst.msk [vmem:[%s14434_s10 + $0xf8] sm:$0xf] %vm9472_vm9, %v9470_v7  ;;  %v9215_v3 = vadd.f32 %v14063_v23, %v9147_v61 }
 0x790   :  { %v9343_v48 = vadd.f32 %v9279_v8, %v9215_v3 }
 0x792   :  { %v9407_v50 = vmax.f32 %v9343_v48, 0.0 }
 0x794   :  { %v9471_v17 = vpack.c.bf16 %v9407_v50, %v9407_v50 }
 0x796   :  { %9536 = vst.msk [vmem:[%s14434_s10 + $0xfc] sm:$0xf] %vm9472_vm9, %v9471_v17 }

</bundles_post_ra>
